<compile_context>
chip_gen: v6e
topology: v6e:2x2x1
jax: 0.10.0
libtpu: 0.0.40
codegen_flags: <defaults>
</compile_context>

<pallas_src>
import functools

import jax
import jax.numpy as jnp
from jax.experimental import pallas as pl
from jax.experimental.pallas import tpu as pltpu


_VMEM_SPEC = pl.BlockSpec(memory_space=pltpu.MemorySpace.VMEM)


# ----------------------------------------------------------------------------
# Kernel 1/2: fused conv (as GEMM) + bias + 2x2/2 maxpool + ReLU
# ----------------------------------------------------------------------------
def _conv_pool_relu_kernel(p_ref, w_ref, b_ref, o_ref, *, fpb):
    """p_ref: (fpb, 4, K, PP) bf16 patches; group q = di*2+dj holds, for every pooled
    output position, the conv input patch at spatial offset (di, dj) of its window.
    w_ref: (OC, K) bf16;  b_ref: (OC, 1) f32;  o_ref: (fpb, OC, PP) f32."""
    w = w_ref[...]
    b = b_ref[...]
    for f in range(fpb):  # static unroll over the frames in this block
        y00 = jnp.dot(w, p_ref[f, 0], preferred_element_type=jnp.float32)
        y01 = jnp.dot(w, p_ref[f, 1], preferred_element_type=jnp.float32)
        y10 = jnp.dot(w, p_ref[f, 2], preferred_element_type=jnp.float32)
        y11 = jnp.dot(w, p_ref[f, 3], preferred_element_type=jnp.float32)
        m = jnp.maximum(jnp.maximum(y00, y01), jnp.maximum(y10, y11))
        o_ref[f] = jnp.maximum(m + b, 0.0)        # relu(maxpool(conv) + bias)


def _pick_frames_per_block(n):
    for c in (8, 4, 2, 1):
        if n % c == 0:
            return c
    return 1


def conv_pool_relu(patches, w, b):
    n, _four, k, pp = patches.shape
    oc = w.shape[0]
    fpb = _pick_frames_per_block(n)
    kernel = functools.partial(_conv_pool_relu_kernel, fpb=fpb)
    return pl.pallas_call(
        kernel,
        out_shape=jax.ShapeDtypeStruct((n, oc, pp), jnp.float32),
        grid=(n // fpb,),
        in_specs=[
            pl.BlockSpec((fpb, 4, k, pp), lambda i: (i, 0, 0, 0)),
            pl.BlockSpec((oc, k), lambda i: (0, 0)),   # weight resident across grid
            pl.BlockSpec((oc, 1), lambda i: (0, 0)),
        ],
        out_specs=pl.BlockSpec((fpb, oc, pp), lambda i: (i, 0, 0)),
        compiler_params=pltpu.CompilerParams(
            dimension_semantics=("parallel",),         # 2 TCs on v7x split frames
            vmem_limit_bytes=32 * 1024 * 1024,
        ),
    )(patches, w, b)


# ----------------------------------------------------------------------------
# Kernel 3: fc1 + fc2 + LSTM (hoisted input projection) + fc8, fully fused
# ----------------------------------------------------------------------------
def _head_kernel(x_ref, w1_ref, b1_ref, w2_ref, b2_ref,
                 wih_ref, whh_ref, bl_ref, w8_ref, b8_ref,
                 o_ref, gx_ref, *, batch, seq):
    hdim = whh_ref.shape[0]                           # 32

    # fc1 + ReLU, fc2 + ReLU (bf16 MXU operands, f32 accumulate / epilogue)
    x = x_ref[...]                                    # (seq*batch, 400) bf16, time-major rows
    h1 = jnp.dot(x, w1_ref[...], preferred_element_type=jnp.float32) + b1_ref[...]
    h1 = jnp.maximum(h1, 0.0)
    h2 = jnp.dot(h1.astype(jnp.bfloat16), w2_ref[...],
                 preferred_element_type=jnp.float32) + b2_ref[...]
    h2 = jnp.maximum(h2, 0.0)                         # (seq*batch, 32) f32

    # LSTM input projection hoisted out of the recurrence: one matmul for all steps.
    gx_ref[...] = (jnp.dot(h2, wih_ref[...], preferred_element_type=jnp.float32)
                   + bl_ref[...])                     # (seq*batch, 4*hdim)

    whh = whh_ref[...]
    w8 = w8_ref[...]                                  # (1, 32)
    b8 = b8_ref[...]                                  # (1, 1)

    lane = jax.lax.broadcasted_iota(jnp.int32, (batch, 4 * hdim), 1)
    is_g = jnp.logical_and(lane >= 2 * hdim, lane < 3 * hdim)
    col = jax.lax.broadcasted_iota(jnp.int32, (batch, seq), 1)

    h = jnp.zeros((batch, hdim), jnp.float32)
    c = jnp.zeros((batch, hdim), jnp.float32)
    out = jnp.zeros((batch, seq), jnp.float32)
    for t in range(seq):                              # serial recurrence, static unroll
        gates = gx_ref[t * batch:(t + 1) * batch, :] + jnp.dot(
            h, whh, preferred_element_type=jnp.float32)          # (batch, 4*hdim)
        # full-width transcendentals (EUP), tanh only on the g segment via lane mask
        act = jnp.where(is_g, jnp.tanh(gates), jax.nn.sigmoid(gates))
        i_g = act[:, 0:hdim]
        f_g = act[:, hdim:2 * hdim]
        g_g = act[:, 2 * hdim:3 * hdim]
        o_g = act[:, 3 * hdim:4 * hdim]
        c = f_g * c + i_g * g_g
        h = o_g * jnp.tanh(c)
        # fc8 + sigmoid fused: a single lane reduction on h (no extra kernel/store)
        y_t = jax.nn.sigmoid(jnp.sum(h * w8, axis=1, keepdims=True) + b8)  # (batch, 1)
        out = jnp.where(col == t, y_t, out)
    o_ref[...] = out


def head_forward(feat, prep, *, batch, seq):
    hdim = 32
    kernel = functools.partial(_head_kernel, batch=batch, seq=seq)
    return pl.pallas_call(
        kernel,
        out_shape=jax.ShapeDtypeStruct((batch, seq), jnp.float32),
        in_specs=[_VMEM_SPEC] * 10,
        out_specs=_VMEM_SPEC,
        scratch_shapes=[pltpu.VMEM((seq * batch, 4 * hdim), jnp.float32)],
    )(feat, prep["fc1_wt"], prep["fc1_b"], prep["fc2_wt"], prep["fc2_b"],
      prep["lstm_wih_t"], prep["lstm_whh_t"], prep["lstm_b"],
      prep["fc8_w"], prep["fc8_b"])


# ----------------------------------------------------------------------------
# XLA glue: pooled im2col (strided slices + stack/reshape only, no transposes)
# ----------------------------------------------------------------------------
def _pooled_im2col(x_nchw, k):
    """Patches for conv(k, stride 1, valid) followed by MaxPool2d(2, 2).

    Returns (N, 4, C*k*k, PH*PW); group q = di*2+dj holds, for every pooled output
    position (i, j), the flattened (c, kh, kw) patch feeding the conv output at
    spatial position (2i+di, 2j+dj).  K ordering matches w.reshape(OC, C*k*k)."""
    n, c, h, w = x_nchw.shape
    oh, ow = h - k + 1, w - k + 1
    ph, pw = oh // 2, ow // 2
    quads = []
    for di in range(2):
        for dj in range(2):
            blocks = []
            for kh in range(k):
                for kw in range(k):
                    sl = x_nchw[:, :, kh + di:kh + di + 2 * ph:2,
                                      kw + dj:kw + dj + 2 * pw:2]   # (N, C, PH, PW)
                    blocks.append(sl.reshape(n, c, ph * pw))
            q = jnp.stack(blocks, axis=2)                # (N, C, k*k, PH*PW)
            quads.append(q.reshape(n, c * k * k, ph * pw))
    return jnp.stack(quads, axis=1)                      # (N, 4, C*k*k, PH*PW)


# ----------------------------------------------------------------------------
# Parameters
# ----------------------------------------------------------------------------
def init_params(key):
    ks = jax.random.split(key, 14)

    def nrm(k, shape, scale=0.05):
        return scale * jax.random.normal(k, shape, dtype=jnp.float32)

    return dict(
        conv1_w=nrm(ks[0], (6, 3, 5, 5)),   conv1_b=nrm(ks[1], (6,)),
        conv2_w=nrm(ks[2], (16, 6, 5, 5)),  conv2_b=nrm(ks[3], (16,)),
        fc1_w=nrm(ks[4], (120, 400)),       fc1_b=nrm(ks[5], (120,)),
        fc2_w=nrm(ks[6], (32, 120)),        fc2_b=nrm(ks[7], (32,)),
        lstm_w_ih=nrm(ks[8], (128, 32)),    lstm_w_hh=nrm(ks[9], (128, 32)),
        lstm_b_ih=nrm(ks[10], (128,)),      lstm_b_hh=nrm(ks[11], (128,)),
        fc8_w=nrm(ks[12], (1, 32)),         fc8_b=jnp.zeros((1,), jnp.float32),
    )


def prepare_params(params):
    """One-time weight prep (reshape / transpose / cast) so the forward pass does no
    per-call weight relayout.  Conv/fc GEMM operands are bf16; epilogues stay f32."""
    return dict(
        conv1_w=params["conv1_w"].reshape(6, 75).astype(jnp.bfloat16),    # (oc, ic*kh*kw)
        conv1_b=params["conv1_b"].reshape(6, 1).astype(jnp.float32),
        conv2_w=params["conv2_w"].reshape(16, 150).astype(jnp.bfloat16),
        conv2_b=params["conv2_b"].reshape(16, 1).astype(jnp.float32),
        fc1_wt=params["fc1_w"].T.astype(jnp.bfloat16),                    # (400, 120)
        fc1_b=params["fc1_b"].reshape(1, 120).astype(jnp.float32),
        fc2_wt=params["fc2_w"].T.astype(jnp.bfloat16),                    # (120, 32)
        fc2_b=params["fc2_b"].reshape(1, 32).astype(jnp.float32),
        lstm_wih_t=params["lstm_w_ih"].T.astype(jnp.float32),             # (32, 128)
        lstm_whh_t=params["lstm_w_hh"].T.astype(jnp.float32),             # (32, 128)
        lstm_b=(params["lstm_b_ih"] + params["lstm_b_hh"]).reshape(1, 128),
        fc8_w=params["fc8_w"].astype(jnp.float32),                        # (1, 32)
        fc8_b=params["fc8_b"].reshape(1, 1).astype(jnp.float32),
    )


# ----------------------------------------------------------------------------
# ToyNet forward
# ----------------------------------------------------------------------------
def toynet_forward(prep, frames):
    # frames: (B, S, 3, 32, 32) float32 (PyTorch NCHW per frame)
    b, s = frames.shape[0], frames.shape[1]
    n = b * s
    # time-major flatten so the LSTM consumes contiguous row blocks per step
    x = jnp.transpose(frames, (1, 0, 2, 3, 4)).reshape(n, 3, 32, 32)
    x = x.astype(jnp.bfloat16)

    # conv1 -> maxpool2x2 -> relu (one fused kernel)
    p1 = _pooled_im2col(x, 5)                                        # (N, 4, 75, 196)
    z1 = conv_pool_relu(p1, prep["conv1_w"], prep["conv1_b"])        # (N, 6, 196)

    # conv2 -> maxpool2x2 -> relu (one fused kernel)
    z1 = z1.reshape(n, 6, 14, 14).astype(jnp.bfloat16)
    p2 = _pooled_im2col(z1, 5)                                       # (N, 4, 150, 25)
    z2 = conv_pool_relu(p2, prep["conv2_w"], prep["conv2_b"])        # (N, 16, 25)

    # flatten (c, h, w) per frame -> matches torch.flatten of NCHW exactly
    feat = z2.reshape(n, 16 * 5 * 5).astype(jnp.bfloat16)            # (N, 400)

    # TODO(synk): backbone_dropout is the identity at inference; training-mode dropout not implemented.

    # fc1 + relu + fc2 + relu + LSTM + fc8 + sigmoid, all in one kernel
    return head_forward(feat, prep, batch=b, seq=s)                  # (B, S)


if __name__ == "__main__":
    key = jax.random.PRNGKey(0)
    pkey, xkey = jax.random.split(key)
    params = init_params(pkey)
    prep = prepare_params(params)

    B, S = 2, 8
    frames = jax.random.normal(xkey, (B, S, 3, 32, 32), dtype=jnp.float32)

    out = jax.jit(toynet_forward)(prep, frames)
    out = jax.block_until_ready(out)
    assert out.shape == (B, S), out.shape
    assert bool(jnp.all(jnp.isfinite(out)))
    print("KERNEL_OK")
</pallas_src>

<mosaic_0001>
module attributes {stable_mosaic.version = 11 : i64} {
  func.func @_conv_pool_relu_kernel(%arg0: i32, %arg1: memref<8x4x75x196xbf16, #tpu.memory_space<vmem>>, %arg2: memref<6x75xbf16, #tpu.memory_space<vmem>>, %arg3: memref<6x1xf32, #tpu.memory_space<vmem>>, %arg4: memref<8x6x196xf32, #tpu.memory_space<vmem>>) attributes {dimension_semantics = [#tpu.dimension_semantics<parallel>], iteration_bounds = array<i64: 2>, scalar_prefetch = 0 : i64, scratch_operands = 0 : i64, tpu.core_type = #tpu.core_type<tc>, window_params = [{transform_indices = @transform_0, window_bounds = array<i64: 8, 4, 75, 196>}, {pipeline_mode = #tpu.pipeline_mode<synchronous>, transform_indices = @transform_1, window_bounds = array<i64: 6, 75>}, {pipeline_mode = #tpu.pipeline_mode<synchronous>, transform_indices = @transform_2, window_bounds = array<i64: 6, 1>}, {transform_indices = @transform_3, window_bounds = array<i64: 8, 6, 196>}]} {
    %c0 = arith.constant 0 : index
    %c0_0 = arith.constant 0 : index
    %0 = vector.load %arg2[%c0, %c0_0] : memref<6x75xbf16, #tpu.memory_space<vmem>>, vector<6x75xbf16>
    %c0_1 = arith.constant 0 : index
    %c0_2 = arith.constant 0 : index
    %1 = vector.load %arg3[%c0_1, %c0_2] : memref<6x1xf32, #tpu.memory_space<vmem>>, vector<6x1xf32>
    %c0_3 = arith.constant 0 : index
    %c0_4 = arith.constant 0 : index
    %c0_5 = arith.constant 0 : index
    %c0_6 = arith.constant 0 : index
    %2 = vector.load %arg1[%c0_3, %c0_4, %c0_5, %c0_6] : memref<8x4x75x196xbf16, #tpu.memory_space<vmem>>, vector<1x1x75x196xbf16>
    %3 = vector.shape_cast %2 : vector<1x1x75x196xbf16> to vector<75x196xbf16>
    %cst = arith.constant dense<0.000000e+00> : vector<6x196xf32>
    %4 = tpu.matmul %0, %3, %cst {dimension_numbers = #tpu.dot_dimension_numbers<[1], [0], [0], [1], [0, 0, 1, 1], [], []>} : vector<6x75xbf16>, vector<75x196xbf16>, vector<6x196xf32> -> vector<6x196xf32>
    %c0_7 = arith.constant 0 : index
    %c1 = arith.constant 1 : index
    %c0_8 = arith.constant 0 : index
    %c0_9 = arith.constant 0 : index
    %5 = vector.load %arg1[%c0_7, %c1, %c0_8, %c0_9] : memref<8x4x75x196xbf16, #tpu.memory_space<vmem>>, vector<1x1x75x196xbf16>
    %6 = vector.shape_cast %5 : vector<1x1x75x196xbf16> to vector<75x196xbf16>
    %cst_10 = arith.constant dense<0.000000e+00> : vector<6x196xf32>
    %7 = tpu.matmul %0, %6, %cst_10 {dimension_numbers = #tpu.dot_dimension_numbers<[1], [0], [0], [1], [0, 0, 1, 1], [], []>} : vector<6x75xbf16>, vector<75x196xbf16>, vector<6x196xf32> -> vector<6x196xf32>
    %c0_11 = arith.constant 0 : index
    %c2 = arith.constant 2 : index
    %c0_12 = arith.constant 0 : index
    %c0_13 = arith.constant 0 : index
    %8 = vector.load %arg1[%c0_11, %c2, %c0_12, %c0_13] : memref<8x4x75x196xbf16, #tpu.memory_space<vmem>>, vector<1x1x75x196xbf16>
    %9 = vector.shape_cast %8 : vector<1x1x75x196xbf16> to vector<75x196xbf16>
    %cst_14 = arith.constant dense<0.000000e+00> : vector<6x196xf32>
    %10 = tpu.matmul %0, %9, %cst_14 {dimension_numbers = #tpu.dot_dimension_numbers<[1], [0], [0], [1], [0, 0, 1, 1], [], []>} : vector<6x75xbf16>, vector<75x196xbf16>, vector<6x196xf32> -> vector<6x196xf32>
    %c0_15 = arith.constant 0 : index
    %c3 = arith.constant 3 : index
    %c0_16 = arith.constant 0 : index
    %c0_17 = arith.constant 0 : index
    %11 = vector.load %arg1[%c0_15, %c3, %c0_16, %c0_17] : memref<8x4x75x196xbf16, #tpu.memory_space<vmem>>, vector<1x1x75x196xbf16>
    %12 = vector.shape_cast %11 : vector<1x1x75x196xbf16> to vector<75x196xbf16>
    %cst_18 = arith.constant dense<0.000000e+00> : vector<6x196xf32>
    %13 = tpu.matmul %0, %12, %cst_18 {dimension_numbers = #tpu.dot_dimension_numbers<[1], [0], [0], [1], [0, 0, 1, 1], [], []>} : vector<6x75xbf16>, vector<75x196xbf16>, vector<6x196xf32> -> vector<6x196xf32>
    %14 = arith.maximumf %4, %7 : vector<6x196xf32>
    %15 = arith.maximumf %10, %13 : vector<6x196xf32>
    %16 = arith.maximumf %14, %15 : vector<6x196xf32>
    %17 = vector.broadcast %1 : vector<6x1xf32> to vector<6x196xf32>
    %18 = arith.addf %16, %17 : vector<6x196xf32>
    %cst_19 = arith.constant 0.000000e+00 : f32
    %19 = vector.broadcast %cst_19 : f32 to vector<6x196xf32>
    %20 = arith.maximumf %18, %19 : vector<6x196xf32>
    %c0_20 = arith.constant 0 : index
    %c0_21 = arith.constant 0 : index
    %c0_22 = arith.constant 0 : index
    %21 = vector.load %arg4[%c0_20, %c0_21, %c0_22] : memref<8x6x196xf32, #tpu.memory_space<vmem>>, vector<1x6x196xf32>
    %22 = vector.shape_cast %21 : vector<1x6x196xf32> to vector<6x196xf32>
    %23 = vector.shape_cast %20 : vector<6x196xf32> to vector<1x6x196xf32>
    tpu.vector_store %arg4[%c0_20, %c0_21, %c0_22], %23 {strides = array<i32>} : memref<8x6x196xf32, #tpu.memory_space<vmem>>, vector<1x6x196xf32>,
    %c1_23 = arith.constant 1 : index
    %c0_24 = arith.constant 0 : index
    %c0_25 = arith.constant 0 : index
    %c0_26 = arith.constant 0 : index
    %24 = vector.load %arg1[%c1_23, %c0_24, %c0_25, %c0_26] : memref<8x4x75x196xbf16, #tpu.memory_space<vmem>>, vector<1x1x75x196xbf16>
    %25 = vector.shape_cast %24 : vector<1x1x75x196xbf16> to vector<75x196xbf16>
    %cst_27 = arith.constant dense<0.000000e+00> : vector<6x196xf32>
    %26 = tpu.matmul %0, %25, %cst_27 {dimension_numbers = #tpu.dot_dimension_numbers<[1], [0], [0], [1], [0, 0, 1, 1], [], []>} : vector<6x75xbf16>, vector<75x196xbf16>, vector<6x196xf32> -> vector<6x196xf32>
    %c1_28 = arith.constant 1 : index
    %c1_29 = arith.constant 1 : index
    %c0_30 = arith.constant 0 : index
    %c0_31 = arith.constant 0 : index
    %27 = vector.load %arg1[%c1_28, %c1_29, %c0_30, %c0_31] : memref<8x4x75x196xbf16, #tpu.memory_space<vmem>>, vector<1x1x75x196xbf16>
    %28 = vector.shape_cast %27 : vector<1x1x75x196xbf16> to vector<75x196xbf16>
    %cst_32 = arith.constant dense<0.000000e+00> : vector<6x196xf32>
    %29 = tpu.matmul %0, %28, %cst_32 {dimension_numbers = #tpu.dot_dimension_numbers<[1], [0], [0], [1], [0, 0, 1, 1], [], []>} : vector<6x75xbf16>, vector<75x196xbf16>, vector<6x196xf32> -> vector<6x196xf32>
    %c1_33 = arith.constant 1 : index
    %c2_34 = arith.constant 2 : index
    %c0_35 = arith.constant 0 : index
    %c0_36 = arith.constant 0 : index
    %30 = vector.load %arg1[%c1_33, %c2_34, %c0_35, %c0_36] : memref<8x4x75x196xbf16, #tpu.memory_space<vmem>>, vector<1x1x75x196xbf16>
    %31 = vector.shape_cast %30 : vector<1x1x75x196xbf16> to vector<75x196xbf16>
    %cst_37 = arith.constant dense<0.000000e+00> : vector<6x196xf32>
    %32 = tpu.matmul %0, %31, %cst_37 {dimension_numbers = #tpu.dot_dimension_numbers<[1], [0], [0], [1], [0, 0, 1, 1], [], []>} : vector<6x75xbf16>, vector<75x196xbf16>, vector<6x196xf32> -> vector<6x196xf32>
    %c1_38 = arith.constant 1 : index
    %c3_39 = arith.constant 3 : index
    %c0_40 = arith.constant 0 : index
    %c0_41 = arith.constant 0 : index
    %33 = vector.load %arg1[%c1_38, %c3_39, %c0_40, %c0_41] : memref<8x4x75x196xbf16, #tpu.memory_space<vmem>>, vector<1x1x75x196xbf16>
    %34 = vector.shape_cast %33 : vector<1x1x75x196xbf16> to vector<75x196xbf16>
    %cst_42 = arith.constant dense<0.000000e+00> : vector<6x196xf32>
    %35 = tpu.matmul %0, %34, %cst_42 {dimension_numbers = #tpu.dot_dimension_numbers<[1], [0], [0], [1], [0, 0, 1, 1], [], []>} : vector<6x75xbf16>, vector<75x196xbf16>, vector<6x196xf32> -> vector<6x196xf32>
    %36 = arith.maximumf %26, %29 : vector<6x196xf32>
    %37 = arith.maximumf %32, %35 : vector<6x196xf32>
    %38 = arith.maximumf %36, %37 : vector<6x196xf32>
    %39 = vector.broadcast %1 : vector<6x1xf32> to vector<6x196xf32>
    %40 = arith.addf %38, %39 : vector<6x196xf32>
    %cst_43 = arith.constant 0.000000e+00 : f32
    %41 = vector.broadcast %cst_43 : f32 to vector<6x196xf32>
    %42 = arith.maximumf %40, %41 : vector<6x196xf32>
    %c1_44 = arith.constant 1 : index
    %c0_45 = arith.constant 0 : index
    %c0_46 = arith.constant 0 : index
    %43 = vector.load %arg4[%c1_44, %c0_45, %c0_46] : memref<8x6x196xf32, #tpu.memory_space<vmem>>, vector<1x6x196xf32>
    %44 = vector.shape_cast %43 : vector<1x6x196xf32> to vector<6x196xf32>
    %45 = vector.shape_cast %42 : vector<6x196xf32> to vector<1x6x196xf32>
    tpu.vector_store %arg4[%c1_44, %c0_45, %c0_46], %45 {strides = array<i32>} : memref<8x6x196xf32, #tpu.memory_space<vmem>>, vector<1x6x196xf32>,
    %c2_47 = arith.constant 2 : index
    %c0_48 = arith.constant 0 : index
    %c0_49 = arith.constant 0 : index
    %c0_50 = arith.constant 0 : index
    %46 = vector.load %arg1[%c2_47, %c0_48, %c0_49, %c0_50] : memref<8x4x75x196xbf16, #tpu.memory_space<vmem>>, vector<1x1x75x196xbf16>
    %47 = vector.shape_cast %46 : vector<1x1x75x196xbf16> to vector<75x196xbf16>
    %cst_51 = arith.constant dense<0.000000e+00> : vector<6x196xf32>
    %48 = tpu.matmul %0, %47, %cst_51 {dimension_numbers = #tpu.dot_dimension_numbers<[1], [0], [0], [1], [0, 0, 1, 1], [], []>} : vector<6x75xbf16>, vector<75x196xbf16>, vector<6x196xf32> -> vector<6x196xf32>
    %c2_52 = arith.constant 2 : index
    %c1_53 = arith.constant 1 : index
    %c0_54 = arith.constant 0 : index
    %c0_55 = arith.constant 0 : index
    %49 = vector.load %arg1[%c2_52, %c1_53, %c0_54, %c0_55] : memref<8x4x75x196xbf16, #tpu.memory_space<vmem>>, vector<1x1x75x196xbf16>
    %50 = vector.shape_cast %49 : vector<1x1x75x196xbf16> to vector<75x196xbf16>
    %cst_56 = arith.constant dense<0.000000e+00> : vector<6x196xf32>
    %51 = tpu.matmul %0, %50, %cst_56 {dimension_numbers = #tpu.dot_dimension_numbers<[1], [0], [0], [1], [0, 0, 1, 1], [], []>} : vector<6x75xbf16>, vector<75x196xbf16>, vector<6x196xf32> -> vector<6x196xf32>
    %c2_57 = arith.constant 2 : index
    %c2_58 = arith.constant 2 : index
    %c0_59 = arith.constant 0 : index
    %c0_60 = arith.constant 0 : index
    %52 = vector.load %arg1[%c2_57, %c2_58, %c0_59, %c0_60] : memref<8x4x75x196xbf16, #tpu.memory_space<vmem>>, vector<1x1x75x196xbf16>
    %53 = vector.shape_cast %52 : vector<1x1x75x196xbf16> to vector<75x196xbf16>
    %cst_61 = arith.constant dense<0.000000e+00> : vector<6x196xf32>
    %54 = tpu.matmul %0, %53, %cst_61 {dimension_numbers = #tpu.dot_dimension_numbers<[1], [0], [0], [1], [0, 0, 1, 1], [], []>} : vector<6x75xbf16>, vector<75x196xbf16>, vector<6x196xf32> -> vector<6x196xf32>
    %c2_62 = arith.constant 2 : index
    %c3_63 = arith.constant 3 : index
    %c0_64 = arith.constant 0 : index
    %c0_65 = arith.constant 0 : index
    %55 = vector.load %arg1[%c2_62, %c3_63, %c0_64, %c0_65] : memref<8x4x75x196xbf16, #tpu.memory_space<vmem>>, vector<1x1x75x196xbf16>
    %56 = vector.shape_cast %55 : vector<1x1x75x196xbf16> to vector<75x196xbf16>
    %cst_66 = arith.constant dense<0.000000e+00> : vector<6x196xf32>
    %57 = tpu.matmul %0, %56, %cst_66 {dimension_numbers = #tpu.dot_dimension_numbers<[1], [0], [0], [1], [0, 0, 1, 1], [], []>} : vector<6x75xbf16>, vector<75x196xbf16>, vector<6x196xf32> -> vector<6x196xf32>
    %58 = arith.maximumf %48, %51 : vector<6x196xf32>
    %59 = arith.maximumf %54, %57 : vector<6x196xf32>
    %60 = arith.maximumf %58, %59 : vector<6x196xf32>
    %61 = vector.broadcast %1 : vector<6x1xf32> to vector<6x196xf32>
    %62 = arith.addf %60, %61 : vector<6x196xf32>
    %cst_67 = arith.constant 0.000000e+00 : f32
    %63 = vector.broadcast %cst_67 : f32 to vector<6x196xf32>
    %64 = arith.maximumf %62, %63 : vector<6x196xf32>
    %c2_68 = arith.constant 2 : index
    %c0_69 = arith.constant 0 : index
    %c0_70 = arith.constant 0 : index
    %65 = vector.load %arg4[%c2_68, %c0_69, %c0_70] : memref<8x6x196xf32, #tpu.memory_space<vmem>>, vector<1x6x196xf32>
    %66 = vector.shape_cast %65 : vector<1x6x196xf32> to vector<6x196xf32>
    %67 = vector.shape_cast %64 : vector<6x196xf32> to vector<1x6x196xf32>
    tpu.vector_store %arg4[%c2_68, %c0_69, %c0_70], %67 {strides = array<i32>} : memref<8x6x196xf32, #tpu.memory_space<vmem>>, vector<1x6x196xf32>,
    %c3_71 = arith.constant 3 : index
    %c0_72 = arith.constant 0 : index
    %c0_73 = arith.constant 0 : index
    %c0_74 = arith.constant 0 : index
    %68 = vector.load %arg1[%c3_71, %c0_72, %c0_73, %c0_74] : memref<8x4x75x196xbf16, #tpu.memory_space<vmem>>, vector<1x1x75x196xbf16>
    %69 = vector.shape_cast %68 : vector<1x1x75x196xbf16> to vector<75x196xbf16>
    %cst_75 = arith.constant dense<0.000000e+00> : vector<6x196xf32>
    %70 = tpu.matmul %0, %69, %cst_75 {dimension_numbers = #tpu.dot_dimension_numbers<[1], [0], [0], [1], [0, 0, 1, 1], [], []>} : vector<6x75xbf16>, vector<75x196xbf16>, vector<6x196xf32> -> vector<6x196xf32>
    %c3_76 = arith.constant 3 : index
    %c1_77 = arith.constant 1 : index
    %c0_78 = arith.constant 0 : index
    %c0_79 = arith.constant 0 : index
    %71 = vector.load %arg1[%c3_76, %c1_77, %c0_78, %c0_79] : memref<8x4x75x196xbf16, #tpu.memory_space<vmem>>, vector<1x1x75x196xbf16>
    %72 = vector.shape_cast %71 : vector<1x1x75x196xbf16> to vector<75x196xbf16>
    %cst_80 = arith.constant dense<0.000000e+00> : vector<6x196xf32>
    %73 = tpu.matmul %0, %72, %cst_80 {dimension_numbers = #tpu.dot_dimension_numbers<[1], [0], [0], [1], [0, 0, 1, 1], [], []>} : vector<6x75xbf16>, vector<75x196xbf16>, vector<6x196xf32> -> vector<6x196xf32>
    %c3_81 = arith.constant 3 : index
    %c2_82 = arith.constant 2 : index
    %c0_83 = arith.constant 0 : index
    %c0_84 = arith.constant 0 : index
    %74 = vector.load %arg1[%c3_81, %c2_82, %c0_83, %c0_84] : memref<8x4x75x196xbf16, #tpu.memory_space<vmem>>, vector<1x1x75x196xbf16>
    %75 = vector.shape_cast %74 : vector<1x1x75x196xbf16> to vector<75x196xbf16>
    %cst_85 = arith.constant dense<0.000000e+00> : vector<6x196xf32>
    %76 = tpu.matmul %0, %75, %cst_85 {dimension_numbers = #tpu.dot_dimension_numbers<[1], [0], [0], [1], [0, 0, 1, 1], [], []>} : vector<6x75xbf16>, vector<75x196xbf16>, vector<6x196xf32> -> vector<6x196xf32>
    %c3_86 = arith.constant 3 : index
    %c3_87 = arith.constant 3 : index
    %c0_88 = arith.constant 0 : index
    %c0_89 = arith.constant 0 : index
    %77 = vector.load %arg1[%c3_86, %c3_87, %c0_88, %c0_89] : memref<8x4x75x196xbf16, #tpu.memory_space<vmem>>, vector<1x1x75x196xbf16>
    %78 = vector.shape_cast %77 : vector<1x1x75x196xbf16> to vector<75x196xbf16>
    %cst_90 = arith.constant dense<0.000000e+00> : vector<6x196xf32>
    %79 = tpu.matmul %0, %78, %cst_90 {dimension_numbers = #tpu.dot_dimension_numbers<[1], [0], [0], [1], [0, 0, 1, 1], [], []>} : vector<6x75xbf16>, vector<75x196xbf16>, vector<6x196xf32> -> vector<6x196xf32>
    %80 = arith.maximumf %70, %73 : vector<6x196xf32>
    %81 = arith.maximumf %76, %79 : vector<6x196xf32>
    %82 = arith.maximumf %80, %81 : vector<6x196xf32>
    %83 = vector.broadcast %1 : vector<6x1xf32> to vector<6x196xf32>
    %84 = arith.addf %82, %83 : vector<6x196xf32>
    %cst_91 = arith.constant 0.000000e+00 : f32
    %85 = vector.broadcast %cst_91 : f32 to vector<6x196xf32>
    %86 = arith.maximumf %84, %85 : vector<6x196xf32>
    %c3_92 = arith.constant 3 : index
    %c0_93 = arith.constant 0 : index
    %c0_94 = arith.constant 0 : index
    %87 = vector.load %arg4[%c3_92, %c0_93, %c0_94] : memref<8x6x196xf32, #tpu.memory_space<vmem>>, vector<1x6x196xf32>
    %88 = vector.shape_cast %87 : vector<1x6x196xf32> to vector<6x196xf32>
    %89 = vector.shape_cast %86 : vector<6x196xf32> to vector<1x6x196xf32>
    tpu.vector_store %arg4[%c3_92, %c0_93, %c0_94], %89 {strides = array<i32>} : memref<8x6x196xf32, #tpu.memory_space<vmem>>, vector<1x6x196xf32>,
    %c4 = arith.constant 4 : index
    %c0_95 = arith.constant 0 : index
    %c0_96 = arith.constant 0 : index
    %c0_97 = arith.constant 0 : index
    %90 = vector.load %arg1[%c4, %c0_95, %c0_96, %c0_97] : memref<8x4x75x196xbf16, #tpu.memory_space<vmem>>, vector<1x1x75x196xbf16>
    %91 = vector.shape_cast %90 : vector<1x1x75x196xbf16> to vector<75x196xbf16>
    %cst_98 = arith.constant dense<0.000000e+00> : vector<6x196xf32>
    %92 = tpu.matmul %0, %91, %cst_98 {dimension_numbers = #tpu.dot_dimension_numbers<[1], [0], [0], [1], [0, 0, 1, 1], [], []>} : vector<6x75xbf16>, vector<75x196xbf16>, vector<6x196xf32> -> vector<6x196xf32>
    %c4_99 = arith.constant 4 : index
    %c1_100 = arith.constant 1 : index
    %c0_101 = arith.constant 0 : index
    %c0_102 = arith.constant 0 : index
    %93 = vector.load %arg1[%c4_99, %c1_100, %c0_101, %c0_102] : memref<8x4x75x196xbf16, #tpu.memory_space<vmem>>, vector<1x1x75x196xbf16>
    %94 = vector.shape_cast %93 : vector<1x1x75x196xbf16> to vector<75x196xbf16>
    %cst_103 = arith.constant dense<0.000000e+00> : vector<6x196xf32>
    %95 = tpu.matmul %0, %94, %cst_103 {dimension_numbers = #tpu.dot_dimension_numbers<[1], [0], [0], [1], [0, 0, 1, 1], [], []>} : vector<6x75xbf16>, vector<75x196xbf16>, vector<6x196xf32> -> vector<6x196xf32>
    %c4_104 = arith.constant 4 : index
    %c2_105 = arith.constant 2 : index
    %c0_106 = arith.constant 0 : index
    %c0_107 = arith.constant 0 : index
    %96 = vector.load %arg1[%c4_104, %c2_105, %c0_106, %c0_107] : memref<8x4x75x196xbf16, #tpu.memory_space<vmem>>, vector<1x1x75x196xbf16>
    %97 = vector.shape_cast %96 : vector<1x1x75x196xbf16> to vector<75x196xbf16>
    %cst_108 = arith.constant dense<0.000000e+00> : vector<6x196xf32>
    %98 = tpu.matmul %0, %97, %cst_108 {dimension_numbers = #tpu.dot_dimension_numbers<[1], [0], [0], [1], [0, 0, 1, 1], [], []>} : vector<6x75xbf16>, vector<75x196xbf16>, vector<6x196xf32> -> vector<6x196xf32>
    %c4_109 = arith.constant 4 : index
    %c3_110 = arith.constant 3 : index
    %c0_111 = arith.constant 0 : index
    %c0_112 = arith.constant 0 : index
    %99 = vector.load %arg1[%c4_109, %c3_110, %c0_111, %c0_112] : memref<8x4x75x196xbf16, #tpu.memory_space<vmem>>, vector<1x1x75x196xbf16>
    %100 = vector.shape_cast %99 : vector<1x1x75x196xbf16> to vector<75x196xbf16>
    %cst_113 = arith.constant dense<0.000000e+00> : vector<6x196xf32>
    %101 = tpu.matmul %0, %100, %cst_113 {dimension_numbers = #tpu.dot_dimension_numbers<[1], [0], [0], [1], [0, 0, 1, 1], [], []>} : vector<6x75xbf16>, vector<75x196xbf16>, vector<6x196xf32> -> vector<6x196xf32>
    %102 = arith.maximumf %92, %95 : vector<6x196xf32>
    %103 = arith.maximumf %98, %101 : vector<6x196xf32>
    %104 = arith.maximumf %102, %103 : vector<6x196xf32>
    %105 = vector.broadcast %1 : vector<6x1xf32> to vector<6x196xf32>
    %106 = arith.addf %104, %105 : vector<6x196xf32>
    %cst_114 = arith.constant 0.000000e+00 : f32
    %107 = vector.broadcast %cst_114 : f32 to vector<6x196xf32>
    %108 = arith.maximumf %106, %107 : vector<6x196xf32>
    %c4_115 = arith.constant 4 : index
    %c0_116 = arith.constant 0 : index
    %c0_117 = arith.constant 0 : index
    %109 = vector.load %arg4[%c4_115, %c0_116, %c0_117] : memref<8x6x196xf32, #tpu.memory_space<vmem>>, vector<1x6x196xf32>
    %110 = vector.shape_cast %109 : vector<1x6x196xf32> to vector<6x196xf32>
    %111 = vector.shape_cast %108 : vector<6x196xf32> to vector<1x6x196xf32>
    tpu.vector_store %arg4[%c4_115, %c0_116, %c0_117], %111 {strides = array<i32>} : memref<8x6x196xf32, #tpu.memory_space<vmem>>, vector<1x6x196xf32>,
    %c5 = arith.constant 5 : index
    %c0_118 = arith.constant 0 : index
    %c0_119 = arith.constant 0 : index
    %c0_120 = arith.constant 0 : index
    %112 = vector.load %arg1[%c5, %c0_118, %c0_119, %c0_120] : memref<8x4x75x196xbf16, #tpu.memory_space<vmem>>, vector<1x1x75x196xbf16>
    %113 = vector.shape_cast %112 : vector<1x1x75x196xbf16> to vector<75x196xbf16>
    %cst_121 = arith.constant dense<0.000000e+00> : vector<6x196xf32>
    %114 = tpu.matmul %0, %113, %cst_121 {dimension_numbers = #tpu.dot_dimension_numbers<[1], [0], [0], [1], [0, 0, 1, 1], [], []>} : vector<6x75xbf16>, vector<75x196xbf16>, vector<6x196xf32> -> vector<6x196xf32>
    %c5_122 = arith.constant 5 : index
    %c1_123 = arith.constant 1 : index
    %c0_124 = arith.constant 0 : index
    %c0_125 = arith.constant 0 : index
    %115 = vector.load %arg1[%c5_122, %c1_123, %c0_124, %c0_125] : memref<8x4x75x196xbf16, #tpu.memory_space<vmem>>, vector<1x1x75x196xbf16>
    %116 = vector.shape_cast %115 : vector<1x1x75x196xbf16> to vector<75x196xbf16>
    %cst_126 = arith.constant dense<0.000000e+00> : vector<6x196xf32>
    %117 = tpu.matmul %0, %116, %cst_126 {dimension_numbers = #tpu.dot_dimension_numbers<[1], [0], [0], [1], [0, 0, 1, 1], [], []>} : vector<6x75xbf16>, vector<75x196xbf16>, vector<6x196xf32> -> vector<6x196xf32>
    %c5_127 = arith.constant 5 : index
    %c2_128 = arith.constant 2 : index
    %c0_129 = arith.constant 0 : index
    %c0_130 = arith.constant 0 : index
    %118 = vector.load %arg1[%c5_127, %c2_128, %c0_129, %c0_130] : memref<8x4x75x196xbf16, #tpu.memory_space<vmem>>, vector<1x1x75x196xbf16>
    %119 = vector.shape_cast %118 : vector<1x1x75x196xbf16> to vector<75x196xbf16>
    %cst_131 = arith.constant dense<0.000000e+00> : vector<6x196xf32>
    %120 = tpu.matmul %0, %119, %cst_131 {dimension_numbers = #tpu.dot_dimension_numbers<[1], [0], [0], [1], [0, 0, 1, 1], [], []>} : vector<6x75xbf16>, vector<75x196xbf16>, vector<6x196xf32> -> vector<6x196xf32>
    %c5_132 = arith.constant 5 : index
    %c3_133 = arith.constant 3 : index
    %c0_134 = arith.constant 0 : index
    %c0_135 = arith.constant 0 : index
    %121 = vector.load %arg1[%c5_132, %c3_133, %c0_134, %c0_135] : memref<8x4x75x196xbf16, #tpu.memory_space<vmem>>, vector<1x1x75x196xbf16>
    %122 = vector.shape_cast %121 : vector<1x1x75x196xbf16> to vector<75x196xbf16>
    %cst_136 = arith.constant dense<0.000000e+00> : vector<6x196xf32>
    %123 = tpu.matmul %0, %122, %cst_136 {dimension_numbers = #tpu.dot_dimension_numbers<[1], [0], [0], [1], [0, 0, 1, 1], [], []>} : vector<6x75xbf16>, vector<75x196xbf16>, vector<6x196xf32> -> vector<6x196xf32>
    %124 = arith.maximumf %114, %117 : vector<6x196xf32>
    %125 = arith.maximumf %120, %123 : vector<6x196xf32>
    %126 = arith.maximumf %124, %125 : vector<6x196xf32>
    %127 = vector.broadcast %1 : vector<6x1xf32> to vector<6x196xf32>
    %128 = arith.addf %126, %127 : vector<6x196xf32>
    %cst_137 = arith.constant 0.000000e+00 : f32
    %129 = vector.broadcast %cst_137 : f32 to vector<6x196xf32>
    %130 = arith.maximumf %128, %129 : vector<6x196xf32>
    %c5_138 = arith.constant 5 : index
    %c0_139 = arith.constant 0 : index
    %c0_140 = arith.constant 0 : index
    %131 = vector.load %arg4[%c5_138, %c0_139, %c0_140] : memref<8x6x196xf32, #tpu.memory_space<vmem>>, vector<1x6x196xf32>
    %132 = vector.shape_cast %131 : vector<1x6x196xf32> to vector<6x196xf32>
    %133 = vector.shape_cast %130 : vector<6x196xf32> to vector<1x6x196xf32>
    tpu.vector_store %arg4[%c5_138, %c0_139, %c0_140], %133 {strides = array<i32>} : memref<8x6x196xf32, #tpu.memory_space<vmem>>, vector<1x6x196xf32>,
    %c6 = arith.constant 6 : index
    %c0_141 = arith.constant 0 : index
    %c0_142 = arith.constant 0 : index
    %c0_143 = arith.constant 0 : index
    %134 = vector.load %arg1[%c6, %c0_141, %c0_142, %c0_143] : memref<8x4x75x196xbf16, #tpu.memory_space<vmem>>, vector<1x1x75x196xbf16>
    %135 = vector.shape_cast %134 : vector<1x1x75x196xbf16> to vector<75x196xbf16>
    %cst_144 = arith.constant dense<0.000000e+00> : vector<6x196xf32>
    %136 = tpu.matmul %0, %135, %cst_144 {dimension_numbers = #tpu.dot_dimension_numbers<[1], [0], [0], [1], [0, 0, 1, 1], [], []>} : vector<6x75xbf16>, vector<75x196xbf16>, vector<6x196xf32> -> vector<6x196xf32>
    %c6_145 = arith.constant 6 : index
    %c1_146 = arith.constant 1 : index
    %c0_147 = arith.constant 0 : index
    %c0_148 = arith.constant 0 : index
    %137 = vector.load %arg1[%c6_145, %c1_146, %c0_147, %c0_148] : memref<8x4x75x196xbf16, #tpu.memory_space<vmem>>, vector<1x1x75x196xbf16>
    %138 = vector.shape_cast %137 : vector<1x1x75x196xbf16> to vector<75x196xbf16>
    %cst_149 = arith.constant dense<0.000000e+00> : vector<6x196xf32>
    %139 = tpu.matmul %0, %138, %cst_149 {dimension_numbers = #tpu.dot_dimension_numbers<[1], [0], [0], [1], [0, 0, 1, 1], [], []>} : vector<6x75xbf16>, vector<75x196xbf16>, vector<6x196xf32> -> vector<6x196xf32>
    %c6_150 = arith.constant 6 : index
    %c2_151 = arith.constant 2 : index
    %c0_152 = arith.constant 0 : index
    %c0_153 = arith.constant 0 : index
    %140 = vector.load %arg1[%c6_150, %c2_151, %c0_152, %c0_153] : memref<8x4x75x196xbf16, #tpu.memory_space<vmem>>, vector<1x1x75x196xbf16>
    %141 = vector.shape_cast %140 : vector<1x1x75x196xbf16> to vector<75x196xbf16>
    %cst_154 = arith.constant dense<0.000000e+00> : vector<6x196xf32>
    %142 = tpu.matmul %0, %141, %cst_154 {dimension_numbers = #tpu.dot_dimension_numbers<[1], [0], [0], [1], [0, 0, 1, 1], [], []>} : vector<6x75xbf16>, vector<75x196xbf16>, vector<6x196xf32> -> vector<6x196xf32>
    %c6_155 = arith.constant 6 : index
    %c3_156 = arith.constant 3 : index
    %c0_157 = arith.constant 0 : index
    %c0_158 = arith.constant 0 : index
    %143 = vector.load %arg1[%c6_155, %c3_156, %c0_157, %c0_158] : memref<8x4x75x196xbf16, #tpu.memory_space<vmem>>, vector<1x1x75x196xbf16>
    %144 = vector.shape_cast %143 : vector<1x1x75x196xbf16> to vector<75x196xbf16>
    %cst_159 = arith.constant dense<0.000000e+00> : vector<6x196xf32>
    %145 = tpu.matmul %0, %144, %cst_159 {dimension_numbers = #tpu.dot_dimension_numbers<[1], [0], [0], [1], [0, 0, 1, 1], [], []>} : vector<6x75xbf16>, vector<75x196xbf16>, vector<6x196xf32> -> vector<6x196xf32>
    %146 = arith.maximumf %136, %139 : vector<6x196xf32>
    %147 = arith.maximumf %142, %145 : vector<6x196xf32>
    %148 = arith.maximumf %146, %147 : vector<6x196xf32>
    %149 = vector.broadcast %1 : vector<6x1xf32> to vector<6x196xf32>
    %150 = arith.addf %148, %149 : vector<6x196xf32>
    %cst_160 = arith.constant 0.000000e+00 : f32
    %151 = vector.broadcast %cst_160 : f32 to vector<6x196xf32>
    %152 = arith.maximumf %150, %151 : vector<6x196xf32>
    %c6_161 = arith.constant 6 : index
    %c0_162 = arith.constant 0 : index
    %c0_163 = arith.constant 0 : index
    %153 = vector.load %arg4[%c6_161, %c0_162, %c0_163] : memref<8x6x196xf32, #tpu.memory_space<vmem>>, vector<1x6x196xf32>
    %154 = vector.shape_cast %153 : vector<1x6x196xf32> to vector<6x196xf32>
    %155 = vector.shape_cast %152 : vector<6x196xf32> to vector<1x6x196xf32>
    tpu.vector_store %arg4[%c6_161, %c0_162, %c0_163], %155 {strides = array<i32>} : memref<8x6x196xf32, #tpu.memory_space<vmem>>, vector<1x6x196xf32>,
    %c7 = arith.constant 7 : index
    %c0_164 = arith.constant 0 : index
    %c0_165 = arith.constant 0 : index
    %c0_166 = arith.constant 0 : index
    %156 = vector.load %arg1[%c7, %c0_164, %c0_165, %c0_166] : memref<8x4x75x196xbf16, #tpu.memory_space<vmem>>, vector<1x1x75x196xbf16>
    %157 = vector.shape_cast %156 : vector<1x1x75x196xbf16> to vector<75x196xbf16>
    %cst_167 = arith.constant dense<0.000000e+00> : vector<6x196xf32>
    %158 = tpu.matmul %0, %157, %cst_167 {dimension_numbers = #tpu.dot_dimension_numbers<[1], [0], [0], [1], [0, 0, 1, 1], [], []>} : vector<6x75xbf16>, vector<75x196xbf16>, vector<6x196xf32> -> vector<6x196xf32>
    %c7_168 = arith.constant 7 : index
    %c1_169 = arith.constant 1 : index
    %c0_170 = arith.constant 0 : index
    %c0_171 = arith.constant 0 : index
    %159 = vector.load %arg1[%c7_168, %c1_169, %c0_170, %c0_171] : memref<8x4x75x196xbf16, #tpu.memory_space<vmem>>, vector<1x1x75x196xbf16>
    %160 = vector.shape_cast %159 : vector<1x1x75x196xbf16> to vector<75x196xbf16>
    %cst_172 = arith.constant dense<0.000000e+00> : vector<6x196xf32>
    %161 = tpu.matmul %0, %160, %cst_172 {dimension_numbers = #tpu.dot_dimension_numbers<[1], [0], [0], [1], [0, 0, 1, 1], [], []>} : vector<6x75xbf16>, vector<75x196xbf16>, vector<6x196xf32> -> vector<6x196xf32>
    %c7_173 = arith.constant 7 : index
    %c2_174 = arith.constant 2 : index
    %c0_175 = arith.constant 0 : index
    %c0_176 = arith.constant 0 : index
    %162 = vector.load %arg1[%c7_173, %c2_174, %c0_175, %c0_176] : memref<8x4x75x196xbf16, #tpu.memory_space<vmem>>, vector<1x1x75x196xbf16>
    %163 = vector.shape_cast %162 : vector<1x1x75x196xbf16> to vector<75x196xbf16>
    %cst_177 = arith.constant dense<0.000000e+00> : vector<6x196xf32>
    %164 = tpu.matmul %0, %163, %cst_177 {dimension_numbers = #tpu.dot_dimension_numbers<[1], [0], [0], [1], [0, 0, 1, 1], [], []>} : vector<6x75xbf16>, vector<75x196xbf16>, vector<6x196xf32> -> vector<6x196xf32>
    %c7_178 = arith.constant 7 : index
    %c3_179 = arith.constant 3 : index
    %c0_180 = arith.constant 0 : index
    %c0_181 = arith.constant 0 : index
    %165 = vector.load %arg1[%c7_178, %c3_179, %c0_180, %c0_181] : memref<8x4x75x196xbf16, #tpu.memory_space<vmem>>, vector<1x1x75x196xbf16>
    %166 = vector.shape_cast %165 : vector<1x1x75x196xbf16> to vector<75x196xbf16>
    %cst_182 = arith.constant dense<0.000000e+00> : vector<6x196xf32>
    %167 = tpu.matmul %0, %166, %cst_182 {dimension_numbers = #tpu.dot_dimension_numbers<[1], [0], [0], [1], [0, 0, 1, 1], [], []>} : vector<6x75xbf16>, vector<75x196xbf16>, vector<6x196xf32> -> vector<6x196xf32>
    %168 = arith.maximumf %158, %161 : vector<6x196xf32>
    %169 = arith.maximumf %164, %167 : vector<6x196xf32>
    %170 = arith.maximumf %168, %169 : vector<6x196xf32>
    %171 = vector.broadcast %1 : vector<6x1xf32> to vector<6x196xf32>
    %172 = arith.addf %170, %171 : vector<6x196xf32>
    %cst_183 = arith.constant 0.000000e+00 : f32
    %173 = vector.broadcast %cst_183 : f32 to vector<6x196xf32>
    %174 = arith.maximumf %172, %173 : vector<6x196xf32>
    %c7_184 = arith.constant 7 : index
    %c0_185 = arith.constant 0 : index
    %c0_186 = arith.constant 0 : index
    %175 = vector.load %arg4[%c7_184, %c0_185, %c0_186] : memref<8x6x196xf32, #tpu.memory_space<vmem>>, vector<1x6x196xf32>
    %176 = vector.shape_cast %175 : vector<1x6x196xf32> to vector<6x196xf32>
    %177 = vector.shape_cast %174 : vector<6x196xf32> to vector<1x6x196xf32>
    tpu.vector_store %arg4[%c7_184, %c0_185, %c0_186], %177 {strides = array<i32>} : memref<8x6x196xf32, #tpu.memory_space<vmem>>, vector<1x6x196xf32>,
    return
  }
  func.func @transform_0(%arg0: i32) -> (i32, i32, i32, i32) {
    %c0_i32 = arith.constant 0 : i32
    %c0_i32_0 = arith.constant 0 : i32
    %c0_i32_1 = arith.constant 0 : i32
    %c0_i32_2 = arith.constant 0 : i32
    return %arg0, %c0_i32, %c0_i32_0, %c0_i32_1 : i32, i32, i32, i32
  }
  func.func @transform_1(%arg0: i32) -> (i32, i32) {
    %c0_i32 = arith.constant 0 : i32
    %c0_i32_0 = arith.constant 0 : i32
    %c0_i32_1 = arith.constant 0 : i32
    return %c0_i32, %c0_i32_0 : i32, i32
  }
  func.func @transform_2(%arg0: i32) -> (i32, i32) {
    %c0_i32 = arith.constant 0 : i32
    %c0_i32_0 = arith.constant 0 : i32
    %c0_i32_1 = arith.constant 0 : i32
    return %c0_i32, %c0_i32_0 : i32, i32
  }
  func.func @transform_3(%arg0: i32) -> (i32, i32, i32) {
    %c0_i32 = arith.constant 0 : i32
    %c0_i32_0 = arith.constant 0 : i32
    %c0_i32_1 = arith.constant 0 : i32
    return %arg0, %c0_i32, %c0_i32_0 : i32, i32, i32
  }
}

module attributes {stable_mosaic.version = 11 : i64} {
  func.func @_conv_pool_relu_kernel(%arg0: i32, %arg1: memref<8x4x150x25xbf16, #tpu.memory_space<vmem>>, %arg2: memref<16x150xbf16, #tpu.memory_space<vmem>>, %arg3: memref<16x1xf32, #tpu.memory_space<vmem>>, %arg4: memref<8x16x25xf32, #tpu.memory_space<vmem>>) attributes {dimension_semantics = [#tpu.dimension_semantics<parallel>], iteration_bounds = array<i64: 2>, scalar_prefetch = 0 : i64, scratch_operands = 0 : i64, tpu.core_type = #tpu.core_type<tc>, window_params = [{transform_indices = @transform_0, window_bounds = array<i64: 8, 4, 150, 25>}, {pipeline_mode = #tpu.pipeline_mode<synchronous>, transform_indices = @transform_1, window_bounds = array<i64: 16, 150>}, {pipeline_mode = #tpu.pipeline_mode<synchronous>, transform_indices = @transform_2, window_bounds = array<i64: 16, 1>}, {transform_indices = @transform_3, window_bounds = array<i64: 8, 16, 25>}]} {
    %c0 = arith.constant 0 : index
    %c0_0 = arith.constant 0 : index
    %0 = vector.load %arg2[%c0, %c0_0] : memref<16x150xbf16, #tpu.memory_space<vmem>>, vector<16x150xbf16>
    %c0_1 = arith.constant 0 : index
    %c0_2 = arith.constant 0 : index
    %1 = vector.load %arg3[%c0_1, %c0_2] : memref<16x1xf32, #tpu.memory_space<vmem>>, vector<16x1xf32>
    %c0_3 = arith.constant 0 : index
    %c0_4 = arith.constant 0 : index
    %c0_5 = arith.constant 0 : index
    %c0_6 = arith.constant 0 : index
    %2 = vector.load %arg1[%c0_3, %c0_4, %c0_5, %c0_6] : memref<8x4x150x25xbf16, #tpu.memory_space<vmem>>, vector<1x1x150x25xbf16>
    %3 = vector.shape_cast %2 : vector<1x1x150x25xbf16> to vector<150x25xbf16>
    %cst = arith.constant dense<0.000000e+00> : vector<16x25xf32>
    %4 = tpu.matmul %0, %3, %cst {dimension_numbers = #tpu.dot_dimension_numbers<[1], [0], [0], [1], [0, 0, 1, 1], [], []>} : vector<16x150xbf16>, vector<150x25xbf16>, vector<16x25xf32> -> vector<16x25xf32>
    %c0_7 = arith.constant 0 : index
    %c1 = arith.constant 1 : index
    %c0_8 = arith.constant 0 : index
    %c0_9 = arith.constant 0 : index
    %5 = vector.load %arg1[%c0_7, %c1, %c0_8, %c0_9] : memref<8x4x150x25xbf16, #tpu.memory_space<vmem>>, vector<1x1x150x25xbf16>
    %6 = vector.shape_cast %5 : vector<1x1x150x25xbf16> to vector<150x25xbf16>
    %cst_10 = arith.constant dense<0.000000e+00> : vector<16x25xf32>
    %7 = tpu.matmul %0, %6, %cst_10 {dimension_numbers = #tpu.dot_dimension_numbers<[1], [0], [0], [1], [0, 0, 1, 1], [], []>} : vector<16x150xbf16>, vector<150x25xbf16>, vector<16x25xf32> -> vector<16x25xf32>
    %c0_11 = arith.constant 0 : index
    %c2 = arith.constant 2 : index
    %c0_12 = arith.constant 0 : index
    %c0_13 = arith.constant 0 : index
    %8 = vector.load %arg1[%c0_11, %c2, %c0_12, %c0_13] : memref<8x4x150x25xbf16, #tpu.memory_space<vmem>>, vector<1x1x150x25xbf16>
    %9 = vector.shape_cast %8 : vector<1x1x150x25xbf16> to vector<150x25xbf16>
    %cst_14 = arith.constant dense<0.000000e+00> : vector<16x25xf32>
    %10 = tpu.matmul %0, %9, %cst_14 {dimension_numbers = #tpu.dot_dimension_numbers<[1], [0], [0], [1], [0, 0, 1, 1], [], []>} : vector<16x150xbf16>, vector<150x25xbf16>, vector<16x25xf32> -> vector<16x25xf32>
    %c0_15 = arith.constant 0 : index
    %c3 = arith.constant 3 : index
    %c0_16 = arith.constant 0 : index
    %c0_17 = arith.constant 0 : index
    %11 = vector.load %arg1[%c0_15, %c3, %c0_16, %c0_17] : memref<8x4x150x25xbf16, #tpu.memory_space<vmem>>, vector<1x1x150x25xbf16>
    %12 = vector.shape_cast %11 : vector<1x1x150x25xbf16> to vector<150x25xbf16>
    %cst_18 = arith.constant dense<0.000000e+00> : vector<16x25xf32>
    %13 = tpu.matmul %0, %12, %cst_18 {dimension_numbers = #tpu.dot_dimension_numbers<[1], [0], [0], [1], [0, 0, 1, 1], [], []>} : vector<16x150xbf16>, vector<150x25xbf16>, vector<16x25xf32> -> vector<16x25xf32>
    %14 = arith.maximumf %4, %7 : vector<16x25xf32>
    %15 = arith.maximumf %10, %13 : vector<16x25xf32>
    %16 = arith.maximumf %14, %15 : vector<16x25xf32>
    %17 = vector.broadcast %1 : vector<16x1xf32> to vector<16x25xf32>
    %18 = arith.addf %16, %17 : vector<16x25xf32>
    %cst_19 = arith.constant 0.000000e+00 : f32
    %19 = vector.broadcast %cst_19 : f32 to vector<16x25xf32>
    %20 = arith.maximumf %18, %19 : vector<16x25xf32>
    %c0_20 = arith.constant 0 : index
    %c0_21 = arith.constant 0 : index
    %c0_22 = arith.constant 0 : index
    %21 = vector.load %arg4[%c0_20, %c0_21, %c0_22] : memref<8x16x25xf32, #tpu.memory_space<vmem>>, vector<1x16x25xf32>
    %22 = vector.shape_cast %21 : vector<1x16x25xf32> to vector<16x25xf32>
    %23 = vector.shape_cast %20 : vector<16x25xf32> to vector<1x16x25xf32>
    tpu.vector_store %arg4[%c0_20, %c0_21, %c0_22], %23 {strides = array<i32>} : memref<8x16x25xf32, #tpu.memory_space<vmem>>, vector<1x16x25xf32>,
    %c1_23 = arith.constant 1 : index
    %c0_24 = arith.constant 0 : index
    %c0_25 = arith.constant 0 : index
    %c0_26 = arith.constant 0 : index
    %24 = vector.load %arg1[%c1_23, %c0_24, %c0_25, %c0_26] : memref<8x4x150x25xbf16, #tpu.memory_space<vmem>>, vector<1x1x150x25xbf16>
    %25 = vector.shape_cast %24 : vector<1x1x150x25xbf16> to vector<150x25xbf16>
    %cst_27 = arith.constant dense<0.000000e+00> : vector<16x25xf32>
    %26 = tpu.matmul %0, %25, %cst_27 {dimension_numbers = #tpu.dot_dimension_numbers<[1], [0], [0], [1], [0, 0, 1, 1], [], []>} : vector<16x150xbf16>, vector<150x25xbf16>, vector<16x25xf32> -> vector<16x25xf32>
    %c1_28 = arith.constant 1 : index
    %c1_29 = arith.constant 1 : index
    %c0_30 = arith.constant 0 : index
    %c0_31 = arith.constant 0 : index
    %27 = vector.load %arg1[%c1_28, %c1_29, %c0_30, %c0_31] : memref<8x4x150x25xbf16, #tpu.memory_space<vmem>>, vector<1x1x150x25xbf16>
    %28 = vector.shape_cast %27 : vector<1x1x150x25xbf16> to vector<150x25xbf16>
    %cst_32 = arith.constant dense<0.000000e+00> : vector<16x25xf32>
    %29 = tpu.matmul %0, %28, %cst_32 {dimension_numbers = #tpu.dot_dimension_numbers<[1], [0], [0], [1], [0, 0, 1, 1], [], []>} : vector<16x150xbf16>, vector<150x25xbf16>, vector<16x25xf32> -> vector<16x25xf32>
    %c1_33 = arith.constant 1 : index
    %c2_34 = arith.constant 2 : index
    %c0_35 = arith.constant 0 : index
    %c0_36 = arith.constant 0 : index
    %30 = vector.load %arg1[%c1_33, %c2_34, %c0_35, %c0_36] : memref<8x4x150x25xbf16, #tpu.memory_space<vmem>>, vector<1x1x150x25xbf16>
    %31 = vector.shape_cast %30 : vector<1x1x150x25xbf16> to vector<150x25xbf16>
    %cst_37 = arith.constant dense<0.000000e+00> : vector<16x25xf32>
    %32 = tpu.matmul %0, %31, %cst_37 {dimension_numbers = #tpu.dot_dimension_numbers<[1], [0], [0], [1], [0, 0, 1, 1], [], []>} : vector<16x150xbf16>, vector<150x25xbf16>, vector<16x25xf32> -> vector<16x25xf32>
    %c1_38 = arith.constant 1 : index
    %c3_39 = arith.constant 3 : index
    %c0_40 = arith.constant 0 : index
    %c0_41 = arith.constant 0 : index
    %33 = vector.load %arg1[%c1_38, %c3_39, %c0_40, %c0_41] : memref<8x4x150x25xbf16, #tpu.memory_space<vmem>>, vector<1x1x150x25xbf16>
    %34 = vector.shape_cast %33 : vector<1x1x150x25xbf16> to vector<150x25xbf16>
    %cst_42 = arith.constant dense<0.000000e+00> : vector<16x25xf32>
    %35 = tpu.matmul %0, %34, %cst_42 {dimension_numbers = #tpu.dot_dimension_numbers<[1], [0], [0], [1], [0, 0, 1, 1], [], []>} : vector<16x150xbf16>, vector<150x25xbf16>, vector<16x25xf32> -> vector<16x25xf32>
    %36 = arith.maximumf %26, %29 : vector<16x25xf32>
    %37 = arith.maximumf %32, %35 : vector<16x25xf32>
    %38 = arith.maximumf %36, %37 : vector<16x25xf32>
    %39 = vector.broadcast %1 : vector<16x1xf32> to vector<16x25xf32>
    %40 = arith.addf %38, %39 : vector<16x25xf32>
    %cst_43 = arith.constant 0.000000e+00 : f32
    %41 = vector.broadcast %cst_43 : f32 to vector<16x25xf32>
    %42 = arith.maximumf %40, %41 : vector<16x25xf32>
    %c1_44 = arith.constant 1 : index
    %c0_45 = arith.constant 0 : index
    %c0_46 = arith.constant 0 : index
    %43 = vector.load %arg4[%c1_44, %c0_45, %c0_46] : memref<8x16x25xf32, #tpu.memory_space<vmem>>, vector<1x16x25xf32>
    %44 = vector.shape_cast %43 : vector<1x16x25xf32> to vector<16x25xf32>
    %45 = vector.shape_cast %42 : vector<16x25xf32> to vector<1x16x25xf32>
    tpu.vector_store %arg4[%c1_44, %c0_45, %c0_46], %45 {strides = array<i32>} : memref<8x16x25xf32, #tpu.memory_space<vmem>>, vector<1x16x25xf32>,
    %c2_47 = arith.constant 2 : index
    %c0_48 = arith.constant 0 : index
    %c0_49 = arith.constant 0 : index
    %c0_50 = arith.constant 0 : index
    %46 = vector.load %arg1[%c2_47, %c0_48, %c0_49, %c0_50] : memref<8x4x150x25xbf16, #tpu.memory_space<vmem>>, vector<1x1x150x25xbf16>
    %47 = vector.shape_cast %46 : vector<1x1x150x25xbf16> to vector<150x25xbf16>
    %cst_51 = arith.constant dense<0.000000e+00> : vector<16x25xf32>
    %48 = tpu.matmul %0, %47, %cst_51 {dimension_numbers = #tpu.dot_dimension_numbers<[1], [0], [0], [1], [0, 0, 1, 1], [], []>} : vector<16x150xbf16>, vector<150x25xbf16>, vector<16x25xf32> -> vector<16x25xf32>
    %c2_52 = arith.constant 2 : index
    %c1_53 = arith.constant 1 : index
    %c0_54 = arith.constant 0 : index
    %c0_55 = arith.constant 0 : index
    %49 = vector.load %arg1[%c2_52, %c1_53, %c0_54, %c0_55] : memref<8x4x150x25xbf16, #tpu.memory_space<vmem>>, vector<1x1x150x25xbf16>
    %50 = vector.shape_cast %49 : vector<1x1x150x25xbf16> to vector<150x25xbf16>
    %cst_56 = arith.constant dense<0.000000e+00> : vector<16x25xf32>
    %51 = tpu.matmul %0, %50, %cst_56 {dimension_numbers = #tpu.dot_dimension_numbers<[1], [0], [0], [1], [0, 0, 1, 1], [], []>} : vector<16x150xbf16>, vector<150x25xbf16>, vector<16x25xf32> -> vector<16x25xf32>
    %c2_57 = arith.constant 2 : index
    %c2_58 = arith.constant 2 : index
    %c0_59 = arith.constant 0 : index
    %c0_60 = arith.constant 0 : index
    %52 = vector.load %arg1[%c2_57, %c2_58, %c0_59, %c0_60] : memref<8x4x150x25xbf16, #tpu.memory_space<vmem>>, vector<1x1x150x25xbf16>
    %53 = vector.shape_cast %52 : vector<1x1x150x25xbf16> to vector<150x25xbf16>
    %cst_61 = arith.constant dense<0.000000e+00> : vector<16x25xf32>
    %54 = tpu.matmul %0, %53, %cst_61 {dimension_numbers = #tpu.dot_dimension_numbers<[1], [0], [0], [1], [0, 0, 1, 1], [], []>} : vector<16x150xbf16>, vector<150x25xbf16>, vector<16x25xf32> -> vector<16x25xf32>
    %c2_62 = arith.constant 2 : index
    %c3_63 = arith.constant 3 : index
    %c0_64 = arith.constant 0 : index
    %c0_65 = arith.constant 0 : index
    %55 = vector.load %arg1[%c2_62, %c3_63, %c0_64, %c0_65] : memref<8x4x150x25xbf16, #tpu.memory_space<vmem>>, vector<1x1x150x25xbf16>
    %56 = vector.shape_cast %55 : vector<1x1x150x25xbf16> to vector<150x25xbf16>
    %cst_66 = arith.constant dense<0.000000e+00> : vector<16x25xf32>
    %57 = tpu.matmul %0, %56, %cst_66 {dimension_numbers = #tpu.dot_dimension_numbers<[1], [0], [0], [1], [0, 0, 1, 1], [], []>} : vector<16x150xbf16>, vector<150x25xbf16>, vector<16x25xf32> -> vector<16x25xf32>
    %58 = arith.maximumf %48, %51 : vector<16x25xf32>
    %59 = arith.maximumf %54, %57 : vector<16x25xf32>
    %60 = arith.maximumf %58, %59 : vector<16x25xf32>
    %61 = vector.broadcast %1 : vector<16x1xf32> to vector<16x25xf32>
    %62 = arith.addf %60, %61 : vector<16x25xf32>
    %cst_67 = arith.constant 0.000000e+00 : f32
    %63 = vector.broadcast %cst_67 : f32 to vector<16x25xf32>
    %64 = arith.maximumf %62, %63 : vector<16x25xf32>
    %c2_68 = arith.constant 2 : index
    %c0_69 = arith.constant 0 : index
    %c0_70 = arith.constant 0 : index
    %65 = vector.load %arg4[%c2_68, %c0_69, %c0_70] : memref<8x16x25xf32, #tpu.memory_space<vmem>>, vector<1x16x25xf32>
    %66 = vector.shape_cast %65 : vector<1x16x25xf32> to vector<16x25xf32>
    %67 = vector.shape_cast %64 : vector<16x25xf32> to vector<1x16x25xf32>
    tpu.vector_store %arg4[%c2_68, %c0_69, %c0_70], %67 {strides = array<i32>} : memref<8x16x25xf32, #tpu.memory_space<vmem>>, vector<1x16x25xf32>,
    %c3_71 = arith.constant 3 : index
    %c0_72 = arith.constant 0 : index
    %c0_73 = arith.constant 0 : index
    %c0_74 = arith.constant 0 : index
    %68 = vector.load %arg1[%c3_71, %c0_72, %c0_73, %c0_74] : memref<8x4x150x25xbf16, #tpu.memory_space<vmem>>, vector<1x1x150x25xbf16>
    %69 = vector.shape_cast %68 : vector<1x1x150x25xbf16> to vector<150x25xbf16>
    %cst_75 = arith.constant dense<0.000000e+00> : vector<16x25xf32>
    %70 = tpu.matmul %0, %69, %cst_75 {dimension_numbers = #tpu.dot_dimension_numbers<[1], [0], [0], [1], [0, 0, 1, 1], [], []>} : vector<16x150xbf16>, vector<150x25xbf16>, vector<16x25xf32> -> vector<16x25xf32>
    %c3_76 = arith.constant 3 : index
    %c1_77 = arith.constant 1 : index
    %c0_78 = arith.constant 0 : index
    %c0_79 = arith.constant 0 : index
    %71 = vector.load %arg1[%c3_76, %c1_77, %c0_78, %c0_79] : memref<8x4x150x25xbf16, #tpu.memory_space<vmem>>, vector<1x1x150x25xbf16>
    %72 = vector.shape_cast %71 : vector<1x1x150x25xbf16> to vector<150x25xbf16>
    %cst_80 = arith.constant dense<0.000000e+00> : vector<16x25xf32>
    %73 = tpu.matmul %0, %72, %cst_80 {dimension_numbers = #tpu.dot_dimension_numbers<[1], [0], [0], [1], [0, 0, 1, 1], [], []>} : vector<16x150xbf16>, vector<150x25xbf16>, vector<16x25xf32> -> vector<16x25xf32>
    %c3_81 = arith.constant 3 : index
    %c2_82 = arith.constant 2 : index
    %c0_83 = arith.constant 0 : index
    %c0_84 = arith.constant 0 : index
    %74 = vector.load %arg1[%c3_81, %c2_82, %c0_83, %c0_84] : memref<8x4x150x25xbf16, #tpu.memory_space<vmem>>, vector<1x1x150x25xbf16>
    %75 = vector.shape_cast %74 : vector<1x1x150x25xbf16> to vector<150x25xbf16>
    %cst_85 = arith.constant dense<0.000000e+00> : vector<16x25xf32>
    %76 = tpu.matmul %0, %75, %cst_85 {dimension_numbers = #tpu.dot_dimension_numbers<[1], [0], [0], [1], [0, 0, 1, 1], [], []>} : vector<16x150xbf16>, vector<150x25xbf16>, vector<16x25xf32> -> vector<16x25xf32>
    %c3_86 = arith.constant 3 : index
    %c3_87 = arith.constant 3 : index
    %c0_88 = arith.constant 0 : index
    %c0_89 = arith.constant 0 : index
    %77 = vector.load %arg1[%c3_86, %c3_87, %c0_88, %c0_89] : memref<8x4x150x25xbf16, #tpu.memory_space<vmem>>, vector<1x1x150x25xbf16>
    %78 = vector.shape_cast %77 : vector<1x1x150x25xbf16> to vector<150x25xbf16>
    %cst_90 = arith.constant dense<0.000000e+00> : vector<16x25xf32>
    %79 = tpu.matmul %0, %78, %cst_90 {dimension_numbers = #tpu.dot_dimension_numbers<[1], [0], [0], [1], [0, 0, 1, 1], [], []>} : vector<16x150xbf16>, vector<150x25xbf16>, vector<16x25xf32> -> vector<16x25xf32>
    %80 = arith.maximumf %70, %73 : vector<16x25xf32>
    %81 = arith.maximumf %76, %79 : vector<16x25xf32>
    %82 = arith.maximumf %80, %81 : vector<16x25xf32>
    %83 = vector.broadcast %1 : vector<16x1xf32> to vector<16x25xf32>
    %84 = arith.addf %82, %83 : vector<16x25xf32>
    %cst_91 = arith.constant 0.000000e+00 : f32
    %85 = vector.broadcast %cst_91 : f32 to vector<16x25xf32>
    %86 = arith.maximumf %84, %85 : vector<16x25xf32>
    %c3_92 = arith.constant 3 : index
    %c0_93 = arith.constant 0 : index
    %c0_94 = arith.constant 0 : index
    %87 = vector.load %arg4[%c3_92, %c0_93, %c0_94] : memref<8x16x25xf32, #tpu.memory_space<vmem>>, vector<1x16x25xf32>
    %88 = vector.shape_cast %87 : vector<1x16x25xf32> to vector<16x25xf32>
    %89 = vector.shape_cast %86 : vector<16x25xf32> to vector<1x16x25xf32>
    tpu.vector_store %arg4[%c3_92, %c0_93, %c0_94], %89 {strides = array<i32>} : memref<8x16x25xf32, #tpu.memory_space<vmem>>, vector<1x16x25xf32>,
    %c4 = arith.constant 4 : index
    %c0_95 = arith.constant 0 : index
    %c0_96 = arith.constant 0 : index
    %c0_97 = arith.constant 0 : index
    %90 = vector.load %arg1[%c4, %c0_95, %c0_96, %c0_97] : memref<8x4x150x25xbf16, #tpu.memory_space<vmem>>, vector<1x1x150x25xbf16>
    %91 = vector.shape_cast %90 : vector<1x1x150x25xbf16> to vector<150x25xbf16>
    %cst_98 = arith.constant dense<0.000000e+00> : vector<16x25xf32>
    %92 = tpu.matmul %0, %91, %cst_98 {dimension_numbers = #tpu.dot_dimension_numbers<[1], [0], [0], [1], [0, 0, 1, 1], [], []>} : vector<16x150xbf16>, vector<150x25xbf16>, vector<16x25xf32> -> vector<16x25xf32>
    %c4_99 = arith.constant 4 : index
    %c1_100 = arith.constant 1 : index
    %c0_101 = arith.constant 0 : index
    %c0_102 = arith.constant 0 : index
    %93 = vector.load %arg1[%c4_99, %c1_100, %c0_101, %c0_102] : memref<8x4x150x25xbf16, #tpu.memory_space<vmem>>, vector<1x1x150x25xbf16>
    %94 = vector.shape_cast %93 : vector<1x1x150x25xbf16> to vector<150x25xbf16>
    %cst_103 = arith.constant dense<0.000000e+00> : vector<16x25xf32>
    %95 = tpu.matmul %0, %94, %cst_103 {dimension_numbers = #tpu.dot_dimension_numbers<[1], [0], [0], [1], [0, 0, 1, 1], [], []>} : vector<16x150xbf16>, vector<150x25xbf16>, vector<16x25xf32> -> vector<16x25xf32>
    %c4_104 = arith.constant 4 : index
    %c2_105 = arith.constant 2 : index
    %c0_106 = arith.constant 0 : index
    %c0_107 = arith.constant 0 : index
    %96 = vector.load %arg1[%c4_104, %c2_105, %c0_106, %c0_107] : memref<8x4x150x25xbf16, #tpu.memory_space<vmem>>, vector<1x1x150x25xbf16>
    %97 = vector.shape_cast %96 : vector<1x1x150x25xbf16> to vector<150x25xbf16>
    %cst_108 = arith.constant dense<0.000000e+00> : vector<16x25xf32>
    %98 = tpu.matmul %0, %97, %cst_108 {dimension_numbers = #tpu.dot_dimension_numbers<[1], [0], [0], [1], [0, 0, 1, 1], [], []>} : vector<16x150xbf16>, vector<150x25xbf16>, vector<16x25xf32> -> vector<16x25xf32>
    %c4_109 = arith.constant 4 : index
    %c3_110 = arith.constant 3 : index
    %c0_111 = arith.constant 0 : index
    %c0_112 = arith.constant 0 : index
    %99 = vector.load %arg1[%c4_109, %c3_110, %c0_111, %c0_112] : memref<8x4x150x25xbf16, #tpu.memory_space<vmem>>, vector<1x1x150x25xbf16>
    %100 = vector.shape_cast %99 : vector<1x1x150x25xbf16> to vector<150x25xbf16>
    %cst_113 = arith.constant dense<0.000000e+00> : vector<16x25xf32>
    %101 = tpu.matmul %0, %100, %cst_113 {dimension_numbers = #tpu.dot_dimension_numbers<[1], [0], [0], [1], [0, 0, 1, 1], [], []>} : vector<16x150xbf16>, vector<150x25xbf16>, vector<16x25xf32> -> vector<16x25xf32>
    %102 = arith.maximumf %92, %95 : vector<16x25xf32>
    %103 = arith.maximumf %98, %101 : vector<16x25xf32>
    %104 = arith.maximumf %102, %103 : vector<16x25xf32>
    %105 = vector.broadcast %1 : vector<16x1xf32> to vector<16x25xf32>
    %106 = arith.addf %104, %105 : vector<16x25xf32>
    %cst_114 = arith.constant 0.000000e+00 : f32
    %107 = vector.broadcast %cst_114 : f32 to vector<16x25xf32>
    %108 = arith.maximumf %106, %107 : vector<16x25xf32>
    %c4_115 = arith.constant 4 : index
    %c0_116 = arith.constant 0 : index
    %c0_117 = arith.constant 0 : index
    %109 = vector.load %arg4[%c4_115, %c0_116, %c0_117] : memref<8x16x25xf32, #tpu.memory_space<vmem>>, vector<1x16x25xf32>
    %110 = vector.shape_cast %109 : vector<1x16x25xf32> to vector<16x25xf32>
    %111 = vector.shape_cast %108 : vector<16x25xf32> to vector<1x16x25xf32>
    tpu.vector_store %arg4[%c4_115, %c0_116, %c0_117], %111 {strides = array<i32>} : memref<8x16x25xf32, #tpu.memory_space<vmem>>, vector<1x16x25xf32>,
    %c5 = arith.constant 5 : index
    %c0_118 = arith.constant 0 : index
    %c0_119 = arith.constant 0 : index
    %c0_120 = arith.constant 0 : index
    %112 = vector.load %arg1[%c5, %c0_118, %c0_119, %c0_120] : memref<8x4x150x25xbf16, #tpu.memory_space<vmem>>, vector<1x1x150x25xbf16>
    %113 = vector.shape_cast %112 : vector<1x1x150x25xbf16> to vector<150x25xbf16>
    %cst_121 = arith.constant dense<0.000000e+00> : vector<16x25xf32>
    %114 = tpu.matmul %0, %113, %cst_121 {dimension_numbers = #tpu.dot_dimension_numbers<[1], [0], [0], [1], [0, 0, 1, 1], [], []>} : vector<16x150xbf16>, vector<150x25xbf16>, vector<16x25xf32> -> vector<16x25xf32>
    %c5_122 = arith.constant 5 : index
    %c1_123 = arith.constant 1 : index
    %c0_124 = arith.constant 0 : index
    %c0_125 = arith.constant 0 : index
    %115 = vector.load %arg1[%c5_122, %c1_123, %c0_124, %c0_125] : memref<8x4x150x25xbf16, #tpu.memory_space<vmem>>, vector<1x1x150x25xbf16>
    %116 = vector.shape_cast %115 : vector<1x1x150x25xbf16> to vector<150x25xbf16>
    %cst_126 = arith.constant dense<0.000000e+00> : vector<16x25xf32>
    %117 = tpu.matmul %0, %116, %cst_126 {dimension_numbers = #tpu.dot_dimension_numbers<[1], [0], [0], [1], [0, 0, 1, 1], [], []>} : vector<16x150xbf16>, vector<150x25xbf16>, vector<16x25xf32> -> vector<16x25xf32>
    %c5_127 = arith.constant 5 : index
    %c2_128 = arith.constant 2 : index
    %c0_129 = arith.constant 0 : index
    %c0_130 = arith.constant 0 : index
    %118 = vector.load %arg1[%c5_127, %c2_128, %c0_129, %c0_130] : memref<8x4x150x25xbf16, #tpu.memory_space<vmem>>, vector<1x1x150x25xbf16>
    %119 = vector.shape_cast %118 : vector<1x1x150x25xbf16> to vector<150x25xbf16>
    %cst_131 = arith.constant dense<0.000000e+00> : vector<16x25xf32>
    %120 = tpu.matmul %0, %119, %cst_131 {dimension_numbers = #tpu.dot_dimension_numbers<[1], [0], [0], [1], [0, 0, 1, 1], [], []>} : vector<16x150xbf16>, vector<150x25xbf16>, vector<16x25xf32> -> vector<16x25xf32>
    %c5_132 = arith.constant 5 : index
    %c3_133 = arith.constant 3 : index
    %c0_134 = arith.constant 0 : index
    %c0_135 = arith.constant 0 : index
    %121 = vector.load %arg1[%c5_132, %c3_133, %c0_134, %c0_135] : memref<8x4x150x25xbf16, #tpu.memory_space<vmem>>, vector<1x1x150x25xbf16>
    %122 = vector.shape_cast %121 : vector<1x1x150x25xbf16> to vector<150x25xbf16>
    %cst_136 = arith.constant dense<0.000000e+00> : vector<16x25xf32>
    %123 = tpu.matmul %0, %122, %cst_136 {dimension_numbers = #tpu.dot_dimension_numbers<[1], [0], [0], [1], [0, 0, 1, 1], [], []>} : vector<16x150xbf16>, vector<150x25xbf16>, vector<16x25xf32> -> vector<16x25xf32>
    %124 = arith.maximumf %114, %117 : vector<16x25xf32>
    %125 = arith.maximumf %120, %123 : vector<16x25xf32>
    %126 = arith.maximumf %124, %125 : vector<16x25xf32>
    %127 = vector.broadcast %1 : vector<16x1xf32> to vector<16x25xf32>
    %128 = arith.addf %126, %127 : vector<16x25xf32>
    %cst_137 = arith.constant 0.000000e+00 : f32
    %129 = vector.broadcast %cst_137 : f32 to vector<16x25xf32>
    %130 = arith.maximumf %128, %129 : vector<16x25xf32>
    %c5_138 = arith.constant 5 : index
    %c0_139 = arith.constant 0 : index
    %c0_140 = arith.constant 0 : index
    %131 = vector.load %arg4[%c5_138, %c0_139, %c0_140] : memref<8x16x25xf32, #tpu.memory_space<vmem>>, vector<1x16x25xf32>
    %132 = vector.shape_cast %131 : vector<1x16x25xf32> to vector<16x25xf32>
    %133 = vector.shape_cast %130 : vector<16x25xf32> to vector<1x16x25xf32>
    tpu.vector_store %arg4[%c5_138, %c0_139, %c0_140], %133 {strides = array<i32>} : memref<8x16x25xf32, #tpu.memory_space<vmem>>, vector<1x16x25xf32>,
    %c6 = arith.constant 6 : index
    %c0_141 = arith.constant 0 : index
    %c0_142 = arith.constant 0 : index
    %c0_143 = arith.constant 0 : index
    %134 = vector.load %arg1[%c6, %c0_141, %c0_142, %c0_143] : memref<8x4x150x25xbf16, #tpu.memory_space<vmem>>, vector<1x1x150x25xbf16>
    %135 = vector.shape_cast %134 : vector<1x1x150x25xbf16> to vector<150x25xbf16>
    %cst_144 = arith.constant dense<0.000000e+00> : vector<16x25xf32>
    %136 = tpu.matmul %0, %135, %cst_144 {dimension_numbers = #tpu.dot_dimension_numbers<[1], [0], [0], [1], [0, 0, 1, 1], [], []>} : vector<16x150xbf16>, vector<150x25xbf16>, vector<16x25xf32> -> vector<16x25xf32>
    %c6_145 = arith.constant 6 : index
    %c1_146 = arith.constant 1 : index
    %c0_147 = arith.constant 0 : index
    %c0_148 = arith.constant 0 : index
    %137 = vector.load %arg1[%c6_145, %c1_146, %c0_147, %c0_148] : memref<8x4x150x25xbf16, #tpu.memory_space<vmem>>, vector<1x1x150x25xbf16>
    %138 = vector.shape_cast %137 : vector<1x1x150x25xbf16> to vector<150x25xbf16>
    %cst_149 = arith.constant dense<0.000000e+00> : vector<16x25xf32>
    %139 = tpu.matmul %0, %138, %cst_149 {dimension_numbers = #tpu.dot_dimension_numbers<[1], [0], [0], [1], [0, 0, 1, 1], [], []>} : vector<16x150xbf16>, vector<150x25xbf16>, vector<16x25xf32> -> vector<16x25xf32>
    %c6_150 = arith.constant 6 : index
    %c2_151 = arith.constant 2 : index
    %c0_152 = arith.constant 0 : index
    %c0_153 = arith.constant 0 : index
    %140 = vector.load %arg1[%c6_150, %c2_151, %c0_152, %c0_153] : memref<8x4x150x25xbf16, #tpu.memory_space<vmem>>, vector<1x1x150x25xbf16>
    %141 = vector.shape_cast %140 : vector<1x1x150x25xbf16> to vector<150x25xbf16>
    %cst_154 = arith.constant dense<0.000000e+00> : vector<16x25xf32>
    %142 = tpu.matmul %0, %141, %cst_154 {dimension_numbers = #tpu.dot_dimension_numbers<[1], [0], [0], [1], [0, 0, 1, 1], [], []>} : vector<16x150xbf16>, vector<150x25xbf16>, vector<16x25xf32> -> vector<16x25xf32>
    %c6_155 = arith.constant 6 : index
    %c3_156 = arith.constant 3 : index
    %c0_157 = arith.constant 0 : index
    %c0_158 = arith.constant 0 : index
    %143 = vector.load %arg1[%c6_155, %c3_156, %c0_157, %c0_158] : memref<8x4x150x25xbf16, #tpu.memory_space<vmem>>, vector<1x1x150x25xbf16>
    %144 = vector.shape_cast %143 : vector<1x1x150x25xbf16> to vector<150x25xbf16>
    %cst_159 = arith.constant dense<0.000000e+00> : vector<16x25xf32>
    %145 = tpu.matmul %0, %144, %cst_159 {dimension_numbers = #tpu.dot_dimension_numbers<[1], [0], [0], [1], [0, 0, 1, 1], [], []>} : vector<16x150xbf16>, vector<150x25xbf16>, vector<16x25xf32> -> vector<16x25xf32>
    %146 = arith.maximumf %136, %139 : vector<16x25xf32>
    %147 = arith.maximumf %142, %145 : vector<16x25xf32>
    %148 = arith.maximumf %146, %147 : vector<16x25xf32>
    %149 = vector.broadcast %1 : vector<16x1xf32> to vector<16x25xf32>
    %150 = arith.addf %148, %149 : vector<16x25xf32>
    %cst_160 = arith.constant 0.000000e+00 : f32
    %151 = vector.broadcast %cst_160 : f32 to vector<16x25xf32>
    %152 = arith.maximumf %150, %151 : vector<16x25xf32>
    %c6_161 = arith.constant 6 : index
    %c0_162 = arith.constant 0 : index
    %c0_163 = arith.constant 0 : index
    %153 = vector.load %arg4[%c6_161, %c0_162, %c0_163] : memref<8x16x25xf32, #tpu.memory_space<vmem>>, vector<1x16x25xf32>
    %154 = vector.shape_cast %153 : vector<1x16x25xf32> to vector<16x25xf32>
    %155 = vector.shape_cast %152 : vector<16x25xf32> to vector<1x16x25xf32>
    tpu.vector_store %arg4[%c6_161, %c0_162, %c0_163], %155 {strides = array<i32>} : memref<8x16x25xf32, #tpu.memory_space<vmem>>, vector<1x16x25xf32>,
    %c7 = arith.constant 7 : index
    %c0_164 = arith.constant 0 : index
    %c0_165 = arith.constant 0 : index
    %c0_166 = arith.constant 0 : index
    %156 = vector.load %arg1[%c7, %c0_164, %c0_165, %c0_166] : memref<8x4x150x25xbf16, #tpu.memory_space<vmem>>, vector<1x1x150x25xbf16>
    %157 = vector.shape_cast %156 : vector<1x1x150x25xbf16> to vector<150x25xbf16>
    %cst_167 = arith.constant dense<0.000000e+00> : vector<16x25xf32>
    %158 = tpu.matmul %0, %157, %cst_167 {dimension_numbers = #tpu.dot_dimension_numbers<[1], [0], [0], [1], [0, 0, 1, 1], [], []>} : vector<16x150xbf16>, vector<150x25xbf16>, vector<16x25xf32> -> vector<16x25xf32>
    %c7_168 = arith.constant 7 : index
    %c1_169 = arith.constant 1 : index
    %c0_170 = arith.constant 0 : index
    %c0_171 = arith.constant 0 : index
    %159 = vector.load %arg1[%c7_168, %c1_169, %c0_170, %c0_171] : memref<8x4x150x25xbf16, #tpu.memory_space<vmem>>, vector<1x1x150x25xbf16>
    %160 = vector.shape_cast %159 : vector<1x1x150x25xbf16> to vector<150x25xbf16>
    %cst_172 = arith.constant dense<0.000000e+00> : vector<16x25xf32>
    %161 = tpu.matmul %0, %160, %cst_172 {dimension_numbers = #tpu.dot_dimension_numbers<[1], [0], [0], [1], [0, 0, 1, 1], [], []>} : vector<16x150xbf16>, vector<150x25xbf16>, vector<16x25xf32> -> vector<16x25xf32>
    %c7_173 = arith.constant 7 : index
    %c2_174 = arith.constant 2 : index
    %c0_175 = arith.constant 0 : index
    %c0_176 = arith.constant 0 : index
    %162 = vector.load %arg1[%c7_173, %c2_174, %c0_175, %c0_176] : memref<8x4x150x25xbf16, #tpu.memory_space<vmem>>, vector<1x1x150x25xbf16>
    %163 = vector.shape_cast %162 : vector<1x1x150x25xbf16> to vector<150x25xbf16>
    %cst_177 = arith.constant dense<0.000000e+00> : vector<16x25xf32>
    %164 = tpu.matmul %0, %163, %cst_177 {dimension_numbers = #tpu.dot_dimension_numbers<[1], [0], [0], [1], [0, 0, 1, 1], [], []>} : vector<16x150xbf16>, vector<150x25xbf16>, vector<16x25xf32> -> vector<16x25xf32>
    %c7_178 = arith.constant 7 : index
    %c3_179 = arith.constant 3 : index
    %c0_180 = arith.constant 0 : index
    %c0_181 = arith.constant 0 : index
    %165 = vector.load %arg1[%c7_178, %c3_179, %c0_180, %c0_181] : memref<8x4x150x25xbf16, #tpu.memory_space<vmem>>, vector<1x1x150x25xbf16>
    %166 = vector.shape_cast %165 : vector<1x1x150x25xbf16> to vector<150x25xbf16>
    %cst_182 = arith.constant dense<0.000000e+00> : vector<16x25xf32>
    %167 = tpu.matmul %0, %166, %cst_182 {dimension_numbers = #tpu.dot_dimension_numbers<[1], [0], [0], [1], [0, 0, 1, 1], [], []>} : vector<16x150xbf16>, vector<150x25xbf16>, vector<16x25xf32> -> vector<16x25xf32>
    %168 = arith.maximumf %158, %161 : vector<16x25xf32>
    %169 = arith.maximumf %164, %167 : vector<16x25xf32>
    %170 = arith.maximumf %168, %169 : vector<16x25xf32>
    %171 = vector.broadcast %1 : vector<16x1xf32> to vector<16x25xf32>
    %172 = arith.addf %170, %171 : vector<16x25xf32>
    %cst_183 = arith.constant 0.000000e+00 : f32
    %173 = vector.broadcast %cst_183 : f32 to vector<16x25xf32>
    %174 = arith.maximumf %172, %173 : vector<16x25xf32>
    %c7_184 = arith.constant 7 : index
    %c0_185 = arith.constant 0 : index
    %c0_186 = arith.constant 0 : index
    %175 = vector.load %arg4[%c7_184, %c0_185, %c0_186] : memref<8x16x25xf32, #tpu.memory_space<vmem>>, vector<1x16x25xf32>
    %176 = vector.shape_cast %175 : vector<1x16x25xf32> to vector<16x25xf32>
    %177 = vector.shape_cast %174 : vector<16x25xf32> to vector<1x16x25xf32>
    tpu.vector_store %arg4[%c7_184, %c0_185, %c0_186], %177 {strides = array<i32>} : memref<8x16x25xf32, #tpu.memory_space<vmem>>, vector<1x16x25xf32>,
    return
  }
  func.func @transform_0(%arg0: i32) -> (i32, i32, i32, i32) {
    %c0_i32 = arith.constant 0 : i32
    %c0_i32_0 = arith.constant 0 : i32
    %c0_i32_1 = arith.constant 0 : i32
    %c0_i32_2 = arith.constant 0 : i32
    return %arg0, %c0_i32, %c0_i32_0, %c0_i32_1 : i32, i32, i32, i32
  }
  func.func @transform_1(%arg0: i32) -> (i32, i32) {
    %c0_i32 = arith.constant 0 : i32
    %c0_i32_0 = arith.constant 0 : i32
    %c0_i32_1 = arith.constant 0 : i32
    return %c0_i32, %c0_i32_0 : i32, i32
  }
  func.func @transform_2(%arg0: i32) -> (i32, i32) {
    %c0_i32 = arith.constant 0 : i32
    %c0_i32_0 = arith.constant 0 : i32
    %c0_i32_1 = arith.constant 0 : i32
    return %c0_i32, %c0_i32_0 : i32, i32
  }
  func.func @transform_3(%arg0: i32) -> (i32, i32, i32) {
    %c0_i32 = arith.constant 0 : i32
    %c0_i32_0 = arith.constant 0 : i32
    %c0_i32_1 = arith.constant 0 : i32
    return %arg0, %c0_i32, %c0_i32_0 : i32, i32, i32
  }
}

module attributes {stable_mosaic.version = 11 : i64} {
  func.func @_head_kernel(%arg0: memref<16x400xbf16, #tpu.memory_space<vmem>>, %arg1: memref<400x120xbf16, #tpu.memory_space<vmem>>, %arg2: memref<1x120xf32, #tpu.memory_space<vmem>>, %arg3: memref<120x32xbf16, #tpu.memory_space<vmem>>, %arg4: memref<1x32xf32, #tpu.memory_space<vmem>>, %arg5: memref<32x128xf32, #tpu.memory_space<vmem>>, %arg6: memref<32x128xf32, #tpu.memory_space<vmem>>, %arg7: memref<1x128xf32, #tpu.memory_space<vmem>>, %arg8: memref<1x32xf32, #tpu.memory_space<vmem>>, %arg9: memref<1x1xf32, #tpu.memory_space<vmem>>, %arg10: memref<2x8xf32, #tpu.memory_space<vmem>>, %arg11: memref<16x128xf32, #tpu.memory_space<vmem>>) attributes {dimension_semantics = [], scalar_prefetch = 0 : i64, scratch_operands = 1 : i64, tpu.core_type = #tpu.core_type<tc>} {
    %c0 = arith.constant 0 : index
    %c0_0 = arith.constant 0 : index
    %0 = vector.load %arg0[%c0, %c0_0] : memref<16x400xbf16, #tpu.memory_space<vmem>>, vector<16x400xbf16>
    %c0_1 = arith.constant 0 : index
    %c0_2 = arith.constant 0 : index
    %1 = vector.load %arg1[%c0_1, %c0_2] : memref<400x120xbf16, #tpu.memory_space<vmem>>, vector<400x120xbf16>
    %cst = arith.constant dense<0.000000e+00> : vector<16x120xf32>
    %2 = tpu.matmul %0, %1, %cst {dimension_numbers = #tpu.dot_dimension_numbers<[1], [0], [0], [1], [0, 0, 1, 1], [], []>} : vector<16x400xbf16>, vector<400x120xbf16>, vector<16x120xf32> -> vector<16x120xf32>
    %c0_3 = arith.constant 0 : index
    %c0_4 = arith.constant 0 : index
    %3 = vector.load %arg2[%c0_3, %c0_4] : memref<1x120xf32, #tpu.memory_space<vmem>>, vector<1x120xf32>
    %4 = vector.broadcast %3 : vector<1x120xf32> to vector<16x120xf32>
    %5 = arith.addf %2, %4 : vector<16x120xf32>
    %cst_5 = arith.constant 0.000000e+00 : f32
    %6 = vector.broadcast %cst_5 : f32 to vector<16x120xf32>
    %7 = arith.maximumf %5, %6 : vector<16x120xf32>
    %8 = arith.truncf %7 : vector<16x120xf32> to vector<16x120xbf16>
    %c0_6 = arith.constant 0 : index
    %c0_7 = arith.constant 0 : index
    %9 = vector.load %arg3[%c0_6, %c0_7] : memref<120x32xbf16, #tpu.memory_space<vmem>>, vector<120x32xbf16>
    %cst_8 = arith.constant dense<0.000000e+00> : vector<16x32xf32>
    %10 = tpu.matmul %8, %9, %cst_8 {dimension_numbers = #tpu.dot_dimension_numbers<[1], [0], [0], [1], [0, 0, 1, 1], [], []>} : vector<16x120xbf16>, vector<120x32xbf16>, vector<16x32xf32> -> vector<16x32xf32>
    %c0_9 = arith.constant 0 : index
    %c0_10 = arith.constant 0 : index
    %11 = vector.load %arg4[%c0_9, %c0_10] : memref<1x32xf32, #tpu.memory_space<vmem>>, vector<1x32xf32>
    %12 = vector.broadcast %11 : vector<1x32xf32> to vector<16x32xf32>
    %13 = arith.addf %10, %12 : vector<16x32xf32>
    %cst_11 = arith.constant 0.000000e+00 : f32
    %14 = vector.broadcast %cst_11 : f32 to vector<16x32xf32>
    %15 = arith.maximumf %13, %14 : vector<16x32xf32>
    %c0_12 = arith.constant 0 : index
    %c0_13 = arith.constant 0 : index
    %16 = vector.load %arg5[%c0_12, %c0_13] : memref<32x128xf32, #tpu.memory_space<vmem>>, vector<32x128xf32>
    %cst_14 = arith.constant dense<0.000000e+00> : vector<16x128xf32>
    %17 = tpu.matmul %15, %16, %cst_14 {dimension_numbers = #tpu.dot_dimension_numbers<[1], [0], [0], [1], [0, 0, 1, 1], [], []>} : vector<16x32xf32>, vector<32x128xf32>, vector<16x128xf32> -> vector<16x128xf32>
    %c0_15 = arith.constant 0 : index
    %c0_16 = arith.constant 0 : index
    %18 = vector.load %arg7[%c0_15, %c0_16] : memref<1x128xf32, #tpu.memory_space<vmem>>, vector<1x128xf32>
    %19 = vector.broadcast %18 : vector<1x128xf32> to vector<16x128xf32>
    %20 = arith.addf %17, %19 : vector<16x128xf32>
    %c0_17 = arith.constant 0 : index
    %c0_18 = arith.constant 0 : index
    %21 = vector.load %arg11[%c0_17, %c0_18] : memref<16x128xf32, #tpu.memory_space<vmem>>, vector<16x128xf32>
    tpu.vector_store %arg11[%c0_17, %c0_18], %20 {strides = array<i32>} : memref<16x128xf32, #tpu.memory_space<vmem>>, vector<16x128xf32>,
    %c0_19 = arith.constant 0 : index
    %c0_20 = arith.constant 0 : index
    %22 = vector.load %arg6[%c0_19, %c0_20] : memref<32x128xf32, #tpu.memory_space<vmem>>, vector<32x128xf32>
    %c0_21 = arith.constant 0 : index
    %c0_22 = arith.constant 0 : index
    %23 = vector.load %arg8[%c0_21, %c0_22] : memref<1x32xf32, #tpu.memory_space<vmem>>, vector<1x32xf32>
    %c0_23 = arith.constant 0 : index
    %c0_24 = arith.constant 0 : index
    %24 = vector.load %arg9[%c0_23, %c0_24] : memref<1x1xf32, #tpu.memory_space<vmem>>, vector<1x1xf32>
    %25 = tpu.iota {dimensions = array<i32: 1>} : vector<2x128xi32>
    %c64_i32 = arith.constant 64 : i32
    %26 = vector.broadcast %c64_i32 : i32 to vector<2x128xi32>
    %27 = arith.cmpi sge, %25, %26 : vector<2x128xi32>
    %c96_i32 = arith.constant 96 : i32
    %28 = vector.broadcast %c96_i32 : i32 to vector<2x128xi32>
    %29 = arith.cmpi slt, %25, %28 : vector<2x128xi32>
    %30 = arith.andi %27, %29 : vector<2x128xi1>
    %31 = tpu.iota {dimensions = array<i32: 1>} : vector<2x8xi32>
    %cst_25 = arith.constant 0.000000e+00 : f32
    %32 = vector.broadcast %cst_25 : f32 to vector<2x32xf32>
    %cst_26 = arith.constant 0.000000e+00 : f32
    %33 = vector.broadcast %cst_26 : f32 to vector<2x32xf32>
    %cst_27 = arith.constant 0.000000e+00 : f32
    %34 = vector.broadcast %cst_27 : f32 to vector<2x8xf32>
    %c0_28 = arith.constant 0 : index
    %c0_29 = arith.constant 0 : index
    %35 = vector.load %arg11[%c0_28, %c0_29] : memref<16x128xf32, #tpu.memory_space<vmem>>, vector<2x128xf32>
    %cst_30 = arith.constant dense<0.000000e+00> : vector<2x128xf32>
    %36 = tpu.matmul %32, %22, %cst_30 {dimension_numbers = #tpu.dot_dimension_numbers<[1], [0], [0], [1], [0, 0, 1, 1], [], []>} : vector<2x32xf32>, vector<32x128xf32>, vector<2x128xf32> -> vector<2x128xf32>
    %37 = arith.addf %35, %36 : vector<2x128xf32>
    %38 = math.tanh %37 : vector<2x128xf32>
    %39 = arith.negf %37 : vector<2x128xf32>
    %40 = math.exp %39 : vector<2x128xf32>
    %cst_31 = arith.constant 1.000000e+00 : f32
    %41 = vector.broadcast %cst_31 : f32 to vector<2x128xf32>
    %42 = arith.addf %41, %40 : vector<2x128xf32>
    %43 = arith.divf %41, %42 : vector<2x128xf32>
    %44 = arith.select %30, %38, %43 : vector<2x128xi1>, vector<2x128xf32>
    %45 = vector.extract_strided_slice %44 {offsets = [0, 0], sizes = [2, 32], strides = [1, 1]} : vector<2x128xf32> to vector<2x32xf32>
    %46 = vector.extract_strided_slice %44 {offsets = [0, 32], sizes = [2, 32], strides = [1, 1]} : vector<2x128xf32> to vector<2x32xf32>
    %47 = vector.extract_strided_slice %44 {offsets = [0, 64], sizes = [2, 32], strides = [1, 1]} : vector<2x128xf32> to vector<2x32xf32>
    %48 = vector.extract_strided_slice %44 {offsets = [0, 96], sizes = [2, 32], strides = [1, 1]} : vector<2x128xf32> to vector<2x32xf32>
    %49 = arith.mulf %46, %33 : vector<2x32xf32>
    %50 = arith.mulf %45, %47 : vector<2x32xf32>
    %51 = arith.addf %49, %50 : vector<2x32xf32>
    %52 = math.tanh %51 : vector<2x32xf32>
    %53 = arith.mulf %48, %52 : vector<2x32xf32>
    %54 = vector.broadcast %23 : vector<1x32xf32> to vector<2x32xf32>
    %55 = arith.mulf %53, %54 : vector<2x32xf32>
    %cst_32 = arith.constant dense<0.000000e+00> : vector<2xf32>
    %56 = vector.multi_reduction <add>, %55, %cst_32 [1] : vector<2x32xf32> to vector<2xf32>
    %57 = vector.shape_cast %56 : vector<2xf32> to vector<2x1xf32>
    %58 = vector.broadcast %24 : vector<1x1xf32> to vector<2x1xf32>
    %59 = arith.addf %57, %58 : vector<2x1xf32>
    %60 = arith.negf %59 : vector<2x1xf32>
    %61 = math.exp %60 : vector<2x1xf32>
    %cst_33 = arith.constant 1.000000e+00 : f32
    %62 = vector.broadcast %cst_33 : f32 to vector<2x1xf32>
    %63 = arith.addf %62, %61 : vector<2x1xf32>
    %64 = arith.divf %62, %63 : vector<2x1xf32>
    %c0_i32 = arith.constant 0 : i32
    %65 = vector.broadcast %c0_i32 : i32 to vector<2x8xi32>
    %66 = arith.cmpi eq, %31, %65 : vector<2x8xi32>
    %67 = vector.shape_cast %64 : vector<2x1xf32> to vector<2x1xf32>
    %68 = vector.broadcast %67 : vector<2x1xf32> to vector<2x8xf32>
    %69 = arith.select %66, %68, %34 : vector<2x8xi1>, vector<2x8xf32>
    %c2 = arith.constant 2 : index
    %c0_34 = arith.constant 0 : index
    %70 = vector.load %arg11[%c2, %c0_34] : memref<16x128xf32, #tpu.memory_space<vmem>>, vector<2x128xf32>
    %cst_35 = arith.constant dense<0.000000e+00> : vector<2x128xf32>
    %71 = tpu.matmul %53, %22, %cst_35 {dimension_numbers = #tpu.dot_dimension_numbers<[1], [0], [0], [1], [0, 0, 1, 1], [], []>} : vector<2x32xf32>, vector<32x128xf32>, vector<2x128xf32> -> vector<2x128xf32>
    %72 = arith.addf %70, %71 : vector<2x128xf32>
    %73 = math.tanh %72 : vector<2x128xf32>
    %74 = arith.negf %72 : vector<2x128xf32>
    %75 = math.exp %74 : vector<2x128xf32>
    %cst_36 = arith.constant 1.000000e+00 : f32
    %76 = vector.broadcast %cst_36 : f32 to vector<2x128xf32>
    %77 = arith.addf %76, %75 : vector<2x128xf32>
    %78 = arith.divf %76, %77 : vector<2x128xf32>
    %79 = arith.select %30, %73, %78 : vector<2x128xi1>, vector<2x128xf32>
    %80 = vector.extract_strided_slice %79 {offsets = [0, 0], sizes = [2, 32], strides = [1, 1]} : vector<2x128xf32> to vector<2x32xf32>
    %81 = vector.extract_strided_slice %79 {offsets = [0, 32], sizes = [2, 32], strides = [1, 1]} : vector<2x128xf32> to vector<2x32xf32>
    %82 = vector.extract_strided_slice %79 {offsets = [0, 64], sizes = [2, 32], strides = [1, 1]} : vector<2x128xf32> to vector<2x32xf32>
    %83 = vector.extract_strided_slice %79 {offsets = [0, 96], sizes = [2, 32], strides = [1, 1]} : vector<2x128xf32> to vector<2x32xf32>
    %84 = arith.mulf %81, %51 : vector<2x32xf32>
    %85 = arith.mulf %80, %82 : vector<2x32xf32>
    %86 = arith.addf %84, %85 : vector<2x32xf32>
    %87 = math.tanh %86 : vector<2x32xf32>
    %88 = arith.mulf %83, %87 : vector<2x32xf32>
    %89 = vector.broadcast %23 : vector<1x32xf32> to vector<2x32xf32>
    %90 = arith.mulf %88, %89 : vector<2x32xf32>
    %cst_37 = arith.constant dense<0.000000e+00> : vector<2xf32>
    %91 = vector.multi_reduction <add>, %90, %cst_37 [1] : vector<2x32xf32> to vector<2xf32>
    %92 = vector.shape_cast %91 : vector<2xf32> to vector<2x1xf32>
    %93 = vector.broadcast %24 : vector<1x1xf32> to vector<2x1xf32>
    %94 = arith.addf %92, %93 : vector<2x1xf32>
    %95 = arith.negf %94 : vector<2x1xf32>
    %96 = math.exp %95 : vector<2x1xf32>
    %cst_38 = arith.constant 1.000000e+00 : f32
    %97 = vector.broadcast %cst_38 : f32 to vector<2x1xf32>
    %98 = arith.addf %97, %96 : vector<2x1xf32>
    %99 = arith.divf %97, %98 : vector<2x1xf32>
    %c1_i32 = arith.constant 1 : i32
    %100 = vector.broadcast %c1_i32 : i32 to vector<2x8xi32>
    %101 = arith.cmpi eq, %31, %100 : vector<2x8xi32>
    %102 = vector.shape_cast %99 : vector<2x1xf32> to vector<2x1xf32>
    %103 = vector.broadcast %102 : vector<2x1xf32> to vector<2x8xf32>
    %104 = arith.select %101, %103, %69 : vector<2x8xi1>, vector<2x8xf32>
    %c4 = arith.constant 4 : index
    %c0_39 = arith.constant 0 : index
    %105 = vector.load %arg11[%c4, %c0_39] : memref<16x128xf32, #tpu.memory_space<vmem>>, vector<2x128xf32>
    %cst_40 = arith.constant dense<0.000000e+00> : vector<2x128xf32>
    %106 = tpu.matmul %88, %22, %cst_40 {dimension_numbers = #tpu.dot_dimension_numbers<[1], [0], [0], [1], [0, 0, 1, 1], [], []>} : vector<2x32xf32>, vector<32x128xf32>, vector<2x128xf32> -> vector<2x128xf32>
    %107 = arith.addf %105, %106 : vector<2x128xf32>
    %108 = math.tanh %107 : vector<2x128xf32>
    %109 = arith.negf %107 : vector<2x128xf32>
    %110 = math.exp %109 : vector<2x128xf32>
    %cst_41 = arith.constant 1.000000e+00 : f32
    %111 = vector.broadcast %cst_41 : f32 to vector<2x128xf32>
    %112 = arith.addf %111, %110 : vector<2x128xf32>
    %113 = arith.divf %111, %112 : vector<2x128xf32>
    %114 = arith.select %30, %108, %113 : vector<2x128xi1>, vector<2x128xf32>
    %115 = vector.extract_strided_slice %114 {offsets = [0, 0], sizes = [2, 32], strides = [1, 1]} : vector<2x128xf32> to vector<2x32xf32>
    %116 = vector.extract_strided_slice %114 {offsets = [0, 32], sizes = [2, 32], strides = [1, 1]} : vector<2x128xf32> to vector<2x32xf32>
    %117 = vector.extract_strided_slice %114 {offsets = [0, 64], sizes = [2, 32], strides = [1, 1]} : vector<2x128xf32> to vector<2x32xf32>
    %118 = vector.extract_strided_slice %114 {offsets = [0, 96], sizes = [2, 32], strides = [1, 1]} : vector<2x128xf32> to vector<2x32xf32>
    %119 = arith.mulf %116, %86 : vector<2x32xf32>
    %120 = arith.mulf %115, %117 : vector<2x32xf32>
    %121 = arith.addf %119, %120 : vector<2x32xf32>
    %122 = math.tanh %121 : vector<2x32xf32>
    %123 = arith.mulf %118, %122 : vector<2x32xf32>
    %124 = vector.broadcast %23 : vector<1x32xf32> to vector<2x32xf32>
    %125 = arith.mulf %123, %124 : vector<2x32xf32>
    %cst_42 = arith.constant dense<0.000000e+00> : vector<2xf32>
    %126 = vector.multi_reduction <add>, %125, %cst_42 [1] : vector<2x32xf32> to vector<2xf32>
    %127 = vector.shape_cast %126 : vector<2xf32> to vector<2x1xf32>
    %128 = vector.broadcast %24 : vector<1x1xf32> to vector<2x1xf32>
    %129 = arith.addf %127, %128 : vector<2x1xf32>
    %130 = arith.negf %129 : vector<2x1xf32>
    %131 = math.exp %130 : vector<2x1xf32>
    %cst_43 = arith.constant 1.000000e+00 : f32
    %132 = vector.broadcast %cst_43 : f32 to vector<2x1xf32>
    %133 = arith.addf %132, %131 : vector<2x1xf32>
    %134 = arith.divf %132, %133 : vector<2x1xf32>
    %c2_i32 = arith.constant 2 : i32
    %135 = vector.broadcast %c2_i32 : i32 to vector<2x8xi32>
    %136 = arith.cmpi eq, %31, %135 : vector<2x8xi32>
    %137 = vector.shape_cast %134 : vector<2x1xf32> to vector<2x1xf32>
    %138 = vector.broadcast %137 : vector<2x1xf32> to vector<2x8xf32>
    %139 = arith.select %136, %138, %104 : vector<2x8xi1>, vector<2x8xf32>
    %c6 = arith.constant 6 : index
    %c0_44 = arith.constant 0 : index
    %140 = vector.load %arg11[%c6, %c0_44] : memref<16x128xf32, #tpu.memory_space<vmem>>, vector<2x128xf32>
    %cst_45 = arith.constant dense<0.000000e+00> : vector<2x128xf32>
    %141 = tpu.matmul %123, %22, %cst_45 {dimension_numbers = #tpu.dot_dimension_numbers<[1], [0], [0], [1], [0, 0, 1, 1], [], []>} : vector<2x32xf32>, vector<32x128xf32>, vector<2x128xf32> -> vector<2x128xf32>
    %142 = arith.addf %140, %141 : vector<2x128xf32>
    %143 = math.tanh %142 : vector<2x128xf32>
    %144 = arith.negf %142 : vector<2x128xf32>
    %145 = math.exp %144 : vector<2x128xf32>
    %cst_46 = arith.constant 1.000000e+00 : f32
    %146 = vector.broadcast %cst_46 : f32 to vector<2x128xf32>
    %147 = arith.addf %146, %145 : vector<2x128xf32>
    %148 = arith.divf %146, %147 : vector<2x128xf32>
    %149 = arith.select %30, %143, %148 : vector<2x128xi1>, vector<2x128xf32>
    %150 = vector.extract_strided_slice %149 {offsets = [0, 0], sizes = [2, 32], strides = [1, 1]} : vector<2x128xf32> to vector<2x32xf32>
    %151 = vector.extract_strided_slice %149 {offsets = [0, 32], sizes = [2, 32], strides = [1, 1]} : vector<2x128xf32> to vector<2x32xf32>
    %152 = vector.extract_strided_slice %149 {offsets = [0, 64], sizes = [2, 32], strides = [1, 1]} : vector<2x128xf32> to vector<2x32xf32>
    %153 = vector.extract_strided_slice %149 {offsets = [0, 96], sizes = [2, 32], strides = [1, 1]} : vector<2x128xf32> to vector<2x32xf32>
    %154 = arith.mulf %151, %121 : vector<2x32xf32>
    %155 = arith.mulf %150, %152 : vector<2x32xf32>
    %156 = arith.addf %154, %155 : vector<2x32xf32>
    %157 = math.tanh %156 : vector<2x32xf32>
    %158 = arith.mulf %153, %157 : vector<2x32xf32>
    %159 = vector.broadcast %23 : vector<1x32xf32> to vector<2x32xf32>
    %160 = arith.mulf %158, %159 : vector<2x32xf32>
    %cst_47 = arith.constant dense<0.000000e+00> : vector<2xf32>
    %161 = vector.multi_reduction <add>, %160, %cst_47 [1] : vector<2x32xf32> to vector<2xf32>
    %162 = vector.shape_cast %161 : vector<2xf32> to vector<2x1xf32>
    %163 = vector.broadcast %24 : vector<1x1xf32> to vector<2x1xf32>
    %164 = arith.addf %162, %163 : vector<2x1xf32>
    %165 = arith.negf %164 : vector<2x1xf32>
    %166 = math.exp %165 : vector<2x1xf32>
    %cst_48 = arith.constant 1.000000e+00 : f32
    %167 = vector.broadcast %cst_48 : f32 to vector<2x1xf32>
    %168 = arith.addf %167, %166 : vector<2x1xf32>
    %169 = arith.divf %167, %168 : vector<2x1xf32>
    %c3_i32 = arith.constant 3 : i32
    %170 = vector.broadcast %c3_i32 : i32 to vector<2x8xi32>
    %171 = arith.cmpi eq, %31, %170 : vector<2x8xi32>
    %172 = vector.shape_cast %169 : vector<2x1xf32> to vector<2x1xf32>
    %173 = vector.broadcast %172 : vector<2x1xf32> to vector<2x8xf32>
    %174 = arith.select %171, %173, %139 : vector<2x8xi1>, vector<2x8xf32>
    %c8 = arith.constant 8 : index
    %c0_49 = arith.constant 0 : index
    %175 = vector.load %arg11[%c8, %c0_49] : memref<16x128xf32, #tpu.memory_space<vmem>>, vector<2x128xf32>
    %cst_50 = arith.constant dense<0.000000e+00> : vector<2x128xf32>
    %176 = tpu.matmul %158, %22, %cst_50 {dimension_numbers = #tpu.dot_dimension_numbers<[1], [0], [0], [1], [0, 0, 1, 1], [], []>} : vector<2x32xf32>, vector<32x128xf32>, vector<2x128xf32> -> vector<2x128xf32>
    %177 = arith.addf %175, %176 : vector<2x128xf32>
    %178 = math.tanh %177 : vector<2x128xf32>
    %179 = arith.negf %177 : vector<2x128xf32>
    %180 = math.exp %179 : vector<2x128xf32>
    %cst_51 = arith.constant 1.000000e+00 : f32
    %181 = vector.broadcast %cst_51 : f32 to vector<2x128xf32>
    %182 = arith.addf %181, %180 : vector<2x128xf32>
    %183 = arith.divf %181, %182 : vector<2x128xf32>
    %184 = arith.select %30, %178, %183 : vector<2x128xi1>, vector<2x128xf32>
    %185 = vector.extract_strided_slice %184 {offsets = [0, 0], sizes = [2, 32], strides = [1, 1]} : vector<2x128xf32> to vector<2x32xf32>
    %186 = vector.extract_strided_slice %184 {offsets = [0, 32], sizes = [2, 32], strides = [1, 1]} : vector<2x128xf32> to vector<2x32xf32>
    %187 = vector.extract_strided_slice %184 {offsets = [0, 64], sizes = [2, 32], strides = [1, 1]} : vector<2x128xf32> to vector<2x32xf32>
    %188 = vector.extract_strided_slice %184 {offsets = [0, 96], sizes = [2, 32], strides = [1, 1]} : vector<2x128xf32> to vector<2x32xf32>
    %189 = arith.mulf %186, %156 : vector<2x32xf32>
    %190 = arith.mulf %185, %187 : vector<2x32xf32>
    %191 = arith.addf %189, %190 : vector<2x32xf32>
    %192 = math.tanh %191 : vector<2x32xf32>
    %193 = arith.mulf %188, %192 : vector<2x32xf32>
    %194 = vector.broadcast %23 : vector<1x32xf32> to vector<2x32xf32>
    %195 = arith.mulf %193, %194 : vector<2x32xf32>
    %cst_52 = arith.constant dense<0.000000e+00> : vector<2xf32>
    %196 = vector.multi_reduction <add>, %195, %cst_52 [1] : vector<2x32xf32> to vector<2xf32>
    %197 = vector.shape_cast %196 : vector<2xf32> to vector<2x1xf32>
    %198 = vector.broadcast %24 : vector<1x1xf32> to vector<2x1xf32>
    %199 = arith.addf %197, %198 : vector<2x1xf32>
    %200 = arith.negf %199 : vector<2x1xf32>
    %201 = math.exp %200 : vector<2x1xf32>
    %cst_53 = arith.constant 1.000000e+00 : f32
    %202 = vector.broadcast %cst_53 : f32 to vector<2x1xf32>
    %203 = arith.addf %202, %201 : vector<2x1xf32>
    %204 = arith.divf %202, %203 : vector<2x1xf32>
    %c4_i32 = arith.constant 4 : i32
    %205 = vector.broadcast %c4_i32 : i32 to vector<2x8xi32>
    %206 = arith.cmpi eq, %31, %205 : vector<2x8xi32>
    %207 = vector.shape_cast %204 : vector<2x1xf32> to vector<2x1xf32>
    %208 = vector.broadcast %207 : vector<2x1xf32> to vector<2x8xf32>
    %209 = arith.select %206, %208, %174 : vector<2x8xi1>, vector<2x8xf32>
    %c10 = arith.constant 10 : index
    %c0_54 = arith.constant 0 : index
    %210 = vector.load %arg11[%c10, %c0_54] : memref<16x128xf32, #tpu.memory_space<vmem>>, vector<2x128xf32>
    %cst_55 = arith.constant dense<0.000000e+00> : vector<2x128xf32>
    %211 = tpu.matmul %193, %22, %cst_55 {dimension_numbers = #tpu.dot_dimension_numbers<[1], [0], [0], [1], [0, 0, 1, 1], [], []>} : vector<2x32xf32>, vector<32x128xf32>, vector<2x128xf32> -> vector<2x128xf32>
    %212 = arith.addf %210, %211 : vector<2x128xf32>
    %213 = math.tanh %212 : vector<2x128xf32>
    %214 = arith.negf %212 : vector<2x128xf32>
    %215 = math.exp %214 : vector<2x128xf32>
    %cst_56 = arith.constant 1.000000e+00 : f32
    %216 = vector.broadcast %cst_56 : f32 to vector<2x128xf32>
    %217 = arith.addf %216, %215 : vector<2x128xf32>
    %218 = arith.divf %216, %217 : vector<2x128xf32>
    %219 = arith.select %30, %213, %218 : vector<2x128xi1>, vector<2x128xf32>
    %220 = vector.extract_strided_slice %219 {offsets = [0, 0], sizes = [2, 32], strides = [1, 1]} : vector<2x128xf32> to vector<2x32xf32>
    %221 = vector.extract_strided_slice %219 {offsets = [0, 32], sizes = [2, 32], strides = [1, 1]} : vector<2x128xf32> to vector<2x32xf32>
    %222 = vector.extract_strided_slice %219 {offsets = [0, 64], sizes = [2, 32], strides = [1, 1]} : vector<2x128xf32> to vector<2x32xf32>
    %223 = vector.extract_strided_slice %219 {offsets = [0, 96], sizes = [2, 32], strides = [1, 1]} : vector<2x128xf32> to vector<2x32xf32>
    %224 = arith.mulf %221, %191 : vector<2x32xf32>
    %225 = arith.mulf %220, %222 : vector<2x32xf32>
    %226 = arith.addf %224, %225 : vector<2x32xf32>
    %227 = math.tanh %226 : vector<2x32xf32>
    %228 = arith.mulf %223, %227 : vector<2x32xf32>
    %229 = vector.broadcast %23 : vector<1x32xf32> to vector<2x32xf32>
    %230 = arith.mulf %228, %229 : vector<2x32xf32>
    %cst_57 = arith.constant dense<0.000000e+00> : vector<2xf32>
    %231 = vector.multi_reduction <add>, %230, %cst_57 [1] : vector<2x32xf32> to vector<2xf32>
    %232 = vector.shape_cast %231 : vector<2xf32> to vector<2x1xf32>
    %233 = vector.broadcast %24 : vector<1x1xf32> to vector<2x1xf32>
    %234 = arith.addf %232, %233 : vector<2x1xf32>
    %235 = arith.negf %234 : vector<2x1xf32>
    %236 = math.exp %235 : vector<2x1xf32>
    %cst_58 = arith.constant 1.000000e+00 : f32
    %237 = vector.broadcast %cst_58 : f32 to vector<2x1xf32>
    %238 = arith.addf %237, %236 : vector<2x1xf32>
    %239 = arith.divf %237, %238 : vector<2x1xf32>
    %c5_i32 = arith.constant 5 : i32
    %240 = vector.broadcast %c5_i32 : i32 to vector<2x8xi32>
    %241 = arith.cmpi eq, %31, %240 : vector<2x8xi32>
    %242 = vector.shape_cast %239 : vector<2x1xf32> to vector<2x1xf32>
    %243 = vector.broadcast %242 : vector<2x1xf32> to vector<2x8xf32>
    %244 = arith.select %241, %243, %209 : vector<2x8xi1>, vector<2x8xf32>
    %c12 = arith.constant 12 : index
    %c0_59 = arith.constant 0 : index
    %245 = vector.load %arg11[%c12, %c0_59] : memref<16x128xf32, #tpu.memory_space<vmem>>, vector<2x128xf32>
    %cst_60 = arith.constant dense<0.000000e+00> : vector<2x128xf32>
    %246 = tpu.matmul %228, %22, %cst_60 {dimension_numbers = #tpu.dot_dimension_numbers<[1], [0], [0], [1], [0, 0, 1, 1], [], []>} : vector<2x32xf32>, vector<32x128xf32>, vector<2x128xf32> -> vector<2x128xf32>
    %247 = arith.addf %245, %246 : vector<2x128xf32>
    %248 = math.tanh %247 : vector<2x128xf32>
    %249 = arith.negf %247 : vector<2x128xf32>
    %250 = math.exp %249 : vector<2x128xf32>
    %cst_61 = arith.constant 1.000000e+00 : f32
    %251 = vector.broadcast %cst_61 : f32 to vector<2x128xf32>
    %252 = arith.addf %251, %250 : vector<2x128xf32>
    %253 = arith.divf %251, %252 : vector<2x128xf32>
    %254 = arith.select %30, %248, %253 : vector<2x128xi1>, vector<2x128xf32>
    %255 = vector.extract_strided_slice %254 {offsets = [0, 0], sizes = [2, 32], strides = [1, 1]} : vector<2x128xf32> to vector<2x32xf32>
    %256 = vector.extract_strided_slice %254 {offsets = [0, 32], sizes = [2, 32], strides = [1, 1]} : vector<2x128xf32> to vector<2x32xf32>
    %257 = vector.extract_strided_slice %254 {offsets = [0, 64], sizes = [2, 32], strides = [1, 1]} : vector<2x128xf32> to vector<2x32xf32>
    %258 = vector.extract_strided_slice %254 {offsets = [0, 96], sizes = [2, 32], strides = [1, 1]} : vector<2x128xf32> to vector<2x32xf32>
    %259 = arith.mulf %256, %226 : vector<2x32xf32>
    %260 = arith.mulf %255, %257 : vector<2x32xf32>
    %261 = arith.addf %259, %260 : vector<2x32xf32>
    %262 = math.tanh %261 : vector<2x32xf32>
    %263 = arith.mulf %258, %262 : vector<2x32xf32>
    %264 = vector.broadcast %23 : vector<1x32xf32> to vector<2x32xf32>
    %265 = arith.mulf %263, %264 : vector<2x32xf32>
    %cst_62 = arith.constant dense<0.000000e+00> : vector<2xf32>
    %266 = vector.multi_reduction <add>, %265, %cst_62 [1] : vector<2x32xf32> to vector<2xf32>
    %267 = vector.shape_cast %266 : vector<2xf32> to vector<2x1xf32>
    %268 = vector.broadcast %24 : vector<1x1xf32> to vector<2x1xf32>
    %269 = arith.addf %267, %268 : vector<2x1xf32>
    %270 = arith.negf %269 : vector<2x1xf32>
    %271 = math.exp %270 : vector<2x1xf32>
    %cst_63 = arith.constant 1.000000e+00 : f32
    %272 = vector.broadcast %cst_63 : f32 to vector<2x1xf32>
    %273 = arith.addf %272, %271 : vector<2x1xf32>
    %274 = arith.divf %272, %273 : vector<2x1xf32>
    %c6_i32 = arith.constant 6 : i32
    %275 = vector.broadcast %c6_i32 : i32 to vector<2x8xi32>
    %276 = arith.cmpi eq, %31, %275 : vector<2x8xi32>
    %277 = vector.shape_cast %274 : vector<2x1xf32> to vector<2x1xf32>
    %278 = vector.broadcast %277 : vector<2x1xf32> to vector<2x8xf32>
    %279 = arith.select %276, %278, %244 : vector<2x8xi1>, vector<2x8xf32>
    %c14 = arith.constant 14 : index
    %c0_64 = arith.constant 0 : index
    %280 = vector.load %arg11[%c14, %c0_64] : memref<16x128xf32, #tpu.memory_space<vmem>>, vector<2x128xf32>
    %cst_65 = arith.constant dense<0.000000e+00> : vector<2x128xf32>
    %281 = tpu.matmul %263, %22, %cst_65 {dimension_numbers = #tpu.dot_dimension_numbers<[1], [0], [0], [1], [0, 0, 1, 1], [], []>} : vector<2x32xf32>, vector<32x128xf32>, vector<2x128xf32> -> vector<2x128xf32>
    %282 = arith.addf %280, %281 : vector<2x128xf32>
    %283 = math.tanh %282 : vector<2x128xf32>
    %284 = arith.negf %282 : vector<2x128xf32>
    %285 = math.exp %284 : vector<2x128xf32>
    %cst_66 = arith.constant 1.000000e+00 : f32
    %286 = vector.broadcast %cst_66 : f32 to vector<2x128xf32>
    %287 = arith.addf %286, %285 : vector<2x128xf32>
    %288 = arith.divf %286, %287 : vector<2x128xf32>
    %289 = arith.select %30, %283, %288 : vector<2x128xi1>, vector<2x128xf32>
    %290 = vector.extract_strided_slice %289 {offsets = [0, 0], sizes = [2, 32], strides = [1, 1]} : vector<2x128xf32> to vector<2x32xf32>
    %291 = vector.extract_strided_slice %289 {offsets = [0, 32], sizes = [2, 32], strides = [1, 1]} : vector<2x128xf32> to vector<2x32xf32>
    %292 = vector.extract_strided_slice %289 {offsets = [0, 64], sizes = [2, 32], strides = [1, 1]} : vector<2x128xf32> to vector<2x32xf32>
    %293 = vector.extract_strided_slice %289 {offsets = [0, 96], sizes = [2, 32], strides = [1, 1]} : vector<2x128xf32> to vector<2x32xf32>
    %294 = arith.mulf %291, %261 : vector<2x32xf32>
    %295 = arith.mulf %290, %292 : vector<2x32xf32>
    %296 = arith.addf %294, %295 : vector<2x32xf32>
    %297 = math.tanh %296 : vector<2x32xf32>
    %298 = arith.mulf %293, %297 : vector<2x32xf32>
    %299 = vector.broadcast %23 : vector<1x32xf32> to vector<2x32xf32>
    %300 = arith.mulf %298, %299 : vector<2x32xf32>
    %cst_67 = arith.constant dense<0.000000e+00> : vector<2xf32>
    %301 = vector.multi_reduction <add>, %300, %cst_67 [1] : vector<2x32xf32> to vector<2xf32>
    %302 = vector.shape_cast %301 : vector<2xf32> to vector<2x1xf32>
    %303 = vector.broadcast %24 : vector<1x1xf32> to vector<2x1xf32>
    %304 = arith.addf %302, %303 : vector<2x1xf32>
    %305 = arith.negf %304 : vector<2x1xf32>
    %306 = math.exp %305 : vector<2x1xf32>
    %cst_68 = arith.constant 1.000000e+00 : f32
    %307 = vector.broadcast %cst_68 : f32 to vector<2x1xf32>
    %308 = arith.addf %307, %306 : vector<2x1xf32>
    %309 = arith.divf %307, %308 : vector<2x1xf32>
    %c7_i32 = arith.constant 7 : i32
    %310 = vector.broadcast %c7_i32 : i32 to vector<2x8xi32>
    %311 = arith.cmpi eq, %31, %310 : vector<2x8xi32>
    %312 = vector.shape_cast %309 : vector<2x1xf32> to vector<2x1xf32>
    %313 = vector.broadcast %312 : vector<2x1xf32> to vector<2x8xf32>
    %314 = arith.select %311, %313, %279 : vector<2x8xi1>, vector<2x8xf32>
    %c0_69 = arith.constant 0 : index
    %c0_70 = arith.constant 0 : index
    %315 = vector.load %arg10[%c0_69, %c0_70] : memref<2x8xf32, #tpu.memory_space<vmem>>, vector<2x8xf32>
    tpu.vector_store %arg10[%c0_69, %c0_70], %314 {strides = array<i32>} : memref<2x8xf32, #tpu.memory_space<vmem>>, vector<2x8xf32>,
    return
  }
}

</mosaic_0001>

<bundles_post_ra>
// kernel: toynet_forward.3
= control target key start
LH: loop header
LB: loop body
LE: loop exit
PB: predicated region body
PF: predicated region fallthrough
CT: control target
= control target key end

     0   :  { %s4961_s12 = smov 0   ;;  %s5561_s0 = inlined_call_operand.vmem [shape: bf16[16,4,75,196], index: 0, kind: input, shape index: {}]   ;;  %s5562_s1 = inlined_call_operand.vmem [shape: bf16[6,75], index: 1, kind: input, shape index: {}]   ;;  %s5563_s2 = inlined_call_operand.vmem [shape: f32[6,1], index: 2, kind: input, shape index: {}]   ;;  %s5564_s3 = inlined_call_operand.vmem [shape: f32[16,6,196], index: 3, kind: output, shape index: {}]  }
   0x1 LB: > { %s3748_s13 = sadd.s32 4294967295, %s4937_s12   ;;  %p3752_p0 = scmp.ge.s32.totalorder %s4937_s12, 1  ;;  %s4937_s12 = sphi %s4961_s12, %s13_s12  }
   0x2   : > { %p139_p1 = scmp.lt.s32.totalorder %s4937_s12, 3 }
   0x4   : > { %p140_p2 = pnand %p3752_p0, %p139_p1 }
   0x5   : > { %s3753_s14 = sshll.u32 (!%p140_p2), %s3748_s13, 3 }
   0x6   : > { %143 = sbr.rel (%p140_p2) target bundleno = 542 (0x21e), region = 32  ;;  %p166_p3 = scmp.lt.s32.totalorder (!%p140_p2), %s3753_s14, 15 }
   0xb   : > { %vm244_vm0 = vcmask 1044480   ;;  %v4939_v0 = vmov 0   ;;  %v181_v1 = vld [vmem:[%s5563_s2] sm:$0x3f]  ;;  %s5566_s14 = smov (!%p166_p3, %s3753_s14), 15  ;;  %vm245_vm1 = vcmask 1045504  }
   0xc   : > { %286 = vmatprep.mubr.bf16.mxu0 %v4939_v0  ;;  %392 = vmatprep.mubr.bf16.mxu1 %v4939_v0  ;;  %v4940_v2 = vmov 65535   ;;  %s4437_s17 = smul.u32 320, %s5566_s14  ;;  %v5018_v35 = vld [vmem:[%s5562_s1] sm:$0x7]  ;;  %vm240_vm2 = vcmask 613376   ;;  %s4436_s25 = sshll.u32 %s5566_s14, 4 }
   0xd   : > { %4448 = vset.pattern.permute.xlu0 %v4939_v0  ;;  %v246_v3 = vsel %vm244_vm0, 4294967295, %v4940_v2  ;;  %s5376_s28 = scalar_lea.vmem %s5564_s3, %s4436_s25  ;;  %vm629_vm3 = vcmask 553984  }
   0xe   : > { %621 = vperm.xlu0 %4448, %v181_v1   ;;  %s4981_s20 = scalar_lea.vmem %s5561_s0, %s4437_s17  ;;  %v4983_v4 = vsel %vm245_vm1, %v246_v3, 0 }
   0xf   : > { %v4449_v5 = vld [vmem:[%s4981_s20 + $0x44] ss:$8 sps:$4 sm:$0x3f]   ;;  %v4451_v6 = vld [vmem:[%s4981_s20 + $0x94] ss:$8 sps:$4 sm:$0x3f]  }
  0x10   : > { %v252_v7 = vand.u32 %v4449_v5, %v4983_v4  ;;  %v4453_v8 = vld [vmem:[%s4981_s20 + $0x40] ss:$8 sps:$4 sm:$0x3f]   ;;  %v4454_v9 = vld [vmem:[%s4981_s20 + $0x90] ss:$8 sps:$4 sm:$0x3f]   ;;  %v358_v10 = vand.u32 %v4451_v6, %v4983_v4 }
  0x11   : > { %v4455_v11 = vld [vmem:[%s4981_s20 + $0x34] ss:$8 sps:$4 sm:$0xff]   ;;  %v249_v12 = vand.u32 %v4453_v8, %v4983_v4  ;;  %v355_v13 = vand.u32 %v4454_v9, %v4983_v4  ;;  %v4457_v14 = vld [vmem:[%s4981_s20 + $0x84] ss:$8 sps:$4 sm:$0xff]   ;;  %v4459_v15 = vld [vmem:[%s4981_s20 + $0x30] ss:$8 sps:$4 sm:$0xff]  }
  0x12   : > { %260 = vmatprep.subr.bf16.mxu0 %v252_v7  ;;  %366 = vmatprep.subr.bf16.mxu1 %v358_v10  ;;  %v4460_v16 = vld [vmem:[%s4981_s20 + $0x80] ss:$8 sps:$4 sm:$0xff]   ;;  %v4461_v17 = vld [vmem:[%s4981_s20 + $0x24] ss:$8 sps:$4 sm:$0xff]   ;;  %v4463_v18 = vld [vmem:[%s4981_s20 + $0x74] ss:$8 sps:$4 sm:$0xff]  }
  0x13   : > { %261 = vmatpush1.bf16.msra.mxu0 %v249_v12  ;;  %367 = vmatpush1.bf16.msra.mxu1 %v355_v13  ;;  %v4465_v19 = vld [vmem:[%s4981_s20 + $0x20] ss:$8 sps:$4 sm:$0xff]   ;;  %v4466_v20 = vld [vmem:[%s4981_s20 + $0x70] ss:$8 sps:$4 sm:$0xff]   ;;  %v4467_v21 = vld [vmem:[%s4981_s20 + $0x14] ss:$8 sps:$4 sm:$0xff]  }
  0x14   : > { %262 = vmatprep.subr.bf16.mxu0 %v4455_v11  ;;  %368 = vmatprep.subr.bf16.mxu1 %v4457_v14  ;;  %v4469_v22 = vld [vmem:[%s4981_s20 + $0x64] ss:$8 sps:$4 sm:$0xff]   ;;  %v4471_v23 = vld [vmem:[%s4981_s20 + $0x10] ss:$8 sps:$4 sm:$0xff]   ;;  %v4472_v24 = vld [vmem:[%s4981_s20 + $0x60] ss:$8 sps:$4 sm:$0xff]  }
  0x15   : > { %v4473_v25 = vld [vmem:[%s4981_s20 + $0x4] ss:$8 sps:$4 sm:$0xff]   ;;  %v4475_v26 = vld [vmem:[%s4981_s20 + $0x54] ss:$8 sps:$4 sm:$0xff]   ;;  %v4477_v28 = vld [vmem:[%s4981_s20] ss:$8 sps:$4 sm:$0xff]  }
  0x16   : > { %v4481_v27 = vld [vmem:[%s4981_s20 + $0xe4] ss:$8 sps:$4 sm:$0x3f]   ;;  %v4484_v29 = vld [vmem:[%s4981_s20 + $0x134] ss:$8 sps:$4 sm:$0x3f]  }
  0x17   : > { %263 = vmatpush1.bf16.msra.mxu0 %v4459_v15  ;;  %369 = vmatpush1.bf16.msra.mxu1 %v4460_v16  ;;  %v4478_v30 = vld [vmem:[%s4981_s20 + $0x50] ss:$8 sps:$4 sm:$0xff]   ;;  %v4479_v31 = vld [vmem:[%s4981_s20 + $0xe0] ss:$8 sps:$4 sm:$0x3f]   ;;  %v464_v33 = vand.u32 %v4481_v27, %v4983_v4  ;;  %v570_v34 = vand.u32 %v4484_v29, %v4983_v4 }
  0x18   : > { %264 = vmatprep.subr.bf16.mxu0 %v4461_v17  ;;  %370 = vmatprep.subr.bf16.mxu1 %v4463_v18  ;;  %v4482_v32 = vld [vmem:[%s4981_s20 + $0x130] ss:$8 sps:$4 sm:$0x3f]   ;;  %v461_v36 = vand.u32 %v4479_v31, %v4983_v4  ;;  %v4487_v38 = vld [vmem:[%s4981_s20 + $0xd4] ss:$8 sps:$4 sm:$0xff]  }
  0x19   : > { %v567_v37 = vand.u32 %v4482_v32, %v4983_v4  ;;  %v4490_v39 = vld [vmem:[%s4981_s20 + $0x124] ss:$8 sps:$4 sm:$0xff]   ;;  %v4485_v40 = vld [vmem:[%s4981_s20 + $0xd0] ss:$8 sps:$4 sm:$0xff]   ;;  %v4488_v41 = vld [vmem:[%s4981_s20 + $0x120] ss:$8 sps:$4 sm:$0xff]  }
  0x1a   : > { %v4493_v42 = vld [vmem:[%s4981_s20 + $0xc4] ss:$8 sps:$4 sm:$0xff]   ;;  %v4496_v43 = vld [vmem:[%s4981_s20 + $0x114] ss:$8 sps:$4 sm:$0xff]   ;;  %v4491_v44 = vld [vmem:[%s4981_s20 + $0xc0] ss:$8 sps:$4 sm:$0xff]  }
  0x1b   : > { %265 = vmatpush1.bf16.msra.mxu0 %v4465_v19  ;;  %371 = vmatpush1.bf16.msra.mxu1 %v4466_v20  ;;  %v4494_v45 = vld [vmem:[%s4981_s20 + $0x110] ss:$8 sps:$4 sm:$0xff]   ;;  %v4499_v46 = vld [vmem:[%s4981_s20 + $0xb4] ss:$8 sps:$4 sm:$0xff]   ;;  %v4502_v47 = vld [vmem:[%s4981_s20 + $0x104] ss:$8 sps:$4 sm:$0xff]  }
  0x1c   : > { %266 = vmatprep.subr.bf16.mxu0 %v4467_v21  ;;  %372 = vmatprep.subr.bf16.mxu1 %v4469_v22  ;;  %v4497_v48 = vld [vmem:[%s4981_s20 + $0xb0] ss:$8 sps:$4 sm:$0xff]   ;;  %v4500_v49 = vld [vmem:[%s4981_s20 + $0x100] ss:$8 sps:$4 sm:$0xff]   ;;  %v4505_v50 = vld [vmem:[%s4981_s20 + $0xa4] ss:$8 sps:$4 sm:$0xff]  }
  0x1d   : > { %v4511_v51 = vld [vmem:[%s4981_s20 + $0x184] ss:$8 sps:$4 sm:$0x3f]   ;;  %v4508_v52 = vld [vmem:[%s4981_s20 + $0xf4] ss:$8 sps:$4 sm:$0xff]  }
  0x1e   : > { %v4514_v53 = vld [vmem:[%s4981_s20 + $0x1d4] ss:$8 sps:$4 sm:$0x3f]   ;;  %v4503_v54 = vld [vmem:[%s4981_s20 + $0xa0] ss:$8 sps:$4 sm:$0xff]   ;;  %v694_v58 = vand.u32 %v4511_v51, %v4983_v4 }
  0x1f   : > { %267 = vmatpush1.bf16.msra.mxu0 %v4471_v23  ;;  %373 = vmatpush1.bf16.msra.mxu1 %v4472_v24  ;;  %v4506_v55 = vld [vmem:[%s4981_s20 + $0xf0] ss:$8 sps:$4 sm:$0xff]   ;;  %v4509_v56 = vld [vmem:[%s4981_s20 + $0x180] ss:$8 sps:$4 sm:$0x3f]   ;;  %v800_v59 = vand.u32 %v4514_v53, %v4983_v4 }
  0x20   : > { %268 = vmatprep.subr.bf16.mxu0 %v4473_v25  ;;  %374 = vmatprep.subr.bf16.mxu1 %v4475_v26  ;;  %v4512_v57 = vld [vmem:[%s4981_s20 + $0x1d0] ss:$8 sps:$4 sm:$0x3f]   ;;  %v691_v60 = vand.u32 %v4509_v56, %v4983_v4  ;;  %v4517_v62 = vld [vmem:[%s4981_s20 + $0x174] ss:$8 sps:$4 sm:$0xff]  }
  0x21   : > { %v797_v61 = vand.u32 %v4512_v57, %v4983_v4  ;;  %v4520_v63 = vld [vmem:[%s4981_s20 + $0x1c4] ss:$8 sps:$4 sm:$0xff]   ;;  %v4515_v1 = vld [vmem:[%s4981_s20 + $0x170] ss:$8 sps:$4 sm:$0xff]   ;;  %v4518_v2 = vld [vmem:[%s4981_s20 + $0x1c0] ss:$8 sps:$4 sm:$0xff]  }
  0x22   : > { %v4523_v3 = vld [vmem:[%s4981_s20 + $0x164] ss:$8 sps:$4 sm:$0xff]   ;;  %v4526_v5 = vld [vmem:[%s4981_s20 + $0x1b4] ss:$8 sps:$4 sm:$0xff]   ;;  %v4521_v6 = vld [vmem:[%s4981_s20 + $0x160] ss:$8 sps:$4 sm:$0xff]  }
  0x23   : > { %269 = vmatpush1.bf16.msra.mxu0 %v4477_v28  ;;  %375 = vmatpush1.bf16.msra.mxu1 %v4478_v30  ;;  %v4524_v7 = vld [vmem:[%s4981_s20 + $0x1b0] ss:$8 sps:$4 sm:$0xff]   ;;  %v4529_v8 = vld [vmem:[%s4981_s20 + $0x154] ss:$8 sps:$4 sm:$0xff]   ;;  %v4532_v9 = vld [vmem:[%s4981_s20 + $0x1a4] ss:$8 sps:$4 sm:$0xff]  }
  0x24   : > { %472 = vmatprep.subr.bf16.mxu0 %v464_v33  ;;  %578 = vmatprep.subr.bf16.mxu1 %v570_v34  ;;  %v4527_v10 = vld [vmem:[%s4981_s20 + $0x150] ss:$8 sps:$4 sm:$0xff]   ;;  %v4530_v11 = vld [vmem:[%s4981_s20 + $0x1a0] ss:$8 sps:$4 sm:$0xff]   ;;  %v4535_v12 = vld [vmem:[%s4981_s20 + $0x144] ss:$8 sps:$4 sm:$0xff]  }
  0x25   : > { %v4538_v13 = vld [vmem:[%s4981_s20 + $0x194] ss:$8 sps:$4 sm:$0xff]   ;;  %v4541_v14 = vld [vmem:[%s4981_s20 + $0x224] ss:$8 sps:$4 sm:$0x3f]  }
  0x26   : > { %3768 = vmatmul.mubr.msk.bf16.vlgmr.msra.gmra.mxu0 %vm240_vm2, %v5018_v35  ;;  %3789 = vmatmul.mubr.msk.bf16.vlgmr.msra.gmra.mxu1 %vm240_vm2, %v5018_v35  ;;  %v4544_v15 = vld [vmem:[%s4981_s20 + $0x274] ss:$8 sps:$4 sm:$0x3f]   ;;  %v4533_v16 = vld [vmem:[%s4981_s20 + $0x140] ss:$8 sps:$4 sm:$0xff]   ;;  %v906_v20 = vand.u32 %v4541_v14, %v4983_v4 }
  0x27   : > { %473 = vmatpush1.bf16.msra.mxu0 %v461_v36  ;;  %579 = vmatpush1.bf16.msra.mxu1 %v567_v37  ;;  %v4539_v17 = vld [vmem:[%s4981_s20 + $0x220] ss:$8 sps:$4 sm:$0x3f]   ;;  %v4536_v18 = vld [vmem:[%s4981_s20 + $0x190] ss:$8 sps:$4 sm:$0xff]   ;;  %v1012_v21 = vand.u32 %v4544_v15, %v4983_v4 }
  0x28   : > { %474 = vmatprep.subr.bf16.mxu0 %v4487_v38  ;;  %580 = vmatprep.subr.bf16.mxu1 %v4490_v39  ;;  %v4542_v19 = vld [vmem:[%s4981_s20 + $0x270] ss:$8 sps:$4 sm:$0x3f]   ;;  %v903_v22 = vand.u32 %v4539_v17, %v4983_v4  ;;  %v4547_v24 = vld [vmem:[%s4981_s20 + $0x214] ss:$8 sps:$4 sm:$0xff]  }
  0x29   : > { %498 = vmatprep.mubr.bf16.mxu0 %v4939_v0  ;;  %604 = vmatprep.mubr.bf16.mxu1 %v4939_v0  ;;  %v1009_v23 = vand.u32 %v4542_v19, %v4983_v4  ;;  %v4550_v25 = vld [vmem:[%s4981_s20 + $0x264] ss:$8 sps:$4 sm:$0xff]   ;;  %v4545_v26 = vld [vmem:[%s4981_s20 + $0x210] ss:$8 sps:$4 sm:$0xff]   ;;  %v4548_v27 = vld [vmem:[%s4981_s20 + $0x260] ss:$8 sps:$4 sm:$0xff]  }
  0x2a   : > { %v4553_v28 = vld [vmem:[%s4981_s20 + $0x204] ss:$8 sps:$4 sm:$0xff]   ;;  %v4556_v29 = vld [vmem:[%s4981_s20 + $0x254] ss:$8 sps:$4 sm:$0xff]   ;;  %v4551_v30 = vld [vmem:[%s4981_s20 + $0x200] ss:$8 sps:$4 sm:$0xff]  }
  0x2b   : > { %475 = vmatpush1.bf16.msra.mxu0 %v4485_v40  ;;  %581 = vmatpush1.bf16.msra.mxu1 %v4488_v41  ;;  %v4554_v31 = vld [vmem:[%s4981_s20 + $0x250] ss:$8 sps:$4 sm:$0xff]   ;;  %v4559_v32 = vld [vmem:[%s4981_s20 + $0x1f4] ss:$8 sps:$4 sm:$0xff]   ;;  %v4562_v33 = vld [vmem:[%s4981_s20 + $0x244] ss:$8 sps:$4 sm:$0xff]  }
  0x2c   : > { %476 = vmatprep.subr.bf16.mxu0 %v4493_v42  ;;  %582 = vmatprep.subr.bf16.mxu1 %v4496_v43  ;;  %v4557_v34 = vld [vmem:[%s4981_s20 + $0x1f0] ss:$8 sps:$4 sm:$0xff]   ;;  %v4560_v36 = vld [vmem:[%s4981_s20 + $0x240] ss:$8 sps:$4 sm:$0xff]   ;;  %v4565_v37 = vld [vmem:[%s4981_s20 + $0x1e4] ss:$8 sps:$4 sm:$0xff]  }
  0x2d   : > { %v4568_v38 = vld [vmem:[%s4981_s20 + $0x234] ss:$8 sps:$4 sm:$0xff]   ;;  %v4571_v39 = vld [vmem:[%s4981_s20 + $0x2c4] ss:$8 sps:$4 sm:$0x3f]  }
  0x2e   : > { %v4574_v40 = vld [vmem:[%s4981_s20 + $0x314] ss:$8 sps:$4 sm:$0x3f]   ;;  %v4563_v41 = vld [vmem:[%s4981_s20 + $0x1e0] ss:$8 sps:$4 sm:$0xff]  }
  0x2f   : > { %477 = vmatpush1.bf16.msra.mxu0 %v4491_v44  ;;  %583 = vmatpush1.bf16.msra.mxu1 %v4494_v45  ;;  %v4566_v42 = vld [vmem:[%s4981_s20 + $0x230] ss:$8 sps:$4 sm:$0xff]   ;;  %v4569_v43 = vld [vmem:[%s4981_s20 + $0x2c0] ss:$8 sps:$4 sm:$0x3f]   ;;  %v1131_v45 = vand.u32 %v4571_v39, %v4983_v4 }
  0x30   : > { %478 = vmatprep.subr.bf16.mxu0 %v4499_v46  ;;  %584 = vmatprep.subr.bf16.mxu1 %v4502_v47  ;;  %v4572_v44 = vld [vmem:[%s4981_s20 + $0x310] ss:$8 sps:$4 sm:$0x3f]   ;;  %v1237_v46 = vand.u32 %v4574_v40, %v4983_v4  ;;  %v1128_v47 = vand.u32 %v4569_v43, %v4983_v4  ;;  %v4583_v53 = vld [vmem:[%s4981_s20 + $0x2a4] ss:$8 sps:$4 sm:$0xff]  }
  0x31   : > { %v4575_v51 = vld [vmem:[%s4981_s20 + $0x2b0] ss:$8 sps:$4 sm:$0xff]   ;;  %v4589_v57 = vld [vmem:[%s4981_s20 + $0x294] ss:$8 sps:$4 sm:$0xff]   ;;  %v4608_v14 = vld [vmem:[%s4981_s20 + $0x3a0] ss:$8 sps:$4 sm:$0xff]  }
  0x32   : > { %v4584_v56 = vld [vmem:[%s4981_s20 + $0x2f0] ss:$8 sps:$4 sm:$0xff]   ;;  %v4613_v15 = vld [vmem:[%s4981_s20 + $0x344] ss:$8 sps:$4 sm:$0xff]   ;;  %v4611_v17 = vld [vmem:[%s4981_s20 + $0x340] ss:$8 sps:$4 sm:$0xff]  }
  0x33   : > { %479 = vmatpush1.bf16.msra.mxu0 %v4497_v48  ;;  %585 = vmatpush1.bf16.msra.mxu1 %v4500_v49  ;;  %v1234_v48 = vand.u32 %v4572_v44, %v4983_v4  ;;  %v4577_v49 = vld [vmem:[%s4981_s20 + $0x2b4] ss:$8 sps:$4 sm:$0xff]   ;;  %v4638_v39 = vld [vmem:[%s4981_s20 + $0x440] ss:$8 sps:$4 sm:$0xff]   ;;  %v4643_v40 = vld [vmem:[%s4981_s20 + $0x3e4] ss:$8 sps:$4 sm:$0xff]  }
  0x34   : > { %480 = vmatprep.subr.bf16.mxu0 %v4505_v50  ;;  %586 = vmatprep.subr.bf16.mxu1 %v4508_v52  ;;  %v4580_v50 = vld [vmem:[%s4981_s20 + $0x304] ss:$8 sps:$4 sm:$0xff]   ;;  %v4578_v52 = vld [vmem:[%s4981_s20 + $0x300] ss:$8 sps:$4 sm:$0xff]   ;;  %v4619_v19 = vld [vmem:[%s4981_s20 + $0x334] ss:$8 sps:$4 sm:$0xff]  }
  0x35   : > { %v4644_v43 = vld [vmem:[%s4981_s20 + $0x430] ss:$8 sps:$4 sm:$0xff]   ;;  %v4649_v44 = vld [vmem:[%s4981_s20 + $0x3d4] ss:$8 sps:$4 sm:$0xff]  }
  0x37   : > { %481 = vmatpush1.bf16.msra.mxu0 %v4503_v54  ;;  %587 = vmatpush1.bf16.msra.mxu1 %v4506_v55  ;;  %v4586_v54 = vld [vmem:[%s4981_s20 + $0x2f4] ss:$8 sps:$4 sm:$0xff]   ;;  %v4581_v55 = vld [vmem:[%s4981_s20 + $0x2a0] ss:$8 sps:$4 sm:$0xff]  }
  0x38   : > { %702 = vmatprep.subr.bf16.mxu0 %v694_v58  ;;  %808 = vmatprep.subr.bf16.mxu1 %v800_v59  ;;  %v4592_v58 = vld [vmem:[%s4981_s20 + $0x2e4] ss:$8 sps:$4 sm:$0xff]   ;;  %v4587_v59 = vld [vmem:[%s4981_s20 + $0x290] ss:$8 sps:$4 sm:$0xff]  }
  0x3a   : > { %3810 = vmatmul.mubr.msk.bf16.vlgmr.msra.gmra.mxu0 %vm240_vm2, %v5018_v35  ;;  %3831 = vmatmul.mubr.msk.bf16.vlgmr.msra.gmra.mxu1 %vm240_vm2, %v5018_v35 }
  0x3b   : > { %703 = vmatpush1.bf16.msra.mxu0 %v691_v60  ;;  %809 = vmatpush1.bf16.msra.mxu1 %v797_v61  ;;  %v4590_v60 = vld [vmem:[%s4981_s20 + $0x2e0] ss:$8 sps:$4 sm:$0xff]   ;;  %v4595_v61 = vld [vmem:[%s4981_s20 + $0x284] ss:$8 sps:$4 sm:$0xff]  }
  0x3c   : > { %704 = vmatprep.subr.bf16.mxu0 %v4517_v62  ;;  %810 = vmatprep.subr.bf16.mxu1 %v4520_v63  ;;  %v4601_v62 = vld [vmem:[%s4981_s20 + $0x364] ss:$8 sps:$4 sm:$0x3f]   ;;  %v4598_v63 = vld [vmem:[%s4981_s20 + $0x2d4] ss:$8 sps:$4 sm:$0xff]  }
  0x3d   : > { %728 = vmatprep.mubr.bf16.mxu0 %v4939_v0  ;;  %834 = vmatprep.mubr.bf16.mxu1 %v4939_v0 }
  0x3f   : > { %705 = vmatpush1.bf16.msra.mxu0 %v4515_v1  ;;  %811 = vmatpush1.bf16.msra.mxu1 %v4518_v2  ;;  %v4604_v1 = vld [vmem:[%s4981_s20 + $0x3b4] ss:$8 sps:$4 sm:$0x3f]   ;;  %v4593_v2 = vld [vmem:[%s4981_s20 + $0x280] ss:$8 sps:$4 sm:$0xff]  }
  0x40   : > { %706 = vmatprep.subr.bf16.mxu0 %v4523_v3  ;;  %812 = vmatprep.subr.bf16.mxu1 %v4526_v5  ;;  %v4596_v3 = vld [vmem:[%s4981_s20 + $0x2d0] ss:$8 sps:$4 sm:$0xff]   ;;  %v4599_v5 = vld [vmem:[%s4981_s20 + $0x360] ss:$8 sps:$4 sm:$0x3f]  }
  0x43   : > { %707 = vmatpush1.bf16.msra.mxu0 %v4521_v6  ;;  %813 = vmatpush1.bf16.msra.mxu1 %v4524_v7  ;;  %v4602_v6 = vld [vmem:[%s4981_s20 + $0x3b0] ss:$8 sps:$4 sm:$0x3f]   ;;  %v1343_v7 = vand.u32 %v4601_v62, %v4983_v4 }
  0x44   : > { %708 = vmatprep.subr.bf16.mxu0 %v4529_v8  ;;  %814 = vmatprep.subr.bf16.mxu1 %v4532_v9  ;;  %v1449_v8 = vand.u32 %v4604_v1, %v4983_v4  ;;  %v1340_v9 = vand.u32 %v4599_v5, %v4983_v4  ;;  %v4665_v62 = vld [vmem:[%s4981_s20 + $0x490] ss:$8 sps:$4 sm:$0xff]   ;;  %v4673_v1 = vld [vmem:[%s4981_s20 + $0x484] ss:$8 sps:$4 sm:$0xff]   ;;  %v4679_v5 = vld [vmem:[%s4981_s20 + $0x474] ss:$8 sps:$4 sm:$0xff]  }
  0x47   : > { %709 = vmatpush1.bf16.msra.mxu0 %v4527_v10  ;;  %815 = vmatpush1.bf16.msra.mxu1 %v4530_v11  ;;  %v1446_v10 = vand.u32 %v4602_v6, %v4983_v4  ;;  %v4607_v11 = vld [vmem:[%s4981_s20 + $0x354] ss:$8 sps:$4 sm:$0xff]   ;;  %v4682_v6 = vld [vmem:[%s4981_s20 + $0x4c4] ss:$8 sps:$4 sm:$0xff]  }
  0x48   : > { %710 = vmatprep.subr.bf16.mxu0 %v4535_v12  ;;  %816 = vmatprep.subr.bf16.mxu1 %v4538_v13  ;;  %v4610_v12 = vld [vmem:[%s4981_s20 + $0x3a4] ss:$8 sps:$4 sm:$0xff]   ;;  %v4605_v13 = vld [vmem:[%s4981_s20 + $0x350] ss:$8 sps:$4 sm:$0xff]  }
  0x4b   : > { %711 = vmatpush1.bf16.msra.mxu0 %v4533_v16  ;;  %817 = vmatpush1.bf16.msra.mxu1 %v4536_v18  ;;  %v4616_v16 = vld [vmem:[%s4981_s20 + $0x394] ss:$8 sps:$4 sm:$0xff]   ;;  %v4614_v18 = vld [vmem:[%s4981_s20 + $0x390] ss:$8 sps:$4 sm:$0xff]  }
  0x4c   : > { %914 = vmatprep.subr.bf16.mxu0 %v906_v20  ;;  %1020 = vmatprep.subr.bf16.mxu1 %v1012_v21  ;;  %v4622_v20 = vld [vmem:[%s4981_s20 + $0x384] ss:$8 sps:$4 sm:$0xff]   ;;  %v4617_v21 = vld [vmem:[%s4981_s20 + $0x330] ss:$8 sps:$4 sm:$0xff]  }
  0x4e   : > { %3852 = vmatmul.mubr.msk.bf16.vlgmr.msra.gmra.mxu0 %vm240_vm2, %v5018_v35  ;;  %3873 = vmatmul.mubr.msk.bf16.vlgmr.msra.gmra.mxu1 %vm240_vm2, %v5018_v35 }
  0x4f   : > { %915 = vmatpush1.bf16.msra.mxu0 %v903_v22  ;;  %1021 = vmatpush1.bf16.msra.mxu1 %v1009_v23  ;;  %v4620_v22 = vld [vmem:[%s4981_s20 + $0x380] ss:$8 sps:$4 sm:$0xff]   ;;  %v4625_v23 = vld [vmem:[%s4981_s20 + $0x324] ss:$8 sps:$4 sm:$0xff]  }
  0x50   : > { %916 = vmatprep.subr.bf16.mxu0 %v4547_v24  ;;  %1022 = vmatprep.subr.bf16.mxu1 %v4550_v25  ;;  %v4628_v24 = vld [vmem:[%s4981_s20 + $0x374] ss:$8 sps:$4 sm:$0xff]   ;;  %v4631_v25 = vld [vmem:[%s4981_s20 + $0x404] ss:$8 sps:$4 sm:$0x3f]  }
  0x51   : > { %940 = vmatprep.mubr.bf16.mxu0 %v4939_v0  ;;  %1046 = vmatprep.mubr.bf16.mxu1 %v4939_v0 }
  0x53   : > { %917 = vmatpush1.bf16.msra.mxu0 %v4545_v26  ;;  %1023 = vmatpush1.bf16.msra.mxu1 %v4548_v27  ;;  %v4634_v26 = vld [vmem:[%s4981_s20 + $0x454] ss:$8 sps:$4 sm:$0x3f]   ;;  %v4623_v27 = vld [vmem:[%s4981_s20 + $0x320] ss:$8 sps:$4 sm:$0xff]  }
  0x54   : > { %918 = vmatprep.subr.bf16.mxu0 %v4553_v28  ;;  %1024 = vmatprep.subr.bf16.mxu1 %v4556_v29  ;;  %v4629_v28 = vld [vmem:[%s4981_s20 + $0x400] ss:$8 sps:$4 sm:$0x3f]   ;;  %v4626_v29 = vld [vmem:[%s4981_s20 + $0x370] ss:$8 sps:$4 sm:$0xff]  }
  0x57   : > { %919 = vmatpush1.bf16.msra.mxu0 %v4551_v30  ;;  %1025 = vmatpush1.bf16.msra.mxu1 %v4554_v31  ;;  %v4632_v30 = vld [vmem:[%s4981_s20 + $0x450] ss:$8 sps:$4 sm:$0x3f]   ;;  %v1568_v31 = vand.u32 %v4631_v25, %v4983_v4  ;;  %v4698_v25 = vld [vmem:[%s4981_s20 + $0x580] ss:$8 sps:$4 sm:$0xff]  }
  0x58   : > { %920 = vmatprep.subr.bf16.mxu0 %v4559_v32  ;;  %1026 = vmatprep.subr.bf16.mxu1 %v4562_v33  ;;  %v1674_v32 = vand.u32 %v4634_v26, %v4983_v4  ;;  %v1565_v33 = vand.u32 %v4629_v28, %v4983_v4  ;;  %v4703_v26 = vld [vmem:[%s4981_s20 + $0x524] ss:$8 sps:$4 sm:$0xff]   ;;  %v4701_v28 = vld [vmem:[%s4981_s20 + $0x520] ss:$8 sps:$4 sm:$0xff]  }
  0x5b   : > { %921 = vmatpush1.bf16.msra.mxu0 %v4557_v34  ;;  %1027 = vmatpush1.bf16.msra.mxu1 %v4560_v36  ;;  %v1671_v34 = vand.u32 %v4632_v30, %v4983_v4  ;;  %v4637_v36 = vld [vmem:[%s4981_s20 + $0x3f4] ss:$8 sps:$4 sm:$0xff]  }
  0x5c   : > { %922 = vmatprep.subr.bf16.mxu0 %v4565_v37  ;;  %1028 = vmatprep.subr.bf16.mxu1 %v4568_v38  ;;  %v4640_v37 = vld [vmem:[%s4981_s20 + $0x444] ss:$8 sps:$4 sm:$0xff]   ;;  %v4635_v38 = vld [vmem:[%s4981_s20 + $0x3f0] ss:$8 sps:$4 sm:$0xff]   ;;  %v4709_v30 = vld [vmem:[%s4981_s20 + $0x514] ss:$8 sps:$4 sm:$0xff]  }
  0x5f   : > { %923 = vmatpush1.bf16.msra.mxu0 %v4563_v41  ;;  %1029 = vmatpush1.bf16.msra.mxu1 %v4566_v42  ;;  %v4646_v41 = vld [vmem:[%s4981_s20 + $0x434] ss:$8 sps:$4 sm:$0xff]   ;;  %v4641_v42 = vld [vmem:[%s4981_s20 + $0x3e0] ss:$8 sps:$4 sm:$0xff]  }
  0x60   : > { %1139 = vmatprep.subr.bf16.mxu0 %v1131_v45  ;;  %1245 = vmatprep.subr.bf16.mxu1 %v1237_v46  ;;  %v4652_v45 = vld [vmem:[%s4981_s20 + $0x424] ss:$8 sps:$4 sm:$0xff]   ;;  %v4647_v46 = vld [vmem:[%s4981_s20 + $0x3d0] ss:$8 sps:$4 sm:$0xff]  }
  0x62   : > { %3894 = vmatmul.mubr.msk.bf16.vlgmr.msra.gmra.mxu0 %vm240_vm2, %v5018_v35  ;;  %3915 = vmatmul.mubr.msk.bf16.vlgmr.msra.gmra.mxu1 %vm240_vm2, %v5018_v35 }
  0x63   : > { %1140 = vmatpush1.bf16.msra.mxu0 %v1128_v47  ;;  %1246 = vmatpush1.bf16.msra.mxu1 %v1234_v48  ;;  %v4650_v47 = vld [vmem:[%s4981_s20 + $0x420] ss:$8 sps:$4 sm:$0xff]   ;;  %v4655_v48 = vld [vmem:[%s4981_s20 + $0x3c4] ss:$8 sps:$4 sm:$0xff]  }
  0x64   : > { %1141 = vmatprep.subr.bf16.mxu0 %v4577_v49  ;;  %1247 = vmatprep.subr.bf16.mxu1 %v4580_v50  ;;  %v4658_v49 = vld [vmem:[%s4981_s20 + $0x414] ss:$8 sps:$4 sm:$0xff]   ;;  %v4661_v50 = vld [vmem:[%s4981_s20 + $0x4a4] ss:$8 sps:$4 sm:$0x3f]  }
  0x65   : > { %1165 = vmatprep.mubr.bf16.mxu0 %v4939_v0  ;;  %1271 = vmatprep.mubr.bf16.mxu1 %v4939_v0 }
  0x67   : > { %1142 = vmatpush1.bf16.msra.mxu0 %v4575_v51  ;;  %1248 = vmatpush1.bf16.msra.mxu1 %v4578_v52  ;;  %v4664_v51 = vld [vmem:[%s4981_s20 + $0x4f4] ss:$8 sps:$4 sm:$0x3f]   ;;  %v4653_v52 = vld [vmem:[%s4981_s20 + $0x3c0] ss:$8 sps:$4 sm:$0xff]  }
  0x68   : > { %1143 = vmatprep.subr.bf16.mxu0 %v4583_v53  ;;  %1249 = vmatprep.subr.bf16.mxu1 %v4586_v54  ;;  %v4656_v53 = vld [vmem:[%s4981_s20 + $0x410] ss:$8 sps:$4 sm:$0xff]   ;;  %v4659_v54 = vld [vmem:[%s4981_s20 + $0x4a0] ss:$8 sps:$4 sm:$0x3f]  }
  0x6b   : > { %1144 = vmatpush1.bf16.msra.mxu0 %v4581_v55  ;;  %1250 = vmatpush1.bf16.msra.mxu1 %v4584_v56  ;;  %v4662_v55 = vld [vmem:[%s4981_s20 + $0x4f0] ss:$8 sps:$4 sm:$0x3f]   ;;  %v1780_v56 = vand.u32 %v4661_v50, %v4983_v4  ;;  %v4728_v50 = vld [vmem:[%s4981_s20 + $0x620] ss:$8 sps:$4 sm:$0xff]  }
  0x6c   : > { %1145 = vmatprep.subr.bf16.mxu0 %v4589_v57  ;;  %1251 = vmatprep.subr.bf16.mxu1 %v4592_v58  ;;  %v1886_v57 = vand.u32 %v4664_v51, %v4983_v4  ;;  %v1777_v58 = vand.u32 %v4659_v54, %v4983_v4  ;;  %v4733_v51 = vld [vmem:[%s4981_s20 + $0x5c4] ss:$8 sps:$4 sm:$0xff]   ;;  %v4734_v54 = vld [vmem:[%s4981_s20 + $0x610] ss:$8 sps:$4 sm:$0xff]  }
  0x6f   : > { %1146 = vmatpush1.bf16.msra.mxu0 %v4587_v59  ;;  %1252 = vmatpush1.bf16.msra.mxu1 %v4590_v60  ;;  %v1883_v59 = vand.u32 %v4662_v55, %v4983_v4  ;;  %v4667_v60 = vld [vmem:[%s4981_s20 + $0x494] ss:$8 sps:$4 sm:$0xff]  }
  0x70   : > { %1147 = vmatprep.subr.bf16.mxu0 %v4595_v61  ;;  %1253 = vmatprep.subr.bf16.mxu1 %v4598_v63  ;;  %v4670_v61 = vld [vmem:[%s4981_s20 + $0x4e4] ss:$8 sps:$4 sm:$0xff]   ;;  %v4668_v63 = vld [vmem:[%s4981_s20 + $0x4e0] ss:$8 sps:$4 sm:$0xff]   ;;  %v4739_v55 = vld [vmem:[%s4981_s20 + $0x5b4] ss:$8 sps:$4 sm:$0xff]  }
  0x73   : > { %1148 = vmatpush1.bf16.msra.mxu0 %v4593_v2  ;;  %1254 = vmatpush1.bf16.msra.mxu1 %v4596_v3  ;;  %v4676_v2 = vld [vmem:[%s4981_s20 + $0x4d4] ss:$8 sps:$4 sm:$0xff]   ;;  %v4671_v3 = vld [vmem:[%s4981_s20 + $0x480] ss:$8 sps:$4 sm:$0xff]  }
  0x74   : > { %1351 = vmatprep.subr.bf16.mxu0 %v1343_v7  ;;  %1457 = vmatprep.subr.bf16.mxu1 %v1449_v8  ;;  %v4677_v7 = vld [vmem:[%s4981_s20 + $0x470] ss:$8 sps:$4 sm:$0xff]   ;;  %v4680_v8 = vld [vmem:[%s4981_s20 + $0x4c0] ss:$8 sps:$4 sm:$0xff]  }
  0x76   : > { %3938 = vmatmul.mubr.msk.bf16.vlgmr.msra.gmra.mxu0 %vm240_vm2, %v5018_v35  ;;  %3959 = vmatmul.mubr.msk.bf16.vlgmr.msra.gmra.mxu1 %vm240_vm2, %v5018_v35 }
  0x77   : > { %1352 = vmatpush1.bf16.msra.mxu0 %v1340_v9  ;;  %1458 = vmatpush1.bf16.msra.mxu1 %v1446_v10  ;;  %v4685_v9 = vld [vmem:[%s4981_s20 + $0x464] ss:$8 sps:$4 sm:$0xff]  }
  0x78   : > { %1353 = vmatprep.subr.bf16.mxu0 %v4607_v11  ;;  %1459 = vmatprep.subr.bf16.mxu1 %v4610_v12  ;;  %v4691_v10 = vld [vmem:[%s4981_s20 + $0x544] ss:$8 sps:$4 sm:$0x3f]   ;;  %v4688_v11 = vld [vmem:[%s4981_s20 + $0x4b4] ss:$8 sps:$4 sm:$0xff]  }
  0x79   : > { %1377 = vmatprep.mubr.bf16.mxu0 %v4939_v0  ;;  %1483 = vmatprep.mubr.bf16.mxu1 %v4939_v0  ;;  %v4694_v12 = vld [vmem:[%s4981_s20 + $0x594] ss:$8 sps:$4 sm:$0x3f]  }
  0x7b   : > { %1354 = vmatpush1.bf16.msra.mxu0 %v4605_v13  ;;  %1460 = vmatpush1.bf16.msra.mxu1 %v4608_v14  ;;  %v4683_v13 = vld [vmem:[%s4981_s20 + $0x460] ss:$8 sps:$4 sm:$0xff]  }
  0x7c   : > { %1355 = vmatprep.subr.bf16.mxu0 %v4613_v15  ;;  %1461 = vmatprep.subr.bf16.mxu1 %v4616_v16  ;;  %v4689_v14 = vld [vmem:[%s4981_s20 + $0x540] ss:$8 sps:$4 sm:$0x3f]   ;;  %v4686_v15 = vld [vmem:[%s4981_s20 + $0x4b0] ss:$8 sps:$4 sm:$0xff]  }
  0x7d   : > { %v4692_v16 = vld [vmem:[%s4981_s20 + $0x590] ss:$8 sps:$4 sm:$0x3f]  }
  0x7f   : > { %1356 = vmatpush1.bf16.msra.mxu0 %v4611_v17  ;;  %1462 = vmatpush1.bf16.msra.mxu1 %v4614_v18  ;;  %v2005_v17 = vand.u32 %v4691_v10, %v4983_v4  ;;  %v2111_v18 = vand.u32 %v4694_v12, %v4983_v4  ;;  %v4755_v10 = vld [vmem:[%s4981_s20 + $0x670] ss:$8 sps:$4 sm:$0xff]   ;;  %v4763_v12 = vld [vmem:[%s4981_s20 + $0x664] ss:$8 sps:$4 sm:$0xff]  }
  0x80   : > { %1357 = vmatprep.subr.bf16.mxu0 %v4619_v19  ;;  %1463 = vmatprep.subr.bf16.mxu1 %v4622_v20  ;;  %v2002_v19 = vand.u32 %v4689_v14, %v4983_v4  ;;  %v2108_v20 = vand.u32 %v4692_v16, %v4983_v4  ;;  %v4761_v14 = vld [vmem:[%s4981_s20 + $0x660] ss:$8 sps:$4 sm:$0xff]   ;;  %v4769_v16 = vld [vmem:[%s4981_s20 + $0x654] ss:$8 sps:$4 sm:$0xff]  }
  0x83   : > { %1358 = vmatpush1.bf16.msra.mxu0 %v4617_v21  ;;  %1464 = vmatpush1.bf16.msra.mxu1 %v4620_v22  ;;  %v4697_v21 = vld [vmem:[%s4981_s20 + $0x534] ss:$8 sps:$4 sm:$0xff]   ;;  %v4700_v22 = vld [vmem:[%s4981_s20 + $0x584] ss:$8 sps:$4 sm:$0xff]  }
  0x84   : > { %1359 = vmatprep.subr.bf16.mxu0 %v4625_v23  ;;  %1465 = vmatprep.subr.bf16.mxu1 %v4628_v24  ;;  %v5237_v23 = vld [vmem:[%s5562_s1] sm:$0x7]  ;;  %v4695_v24 = vld [vmem:[%s4981_s20 + $0x530] ss:$8 sps:$4 sm:$0xff]  }
  0x87   : > { %1360 = vmatpush1.bf16.msra.mxu0 %v4623_v27  ;;  %1466 = vmatpush1.bf16.msra.mxu1 %v4626_v29  ;;  %v4706_v27 = vld [vmem:[%s4981_s20 + $0x574] ss:$8 sps:$4 sm:$0xff]   ;;  %v4704_v29 = vld [vmem:[%s4981_s20 + $0x570] ss:$8 sps:$4 sm:$0xff]  }
  0x88   : > { %1576 = vmatprep.subr.bf16.mxu0 %v1568_v31  ;;  %1682 = vmatprep.subr.bf16.mxu1 %v1674_v32  ;;  %v4712_v31 = vld [vmem:[%s4981_s20 + $0x564] ss:$8 sps:$4 sm:$0xff]   ;;  %v4707_v32 = vld [vmem:[%s4981_s20 + $0x510] ss:$8 sps:$4 sm:$0xff]  }
  0x8a   : > { %3980 = vmatmul.mubr.msk.bf16.vlgmr.msra.gmra.mxu0 %vm240_vm2, %v5018_v35  ;;  %4001 = vmatmul.mubr.msk.bf16.vlgmr.msra.gmra.mxu1 %vm240_vm2, %v5018_v35 }
  0x8b   : > { %1577 = vmatpush1.bf16.msra.mxu0 %v1565_v33  ;;  %1683 = vmatpush1.bf16.msra.mxu1 %v1671_v34  ;;  %v4710_v33 = vld [vmem:[%s4981_s20 + $0x560] ss:$8 sps:$4 sm:$0xff]   ;;  %v4715_v34 = vld [vmem:[%s4981_s20 + $0x504] ss:$8 sps:$4 sm:$0xff]  }
  0x8c   : > { %1578 = vmatprep.subr.bf16.mxu0 %v4637_v36  ;;  %1684 = vmatprep.subr.bf16.mxu1 %v4640_v37  ;;  %v4718_v36 = vld [vmem:[%s4981_s20 + $0x554] ss:$8 sps:$4 sm:$0xff]   ;;  %v4721_v37 = vld [vmem:[%s4981_s20 + $0x5e4] ss:$8 sps:$4 sm:$0x3f]  }
  0x8d   : > { %1602 = vmatprep.mubr.bf16.mxu0 %v4939_v0  ;;  %1708 = vmatprep.mubr.bf16.mxu1 %v4939_v0 }
  0x8f   : > { %1579 = vmatpush1.bf16.msra.mxu0 %v4635_v38  ;;  %1685 = vmatpush1.bf16.msra.mxu1 %v4638_v39  ;;  %v4724_v38 = vld [vmem:[%s4981_s20 + $0x634] ss:$8 sps:$4 sm:$0x3f]   ;;  %v4713_v39 = vld [vmem:[%s4981_s20 + $0x500] ss:$8 sps:$4 sm:$0xff]  }
  0x90   : > { %1580 = vmatprep.subr.bf16.mxu0 %v4643_v40  ;;  %1686 = vmatprep.subr.bf16.mxu1 %v4646_v41  ;;  %v4716_v40 = vld [vmem:[%s4981_s20 + $0x550] ss:$8 sps:$4 sm:$0xff]   ;;  %v4719_v41 = vld [vmem:[%s4981_s20 + $0x5e0] ss:$8 sps:$4 sm:$0x3f]  }
  0x93   : > { %1581 = vmatpush1.bf16.msra.mxu0 %v4641_v42  ;;  %1687 = vmatpush1.bf16.msra.mxu1 %v4644_v43  ;;  %v4722_v42 = vld [vmem:[%s4981_s20 + $0x630] ss:$8 sps:$4 sm:$0x3f]   ;;  %v2217_v43 = vand.u32 %v4721_v37, %v4983_v4 }
  0x94   : > { %1582 = vmatprep.subr.bf16.mxu0 %v4649_v44  ;;  %1688 = vmatprep.subr.bf16.mxu1 %v4652_v45  ;;  %v2323_v44 = vand.u32 %v4724_v38, %v4983_v4  ;;  %v2214_v45 = vand.u32 %v4719_v41, %v4983_v4 }
  0x97   : > { %1583 = vmatpush1.bf16.msra.mxu0 %v4647_v46  ;;  %1689 = vmatpush1.bf16.msra.mxu1 %v4650_v47  ;;  %v2320_v46 = vand.u32 %v4722_v42, %v4983_v4  ;;  %v4727_v47 = vld [vmem:[%s4981_s20 + $0x5d4] ss:$8 sps:$4 sm:$0xff]  }
  0x98   : > { %1584 = vmatprep.subr.bf16.mxu0 %v4655_v48  ;;  %1690 = vmatprep.subr.bf16.mxu1 %v4658_v49  ;;  %v4730_v48 = vld [vmem:[%s4981_s20 + $0x624] ss:$8 sps:$4 sm:$0xff]   ;;  %v4725_v49 = vld [vmem:[%s4981_s20 + $0x5d0] ss:$8 sps:$4 sm:$0xff]   ;;  %v4787_v42 = vld [vmem:[%s4981_s20 + $0x714] ss:$8 sps:$4 sm:$0xff]  }
  0x9b   : > { %1585 = vmatpush1.bf16.msra.mxu0 %v4653_v52  ;;  %1691 = vmatpush1.bf16.msra.mxu1 %v4656_v53  ;;  %v4736_v52 = vld [vmem:[%s4981_s20 + $0x614] ss:$8 sps:$4 sm:$0xff]   ;;  %v4731_v53 = vld [vmem:[%s4981_s20 + $0x5c0] ss:$8 sps:$4 sm:$0xff]  }
  0x9c   : > { %1788 = vmatprep.subr.bf16.mxu0 %v1780_v56  ;;  %1894 = vmatprep.subr.bf16.mxu1 %v1886_v57  ;;  %v4742_v56 = vld [vmem:[%s4981_s20 + $0x604] ss:$8 sps:$4 sm:$0xff]   ;;  %v4737_v57 = vld [vmem:[%s4981_s20 + $0x5b0] ss:$8 sps:$4 sm:$0xff]  }
  0x9e   : > { %4024 = vmatmul.mubr.msk.bf16.vlgmr.msra.gmra.mxu0 %vm240_vm2, %v5018_v35  ;;  %4045 = vmatmul.mubr.msk.bf16.vlgmr.msra.gmra.mxu1 %vm240_vm2, %v5018_v35  ;;  %v4674_v35 = vld [vmem:[%s4981_s20 + $0x4d0] ss:$8 sps:$4 sm:$0xff]  }
  0x9f   : > { %1789 = vmatpush1.bf16.msra.mxu0 %v1777_v58  ;;  %1895 = vmatpush1.bf16.msra.mxu1 %v1883_v59  ;;  %v4740_v58 = vld [vmem:[%s4981_s20 + $0x600] ss:$8 sps:$4 sm:$0xff]   ;;  %v4745_v59 = vld [vmem:[%s4981_s20 + $0x5a4] ss:$8 sps:$4 sm:$0xff]  }
  0xa0   : > { %1790 = vmatprep.subr.bf16.mxu0 %v4667_v60  ;;  %1896 = vmatprep.subr.bf16.mxu1 %v4670_v61  ;;  %v4751_v60 = vld [vmem:[%s4981_s20 + $0x684] ss:$8 sps:$4 sm:$0x3f]   ;;  %v4748_v61 = vld [vmem:[%s4981_s20 + $0x5f4] ss:$8 sps:$4 sm:$0xff]  }
  0xa1   : > { %1814 = vmatprep.mubr.bf16.mxu0 %v4939_v0  ;;  %1920 = vmatprep.mubr.bf16.mxu1 %v4939_v0 }
  0xa3   : > { %1791 = vmatpush1.bf16.msra.mxu0 %v4665_v62  ;;  %1897 = vmatpush1.bf16.msra.mxu1 %v4668_v63  ;;  %v4754_v62 = vld [vmem:[%s4981_s20 + $0x6d4] ss:$8 sps:$4 sm:$0x3f]   ;;  %v4743_v63 = vld [vmem:[%s4981_s20 + $0x5a0] ss:$8 sps:$4 sm:$0xff]  }
  0xa4   : > { %1792 = vmatprep.subr.bf16.mxu0 %v4673_v1  ;;  %1898 = vmatprep.subr.bf16.mxu1 %v4676_v2  ;;  %v4746_v1 = vld [vmem:[%s4981_s20 + $0x5f0] ss:$8 sps:$4 sm:$0xff]   ;;  %v4749_v2 = vld [vmem:[%s4981_s20 + $0x680] ss:$8 sps:$4 sm:$0x3f]  }
  0xa7   : > { %1793 = vmatpush1.bf16.msra.mxu0 %v4671_v3  ;;  %1899 = vmatpush1.bf16.msra.mxu1 %v4674_v35  ;;  %v4752_v3 = vld [vmem:[%s4981_s20 + $0x6d0] ss:$8 sps:$4 sm:$0x3f]   ;;  %v2442_v35 = vand.u32 %v4751_v60, %v4983_v4  ;;  %v4803_v60 = vld [vmem:[%s4981_s20 + $0x6e0] ss:$8 sps:$4 sm:$0xff]  }
  0xa8   : > { %1794 = vmatprep.subr.bf16.mxu0 %v4679_v5  ;;  %1900 = vmatprep.subr.bf16.mxu1 %v4682_v6  ;;  %v2548_v5 = vand.u32 %v4754_v62, %v4983_v4  ;;  %v2439_v6 = vand.u32 %v4749_v2, %v4983_v4  ;;  %v4806_v2 = vld [vmem:[%s4981_s20 + $0x730] ss:$8 sps:$4 sm:$0xff]  }
  0xab   : > { %1795 = vmatpush1.bf16.msra.mxu0 %v4677_v7  ;;  %1901 = vmatpush1.bf16.msra.mxu1 %v4680_v8  ;;  %v2545_v7 = vand.u32 %v4752_v3, %v4983_v4  ;;  %v4757_v8 = vld [vmem:[%s4981_s20 + $0x674] ss:$8 sps:$4 sm:$0xff]   ;;  %v4812_v3 = vld [vmem:[%s4981_s20 + $0x810] ss:$8 sps:$4 sm:$0x3f]  }
  0xac   : > { %1796 = vmatprep.subr.bf16.mxu0 %v4685_v9  ;;  %1902 = vmatprep.subr.bf16.mxu1 %v4688_v11  ;;  %v4760_v9 = vld [vmem:[%s4981_s20 + $0x6c4] ss:$8 sps:$4 sm:$0xff]   ;;  %v4758_v11 = vld [vmem:[%s4981_s20 + $0x6c0] ss:$8 sps:$4 sm:$0xff]  }
  0xaf   : > { %1797 = vmatpush1.bf16.msra.mxu0 %v4683_v13  ;;  %1903 = vmatpush1.bf16.msra.mxu1 %v4686_v15  ;;  %v4766_v13 = vld [vmem:[%s4981_s20 + $0x6b4] ss:$8 sps:$4 sm:$0xff]   ;;  %v4764_v15 = vld [vmem:[%s4981_s20 + $0x6b0] ss:$8 sps:$4 sm:$0xff]  }
  0xb0   : > { %2013 = vmatprep.subr.bf16.mxu0 %v2005_v17  ;;  %2119 = vmatprep.subr.bf16.mxu1 %v2111_v18  ;;  %v4772_v17 = vld [vmem:[%s4981_s20 + $0x6a4] ss:$8 sps:$4 sm:$0xff]   ;;  %v4767_v18 = vld [vmem:[%s4981_s20 + $0x650] ss:$8 sps:$4 sm:$0xff]  }
  0xb2   : > { %4066 = vmatmul.mubr.msk.bf16.vlgmr.msra.gmra.mxu0 %vm240_vm2, %v5237_v23  ;;  %4087 = vmatmul.mubr.msk.bf16.vlgmr.msra.gmra.mxu1 %vm240_vm2, %v5237_v23 }
  0xb3   : > { %2014 = vmatpush1.bf16.msra.mxu0 %v2002_v19  ;;  %2120 = vmatpush1.bf16.msra.mxu1 %v2108_v20  ;;  %v4770_v19 = vld [vmem:[%s4981_s20 + $0x6a0] ss:$8 sps:$4 sm:$0xff]   ;;  %v4775_v20 = vld [vmem:[%s4981_s20 + $0x644] ss:$8 sps:$4 sm:$0xff]  }
  0xb4   : > { %2015 = vmatprep.subr.bf16.mxu0 %v4697_v21  ;;  %2121 = vmatprep.subr.bf16.mxu1 %v4700_v22  ;;  %v4781_v21 = vld [vmem:[%s4981_s20 + $0x724] ss:$8 sps:$4 sm:$0x3f]   ;;  %v4778_v22 = vld [vmem:[%s4981_s20 + $0x694] ss:$8 sps:$4 sm:$0xff]  }
  0xb5   : > { %2039 = vmatprep.mubr.bf16.mxu0 %v4939_v0  ;;  %2145 = vmatprep.mubr.bf16.mxu1 %v4939_v0 }
  0xb7   : > { %2016 = vmatpush1.bf16.msra.mxu0 %v4695_v24  ;;  %2122 = vmatpush1.bf16.msra.mxu1 %v4698_v25  ;;  %v4784_v24 = vld [vmem:[%s4981_s20 + $0x774] ss:$8 sps:$4 sm:$0x3f]   ;;  %v4773_v25 = vld [vmem:[%s4981_s20 + $0x640] ss:$8 sps:$4 sm:$0xff]  }
  0xb8   : > { %2017 = vmatprep.subr.bf16.mxu0 %v4703_v26  ;;  %2123 = vmatprep.subr.bf16.mxu1 %v4706_v27 }
  0xbb   : > { %2018 = vmatpush1.bf16.msra.mxu0 %v4701_v28  ;;  %2124 = vmatpush1.bf16.msra.mxu1 %v4704_v29  ;;  %v4776_v28 = vld [vmem:[%s4981_s20 + $0x690] ss:$8 sps:$4 sm:$0xff]   ;;  %v4779_v29 = vld [vmem:[%s4981_s20 + $0x720] ss:$8 sps:$4 sm:$0x3f]  }
  0xbc   : > { %2019 = vmatprep.subr.bf16.mxu0 %v4709_v30  ;;  %2125 = vmatprep.subr.bf16.mxu1 %v4712_v31  ;;  %v4782_v30 = vld [vmem:[%s4981_s20 + $0x770] ss:$8 sps:$4 sm:$0x3f]   ;;  %v2651_v38 = vand.u32 %v4779_v29, %v4983_v4  ;;  %v4821_v29 = vld [vmem:[%s4981_s20 + $0x7a0] ss:$8 sps:$4 sm:$0xff]  }
  0xbf   : > { %2020 = vmatpush1.bf16.msra.mxu0 %v4707_v32  ;;  %2126 = vmatpush1.bf16.msra.mxu1 %v4710_v33  ;;  %v2654_v33 = vand.u32 %v4781_v21, %v4983_v4 }
  0xc0   : > { %2021 = vmatprep.subr.bf16.mxu0 %v4715_v34  ;;  %2127 = vmatprep.subr.bf16.mxu1 %v4718_v36  ;;  %v2760_v34 = vand.u32 %v4784_v24, %v4983_v4  ;;  %v4815_v24 = vld [vmem:[%s4981_s20 + $0x7b0] ss:$8 sps:$4 sm:$0xff]  }
  0xc3   : > { %2022 = vmatpush1.bf16.msra.mxu0 %v4713_v39  ;;  %2128 = vmatpush1.bf16.msra.mxu1 %v4716_v40  ;;  %v2757_v39 = vand.u32 %v4782_v30, %v4983_v4  ;;  %v4824_v30 = vld [vmem:[%s4981_s20 + $0x7f0] ss:$8 sps:$4 sm:$0xff]  }
  0xc4   : > { %2225 = vmatprep.subr.bf16.mxu0 %v2217_v43  ;;  %2331 = vmatprep.subr.bf16.mxu1 %v2323_v44  ;;  %v4790_v43 = vld [vmem:[%s4981_s20 + $0x764] ss:$8 sps:$4 sm:$0xff]   ;;  %v4785_v44 = vld [vmem:[%s4981_s20 + $0x710] ss:$8 sps:$4 sm:$0xff]  }
  0xc6   : > { %4110 = vmatmul.mubr.msk.bf16.vlgmr.msra.gmra.mxu0 %vm240_vm2, %v5237_v23  ;;  %4131 = vmatmul.mubr.msk.bf16.vlgmr.msra.gmra.mxu1 %vm240_vm2, %v5237_v23 }
  0xc7   : > { %2226 = vmatpush1.bf16.msra.mxu0 %v2214_v45  ;;  %2332 = vmatpush1.bf16.msra.mxu1 %v2320_v46  ;;  %v4788_v45 = vld [vmem:[%s4981_s20 + $0x760] ss:$8 sps:$4 sm:$0xff]   ;;  %v4793_v46 = vld [vmem:[%s4981_s20 + $0x704] ss:$8 sps:$4 sm:$0xff]  }
  0xc8   : > { %2227 = vmatprep.subr.bf16.mxu0 %v4727_v47  ;;  %2333 = vmatprep.subr.bf16.mxu1 %v4730_v48  ;;  %v4796_v47 = vld [vmem:[%s4981_s20 + $0x754] ss:$8 sps:$4 sm:$0xff]   ;;  %v4791_v48 = vld [vmem:[%s4981_s20 + $0x700] ss:$8 sps:$4 sm:$0xff]  }
  0xc9   : > { %2251 = vmatprep.mubr.bf16.mxu0 %v4939_v0  ;;  %2357 = vmatprep.mubr.bf16.mxu1 %v4939_v0 }
  0xcb   : > { %2228 = vmatpush1.bf16.msra.mxu0 %v4725_v49  ;;  %2334 = vmatpush1.bf16.msra.mxu1 %v4728_v50  ;;  %v4794_v49 = vld [vmem:[%s4981_s20 + $0x750] ss:$8 sps:$4 sm:$0xff]   ;;  %v4799_v50 = vld [vmem:[%s4981_s20 + $0x6f4] ss:$8 sps:$4 sm:$0xff]  }
  0xcc   : > { %2229 = vmatprep.subr.bf16.mxu0 %v4733_v51  ;;  %2335 = vmatprep.subr.bf16.mxu1 %v4736_v52  ;;  %v4802_v51 = vld [vmem:[%s4981_s20 + $0x744] ss:$8 sps:$4 sm:$0xff]   ;;  %v4797_v52 = vld [vmem:[%s4981_s20 + $0x6f0] ss:$8 sps:$4 sm:$0xff]  }
  0xcf   : > { %2230 = vmatpush1.bf16.msra.mxu0 %v4731_v53  ;;  %2336 = vmatpush1.bf16.msra.mxu1 %v4734_v54  ;;  %v4800_v53 = vld [vmem:[%s4981_s20 + $0x740] ss:$8 sps:$4 sm:$0xff]   ;;  %v4805_v54 = vld [vmem:[%s4981_s20 + $0x6e4] ss:$8 sps:$4 sm:$0xff]  }
  0xd0   : > { %2231 = vmatprep.subr.bf16.mxu0 %v4739_v55  ;;  %2337 = vmatprep.subr.bf16.mxu1 %v4742_v56  ;;  %v4808_v55 = vld [vmem:[%s4981_s20 + $0x734] ss:$8 sps:$4 sm:$0xff]   ;;  %v4811_v56 = vld [vmem:[%s4981_s20 + $0x7c4] ss:$8 sps:$4 sm:$0x3f]  }
  0xd3   : > { %2232 = vmatpush1.bf16.msra.mxu0 %v4737_v57  ;;  %2338 = vmatpush1.bf16.msra.mxu1 %v4740_v58  ;;  %v4814_v57 = vld [vmem:[%s4981_s20 + $0x814] ss:$8 sps:$4 sm:$0x3f]  }
  0xd4   : > { %2233 = vmatprep.subr.bf16.mxu0 %v4745_v59  ;;  %2339 = vmatprep.subr.bf16.mxu1 %v4748_v61  ;;  %v4809_v61 = vld [vmem:[%s4981_s20 + $0x7c0] ss:$8 sps:$4 sm:$0x3f]  }
  0xd7   : > { %2234 = vmatpush1.bf16.msra.mxu0 %v4743_v63  ;;  %2340 = vmatpush1.bf16.msra.mxu1 %v4746_v1  ;;  %v5361_v1 = vpop.permute.xlu0 %621 }
  0xd8   : > { %2450 = vmatprep.subr.bf16.mxu0 %v2442_v35  ;;  %2556 = vmatprep.subr.bf16.mxu1 %v2548_v5 }
  0xda   : > { %4152 = vmatmul.mubr.msk.bf16.vlgmr.msra.gmra.mxu0 %vm240_vm2, %v5237_v23  ;;  %4173 = vmatmul.mubr.msk.bf16.vlgmr.msra.gmra.mxu1 %vm240_vm2, %v5237_v23 }
  0xdb   : > { %2451 = vmatpush1.bf16.msra.mxu0 %v2439_v6  ;;  %2557 = vmatpush1.bf16.msra.mxu1 %v2545_v7  ;;  %v2879_v6 = vand.u32 %v4811_v56, %v4983_v4  ;;  %v2985_v7 = vand.u32 %v4814_v57, %v4983_v4  ;;  %v4847_v56 = vld [vmem:[%s4981_s20 + $0x854] ss:$8 sps:$4 sm:$0xff]   ;;  %v4850_v57 = vld [vmem:[%s4981_s20 + $0x8a4] ss:$8 sps:$4 sm:$0xff]  }
  0xdc   : > { %2452 = vmatprep.subr.bf16.mxu0 %v4757_v8  ;;  %2558 = vmatprep.subr.bf16.mxu1 %v4760_v9 }
  0xdd   : > { %2476 = vmatprep.mubr.bf16.mxu0 %v4939_v0  ;;  %2582 = vmatprep.mubr.bf16.mxu1 %v4939_v0 }
  0xdf   : > { %2453 = vmatpush1.bf16.msra.mxu0 %v4755_v10  ;;  %2559 = vmatpush1.bf16.msra.mxu1 %v4758_v11 }
  0xe0   : > { %2454 = vmatprep.subr.bf16.mxu0 %v4763_v12  ;;  %2560 = vmatprep.subr.bf16.mxu1 %v4766_v13  ;;  %v2876_v13 = vand.u32 %v4809_v61, %v4983_v4  ;;  %v4856_v61 = vld [vmem:[%s4981_s20 + $0x894] ss:$8 sps:$4 sm:$0xff]  }
  0xe3   : > { %2455 = vmatpush1.bf16.msra.mxu0 %v4761_v14  ;;  %2561 = vmatpush1.bf16.msra.mxu1 %v4764_v15 }
  0xe4   : > { %2456 = vmatprep.subr.bf16.mxu0 %v4769_v16  ;;  %2562 = vmatprep.subr.bf16.mxu1 %v4772_v17  ;;  %v2982_v16 = vand.u32 %v4812_v3, %v4983_v4  ;;  %v4862_v3 = vld [vmem:[%s4981_s20 + $0x884] ss:$8 sps:$4 sm:$0xff]  }
  0xe6   : > { %v5320_v26 = vpop.f32.mrf.mxu0  ;;  %v5322_v27 = vpop.f32.mrf.mxu1 }
  0xe7   : > { %2457 = vmatpush1.bf16.msra.mxu0 %v4767_v18  ;;  %2563 = vmatpush1.bf16.msra.mxu1 %v4770_v19  ;;  %v613_v62 = vmax.f32 %v5320_v26, %v5322_v27  ;;  %v4817_v19 = vld [vmem:[%s4981_s20 + $0x7b4] ss:$8 sps:$4 sm:$0xff]   ;;  %v4823_v27 = vld [vmem:[%s4981_s20 + $0x7a4] ss:$8 sps:$4 sm:$0xff]  }
  0xe8   : > { %v5327_v31 = vpop.f32.mrf.mxu0  ;;  %v5329_v32 = vpop.f32.mrf.mxu1  ;;  %2458 = vmatprep.subr.bf16.mxu0 %v4775_v20  ;;  %2564 = vmatprep.subr.bf16.mxu1 %v4778_v22  ;;  %v4820_v20 = vld [vmem:[%s4981_s20 + $0x804] ss:$8 sps:$4 sm:$0xff]  }
  0xe9   : > { %v614_v8 = vmax.f32 %v5327_v31, %v5329_v32  ;;  %v4829_v31 = vld [vmem:[%s4981_s20 + $0x794] ss:$8 sps:$4 sm:$0xff]   ;;  %v4832_v32 = vld [vmem:[%s4981_s20 + $0x7e4] ss:$8 sps:$4 sm:$0xff]  }
  0xea   : > { %v292_v36 = vpop.f32.mrf.mxu0  ;;  %v398_v37 = vpop.f32.mrf.mxu1 }
  0xeb   : > { %2459 = vmatpush1.bf16.msra.mxu0 %v4773_v25  ;;  %2565 = vmatpush1.bf16.msra.mxu1 %v4776_v28  ;;  %v4818_v25 = vld [vmem:[%s4981_s20 + $0x800] ss:$8 sps:$4 sm:$0xff]   ;;  %v4826_v28 = vld [vmem:[%s4981_s20 + $0x7f4] ss:$8 sps:$4 sm:$0xff]   ;;  %v4835_v36 = vld [vmem:[%s4981_s20 + $0x784] ss:$8 sps:$4 sm:$0xff]  }
  0xec   : > { %v293_v40 = vpop.f32.mrf.mxu0  ;;  %v399_v41 = vpop.f32.mrf.mxu1  ;;  %2662 = vmatprep.subr.bf16.mxu0 %v2654_v33  ;;  %2768 = vmatprep.subr.bf16.mxu1 %v2760_v34  ;;  %v4827_v33 = vld [vmem:[%s4981_s20 + $0x790] ss:$8 sps:$4 sm:$0xff]   ;;  %v4830_v34 = vld [vmem:[%s4981_s20 + $0x7e0] ss:$8 sps:$4 sm:$0xff]   ;;  %v4838_v37 = vld [vmem:[%s4981_s20 + $0x7d4] ss:$8 sps:$4 sm:$0xff]  }
  0xee   : > { %4196 = vmatmul.mubr.msk.bf16.vlgmr.msra.gmra.mxu0 %vm240_vm2, %v5237_v23  ;;  %4217 = vmatmul.mubr.msk.bf16.vlgmr.msra.gmra.mxu1 %vm240_vm2, %v5237_v23 }
  0xef   : > { %2663 = vmatpush1.bf16.msra.mxu0 %v2651_v38  ;;  %2769 = vmatpush1.bf16.msra.mxu1 %v2757_v39  ;;  %v4841_v38 = vld [vmem:[%s4981_s20 + $0x864] ss:$8 sps:$4 sm:$0x3f]   ;;  %v4844_v39 = vld [vmem:[%s4981_s20 + $0x8b4] ss:$8 sps:$4 sm:$0x3f]  }
  0xf0   : > { %2664 = vmatprep.subr.bf16.mxu0 %v4787_v42  ;;  %2770 = vmatprep.subr.bf16.mxu1 %v4790_v43  ;;  %v4833_v42 = vld [vmem:[%s4981_s20 + $0x780] ss:$8 sps:$4 sm:$0xff]   ;;  %v4836_v43 = vld [vmem:[%s4981_s20 + $0x7d0] ss:$8 sps:$4 sm:$0xff]  }
  0xf1   : > { %2688 = vmatprep.mubr.bf16.mxu0 %v4939_v0  ;;  %2794 = vmatprep.mubr.bf16.mxu1 %v4939_v0 }
  0xf3   : > { %2665 = vmatpush1.bf16.msra.mxu0 %v4785_v44  ;;  %2771 = vmatpush1.bf16.msra.mxu1 %v4788_v45  ;;  %v4839_v44 = vld [vmem:[%s4981_s20 + $0x860] ss:$8 sps:$4 sm:$0x3f]   ;;  %v4842_v45 = vld [vmem:[%s4981_s20 + $0x8b0] ss:$8 sps:$4 sm:$0x3f]  }
  0xf4   : > { %2666 = vmatprep.subr.bf16.mxu0 %v4793_v46  ;;  %2772 = vmatprep.subr.bf16.mxu1 %v4796_v47 }
  0xf7   : > { %2667 = vmatpush1.bf16.msra.mxu0 %v4791_v48  ;;  %2773 = vmatpush1.bf16.msra.mxu1 %v4794_v49  ;;  %v3091_v48 = vand.u32 %v4841_v38, %v4983_v4  ;;  %v3197_v49 = vand.u32 %v4844_v39, %v4983_v4 }
  0xf8   : > { %2668 = vmatprep.subr.bf16.mxu0 %v4799_v50  ;;  %2774 = vmatprep.subr.bf16.mxu1 %v4802_v51 }
  0xfa   : > { %v500_v58 = vpop.f32.mrf.mxu0  ;;  %v606_v59 = vpop.f32.mrf.mxu1 }
  0xfb   : > { %v615_v63 = vmax.f32 %v500_v58, %v606_v59  ;;  %2669 = vmatpush1.bf16.msra.mxu0 %v4797_v52  ;;  %2775 = vmatpush1.bf16.msra.mxu1 %v4800_v53  ;;  %v3088_v52 = vand.u32 %v4839_v44, %v4983_v4  ;;  %v3194_v53 = vand.u32 %v4842_v45, %v4983_v4  ;;  %v4845_v58 = vld [vmem:[%s4981_s20 + $0x850] ss:$8 sps:$4 sm:$0xff]   ;;  %v4848_v59 = vld [vmem:[%s4981_s20 + $0x8a0] ss:$8 sps:$4 sm:$0xff]  }
  0xfc   : > { %v502_v35 = vpop.f32.mrf.mxu0  ;;  %v608_v5 = vpop.f32.mrf.mxu1  ;;  %2670 = vmatprep.subr.bf16.mxu0 %v4805_v54  ;;  %2776 = vmatprep.subr.bf16.mxu1 %v4808_v55  ;;  %v4881_v44 = vld [vmem:[%s4981_s20 + $0x8e0] ss:$8 sps:$4 sm:$0xff]   ;;  %v4884_v45 = vld [vmem:[%s4981_s20 + $0x930] ss:$8 sps:$4 sm:$0xff]  }
  0xfd   : > { %v617_v9 = vmax.f32 %v613_v62, %v615_v63  ;;  %v616_v10 = vmax.f32 %v502_v35, %v608_v5  ;;  %v4851_v62 = vld [vmem:[%s4981_s20 + $0x840] ss:$8 sps:$4 sm:$0xff]   ;;  %v4854_v63 = vld [vmem:[%s4981_s20 + $0x890] ss:$8 sps:$4 sm:$0xff]  }
  0xfe   : > { %v504_v11 = vpop.f32.mrf.mxu0  ;;  %v610_v12 = vpop.f32.mrf.mxu1  ;;  %v4857_v35 = vld [vmem:[%s4981_s20 + $0x830] ss:$8 sps:$4 sm:$0xff]   ;;  %v4860_v5 = vld [vmem:[%s4981_s20 + $0x880] ss:$8 sps:$4 sm:$0xff]  }
  0xff   : > { %v618_v14 = vmax.f32 %v614_v8, %v616_v10  ;;  %v624_v15 = vadd.f32 %v5361_v1, %v617_v9  ;;  %2671 = vmatpush1.bf16.msra.mxu0 %v4803_v60  ;;  %2777 = vmatpush1.bf16.msra.mxu1 %v4806_v2  ;;  %v4853_v60 = vld [vmem:[%s4981_s20 + $0x844] ss:$8 sps:$4 sm:$0xff]   ;;  %v4859_v2 = vld [vmem:[%s4981_s20 + $0x834] ss:$8 sps:$4 sm:$0xff]   ;;  %v4863_v12 = vld [vmem:[%s4981_s20 + $0x820] ss:$8 sps:$4 sm:$0xff]  }
 0x100   : > { %v505_v17 = vpop.f32.mrf.mxu0  ;;  %v611_v18 = vpop.f32.mrf.mxu1  ;;  %2887 = vmatprep.subr.bf16.mxu0 %v2879_v6  ;;  %2993 = vmatprep.subr.bf16.mxu1 %v2985_v7  ;;  %v4865_v6 = vld [vmem:[%s4981_s20 + $0x824] ss:$8 sps:$4 sm:$0xff]   ;;  %v4868_v7 = vld [vmem:[%s4981_s20 + $0x874] ss:$8 sps:$4 sm:$0xff]  }
 0x101   : > { %v626_v21 = vmax.f32 %v624_v15, 0.0  ;;  %v625_v22 = vadd.f32 %v5361_v1, %v618_v14  ;;  %v4871_v8 = vld [vmem:[%s4981_s20 + $0x904] ss:$8 sps:$4 sm:$0x3f]  }
 0x102   : > { %4238 = vmatmul.mubr.msk.bf16.vlgmr.msra.gmra.mxu0 %vm240_vm2, %v5237_v23  ;;  %4259 = vmatmul.mubr.msk.bf16.vlgmr.msra.gmra.mxu1 %vm240_vm2, %v5237_v23  ;;  %v4874_v9 = vld [vmem:[%s4981_s20 + $0x954] ss:$8 sps:$4 sm:$0x3f]   ;;  %v4872_v17 = vld [vmem:[%s4981_s20 + $0x950] ss:$8 sps:$4 sm:$0x3f]  }
 0x103   : > { %628 = vst [vmem:[%s5376_s28] sm:$0x3f] %v626_v21  ;;  %2888 = vmatpush1.bf16.msra.mxu0 %v2876_v13  ;;  %2994 = vmatpush1.bf16.msra.mxu1 %v2982_v16  ;;  %v627_v26 = vmax.f32 %v625_v22, 0.0  ;;  %v4869_v13 = vld [vmem:[%s4981_s20 + $0x900] ss:$8 sps:$4 sm:$0x3f]   ;;  %v3422_v21 = vand.u32 %v4874_v9, %v4983_v4 }
 0x104   : > { %2889 = vmatprep.subr.bf16.mxu0 %v4817_v19  ;;  %2995 = vmatprep.subr.bf16.mxu1 %v4820_v20  ;;  %v4866_v16 = vld [vmem:[%s4981_s20 + $0x870] ss:$8 sps:$4 sm:$0xff]   ;;  %v3316_v20 = vand.u32 %v4871_v8, %v4983_v4  ;;  %v4907_v8 = vld [vmem:[%s4981_s20 + $0x994] ss:$8 sps:$4 sm:$0xff]   ;;  %v4910_v9 = vld [vmem:[%s4981_s20 + $0x9e4] ss:$8 sps:$4 sm:$0xff]  }
 0x105   : > { %2913 = vmatprep.mubr.bf16.mxu0 %v4939_v0  ;;  %3019 = vmatprep.mubr.bf16.mxu1 %v4939_v0  ;;  %630 = vst.msk [vmem:[%s5376_s28 + $0x8] sm:$0x3f] %vm629_vm3, %v627_v26 }
 0x107   : > { %2890 = vmatpush1.bf16.msra.mxu0 %v4815_v24  ;;  %2996 = vmatpush1.bf16.msra.mxu1 %v4818_v25 }
 0x108   : > { %2891 = vmatprep.subr.bf16.mxu0 %v4823_v27  ;;  %2997 = vmatprep.subr.bf16.mxu1 %v4826_v28  ;;  %v3313_v28 = vand.u32 %v4869_v13, %v4983_v4  ;;  %v4914_v13 = vld [vmem:[%s4981_s20 + $0x9d0] ss:$8 sps:$4 sm:$0xff]  }
 0x10b   : > { %2892 = vmatpush1.bf16.msra.mxu0 %v4821_v29  ;;  %2998 = vmatpush1.bf16.msra.mxu1 %v4824_v30 }
 0x10c   : > { %2893 = vmatprep.subr.bf16.mxu0 %v4829_v31  ;;  %2999 = vmatprep.subr.bf16.mxu1 %v4832_v32  ;;  %v3419_v31 = vand.u32 %v4872_v17, %v4983_v4  ;;  %v4920_v17 = vld [vmem:[%s4981_s20 + $0x9c0] ss:$8 sps:$4 sm:$0xff]  }
 0x10e   : > { %v5404_v40 = vpop.f32.mrf.mxu0  ;;  %v5406_v41 = vpop.f32.mrf.mxu1 }
 0x10f   : > { %2894 = vmatpush1.bf16.msra.mxu0 %v4827_v33  ;;  %3000 = vmatpush1.bf16.msra.mxu1 %v4830_v34  ;;  %v1055_v14 = vmax.f32 %v5404_v40, %v5406_v41  ;;  %v4877_v34 = vld [vmem:[%s4981_s20 + $0x8f4] ss:$8 sps:$4 sm:$0xff]   ;;  %v4875_v40 = vld [vmem:[%s4981_s20 + $0x8f0] ss:$8 sps:$4 sm:$0xff]   ;;  %v4878_v41 = vld [vmem:[%s4981_s20 + $0x940] ss:$8 sps:$4 sm:$0xff]  }
 0x110   : > { %v5412_v46 = vpop.f32.mrf.mxu0  ;;  %v5414_v47 = vpop.f32.mrf.mxu1  ;;  %2895 = vmatprep.subr.bf16.mxu0 %v4835_v36  ;;  %3001 = vmatprep.subr.bf16.mxu1 %v4838_v37  ;;  %v4880_v36 = vld [vmem:[%s4981_s20 + $0x944] ss:$8 sps:$4 sm:$0xff]  }
 0x111   : > { %v1056_v22 = vmax.f32 %v5412_v46, %v5414_v47  ;;  %v4889_v46 = vld [vmem:[%s4981_s20 + $0x8d4] ss:$8 sps:$4 sm:$0xff]   ;;  %v4892_v47 = vld [vmem:[%s4981_s20 + $0x924] ss:$8 sps:$4 sm:$0xff]  }
 0x112   : > { %v734_v50 = vpop.f32.mrf.mxu0  ;;  %v840_v51 = vpop.f32.mrf.mxu1 }
 0x113   : > { %2896 = vmatpush1.bf16.msra.mxu0 %v4833_v42  ;;  %3002 = vmatpush1.bf16.msra.mxu1 %v4836_v43  ;;  %v4883_v42 = vld [vmem:[%s4981_s20 + $0x8e4] ss:$8 sps:$4 sm:$0xff]   ;;  %v4886_v43 = vld [vmem:[%s4981_s20 + $0x934] ss:$8 sps:$4 sm:$0xff]  }
 0x114   : > { %v735_v54 = vpop.f32.mrf.mxu0  ;;  %v841_v55 = vpop.f32.mrf.mxu1  ;;  %3099 = vmatprep.subr.bf16.mxu0 %v3091_v48  ;;  %3205 = vmatprep.subr.bf16.mxu1 %v3197_v49  ;;  %v4887_v48 = vld [vmem:[%s4981_s20 + $0x8d0] ss:$8 sps:$4 sm:$0xff]   ;;  %v4890_v49 = vld [vmem:[%s4981_s20 + $0x920] ss:$8 sps:$4 sm:$0xff]   ;;  %v4895_v50 = vld [vmem:[%s4981_s20 + $0x8c4] ss:$8 sps:$4 sm:$0xff]  }
 0x115   : > { %v4898_v51 = vld [vmem:[%s4981_s20 + $0x914] ss:$8 sps:$4 sm:$0xff]  }
 0x116   : > { %4282 = vmatmul.mubr.msk.bf16.vlgmr.msra.gmra.mxu0 %vm240_vm2, %v5237_v23  ;;  %4303 = vmatmul.mubr.msk.bf16.vlgmr.msra.gmra.mxu1 %vm240_vm2, %v5237_v23 }
 0x117   : > { %3100 = vmatpush1.bf16.msra.mxu0 %v3088_v52  ;;  %3206 = vmatpush1.bf16.msra.mxu1 %v3194_v53  ;;  %v4901_v52 = vld [vmem:[%s4981_s20 + $0x9a4] ss:$8 sps:$4 sm:$0x3f]   ;;  %v4904_v53 = vld [vmem:[%s4981_s20 + $0x9f4] ss:$8 sps:$4 sm:$0x3f]  }
 0x118   : > { %3101 = vmatprep.subr.bf16.mxu0 %v4847_v56  ;;  %3207 = vmatprep.subr.bf16.mxu1 %v4850_v57  ;;  %v4893_v56 = vld [vmem:[%s4981_s20 + $0x8c0] ss:$8 sps:$4 sm:$0xff]   ;;  %v4896_v57 = vld [vmem:[%s4981_s20 + $0x910] ss:$8 sps:$4 sm:$0xff]  }
 0x119   : > { %3125 = vmatprep.mubr.bf16.mxu0 %v4939_v0  ;;  %3231 = vmatprep.mubr.bf16.mxu1 %v4939_v0 }
 0x11b   : > { %3102 = vmatpush1.bf16.msra.mxu0 %v4845_v58  ;;  %3208 = vmatpush1.bf16.msra.mxu1 %v4848_v59  ;;  %v4899_v58 = vld [vmem:[%s4981_s20 + $0x9a0] ss:$8 sps:$4 sm:$0x3f]   ;;  %v4902_v59 = vld [vmem:[%s4981_s20 + $0x9f0] ss:$8 sps:$4 sm:$0x3f]  }
 0x11c   : > { %3103 = vmatprep.subr.bf16.mxu0 %v4853_v60  ;;  %3209 = vmatprep.subr.bf16.mxu1 %v4856_v61 }
 0x11f   : > { %3104 = vmatpush1.bf16.msra.mxu0 %v4851_v62  ;;  %3210 = vmatpush1.bf16.msra.mxu1 %v4854_v63  ;;  %v3528_v62 = vand.u32 %v4901_v52, %v4983_v4  ;;  %v3634_v63 = vand.u32 %v4904_v53, %v4983_v4 }
 0x120   : > { %3105 = vmatprep.subr.bf16.mxu0 %v4859_v2  ;;  %3211 = vmatprep.subr.bf16.mxu1 %v4862_v3 }
 0x122   : > { %v942_v10 = vpop.f32.mrf.mxu0  ;;  %v1048_v11 = vpop.f32.mrf.mxu1 }
 0x123   : > { %v1057_v15 = vmax.f32 %v942_v10, %v1048_v11  ;;  %3106 = vmatpush1.bf16.msra.mxu0 %v4857_v35  ;;  %3212 = vmatpush1.bf16.msra.mxu1 %v4860_v5  ;;  %v3525_v35 = vand.u32 %v4899_v58, %v4983_v4  ;;  %v3631_v5 = vand.u32 %v4902_v59, %v4983_v4  ;;  %v4905_v4 = vld [vmem:[%s4981_s20 + $0x990] ss:$8 sps:$4 sm:$0xff]   ;;  %v4908_v10 = vld [vmem:[%s4981_s20 + $0x9e0] ss:$8 sps:$4 sm:$0xff]   ;;  %v4913_v11 = vld [vmem:[%s4981_s20 + $0x984] ss:$8 sps:$4 sm:$0xff]  }
 0x124   : > { %v944_v18 = vpop.f32.mrf.mxu0  ;;  %v1050_v19 = vpop.f32.mrf.mxu1  ;;  %3107 = vmatprep.subr.bf16.mxu0 %v4865_v6  ;;  %3213 = vmatprep.subr.bf16.mxu1 %v4868_v7 }
 0x125   : > { %v1059_v24 = vmax.f32 %v1055_v14, %v1057_v15  ;;  %v1058_v25 = vmax.f32 %v944_v18, %v1050_v19  ;;  %v4919_v14 = vld [vmem:[%s4981_s20 + $0x974] ss:$8 sps:$4 sm:$0xff]   ;;  %v4922_v15 = vld [vmem:[%s4981_s20 + $0x9c4] ss:$8 sps:$4 sm:$0xff]  }
 0x126   : > { %v946_v26 = vpop.f32.mrf.mxu0  ;;  %v1052_v27 = vpop.f32.mrf.mxu1  ;;  %v4925_v18 = vld [vmem:[%s4981_s20 + $0x964] ss:$8 sps:$4 sm:$0xff]   ;;  %v4928_v19 = vld [vmem:[%s4981_s20 + $0x9b4] ss:$8 sps:$4 sm:$0xff]  }
 0x127   : > { %v1061_v29 = vadd.f32 %v1059_v24, %v5361_v1  ;;  %v1060_v30 = vmax.f32 %v1056_v22, %v1058_v25  ;;  %3108 = vmatpush1.bf16.msra.mxu0 %v4863_v12  ;;  %3214 = vmatpush1.bf16.msra.mxu1 %v4866_v16  ;;  %v4916_v12 = vld [vmem:[%s4981_s20 + $0x9d4] ss:$8 sps:$4 sm:$0xff]   ;;  %v4917_v16 = vld [vmem:[%s4981_s20 + $0x970] ss:$8 sps:$4 sm:$0xff]   ;;  %v4923_v24 = vld [vmem:[%s4981_s20 + $0x960] ss:$8 sps:$4 sm:$0xff]  }
 0x128   : > { %v947_v32 = vpop.f32.mrf.mxu0  ;;  %v1053_v33 = vpop.f32.mrf.mxu1  ;;  %3324 = vmatprep.subr.bf16.mxu0 %v3316_v20  ;;  %3430 = vmatprep.subr.bf16.mxu1 %v3422_v21  ;;  %v4926_v25 = vld [vmem:[%s4981_s20 + $0x9b0] ss:$8 sps:$4 sm:$0xff]  }
 0x129   : > { %v1063_v37 = vmax.f32 %v1061_v29, 0.0  ;;  %v1062_v38 = vadd.f32 %v1060_v30, %v5361_v1 }
 0x12a   : > { %4324 = vmatmul.mubr.msk.bf16.vlgmr.msra.gmra.mxu0 %vm240_vm2, %v5237_v23  ;;  %4345 = vmatmul.mubr.msk.bf16.vlgmr.msra.gmra.mxu1 %vm240_vm2, %v5237_v23 }
 0x12b   : > { %3916 = vst [vmem:[%s5376_s28 + $0x10] sm:$0x3f] %v1063_v37  ;;  %v1064_v39 = vmax.f32 %v1062_v38, 0.0  ;;  %3325 = vmatpush1.bf16.msra.mxu0 %v3313_v28  ;;  %3431 = vmatpush1.bf16.msra.mxu1 %v3419_v31 }
 0x12c   : > { %3326 = vmatprep.subr.bf16.mxu0 %v4877_v34  ;;  %3432 = vmatprep.subr.bf16.mxu1 %v4880_v36 }
 0x12d   : > { %3917 = vst.msk [vmem:[%s5376_s28 + $0x18] sm:$0x3f] %vm629_vm3, %v1064_v39  ;;  %3350 = vmatprep.mubr.bf16.mxu0 %v4939_v0  ;;  %3456 = vmatprep.mubr.bf16.mxu1 %v4939_v0 }
 0x12f   : > { %3327 = vmatpush1.bf16.msra.mxu0 %v4875_v40  ;;  %3433 = vmatpush1.bf16.msra.mxu1 %v4878_v41  ;;  %v4930_v40 = vld [vmem:[%s5562_s1] sm:$0x7] }
 0x130   : > { %3328 = vmatprep.subr.bf16.mxu0 %v4883_v42  ;;  %3434 = vmatprep.subr.bf16.mxu1 %v4886_v43 }
 0x133   : > { %3329 = vmatpush1.bf16.msra.mxu0 %v4881_v44  ;;  %3435 = vmatpush1.bf16.msra.mxu1 %v4884_v45 }
 0x134   : > { %3330 = vmatprep.subr.bf16.mxu0 %v4889_v46  ;;  %3436 = vmatprep.subr.bf16.mxu1 %v4892_v47 }
 0x136   : > { %v5481_v54 = vpop.f32.mrf.mxu0  ;;  %v5483_v55 = vpop.f32.mrf.mxu1 }
 0x137   : > { %3331 = vmatpush1.bf16.msra.mxu0 %v4887_v48  ;;  %3437 = vmatpush1.bf16.msra.mxu1 %v4890_v49  ;;  %v1492_v21 = vmax.f32 %v5481_v54, %v5483_v55 }
 0x138   : > { %v5489_v60 = vpop.f32.mrf.mxu0  ;;  %v5491_v61 = vpop.f32.mrf.mxu1  ;;  %3332 = vmatprep.subr.bf16.mxu0 %v4895_v50  ;;  %3438 = vmatprep.subr.bf16.mxu1 %v4898_v51 }
 0x139   : > { %v1493_v28 = vmax.f32 %v5489_v60, %v5491_v61 }
 0x13a   : > { %v1171_v2 = vpop.f32.mrf.mxu0  ;;  %v1277_v3 = vpop.f32.mrf.mxu1 }
 0x13b   : > { %3333 = vmatpush1.bf16.msra.mxu0 %v4893_v56  ;;  %3439 = vmatpush1.bf16.msra.mxu1 %v4896_v57 }
 0x13c   : > { %v1172_v6 = vpop.f32.mrf.mxu0  ;;  %v1278_v7 = vpop.f32.mrf.mxu1  ;;  %3536 = vmatprep.subr.bf16.mxu0 %v3528_v62  ;;  %3642 = vmatprep.subr.bf16.mxu1 %v3634_v63 }
 0x13e   : > { %4368 = vmatmul.mubr.msk.bf16.vlgmr.msra.gmra.mxu0 %vm240_vm2, %v5237_v23  ;;  %4389 = vmatmul.mubr.msk.bf16.vlgmr.msra.gmra.mxu1 %vm240_vm2, %v5237_v23  ;;  %v4911_v23 = vld [vmem:[%s4981_s20 + $0x980] ss:$8 sps:$4 sm:$0xff]  }
 0x13f   : > { %3537 = vmatpush1.bf16.msra.mxu0 %v3525_v35  ;;  %3643 = vmatpush1.bf16.msra.mxu1 %v3631_v5 }
 0x140   : > { %3538 = vmatprep.subr.bf16.mxu0 %v4907_v8  ;;  %3644 = vmatprep.subr.bf16.mxu1 %v4910_v9 }
 0x141   : > { %3562 = vmatprep.mubr.bf16.mxu0 %v4939_v0  ;;  %3668 = vmatprep.mubr.bf16.mxu1 %v4939_v0 }
 0x143   : > { %3539 = vmatpush1.bf16.msra.mxu0 %v4905_v4  ;;  %3645 = vmatpush1.bf16.msra.mxu1 %v4908_v10 }
 0x144   : > { %3540 = vmatprep.subr.bf16.mxu0 %v4913_v11  ;;  %3646 = vmatprep.subr.bf16.mxu1 %v4916_v12 }
 0x147   : > { %3541 = vmatpush1.bf16.msra.mxu0 %v4911_v23  ;;  %3647 = vmatpush1.bf16.msra.mxu1 %v4914_v13 }
 0x148   : > { %3542 = vmatprep.subr.bf16.mxu0 %v4919_v14  ;;  %3648 = vmatprep.subr.bf16.mxu1 %v4922_v15 }
 0x14a   : > { %v1379_v0 = vpop.f32.mrf.mxu0  ;;  %v1485_v20 = vpop.f32.mrf.mxu1 }
 0x14b   : > { %v1494_v22 = vmax.f32 %v1379_v0, %v1485_v20  ;;  %3543 = vmatpush1.bf16.msra.mxu0 %v4917_v16  ;;  %3649 = vmatpush1.bf16.msra.mxu1 %v4920_v17 }
 0x14c   : > { %v1381_v26 = vpop.f32.mrf.mxu0  ;;  %v1487_v27 = vpop.f32.mrf.mxu1  ;;  %3544 = vmatprep.subr.bf16.mxu0 %v4925_v18  ;;  %3650 = vmatprep.subr.bf16.mxu1 %v4928_v19 }
 0x14d   : > { %v1496_v29 = vmax.f32 %v1492_v21, %v1494_v22  ;;  %v1495_v30 = vmax.f32 %v1381_v26, %v1487_v27 }
 0x14e   : > { %v1383_v31 = vpop.f32.mrf.mxu0  ;;  %v1489_v32 = vpop.f32.mrf.mxu1 }
 0x14f   : > { %v1498_v33 = vadd.f32 %v1496_v29, %v5361_v1  ;;  %v1497_v34 = vmax.f32 %v1493_v28, %v1495_v30  ;;  %3545 = vmatpush1.bf16.msra.mxu0 %v4923_v24  ;;  %3651 = vmatpush1.bf16.msra.mxu1 %v4926_v25 }
 0x150   : > { %v1384_v36 = vpop.f32.mrf.mxu0  ;;  %v1490_v37 = vpop.f32.mrf.mxu1 }
 0x151   : > { %v1500_v38 = vmax.f32 %v1498_v33, 0.0  ;;  %v1499_v39 = vadd.f32 %v1497_v34, %v5361_v1 }
 0x152   : > { %4410 = vmatmul.mubr.msk.bf16.vlgmr.msra.gmra.mxu0 %vm240_vm2, %v4930_v40  ;;  %4431 = vmatmul.mubr.msk.bf16.vlgmr.msra.gmra.mxu1 %vm240_vm2, %v4930_v40 }
 0x153   : > { %4002 = vst [vmem:[%s5376_s28 + $0x20] sm:$0x3f] %v1500_v38  ;;  %v1501_v41 = vmax.f32 %v1499_v39, 0.0 }
 0x155   : > { %4003 = vst.msk [vmem:[%s5376_s28 + $0x28] sm:$0x3f] %vm629_vm3, %v1501_v41 }
 0x15e   : > { %v1604_v42 = vpop.f32.mrf.mxu0  ;;  %v1710_v43 = vpop.f32.mrf.mxu1 }
 0x15f   : > { %v1929_v52 = vmax.f32 %v1604_v42, %v1710_v43 }
 0x160   : > { %v1606_v44 = vpop.f32.mrf.mxu0  ;;  %v1712_v45 = vpop.f32.mrf.mxu1 }
 0x161   : > { %v1930_v56 = vmax.f32 %v1606_v44, %v1712_v45 }
 0x162   : > { %v1608_v46 = vpop.f32.mrf.mxu0  ;;  %v1714_v47 = vpop.f32.mrf.mxu1 }
 0x164   : > { %v1609_v48 = vpop.f32.mrf.mxu0  ;;  %v1715_v49 = vpop.f32.mrf.mxu1 }
 0x172   : > { %v1816_v50 = vpop.f32.mrf.mxu0  ;;  %v1922_v51 = vpop.f32.mrf.mxu1 }
 0x173   : > { %v1931_v53 = vmax.f32 %v1816_v50, %v1922_v51 }
 0x174   : > { %v1818_v54 = vpop.f32.mrf.mxu0  ;;  %v1924_v55 = vpop.f32.mrf.mxu1 }
 0x175   : > { %v1933_v57 = vmax.f32 %v1929_v52, %v1931_v53  ;;  %v1932_v58 = vmax.f32 %v1818_v54, %v1924_v55 }
 0x176   : > { %v1820_v59 = vpop.f32.mrf.mxu0  ;;  %v1926_v60 = vpop.f32.mrf.mxu1 }
 0x177   : > { %v1935_v61 = vadd.f32 %v1933_v57, %v5361_v1  ;;  %v1934_v62 = vmax.f32 %v1930_v56, %v1932_v58 }
 0x178   : > { %v1821_v63 = vpop.f32.mrf.mxu0  ;;  %v1927_v2 = vpop.f32.mrf.mxu1 }
 0x179   : > { %v1937_v3 = vmax.f32 %v1935_v61, 0.0  ;;  %v1936_v35 = vadd.f32 %v1934_v62, %v5361_v1 }
 0x17b   : > { %4088 = vst [vmem:[%s5376_s28 + $0x30] sm:$0x3f] %v1937_v3  ;;  %v1938_v5 = vmax.f32 %v1936_v35, 0.0 }
 0x17d   : > { %4089 = vst.msk [vmem:[%s5376_s28 + $0x38] sm:$0x3f] %vm629_vm3, %v1938_v5 }
 0x186   : > { %v2041_v6 = vpop.f32.mrf.mxu0  ;;  %v2147_v7 = vpop.f32.mrf.mxu1 }
 0x187   : > { %v2366_v14 = vmax.f32 %v2041_v6, %v2147_v7 }
 0x188   : > { %v2043_v8 = vpop.f32.mrf.mxu0  ;;  %v2149_v9 = vpop.f32.mrf.mxu1 }
 0x189   : > { %v2367_v18 = vmax.f32 %v2043_v8, %v2149_v9 }
 0x18a   : > { %v2045_v4 = vpop.f32.mrf.mxu0  ;;  %v2151_v10 = vpop.f32.mrf.mxu1 }
 0x18c   : > { %v2046_v11 = vpop.f32.mrf.mxu0  ;;  %v2152_v12 = vpop.f32.mrf.mxu1 }
 0x19a   : > { %v2253_v23 = vpop.f32.mrf.mxu0  ;;  %v2359_v13 = vpop.f32.mrf.mxu1 }
 0x19b   : > { %v2368_v15 = vmax.f32 %v2253_v23, %v2359_v13 }
 0x19c   : > { %v2255_v16 = vpop.f32.mrf.mxu0  ;;  %v2361_v17 = vpop.f32.mrf.mxu1 }
 0x19d   : > { %v2370_v19 = vmax.f32 %v2366_v14, %v2368_v15  ;;  %v2369_v0 = vmax.f32 %v2255_v16, %v2361_v17 }
 0x19e   : > { %v2257_v20 = vpop.f32.mrf.mxu0  ;;  %v2363_v21 = vpop.f32.mrf.mxu1 }
 0x19f   : > { %v2372_v22 = vadd.f32 %v2370_v19, %v5361_v1  ;;  %v2371_v24 = vmax.f32 %v2367_v18, %v2369_v0 }
 0x1a0   : > { %v2258_v25 = vpop.f32.mrf.mxu0  ;;  %v2364_v26 = vpop.f32.mrf.mxu1 }
 0x1a1   : > { %v2374_v27 = vmax.f32 %v2372_v22, 0.0  ;;  %v2373_v28 = vadd.f32 %v2371_v24, %v5361_v1 }
 0x1a3   : > { %4174 = vst [vmem:[%s5376_s28 + $0x40] sm:$0x3f] %v2374_v27  ;;  %v2375_v29 = vmax.f32 %v2373_v28, 0.0 }
 0x1a5   : > { %4175 = vst.msk [vmem:[%s5376_s28 + $0x48] sm:$0x3f] %vm629_vm3, %v2375_v29 }
 0x1ae   : > { %v2478_v30 = vpop.f32.mrf.mxu0  ;;  %v2584_v31 = vpop.f32.mrf.mxu1 }
 0x1af   : > { %v2803_v41 = vmax.f32 %v2478_v30, %v2584_v31 }
 0x1b0   : > { %v2480_v32 = vpop.f32.mrf.mxu0  ;;  %v2586_v33 = vpop.f32.mrf.mxu1 }
 0x1b1   : > { %v2804_v45 = vmax.f32 %v2480_v32, %v2586_v33 }
 0x1b2   : > { %v2482_v34 = vpop.f32.mrf.mxu0  ;;  %v2588_v36 = vpop.f32.mrf.mxu1 }
 0x1b4   : > { %v2483_v37 = vpop.f32.mrf.mxu0  ;;  %v2589_v38 = vpop.f32.mrf.mxu1 }
 0x1c2   : > { %v2690_v39 = vpop.f32.mrf.mxu0  ;;  %v2796_v40 = vpop.f32.mrf.mxu1 }
 0x1c3   : > { %v2805_v42 = vmax.f32 %v2690_v39, %v2796_v40 }
 0x1c4   : > { %v2692_v43 = vpop.f32.mrf.mxu0  ;;  %v2798_v44 = vpop.f32.mrf.mxu1 }
 0x1c5   : > { %v2807_v46 = vmax.f32 %v2803_v41, %v2805_v42  ;;  %v2806_v47 = vmax.f32 %v2692_v43, %v2798_v44 }
 0x1c6   : > { %v2694_v48 = vpop.f32.mrf.mxu0  ;;  %v2800_v49 = vpop.f32.mrf.mxu1 }
 0x1c7   : > { %v2809_v50 = vadd.f32 %v2807_v46, %v5361_v1  ;;  %v2808_v51 = vmax.f32 %v2804_v45, %v2806_v47 }
 0x1c8   : > { %v2695_v52 = vpop.f32.mrf.mxu0  ;;  %v2801_v53 = vpop.f32.mrf.mxu1 }
 0x1c9   : > { %v2811_v54 = vmax.f32 %v2809_v50, 0.0  ;;  %v2810_v55 = vadd.f32 %v2808_v51, %v5361_v1 }
 0x1cb   : > { %4260 = vst [vmem:[%s5376_s28 + $0x50] sm:$0x3f] %v2811_v54  ;;  %v2812_v56 = vmax.f32 %v2810_v55, 0.0 }
 0x1cd   : > { %4261 = vst.msk [vmem:[%s5376_s28 + $0x58] sm:$0x3f] %vm629_vm3, %v2812_v56 }
 0x1d6   : > { %v2915_v57 = vpop.f32.mrf.mxu0  ;;  %v3021_v58 = vpop.f32.mrf.mxu1 }
 0x1d7   : > { %v3240_v5 = vmax.f32 %v2915_v57, %v3021_v58 }
 0x1d8   : > { %v2917_v59 = vpop.f32.mrf.mxu0  ;;  %v3023_v60 = vpop.f32.mrf.mxu1 }
 0x1d9   : > { %v3241_v9 = vmax.f32 %v2917_v59, %v3023_v60 }
 0x1da   : > { %v2919_v61 = vpop.f32.mrf.mxu0  ;;  %v3025_v62 = vpop.f32.mrf.mxu1 }
 0x1dc   : > { %v2920_v63 = vpop.f32.mrf.mxu0  ;;  %v3026_v2 = vpop.f32.mrf.mxu1 }
 0x1ea   : > { %v3127_v3 = vpop.f32.mrf.mxu0  ;;  %v3233_v35 = vpop.f32.mrf.mxu1 }
 0x1eb   : > { %v3242_v6 = vmax.f32 %v3127_v3, %v3233_v35 }
 0x1ec   : > { %v3129_v7 = vpop.f32.mrf.mxu0  ;;  %v3235_v8 = vpop.f32.mrf.mxu1 }
 0x1ed   : > { %v3244_v4 = vmax.f32 %v3240_v5, %v3242_v6  ;;  %v3243_v10 = vmax.f32 %v3129_v7, %v3235_v8 }
 0x1ee   : > { %v3131_v11 = vpop.f32.mrf.mxu0  ;;  %v3237_v12 = vpop.f32.mrf.mxu1 }
 0x1ef   : > { %v3246_v23 = vadd.f32 %v3244_v4, %v5361_v1  ;;  %v3245_v13 = vmax.f32 %v3241_v9, %v3243_v10 }
 0x1f0   : > { %v3132_v14 = vpop.f32.mrf.mxu0  ;;  %v3238_v15 = vpop.f32.mrf.mxu1 }
 0x1f1   : > { %v3248_v16 = vmax.f32 %v3246_v23, 0.0  ;;  %v3247_v17 = vadd.f32 %v3245_v13, %v5361_v1 }
 0x1f3   : > { %4346 = vst [vmem:[%s5376_s28 + $0x60] sm:$0x3f] %v3248_v16  ;;  %v3249_v18 = vmax.f32 %v3247_v17, 0.0 }
 0x1f5   : > { %4347 = vst.msk [vmem:[%s5376_s28 + $0x68] sm:$0x3f] %vm629_vm3, %v3249_v18 }
 0x1fe   : > { %v3352_v19 = vpop.f32.mrf.mxu0  ;;  %v3458_v0 = vpop.f32.mrf.mxu1 }
 0x1ff   : > { %v3677_v29 = vmax.f32 %v3352_v19, %v3458_v0 }
 0x200   : > { %v3354_v20 = vpop.f32.mrf.mxu0  ;;  %v3460_v21 = vpop.f32.mrf.mxu1 }
 0x201   : > { %v3678_v33 = vmax.f32 %v3354_v20, %v3460_v21 }
 0x202   : > { %v3356_v22 = vpop.f32.mrf.mxu0  ;;  %v3462_v24 = vpop.f32.mrf.mxu1 }
 0x204   : > { %v3357_v25 = vpop.f32.mrf.mxu0  ;;  %v3463_v26 = vpop.f32.mrf.mxu1 }
 0x212   : > { %v3564_v27 = vpop.f32.mrf.mxu0  ;;  %v3670_v28 = vpop.f32.mrf.mxu1 }
 0x213   : > { %v3679_v30 = vmax.f32 %v3564_v27, %v3670_v28 }
 0x214   : > { %v3566_v31 = vpop.f32.mrf.mxu0  ;;  %v3672_v32 = vpop.f32.mrf.mxu1 }
 0x215   : > { %v3681_v34 = vmax.f32 %v3677_v29, %v3679_v30  ;;  %v3680_v36 = vmax.f32 %v3566_v31, %v3672_v32 }
 0x216   : > { %v3568_v37 = vpop.f32.mrf.mxu0  ;;  %v3674_v38 = vpop.f32.mrf.mxu1 }
 0x217   : > { %v3683_v39 = vadd.f32 %v3681_v34, %v5361_v1  ;;  %v3682_v40 = vmax.f32 %v3678_v33, %v3680_v36 }
 0x218   : > { %v3569_v41 = vpop.f32.mrf.mxu0  ;;  %v3675_v42 = vpop.f32.mrf.mxu1 }
 0x219   : > { %v3685_v43 = vmax.f32 %v3683_v39, 0.0  ;;  %v3684_v44 = vadd.f32 %v3682_v40, %v5361_v1 }
 0x21b   : > { %4432 = vst [vmem:[%s5376_s28 + $0x70] sm:$0x3f] %v3685_v43  ;;  %v3686_v45 = vmax.f32 %v3684_v44, 0.0 }
 0x21d   : > { %4433 = vst.msk [vmem:[%s5376_s28 + $0x78] sm:$0x3f] %vm629_vm3, %v3686_v45 }
 0x21e PF: > { %s13_s12 = sadd.s32 1, %s4937_s12  }
 0x21f   : > { %p10_p4 = scmp.ge.s32.totalorder %s13_s12, 4  }
 0x221   :  { %12 = sbr.rel (!%p10_p4) target bundleno = 1 (0x1), region = 100 }

// kernel: toynet_forward.5
= control target key start
LH: loop header
LB: loop body
LE: loop exit
PB: predicated region body
PF: predicated region fallthrough
CT: control target
= control target key end

     0   :  { %s2471_s0 = inlined_call_operand.vmem [shape: bf16[16,400], index: 0, kind: input, shape index: {}]   ;;  %s2472_s1 = inlined_call_operand.vmem [shape: bf16[400,120], index: 1, kind: input, shape index: {}]   ;;  %s2473_s2 = inlined_call_operand.vmem [shape: f32[1,120], index: 2, kind: input, shape index: {}]   ;;  %s2474_s3 = inlined_call_operand.vmem [shape: bf16[120,32], index: 3, kind: input, shape index: {}]   ;;  %s2475_s4 = inlined_call_operand.vmem [shape: f32[1,32], index: 4, kind: input, shape index: {}]   ;;  %s2476_s5 = inlined_call_operand.vmem [shape: f32[32,128], index: 5, kind: input, shape index: {}]   ;;  %s2477_s6 = inlined_call_operand.vmem [shape: f32[32,128], index: 6, kind: input, shape index: {}]   ;;  %s2478_s7 = inlined_call_operand.vmem [shape: f32[1,128], index: 7, kind: input, shape index: {}]   ;;  %s2479_s8 = inlined_call_operand.vmem [shape: f32[1,32], index: 8, kind: input, shape index: {}]   ;;  %s2480_s9 = inlined_call_operand.<no memory space> [shape: f32[1,1], index: 9, kind: input, shape index: {}]   ;;  %s2481_s10 = inlined_call_operand.hbm [shape: f32[2,8], index: 10, kind: output, shape index: {}]  }
   0x1   :  { %v15_v0 = vstv %s2480_s9 }
   0x2   :  { %16 = vst [vmem:[#allocation3] sm:$0x1] %v15_v0 }
   0x3   :  { %v1877_v1 = vld [vmem:[%s2472_s1 + $0x78] sm:$0xff]   ;;  %v2034_v2 = vmov 0   ;;  %v1880_v5 = vld [vmem:[%s2472_s1 + $0x70] sm:$0xff]   ;;  %v1883_v8 = vld [vmem:[%s2472_s1 + $0x68] sm:$0xff]   ;;  %vm269_vm0 = vcmask 130048   ;;  %vm429_vm1 = vcmask 1043456  }
   0x4   :  { %314 = vmatprep.subr.bf16.mxu1 %v2034_v2  ;;  %v1878_v3 = vld [vmem:[%s2472_s1 + $0xb8] sm:$0xff]   ;;  %1875 = vset.pattern.permute.xlu1 %v2034_v2  ;;  %v1881_v6 = vld [vmem:[%s2472_s1 + $0xb0] sm:$0xff]   ;;  %v1884_v9 = vld [vmem:[%s2472_s1 + $0xa8] sm:$0xff]   ;;  %v2035_v32 = vmov 0.0  }
   0x5   :  { %1672 = vmatprep.subr.bf16.mxu0 %v1877_v1  ;;  %v1879_v4 = vld [vmem:[%s2472_s1 + $0x38] sm:$0xff]   ;;  %1876 = vset.pattern.permute.xlu0 %v2034_v2  ;;  %v1882_v7 = vld [vmem:[%s2472_s1 + $0x30] sm:$0xff]   ;;  %v1885_v10 = vld [vmem:[%s2472_s1 + $0x28] sm:$0xff]  }
   0x6   :  { %315 = vmatpush1.bf16.msra.mxu1 %v1878_v3  ;;  %1673 = vmatpush3.bf16.msra.mxu0 %v1879_v4  ;;  %v1886_v11 = vld [vmem:[%s2472_s1 + $0x60] sm:$0xff]   ;;  %v1889_v14 = vld [vmem:[%s2472_s1 + $0x58] sm:$0xff]   ;;  %v1892_v17 = vld [vmem:[%s2472_s1 + $0x50] sm:$0xff]  }
   0x7   :  { %316 = vmatprep.subr.bf16.mxu1 %v2034_v2  ;;  %1674 = vmatprep.subr.bf16.mxu0 %v1880_v5  ;;  %v1887_v12 = vld [vmem:[%s2472_s1 + $0xa0] sm:$0xff]   ;;  %v1890_v15 = vld [vmem:[%s2472_s1 + $0x98] sm:$0xff]   ;;  %v1893_v18 = vld [vmem:[%s2472_s1 + $0x90] sm:$0xff]  }
   0x8   :  { %v1888_v13 = vld [vmem:[%s2472_s1 + $0x20] sm:$0xff]   ;;  %v1891_v16 = vld [vmem:[%s2472_s1 + $0x18] sm:$0xff]   ;;  %v1894_v19 = vld [vmem:[%s2472_s1 + $0x10] sm:$0xff]  }
   0x9   :  { %v1895_v20 = vld [vmem:[%s2472_s1 + $0x48] sm:$0xff]   ;;  %v1898_v23 = vld [vmem:[%s2472_s1 + $0x40] sm:$0xff]   ;;  %v1908_v28 = vld [vmem:[%s2474_s3 + $0x38] ss:$0 sps:$4 sm:$0xff]  }
   0xa   :  { %317 = vmatpush1.bf16.msra.mxu1 %v1881_v6  ;;  %1675 = vmatpush3.bf16.msra.mxu0 %v1882_v7  ;;  %v1896_v21 = vld [vmem:[%s2472_s1 + $0x88] sm:$0xff]   ;;  %v1903_v24 = vld [vmem:[%s2471_s0 + $0x4] ss:$16 sps:$4 sm:$0xff]   ;;  %v1901_v29 = vld [vmem:[%s2471_s0] ss:$16 sps:$4 sm:$0xff]   ;;  %v431_v31 = vsel %vm429_vm1, %v1908_v28, 0 }
   0xb   :  { %318 = vmatprep.subr.bf16.mxu1 %v2034_v2  ;;  %1676 = vmatprep.subr.bf16.mxu0 %v1883_v8  ;;  %v1897_v22 = vld [vmem:[%s2472_s1 + $0x8] sm:$0xff]   ;;  %v1899_v25 = vld [vmem:[%s2472_s1 + $0x80] sm:$0xff]  }
   0xc   :  { %v1900_v26 = vld [vmem:[%s2472_s1] sm:$0xff]   ;;  %305 = vmatprep.mubr.bf16.mxu0 %v1903_v24  ;;  %v1907_v27 = vld [vmem:[%s2471_s0 + $0xc] ss:$16 sps:$4 sm:$0xff]   ;;  %v1905_v33 = vld [vmem:[%s2471_s0 + $0x8] ss:$16 sps:$4 sm:$0xff]  }
   0xd   :  { %1633 = vmatprep.mubr.msk.bf16.mxu1 %vm269_vm0, %v1907_v27  ;;  %v1904_v30 = vld [vmem:[%s2472_s1 + $0xc0] sm:$0xff]  }
   0xe   :  { %319 = vmatpush1.bf16.msra.mxu1 %v1884_v9  ;;  %1677 = vmatpush3.bf16.msra.mxu0 %v1885_v10 }
   0xf   :  { %320 = vmatprep.subr.bf16.mxu1 %v2034_v2  ;;  %1678 = vmatprep.subr.bf16.mxu0 %v1886_v11 }
  0x12   :  { %321 = vmatpush1.bf16.msra.mxu1 %v1887_v12  ;;  %1679 = vmatpush3.bf16.msra.mxu0 %v1888_v13 }
  0x13   :  { %322 = vmatprep.subr.bf16.mxu1 %v2034_v2  ;;  %1680 = vmatprep.subr.bf16.mxu0 %v1889_v14 }
  0x16   :  { %323 = vmatpush1.bf16.msra.mxu1 %v1890_v15  ;;  %1681 = vmatpush3.bf16.msra.mxu0 %v1891_v16 }
  0x17   :  { %324 = vmatprep.subr.bf16.mxu1 %v2034_v2  ;;  %1682 = vmatprep.subr.bf16.mxu0 %v1892_v17 }
  0x1a   :  { %325 = vmatpush1.bf16.msra.mxu1 %v1893_v18  ;;  %1683 = vmatpush3.bf16.msra.mxu0 %v1894_v19 }
  0x1b   :  { %326 = vmatprep.subr.bf16.mxu1 %v2034_v2  ;;  %1684 = vmatprep.subr.bf16.mxu0 %v1895_v20 }
  0x1e   :  { %327 = vmatpush1.bf16.msra.mxu1 %v1896_v21  ;;  %1685 = vmatpush3.bf16.msra.mxu0 %v1897_v22 }
  0x1f   :  { %328 = vmatprep.subr.bf16.mxu1 %v2034_v2  ;;  %1686 = vmatprep.subr.bf16.mxu0 %v1898_v23 }
  0x22   :  { %329 = vmatpush1.bf16.msra.mxu1 %v1899_v25  ;;  %1687 = vmatpush3.bf16.msra.mxu0 %v1900_v26 }
  0x23   :  { %344 = vmatprep.subr.bf16.mxu1 %v2034_v2  ;;  %1749 = vmatprep.subr.bf16.mxu0 %v2035_v32 }
  0x24   :  { %17 = vsyncpa [#allocation5], 0  ;;  %v1909_v34 = vld [vmem:[%s2474_s3 + $0x30] sm:$0xff]   ;;  %v1910_v35 = vld [vmem:[%s2474_s3 + $0x28] sm:$0xff]   ;;  %vm2036_vm2 = vmmov 0   ;;  %vm425_vm3 = vcmask 982016   ;;  %v577_v24 = vlaneseq }
  0x25   :  { %306 = vmatmul.mubr.bf16.vlgmr.msra.gmra.mxu0 %v1901_v29  ;;  %v1911_v36 = vld [vmem:[%s2474_s3 + $0x20] sm:$0xff]   ;;  %v1912_v37 = vld [vmem:[%s2474_s3 + $0x18] sm:$0xff]   ;;  %v1913_v38 = vld [vmem:[%s2474_s3 + $0x10] sm:$0xff]   ;;  %vm487_vm4 = vcmask 261120   ;;  %s2038_s18 = smov 32   ;;  %s2039_s9 = smov 96  }
  0x26   :  { %345 = vmatpush2.bf16.msra.mxu1 %v1904_v30  ;;  %1750 = vmatpush3.bf16.msra.mxu0 %v431_v31  ;;  %v1914_v39 = vld [vmem:[%s2474_s3 + $0x8] sm:$0xff]   ;;  %v1915_v40 = vld [vmem:[%s2474_s3] sm:$0xff]   ;;  %v479_v59 = vld [vmem:[%s2476_s5 + $0x18] sm:$0xff]  ;;  %v2307_v25 = vand.u32 127, %v577_v24  ;;  %vm695_vm8 = vcmask 254976   ;;  %vm1587_vm1 = vcmask 58368  }
  0x27   :  { %1751 = vmatprep.subr.bf16.mxu0 %v2035_v32  ;;  %1765 = vmatprep.mubr.msk.bf16.mxu0 %vm2036_vm2, %v2035_v32  ;;  %v1603_v43 = vld [vmem:[%s2473_s2] ss:$0 sm:$0xff]  ;;  %v478_v60 = vld [vmem:[%s2476_s5 + $0x10] sm:$0xff]  ;;  %v477_v61 = vld [vmem:[%s2476_s5 + $0x8] sm:$0xff] }
  0x28   :  { %1769 = vmatprep.subr.mxu1 %v479_v59  ;;  %v476_v62 = vld [vmem:[%s2476_s5] sm:$0xff]  ;;  %v2253_v63 = vld [vmem:[%s2477_s6 + $0x18] sm:$0xff]  ;;  %v2259_v0 = vld [vmem:[%s2477_s6 + $0x10] sm:$0xff]  ;;  %vm579_vm5 = vcmp.ge.s32.totalorder %v2307_v25, 64  ;;  %vm580_vm6 = vcmp.lt.s32.totalorder %v2307_v25, 96  ;;  %vm712_vm9 = vcmp.eq.s32.totalorder %v2307_v25, 0 }
  0x29   :  { %347 = vmatmul.mubr.bf16.vlgmr.msra.gmra.mxu1 %v1905_v33  ;;  %v2266_v1 = vld [vmem:[%s2477_s6 + $0x8] sm:$0xff]  ;;  %v2273_v2 = vld [vmem:[%s2477_s6] sm:$0xff]  ;;  %vm2311_vm7 = vmand %vm579_vm5, %vm580_vm6  ;;  %vm836_vm10 = vcmp.eq.s32.totalorder %v2307_v25, 1  ;;  %vm960_vm11 = vcmp.eq.s32.totalorder %v2307_v25, 2  ;;  %vm1084_vm12 = vcmp.eq.s32.totalorder %v2307_v25, 3  ;;  %vm1208_vm13 = vcmp.eq.s32.totalorder %v2307_v25, 4 }
  0x2a   :  { %1752 = vmatpush3.bf16.msra.mxu0 %v1909_v34  ;;  %1770 = vmatpush3.msra.mxu1 %v479_v59  ;;  %v1634_v3 = vld [vmem:[%s2475_s4] ss:$0 sm:$0xff]  ;;  %vm1332_vm14 = vcmp.eq.s32.totalorder %v2307_v25, 5  ;;  %vm1456_vm15 = vcmp.eq.s32.totalorder %v2307_v25, 6  ;;  %vm1580_vm0 = vcmp.eq.s32.totalorder %v2307_v25, 7 }
  0x2b   :  { %1753 = vmatprep.subr.bf16.mxu0 %v2035_v32  ;;  %1771 = vmatprep.subr.mxu1 %v478_v60  ;;  %v1644_v12 = vld [vmem:[%s2478_s7] ss:$0 sm:$0xff]  ;;  %s2037_s7 = smov 64  }
  0x2c   :  { %1772 = vmatpush3.msra.mxu1 %v478_v60 }
  0x2d   :  { %1773 = vmatprep.subr.mxu1 %v477_v61 }
  0x2e   :  { %1754 = vmatpush3.bf16.msra.mxu0 %v1910_v35  ;;  %1774 = vmatpush3.msra.mxu1 %v477_v61 }
  0x2f   :  { %1755 = vmatprep.subr.bf16.mxu0 %v2035_v32  ;;  %1775 = vmatprep.subr.mxu1 %v476_v62 }
  0x30   :  { %1776 = vmatpush3.msra.mxu1 %v476_v62 }
  0x31   :  { %1780 = vmatprep.subr.mxu1 %v2035_v32 }
  0x32   :  { %1756 = vmatpush3.bf16.msra.mxu0 %v1911_v36 }
  0x33   :  { %1757 = vmatprep.subr.bf16.mxu0 %v2035_v32 }
  0x36   :  { %1758 = vmatpush3.bf16.msra.mxu0 %v1912_v37 }
  0x37   :  { %1759 = vmatprep.subr.bf16.mxu0 %v2035_v32 }
  0x3a   :  { %1760 = vmatpush3.bf16.msra.mxu0 %v1913_v38 }
  0x3b   :  { %1761 = vmatprep.subr.bf16.mxu0 %v2035_v32 }
  0x3e   :  { %1762 = vmatpush3.bf16.msra.mxu0 %v1914_v39 }
  0x3f   :  { %1763 = vmatprep.subr.bf16.mxu0 %v2035_v32 }
  0x42   :  { %1764 = vmatpush3.bf16.msra.mxu0 %v1915_v40 }
  0x43   :  { %1813 = vmatprep.subr.mxu0 %v2035_v32 }
  0xe5   :  { %v1688_v41 = vpop.f32.mrf.mxu0 }
  0xe7   :  { %v1689_v42 = vpop.f32.mrf.mxu0 }
  0xe8   :  { %v1690_v44 = vadd.f32 %v1689_v42, %v1688_v41 }
  0xe9   :  { %v348_v45 = vpop.f32.mrf.mxu1  ;;  %v1691_v46 = vpop.f32.mrf.mxu0 }
  0xea   :  { %v308_v47 = vadd.f32 %v1690_v44, %v1603_v43 }
  0xeb   :  { %v350_v48 = vpop.f32.mrf.mxu1  ;;  %v1692_v49 = vpop.f32.mrf.mxu0 }
  0xec   :  { %v1693_v50 = vadd.f32 %v1692_v49, %v1691_v46  ;;  %v349_v52 = vadd.f32 %v348_v45, %v308_v47 }
  0xed   :  { %v351_v51 = vpop.f32.mrf.mxu1 }
  0xee   :  { %v311_v53 = vadd.f32 %v1693_v50, %v1603_v43  ;;  %v355_v56 = vmax.f32 %v349_v52, 0.0 }
  0xef   :  { %v353_v54 = vpop.f32.mrf.mxu1 }
  0xf0   :  { %v352_v55 = vadd.f32 %v351_v51, %v311_v53 }
  0xf2   :  { %v356_v57 = vmax.f32 %v352_v55, 0.0 }
  0xf4   :  { %v357_v58 = vpack.c.bf16 %v356_v57, %v355_v56 }
  0xf6   :  { %1766 = vmatmul.mubr.msk.bf16.vlgmr.msra.gmra.mxu0 %vm425_vm3, %v357_v58 }
  0xf7   :  { %1821 = vmatprep.mubr.msk.f32.mxu0 %vm2036_vm2, %v2035_v32  ;;  %1814 = vmatpush3.msra.mxu0 %v2253_v63 }
  0xf8   :  { %1815 = vmatprep.subr.mxu0 %v2035_v32 }
  0xf9   :  { %1816 = vmatpush3.msra.mxu0 %v2259_v0 }
  0xfa   :  { %1817 = vmatprep.subr.mxu0 %v2035_v32 }
  0xfb   :  { %1818 = vmatpush3.msra.mxu0 %v2266_v1 }
  0xfc   :  { %1819 = vmatprep.subr.mxu0 %v2035_v32 }
  0xfd   :  { %1820 = vmatpush3.msra.mxu0 %v2273_v2 }
  0xfe   :  { %1835 = vmatprep.subr.mxu0 %v2035_v32 }
 0x1b6   :  { %v467_v4 = vpop.f32.mrf.mxu0 }
 0x1b7   :  { %v468_v5 = vadd.f32 %v1634_v3, %v467_v4 }
 0x1b8   :  { %v1767_v6 = vpop.f32.mrf.mxu0 }
 0x1b9   :  { %v474_v7 = vmax.f32 %v468_v5, 0.0 }
 0x1ba   :  { %v470_v8 = vpop.f32.mrf.mxu0 }
 0x1bb   :  { %v471_v9 = vadd.f32 %v1634_v3, %v470_v8  ;;  %1777 = vmatprep.mubr.msk.f32.mxu1 %vm487_vm4, %v474_v7 }
 0x1bc   :  { %v1768_v10 = vpop.f32.mrf.mxu0 }
 0x1bd   :  { %v475_v11 = vmax.f32 %v471_v9, 0.0 }
 0x1bf   :  { %1778 = vmatmul.mubr.msk.f32.vlgmr.msra.gmra.mxu1 %vm487_vm4, %v475_v11 }
 0x1c0   :  { %1781 = vmatpush3.msra.mxu1 %v2253_v63  ;;  %1788 = vmatprep.mubr.msk.f32.mxu1 %vm2036_vm2, %v2035_v32 }
 0x1c1   :  { %1782 = vmatprep.subr.mxu1 %v2035_v32 }
 0x1c2   :  { %1783 = vmatpush3.msra.mxu1 %v2259_v0 }
 0x1c3   :  { %1784 = vmatprep.subr.mxu1 %v2035_v32 }
 0x1c4   :  { %1785 = vmatpush3.msra.mxu1 %v2266_v1 }
 0x1c5   :  { %1786 = vmatprep.subr.mxu1 %v2035_v32 }
 0x1c6   :  { %1787 = vmatpush3.msra.mxu1 %v2273_v2 }
 0x1c7   :  { %1789 = vmatmul.mubr.f32.vlgmr.msra.gmra.mxu1 %v2035_v32  ;;  %1791 = vmatprep.subr.mxu1 %v2035_v32 }
 0x1c8   :  { %1792 = vmatpush3.msra.mxu1 %v2253_v63  ;;  %1799 = vmatprep.mubr.msk.f32.mxu1 %vm2036_vm2, %v2035_v32 }
 0x1c9   :  { %1793 = vmatprep.subr.mxu1 %v2035_v32 }
 0x1ca   :  { %1794 = vmatpush3.msra.mxu1 %v2259_v0 }
 0x1cb   :  { %1795 = vmatprep.subr.mxu1 %v2035_v32 }
 0x1cc   :  { %1796 = vmatpush3.msra.mxu1 %v2266_v1 }
 0x1cd   :  { %1797 = vmatprep.subr.mxu1 %v2035_v32 }
 0x1ce   :  { %1798 = vmatpush3.msra.mxu1 %v2273_v2 }
 0x1cf   :  { %1802 = vmatprep.subr.mxu1 %v2035_v32 }
 0x27f   :  { %v1779_v13 = vpop.f32.mrf.mxu1 }
 0x280   :  { %v566_v14 = vadd.f32 %v1779_v13, %v1644_v12 }
 0x281   :  { %v560_v15 = vpop.f32.mrf.mxu1 }
 0x282   :  { %570 = vst [vmem:[#allocation2 + $0x8] sm:$0xff] %v566_v14  ;;  %v561_v16 = vadd.f32 %v1644_v12, %v560_v15 }
 0x284   :  { %569 = vst [vmem:[#allocation2] sm:$0xff] %v561_v16 }
 0x287   :  { %v652_v17 = vpop.f32.mrf.mxu1 }
 0x289   :  { %v1790_v18 = vpop.f32.mrf.mxu1 }
 0x28b   :  { %v582_v19 = vld [vmem:[#allocation2] sm:$0x3]  ;;  %v719_v40 = vld [vmem:[#allocation2 + $0x2] sm:$0x3]  ;;  %v843_v59 = vld [vmem:[#allocation2 + $0x4] sm:$0x3] }
 0x28c   :  { %v656_v20 = vadd.f32 %v652_v17, %v582_v19  ;;  %v967_v18 = vld [vmem:[#allocation2 + $0x6] sm:$0x3] }
 0x28e   :  { %v1647_v21 = vmul.f32 -1.442695, %v656_v20 }
 0x290   :  { %1916 = vpow2.f32 %v1647_v21 }
 0x291   :  { %1918 = vtanh.f32 %v656_v20 }
 0x29d   :  { %v1917_v22 = vpop.eup %1916 }
 0x29e   :  { %v661_v23 = vadd.f32 1.0, %v1917_v22  ;;  %v1919_v27 = vpop.eup %1918 }
 0x2a0   :  { %1920 = vrcp.f32 %v661_v23 }
 0x2ad   :  { %v1921_v28 = vpop.eup %1920 }
 0x2ae   :  { %v664_v29 = vsel %vm2311_vm7, %v1919_v27, %v1921_v28 }
 0x2af   :  { %667 = vrot.lane.b32.xlu0 %v664_v29, %s2037_s7  ;;  %v665_v33 = vmul.f32 0.0, %v664_v29 }
 0x321   :  { %v668_v30 = vpop.permute.xlu0 %667 }
 0x322   :  { %v670_v31 = vmul.f32 %v668_v30, %v664_v29 }
 0x324   :  { %672 = vrot.lane.b32.xlu0 %v670_v31, %s2038_s18 }
 0x396   :  { %v673_v34 = vpop.permute.xlu0 %672 }
 0x397   :  { %v675_v35 = vadd.f32 %v673_v34, %v665_v33 }
 0x399   :  { %1922 = vtanh.f32 %v675_v35 }
 0x3a6   :  { %v1923_v36 = vpop.eup %1922 }
 0x3a7   :  { %678 = vrot.lane.b32.xlu1 %v1923_v36, %s2037_s7 }
 0x419   :  { %v679_v37 = vpop.permute.xlu1 %678 }
 0x41a   :  { %v2320_v38 = vmul.f32 %v679_v37, %v664_v29 }
 0x41c   :  { %721 = vrot.lane.b32.xlu1 %v2320_v38, %s2038_s18 }
 0x48e   :  { %v722_v39 = vpop.permute.xlu1 %721 }
 0x48f   :  { %1800 = vmatmul.mubr.msk.f32.vlgmr.msra.gmra.mxu1 %vm487_vm4, %v722_v39 }
 0x490   :  { %1803 = vmatpush3.msra.mxu1 %v2253_v63  ;;  %1810 = vmatprep.mubr.msk.f32.mxu1 %vm2036_vm2, %v2035_v32 }
 0x491   :  { %1804 = vmatprep.subr.mxu1 %v2035_v32 }
 0x492   :  { %1805 = vmatpush3.msra.mxu1 %v2259_v0 }
 0x493   :  { %1806 = vmatprep.subr.mxu1 %v2035_v32 }
 0x494   :  { %1807 = vmatpush3.msra.mxu1 %v2266_v1 }
 0x495   :  { %1808 = vmatprep.subr.mxu1 %v2035_v32 }
 0x496   :  { %1809 = vmatpush3.msra.mxu1 %v2273_v2 }
 0x497   :  { %1824 = vmatprep.subr.mxu1 %v2035_v32 }
 0x54f   :  { %v791_v41 = vpop.f32.mrf.mxu1 }
 0x550   :  { %v795_v42 = vadd.f32 %v791_v41, %v719_v40  ;;  %v1091_v41 = vld [vmem:[#allocation2 + $0x8] sm:$0x3] }
 0x551   :  { %v1801_v43 = vpop.f32.mrf.mxu1 }
 0x552   :  { %v1652_v44 = vmul.f32 -1.442695, %v795_v42 }
 0x554   :  { %1924 = vpow2.f32 %v1652_v44 }
 0x555   :  { %1926 = vtanh.f32 %v795_v42 }
 0x561   :  { %v1925_v45 = vpop.eup %1924 }
 0x562   :  { %v800_v46 = vadd.f32 1.0, %v1925_v45  ;;  %v1927_v47 = vpop.eup %1926 }
 0x564   :  { %1928 = vrcp.f32 %v800_v46 }
 0x571   :  { %v1929_v48 = vpop.eup %1928 }
 0x572   :  { %v803_v49 = vsel %vm2311_vm7, %v1927_v47, %v1929_v48 }
 0x573   :  { %806 = vrot.lane.b32.xlu0 %v803_v49, %s2037_s7  ;;  %v804_v52 = vmul.f32 %v803_v49, %v675_v35 }
 0x5e5   :  { %v807_v50 = vpop.permute.xlu0 %806 }
 0x5e6   :  { %v809_v51 = vmul.f32 %v807_v50, %v803_v49 }
 0x5e8   :  { %811 = vrot.lane.b32.xlu1 %v809_v51, %s2038_s18 }
 0x65a   :  { %v812_v53 = vpop.permute.xlu1 %811 }
 0x65b   :  { %v814_v54 = vadd.f32 %v812_v53, %v804_v52 }
 0x65d   :  { %1930 = vtanh.f32 %v814_v54 }
 0x66a   :  { %v1931_v55 = vpop.eup %1930 }
 0x66b   :  { %817 = vrot.lane.b32.xlu0 %v1931_v55, %s2037_s7 }
 0x6dd   :  { %v818_v56 = vpop.permute.xlu0 %817 }
 0x6de   :  { %v2340_v57 = vmul.f32 %v818_v56, %v803_v49 }
 0x6e0   :  { %845 = vrot.lane.b32.xlu1 %v2340_v57, %s2038_s18 }
 0x752   :  { %v846_v58 = vpop.permute.xlu1 %845 }
 0x753   :  { %1811 = vmatmul.mubr.msk.f32.vlgmr.msra.gmra.mxu1 %vm487_vm4, %v846_v58 }
 0x754   :  { %1825 = vmatpush3.msra.mxu1 %v2253_v63  ;;  %1832 = vmatprep.mubr.msk.f32.mxu1 %vm2036_vm2, %v2035_v32 }
 0x755   :  { %1826 = vmatprep.subr.mxu1 %v2035_v32 }
 0x756   :  { %1827 = vmatpush3.msra.mxu1 %v2259_v0 }
 0x757   :  { %1828 = vmatprep.subr.mxu1 %v2035_v32 }
 0x758   :  { %1829 = vmatpush3.msra.mxu1 %v2266_v1 }
 0x759   :  { %1830 = vmatprep.subr.mxu1 %v2035_v32 }
 0x75a   :  { %1831 = vmatpush3.msra.mxu1 %v2273_v2 }
 0x75b   :  { %1846 = vmatprep.subr.mxu1 %v2035_v32 }
 0x813   :  { %v915_v60 = vpop.f32.mrf.mxu1 }
 0x814   :  { %v919_v61 = vadd.f32 %v915_v60, %v843_v59 }
 0x815   :  { %v1812_v62 = vpop.f32.mrf.mxu1 }
 0x816   :  { %v1655_v3 = vmul.f32 -1.442695, %v919_v61 }
 0x818   :  { %1932 = vpow2.f32 %v1655_v3 }
 0x819   :  { %1934 = vtanh.f32 %v919_v61  ;;  %v1215_v61 = vld [vmem:[#allocation2 + $0xa] sm:$0x3] }
 0x825   :  { %v1933_v4 = vpop.eup %1932 }
 0x826   :  { %v924_v5 = vadd.f32 1.0, %v1933_v4  ;;  %v1935_v6 = vpop.eup %1934 }
 0x828   :  { %1936 = vrcp.f32 %v924_v5 }
 0x835   :  { %v1937_v7 = vpop.eup %1936 }
 0x836   :  { %v927_v8 = vsel %vm2311_vm7, %v1935_v6, %v1937_v7 }
 0x837   :  { %930 = vrot.lane.b32.xlu0 %v927_v8, %s2037_s7  ;;  %v928_v11 = vmul.f32 %v927_v8, %v814_v54 }
 0x8a9   :  { %v931_v9 = vpop.permute.xlu0 %930 }
 0x8aa   :  { %v933_v10 = vmul.f32 %v931_v9, %v927_v8 }
 0x8ac   :  { %935 = vrot.lane.b32.xlu1 %v933_v10, %s2038_s18 }
 0x91e   :  { %v936_v12 = vpop.permute.xlu1 %935 }
 0x91f   :  { %v938_v13 = vadd.f32 %v936_v12, %v928_v11 }
 0x921   :  { %1938 = vtanh.f32 %v938_v13 }
 0x92e   :  { %v1939_v14 = vpop.eup %1938 }
 0x92f   :  { %941 = vrot.lane.b32.xlu0 %v1939_v14, %s2037_s7 }
 0x9a1   :  { %v942_v15 = vpop.permute.xlu0 %941 }
 0x9a2   :  { %v2360_v16 = vmul.f32 %v942_v15, %v927_v8  ;;  %v1339_v15 = vld [vmem:[#allocation2 + $0xc] sm:$0x3] }
 0x9a4   :  { %969 = vrot.lane.b32.xlu1 %v2360_v16, %s2038_s18 }
 0xa16   :  { %v970_v17 = vpop.permute.xlu1 %969 }
 0xa17   :  { %1822 = vmatmul.mubr.msk.f32.vlgmr.msra.gmra.mxu0 %vm487_vm4, %v970_v17 }
 0xa18   :  { %1836 = vmatpush3.msra.mxu0 %v2253_v63  ;;  %1843 = vmatprep.mubr.msk.f32.mxu0 %vm2036_vm2, %v2035_v32 }
 0xa19   :  { %1837 = vmatprep.subr.mxu0 %v2035_v32 }
 0xa1a   :  { %1838 = vmatpush3.msra.mxu0 %v2259_v0 }
 0xa1b   :  { %1839 = vmatprep.subr.mxu0 %v2035_v32 }
 0xa1c   :  { %1840 = vmatpush3.msra.mxu0 %v2266_v1 }
 0xa1d   :  { %1841 = vmatprep.subr.mxu0 %v2035_v32 }
 0xa1e   :  { %1842 = vmatpush3.msra.mxu0 %v2273_v2 }
 0xa1f   :  { %1857 = vmatprep.subr.mxu0 %v2035_v32 }
 0xad7   :  { %v1039_v19 = vpop.f32.mrf.mxu0 }
 0xad8   :  { %v1043_v20 = vadd.f32 %v1039_v19, %v967_v18 }
 0xad9   :  { %v1823_v21 = vpop.f32.mrf.mxu0 }
 0xada   :  { %v1658_v22 = vmul.f32 -1.442695, %v1043_v20 }
 0xadc   :  { %1940 = vpow2.f32 %v1658_v22 }
 0xadd   :  { %1942 = vtanh.f32 %v1043_v20 }
 0xae9   :  { %v1941_v23 = vpop.eup %1940 }
 0xaea   :  { %v1048_v24 = vadd.f32 1.0, %v1941_v23  ;;  %v1943_v27 = vpop.eup %1942 }
 0xaec   :  { %1944 = vrcp.f32 %v1048_v24 }
 0xaf9   :  { %v1945_v28 = vpop.eup %1944 }
 0xafa   :  { %v1051_v29 = vsel %vm2311_vm7, %v1943_v27, %v1945_v28 }
 0xafb   :  { %1054 = vrot.lane.b32.xlu0 %v1051_v29, %s2037_s7  ;;  %v1052_v33 = vmul.f32 %v1051_v29, %v938_v13 }
 0xb6d   :  { %v1055_v30 = vpop.permute.xlu0 %1054 }
 0xb6e   :  { %v1057_v31 = vmul.f32 %v1055_v30, %v1051_v29 }
 0xb70   :  { %1059 = vrot.lane.b32.xlu1 %v1057_v31, %s2038_s18 }
 0xbe2   :  { %v1060_v34 = vpop.permute.xlu1 %1059 }
 0xbe3   :  { %v1062_v35 = vadd.f32 %v1060_v34, %v1052_v33 }
 0xbe5   :  { %1946 = vtanh.f32 %v1062_v35 }
 0xbf2   :  { %v1947_v36 = vpop.eup %1946 }
 0xbf3   :  { %1065 = vrot.lane.b32.xlu0 %v1947_v36, %s2037_s7 }
 0xc65   :  { %v1066_v37 = vpop.permute.xlu0 %1065 }
 0xc66   :  { %v2380_v39 = vmul.f32 %v1066_v37, %v1051_v29 }
 0xc68   :  { %1093 = vrot.lane.b32.xlu1 %v2380_v39, %s2038_s18 }
 0xcda   :  { %v1094_v40 = vpop.permute.xlu1 %1093 }
 0xcdb   :  { %1833 = vmatmul.mubr.msk.f32.vlgmr.msra.gmra.mxu1 %vm487_vm4, %v1094_v40  ;;  %v1463_v40 = vld [vmem:[#allocation2 + $0xe] sm:$0x3] }
 0xcdc   :  { %1847 = vmatpush3.msra.mxu1 %v2253_v63  ;;  %1854 = vmatprep.mubr.msk.f32.mxu1 %vm2036_vm2, %v2035_v32 }
 0xcdd   :  { %1848 = vmatprep.subr.mxu1 %v2035_v32 }
 0xcde   :  { %1849 = vmatpush3.msra.mxu1 %v2259_v0 }
 0xcdf   :  { %1850 = vmatprep.subr.mxu1 %v2035_v32 }
 0xce0   :  { %1851 = vmatpush3.msra.mxu1 %v2266_v1 }
 0xce1   :  { %1852 = vmatprep.subr.mxu1 %v2035_v32 }
 0xce2   :  { %1853 = vmatpush3.msra.mxu1 %v2273_v2 }
 0xd9b   :  { %v1163_v42 = vpop.f32.mrf.mxu1 }
 0xd9c   :  { %v1167_v43 = vadd.f32 %v1163_v42, %v1091_v41 }
 0xd9d   :  { %v1834_v44 = vpop.f32.mrf.mxu1 }
 0xd9e   :  { %v1661_v45 = vmul.f32 -1.442695, %v1167_v43 }
 0xda0   :  { %1948 = vpow2.f32 %v1661_v45 }
 0xda1   :  { %1950 = vtanh.f32 %v1167_v43 }
 0xdad   :  { %v1949_v46 = vpop.eup %1948 }
 0xdae   :  { %v1172_v47 = vadd.f32 1.0, %v1949_v46  ;;  %v1951_v48 = vpop.eup %1950 }
 0xdb0   :  { %1952 = vrcp.f32 %v1172_v47 }
 0xdbd   :  { %v1953_v49 = vpop.eup %1952 }
 0xdbe   :  { %v1175_v50 = vsel %vm2311_vm7, %v1951_v48, %v1953_v49 }
 0xdbf   :  { %1178 = vrot.lane.b32.xlu0 %v1175_v50, %s2037_s7  ;;  %v1176_v53 = vmul.f32 %v1175_v50, %v1062_v35 }
 0xe31   :  { %v1179_v51 = vpop.permute.xlu0 %1178 }
 0xe32   :  { %v1181_v52 = vmul.f32 %v1179_v51, %v1175_v50 }
 0xe34   :  { %1183 = vrot.lane.b32.xlu1 %v1181_v52, %s2038_s18 }
 0xea6   :  { %v1184_v54 = vpop.permute.xlu1 %1183 }
 0xea7   :  { %v1186_v55 = vadd.f32 %v1184_v54, %v1176_v53 }
 0xea9   :  { %1954 = vtanh.f32 %v1186_v55 }
 0xeb6   :  { %v1955_v56 = vpop.eup %1954 }
 0xeb7   :  { %1189 = vrot.lane.b32.xlu0 %v1955_v56, %s2037_s7 }
 0xf29   :  { %v1190_v58 = vpop.permute.xlu0 %1189 }
 0xf2a   :  { %v2399_v59 = vmul.f32 %v1190_v58, %v1175_v50  ;;  %v1648_v50 = vld [vmem:[%s2479_s8] ss:$0 sm:$0xff]  ;;  %s2040_s8 = smov [#allocation4]  }
 0xf2b   :  { %s1595_s21 = sshll.u32 %s2040_s8, 4  ;;  %s1596_s21 = int_to_ptr.vmem [resolvable:$true] %s1595_s21 }
 0xf2c   :  { %1217 = vrot.lane.b32.xlu1 %v2399_v59, %s2038_s18  ;;  %s2012_s22 = scalar_lea.vmem %s1596_s21, 32  ;;  %p2017_p1 = scmp.lt.s32.totalorder %s1596_s21, %s1596_s21 }
 0xf2d   :  { %p2013_p0 = scmp.ne.s32.totalorder %s1596_s21, %s2012_s22  ;;  %p2018_p2 = scmp.lt.s32.totalorder %s2012_s22, %s2012_s22 }
 0xf2f   :  { %p2019_p3 = por %p2018_p2, %p2017_p1 }
 0xf31   :  { %p2020_p4 = pnand %p2019_p3, %p2013_p0 }
 0xf9e   :  { %v1218_v60 = vpop.permute.xlu1 %1217 }
 0xf9f   :  { %1844 = vmatmul.mubr.msk.f32.vlgmr.msra.gmra.mxu0 %vm487_vm4, %v1218_v60 }
 0xfa0   :  { %1858 = vmatpush3.msra.mxu0 %v2253_v63  ;;  %1865 = vmatprep.mubr.msk.f32.mxu0 %vm2036_vm2, %v2035_v32 }
 0xfa1   :  { %1859 = vmatprep.subr.mxu0 %v2035_v32 }
 0xfa2   :  { %1860 = vmatpush3.msra.mxu0 %v2259_v0 }
 0xfa3   :  { %1861 = vmatprep.subr.mxu0 %v2035_v32 }
 0xfa4   :  { %1862 = vmatpush3.msra.mxu0 %v2266_v1 }
 0xfa5   :  { %1863 = vmatprep.subr.mxu0 %v2035_v32 }
 0xfa6   :  { %1864 = vmatpush3.msra.mxu0 %v2273_v2 }
0x105f   :  { %v1287_v62 = vpop.f32.mrf.mxu0 }
0x1060   :  { %v1291_v3 = vadd.f32 %v1287_v62, %v1215_v61 }
0x1061   :  { %v1845_v4 = vpop.f32.mrf.mxu0 }
0x1062   :  { %v1664_v63 = vmul.f32 -1.442695, %v1291_v3 }
0x1064   :  { %1956 = vpow2.f32 %v1664_v63 }
0x1065   :  { %1958 = vtanh.f32 %v1291_v3 }
0x1071   :  { %v1957_v5 = vpop.eup %1956 }
0x1072   :  { %v1296_v6 = vadd.f32 1.0, %v1957_v5  ;;  %v1959_v7 = vpop.eup %1958 }
0x1074   :  { %1960 = vrcp.f32 %v1296_v6 }
0x1081   :  { %v1961_v0 = vpop.eup %1960 }
0x1082   :  { %v1299_v8 = vsel %vm2311_vm7, %v1959_v7, %v1961_v0 }
0x1083   :  { %1302 = vrot.lane.b32.xlu0 %v1299_v8, %s2037_s7  ;;  %v1300_v2 = vmul.f32 %v1299_v8, %v1186_v55 }
0x10f5   :  { %v1303_v32 = vpop.permute.xlu0 %1302 }
0x10f6   :  { %v1305_v1 = vmul.f32 %v1303_v32, %v1299_v8 }
0x10f8   :  { %1307 = vrot.lane.b32.xlu1 %v1305_v1, %s2038_s18 }
0x116a   :  { %v1308_v9 = vpop.permute.xlu1 %1307 }
0x116b   :  { %v1310_v10 = vadd.f32 %v1308_v9, %v1300_v2 }
0x116d   :  { %1962 = vtanh.f32 %v1310_v10 }
0x117a   :  { %v1963_v11 = vpop.eup %1962 }
0x117b   :  { %1313 = vrot.lane.b32.xlu0 %v1963_v11, %s2037_s7 }
0x11ed   :  { %v1314_v12 = vpop.permute.xlu0 %1313 }
0x11ee   :  { %v2418_v13 = vmul.f32 %v1314_v12, %v1299_v8 }
0x11f0   :  { %1341 = vrot.lane.b32.xlu1 %v2418_v13, %s2038_s18 }
0x1262   :  { %v1342_v14 = vpop.permute.xlu1 %1341 }
0x1263   :  { %1855 = vmatmul.mubr.msk.f32.vlgmr.msra.gmra.mxu1 %vm487_vm4, %v1342_v14 }
0x1323   :  { %v1411_v17 = vpop.f32.mrf.mxu1 }
0x1324   :  { %v1415_v18 = vadd.f32 %v1411_v17, %v1339_v15 }
0x1325   :  { %v1856_v19 = vpop.f32.mrf.mxu1 }
0x1326   :  { %v1667_v20 = vmul.f32 -1.442695, %v1415_v18 }
0x1328   :  { %1964 = vpow2.f32 %v1667_v20 }
0x1329   :  { %1966 = vtanh.f32 %v1415_v18 }
0x1335   :  { %v1965_v21 = vpop.eup %1964 }
0x1336   :  { %v1420_v22 = vadd.f32 1.0, %v1965_v21  ;;  %v1967_v23 = vpop.eup %1966 }
0x1338   :  { %1968 = vrcp.f32 %v1420_v22 }
0x1345   :  { %v1969_v24 = vpop.eup %1968 }
0x1346   :  { %v1423_v27 = vsel %vm2311_vm7, %v1967_v23, %v1969_v24 }
0x1347   :  { %1426 = vrot.lane.b32.xlu0 %v1423_v27, %s2037_s7  ;;  %v1424_v30 = vmul.f32 %v1423_v27, %v1310_v10 }
0x13b9   :  { %v1427_v28 = vpop.permute.xlu0 %1426 }
0x13ba   :  { %v1429_v29 = vmul.f32 %v1427_v28, %v1423_v27 }
0x13bc   :  { %1431 = vrot.lane.b32.xlu1 %v1429_v29, %s2038_s18 }
0x142e   :  { %v1432_v31 = vpop.permute.xlu1 %1431 }
0x142f   :  { %v1434_v33 = vadd.f32 %v1432_v31, %v1424_v30 }
0x1431   :  { %1970 = vtanh.f32 %v1434_v33 }
0x143e   :  { %v1971_v34 = vpop.eup %1970 }
0x143f   :  { %1437 = vrot.lane.b32.xlu0 %v1971_v34, %s2037_s7 }
0x14b1   :  { %v1438_v35 = vpop.permute.xlu0 %1437 }
0x14b2   :  { %v1440_v36 = vmul.f32 %v1438_v35, %v1423_v27 }
0x14b4   :  { %1465 = vrot.lane.b32.xlu1 %v1440_v36, %s2038_s18 }
0x1526   :  { %v1466_v37 = vpop.permute.xlu1 %1465 }
0x1527   :  { %1866 = vmatmul.mubr.msk.f32.vlgmr.msra.gmra.mxu0 %vm487_vm4, %v1466_v37 }
0x15e7   :  { %v1535_v41 = vpop.f32.mrf.mxu0 }
0x15e8   :  { %v1539_v42 = vadd.f32 %v1535_v41, %v1463_v40 }
0x15e9   :  { %v1867_v43 = vpop.f32.mrf.mxu0 }
0x15ea   :  { %v1670_v44 = vmul.f32 -1.442695, %v1539_v42 }
0x15ec   :  { %1972 = vpow2.f32 %v1670_v44 }
0x15ed   :  { %1974 = vtanh.f32 %v1539_v42 }
0x15f9   :  { %v1973_v45 = vpop.eup %1972 }
0x15fa   :  { %v1544_v46 = vadd.f32 1.0, %v1973_v45  ;;  %v1975_v47 = vpop.eup %1974 }
0x15fc   :  { %1976 = vrcp.f32 %v1544_v46 }
0x1609   :  { %v1977_v48 = vpop.eup %1976 }
0x160a   :  { %v1547_v49 = vsel %vm2311_vm7, %v1975_v47, %v1977_v48 }
0x160b   :  { %1550 = vrot.lane.b32.xlu0 %v1547_v49, %s2037_s7  ;;  %v1548_v55 = vmul.f32 %v1547_v49, %v1434_v33 }
0x160f   :  { %687 = vrot.lane.b32.xlu0 %v1648_v50, %s2039_s9 }
0x167d   :  { %v1551_v51 = vpop.permute.xlu0 %1550 }
0x167e   :  { %v1553_v52 = vmul.f32 %v1551_v51, %v1547_v49 }
0x1680   :  { %1555 = vrot.lane.b32.xlu1 %v1553_v52, %s2038_s18 }
0x1681   :  { %v688_v53 = vpop.permute.xlu0 %687 }
0x1682   :  { %v690_v54 = vmul.f32 %v688_v53, %v2320_v38  ;;  %v821_v62 = vmul.f32 %v2340_v57, %v688_v53  ;;  %v1069_v38 = vmul.f32 %v2380_v39, %v688_v53  ;;  %v1193_v3 = vmul.f32 %v2399_v59, %v688_v53 }
0x1683   :  { %v1317_v4 = vmul.f32 %v2418_v13, %v688_v53  ;;  %v1441_v63 = vmul.f32 %v1440_v36, %v688_v53  ;;  %v945_v59 = vmul.f32 %v2360_v16, %v688_v53  ;;  %v1649_v16 = vld [vmem:[#allocation3] ss:$0 sm:$0xff] }
0x1684   :  { %692 = vrot.lane.b32.xlu1 %v690_v54, %s2038_s18 }
0x16f2   :  { %v1556_v26 = vpop.permute.xlu1 %1555 }
0x16f3   :  { %v1558_v56 = vadd.f32 %v1556_v26, %v1548_v55 }
0x16f5   :  { %1978 = vtanh.f32 %v1558_v56 }
0x16f6   :  { %v693_v58 = vpop.permute.xlu1 %692 }
0x16f7   :  { %v696_v60 = vsel %vm695_vm8, %v693_v58, 0.0 }
0x16f8   :  { %697 = vadd.xlane.f32.xlu0 %v696_v60 }
0x1702   :  { %v1979_v61 = vpop.eup %1978 }
0x1703   :  { %1561 = vrot.lane.b32.xlu1 %v1979_v61, %s2037_s7 }
0x1707   :  { %823 = vrot.lane.b32.xlu1 %v821_v62, %s2038_s18 }
0x170e   :  { %1071 = vrot.lane.b32.xlu0 %v1069_v38, %s2038_s18 }
0x1712   :  { %1195 = vrot.lane.b32.xlu0 %v1193_v3, %s2038_s18 }
0x1716   :  { %1319 = vrot.lane.b32.xlu0 %v1317_v4, %s2038_s18 }
0x171a   :  { %1443 = vrot.lane.b32.xlu0 %v1441_v63, %s2038_s18 }
0x1775   :  { %v1562_v5 = vpop.permute.xlu1 %1561 }
0x1776   :  { %v1564_v6 = vmul.f32 %v1562_v5, %v1547_v49 }
0x1778   :  { %v1565_v57 = vmul.f32 %v1564_v6, %v688_v53 }
0x1779   :  { %v824_v7 = vpop.permute.xlu1 %823 }
0x177a   :  { %1567 = vrot.lane.b32.xlu0 %v1565_v57, %s2038_s18  ;;  %v826_v39 = vsel %vm695_vm8, %v824_v7, 0.0 }
0x177b   :  { %827 = vadd.xlane.f32.xlu1 %v826_v39 }
0x1781   :  { %v698_v0 = vpop.xlane.xlu0 %697 }
0x1782   :  { %v705_v14 = vadd.f32 %v1649_v16, %v698_v0 }
0x1784   :  { %v1650_v15 = vmul.f32 -1.442695, %v705_v14 }
0x1785   :  { %v1072_v8 = vpop.permute.xlu0 %1071 }
0x1786   :  { %v1074_v2 = vsel %vm695_vm8, %v1072_v8, 0.0  ;;  %1980 = vpow2.f32 %v1650_v15 }
0x1789   :  { %v1196_v32 = vpop.permute.xlu0 %1195 }
0x178a   :  { %v1198_v24 = vsel %vm695_vm8, %v1196_v32, 0.0 }
0x178c   :  { %947 = vrot.lane.b32.xlu1 %v945_v59, %s2038_s18 }
0x178d   :  { %v1320_v1 = vpop.permute.xlu0 %1319 }
0x178e   :  { %v1322_v9 = vsel %vm695_vm8, %v1320_v1, 0.0 }
0x1791   :  { %v1444_v10 = vpop.permute.xlu0 %1443 }
0x1792   :  { %v1446_v11 = vsel %vm695_vm8, %v1444_v10, 0.0 }
0x1793   :  { %v1981_v22 = vpop.eup %1980 }
0x1794   :  { %v709_v23 = vadd.f32 1.0, %v1981_v22 }
0x1799   :  { %1075 = vadd.xlane.f32.xlu0 %v1074_v2 }
0x179d   :  { %1323 = vadd.xlane.f32.xlu0 %v1322_v9 }
0x17a1   :  { %1447 = vadd.xlane.f32.xlu0 %v1446_v11 }
0x17ec   :  { %v1568_v12 = vpop.permute.xlu0 %1567 }
0x17ed   :  { %v1570_v13 = vsel %vm695_vm8, %v1568_v12, 0.0 }
0x17ee   :  { %1571 = vadd.xlane.f32.xlu0 %v1570_v13 }
0x1804   :  { %v828_v17 = vpop.xlane.xlu1 %827 }
0x1805   :  { %v829_v18 = vadd.f32 %v1649_v16, %v828_v17 }
0x1807   :  { %v1653_v19 = vmul.f32 -1.442695, %v829_v18 }
0x1808   :  { %v948_v20 = vpop.permute.xlu1 %947 }
0x1809   :  { %1982 = vpow2.f32 %v1653_v19  ;;  %v950_v21 = vsel %vm695_vm8, %v948_v20, 0.0 }
0x180a   :  { %951 = vadd.xlane.f32.xlu1 %v950_v21  ;;  %1984 = vrcp.f32 %v709_v23 }
0x180e   :  { %1199 = vadd.xlane.f32.xlu1 %v1198_v24 }
0x1816   :  { %v1983_v27 = vpop.eup %1982 }
0x1817   :  { %v833_v28 = vadd.f32 1.0, %v1983_v27  ;;  %v1985_v29 = vpop.eup %1984 }
0x1819   :  { %1986 = vrcp.f32 %v833_v28 }
0x181f   :  { %715 = vperm.xlu1 %1875, %v1985_v29  }
0x1822   :  { %v1076_v30 = vpop.xlane.xlu0 %1075 }
0x1823   :  { %v1077_v31 = vadd.f32 %v1649_v16, %v1076_v30 }
0x1825   :  { %v1659_v33 = vmul.f32 -1.442695, %v1077_v31 }
0x1826   :  { %v1987_v34 = vpop.eup %1986  ;;  %v1324_v35 = vpop.xlane.xlu0 %1323 }
0x1827   :  { %1988 = vpow2.f32 %v1659_v33  ;;  %v1325_v36 = vadd.f32 %v1649_v16, %v1324_v35  ;;  %839 = vperm.xlu0 %1876, %v1987_v34  }
0x1829   :  { %v1665_v37 = vmul.f32 -1.442695, %v1325_v36 }
0x182a   :  { %v1448_v46 = vpop.xlane.xlu0 %1447 }
0x182b   :  { %1990 = vpow2.f32 %v1665_v37  ;;  %v1449_v47 = vadd.f32 %v1649_v16, %v1448_v46 }
0x182d   :  { %v1668_v52 = vmul.f32 -1.442695, %v1449_v47 }
0x1834   :  { %v1989_v40 = vpop.eup %1988 }
0x1835   :  { %v1081_v41 = vadd.f32 1.0, %v1989_v40 }
0x1837   :  { %1992 = vrcp.f32 %v1081_v41 }
0x1838   :  { %v1991_v42 = vpop.eup %1990 }
0x1839   :  { %v1329_v43 = vadd.f32 1.0, %v1991_v42 }
0x183b   :  { %1994 = vrcp.f32 %v1329_v43 }
0x1844   :  { %v1993_v44 = vpop.eup %1992 }
0x1845   :  { %1087 = vperm.xlu1 %1875, %v1993_v44  }
0x1848   :  { %v1995_v45 = vpop.eup %1994 }
0x1849   :  { %1335 = vperm.xlu1 %1875, %v1995_v45  }
0x1877   :  { %v1572_v50 = vpop.xlane.xlu0 %1571 }
0x1878   :  { %v1573_v54 = vadd.f32 %v1649_v16, %v1572_v50 }
0x187a   :  { %v1671_v56 = vmul.f32 -1.442695, %v1573_v54 }
0x1893   :  { %v952_v48 = vpop.xlane.xlu1 %951 }
0x1894   :  { %v953_v49 = vadd.f32 %v1649_v16, %v952_v48 }
0x1896   :  { %v1656_v51 = vmul.f32 -1.442695, %v953_v49 }
0x1897   :  { %v1200_v53 = vpop.xlane.xlu1 %1199 }
0x1898   :  { %1996 = vpow2.f32 %v1656_v51  ;;  %v1201_v55 = vadd.f32 %v1649_v16, %v1200_v53 }
0x1899   :  { %1998 = vpow2.f32 %v1668_v52 }
0x189a   :  { %v1662_v26 = vmul.f32 -1.442695, %v1201_v55 }
0x189b   :  { %v716_v0 = vpop.permute.xlu1 %715 }
0x189c   :  { %2000 = vpow2.f32 %v1662_v26  ;;  %v718_v8 = vsel %vm712_vm9, %v716_v0, 0.0 }
0x189d   :  { %2002 = vpow2.f32 %v1671_v56 }
0x18a2   :  { %v840_v39 = vpop.permute.xlu0 %839 }
0x18a3   :  { %v842_v32 = vsel %vm836_vm10, %v840_v39, %v718_v8 }
0x18a5   :  { %v1997_v58 = vpop.eup %1996 }
0x18a6   :  { %v957_v60 = vadd.f32 1.0, %v1997_v58  ;;  %v1999_v61 = vpop.eup %1998 }
0x18a7   :  { %v1453_v3 = vadd.f32 1.0, %v1999_v61 }
0x18a8   :  { %2004 = vrcp.f32 %v957_v60 }
0x18a9   :  { %v2001_v62 = vpop.eup %2000 }
0x18aa   :  { %v1205_v38 = vadd.f32 1.0, %v2001_v62  ;;  %v2003_v4 = vpop.eup %2002 }
0x18ab   :  { %v1577_v63 = vadd.f32 1.0, %v2003_v4 }
0x18ac   :  { %2006 = vrcp.f32 %v1205_v38 }
0x18ad   :  { %2008 = vrcp.f32 %v1453_v3 }
0x18ae   :  { %2010 = vrcp.f32 %v1577_v63 }
0x18b5   :  { %v2005_v5 = vpop.eup %2004 }
0x18b6   :  { %963 = vperm.xlu0 %1876, %v2005_v5  }
0x18b9   :  { %v2007_v6 = vpop.eup %2006 }
0x18ba   :  { %1211 = vperm.xlu0 %1876, %v2007_v6   ;;  %v2009_v57 = vpop.eup %2008 }
0x18bb   :  { %v2011_v7 = vpop.eup %2010 }
0x18be   :  { %1459 = vperm.xlu0 %1876, %v2009_v57  }
0x18c0   :  { %v1088_v1 = vpop.permute.xlu1 %1087 }
0x18c2   :  { %1583 = vperm.xlu0 %1876, %v2011_v7  }
0x18c4   :  { %v1336_v13 = vpop.permute.xlu1 %1335 }
0x1931   :  { %v964_v59 = vpop.permute.xlu0 %963 }
0x1932   :  { %v966_v2 = vsel %vm960_vm11, %v964_v59, %v842_v32 }
0x1933   :  { %v1090_v10 = vsel %vm1084_vm12, %v1088_v1, %v966_v2 }
0x1935   :  { %v1212_v9 = vpop.permute.xlu0 %1211 }
0x1936   :  { %v1214_v11 = vsel %vm1208_vm13, %v1212_v9, %v1090_v10 }
0x1937   :  { %v1338_v16 = vsel %vm1332_vm14, %v1336_v13, %v1214_v11 }
0x1939   :  { %v1460_v12 = vpop.permute.xlu0 %1459 }
0x193a   :  { %v1462_v14 = vsel %vm1456_vm15, %v1460_v12, %v1338_v16 }
0x193d   :  { %v1584_v15 = vpop.permute.xlu0 %1583 }
0x193e   :  { %v1586_v17 = vsel %vm1580_vm0, %v1584_v15, %v1462_v14 }
0x193f   :  { %1588 = vst.msk [vmem:[#allocation4] sm:$0x3] %vm1587_vm1, %v1586_v17 }
0x1940   :  { %2023 = shalt.err (!%p2020_p4)
}
0x1941   :  { %1598 = dma.vmem_to_hbm [thread:$0]  %s1596_s21, 32, %s2481_s10, [#allocation5]  }
0x1942   :  { %2032 = dma.done.wait [#allocation5], 32  }
0x1943   :  { %2033 = vsyncadd [#allocation5], 4294967264 }
0x1944   :  { %1602 = vsyncpa [#allocation5], 1 }

// kernel: toynet_forward.4
= control target key start
LH: loop header
LB: loop body
LE: loop exit
PB: predicated region body
PF: predicated region fallthrough
CT: control target
= control target key end

     0   :  { %s5579_s12 = smov 0   ;;  %s6522_s0 = inlined_call_operand.vmem [shape: bf16[16,4,150,25], index: 0, kind: input, shape index: {}]   ;;  %s6523_s1 = inlined_call_operand.vmem [shape: bf16[16,150], index: 1, kind: input, shape index: {}]   ;;  %s6524_s2 = inlined_call_operand.vmem [shape: f32[16,1], index: 2, kind: input, shape index: {}]   ;;  %s6525_s3 = inlined_call_operand.vmem [shape: f32[16,16,25], index: 3, kind: output, shape index: {}]  }
   0x1 LB: > { %s4241_s13 = sadd.s32 4294967295, %s5556_s12   ;;  %p4245_p0 = scmp.ge.s32.totalorder %s5556_s12, 1  ;;  %s5556_s12 = sphi %s5579_s12, %s13_s12  }
   0x2   : > { %p139_p1 = scmp.lt.s32.totalorder %s5556_s12, 3 }
   0x4   : > { %p140_p2 = pnand %p4245_p0, %p139_p1 }
   0x5   : > { %s4246_s14 = sshll.u32 (!%p140_p2), %s4241_s13, 3 }
   0x6   : > { %143 = sbr.rel (%p140_p2) target bundleno = 861 (0x35d), region = 32  ;;  %p166_p3 = scmp.lt.s32.totalorder (!%p140_p2), %s4246_s14, 15 }
   0xb   : > { %vm269_vm0 = vcmask 179200   ;;  %v5558_v0 = vmov 0   ;;  %v5592_v1 = vld [vmem:[%s6523_s1 + $0x4] ss:$8 sps:$4 sm:$0xff]   ;;  %s6527_s14 = smov (!%p166_p3, %s4246_s14), 15  ;;  %vm273_vm1 = vcmask 1042432  }
   0xc   : > { %277 = vmatprep.subr.bf16.mxu0 %v5558_v0  ;;  %398 = vmatprep.subr.bf16.mxu1 %v5558_v0  ;;  %s5211_s17 = smul.u32 304, %s6527_s14  ;;  %v5650_v24 = vld [vmem:[%s6523_s1] ss:$8 sps:$4 sm:$0xff]   ;;  %s5210_s4 = sshll.u32 %s6527_s14, 4  ;;  %vm701_vm2 = vcmask 203776  }
   0xd   : > { %5221 = vset.pattern.permute.xlu0 %v5558_v0  ;;  %4263 = vmatprep.mubr.msk.bf16.mxu0 %vm269_vm0, %v5592_v1  ;;  %v182_v46 = vld [vmem:[%s6524_s2] sm:$0xff]  ;;  %v183_v48 = vld [vmem:[%s6524_s2 + $0x8] sm:$0xff]  ;;  %s5978_s7 = scalar_lea.vmem %s6525_s3, %s5210_s4 }
   0xe   : > { %4293 = vmatprep.mubr.msk.bf16.mxu1 %vm269_vm0, %v5592_v1  ;;  %s5605_s20 = scalar_lea.vmem %s6522_s0, %s5211_s17  ;;  %689 = vperm.xlu0 %5221, %v182_v46  }
   0xf   : > { %v5222_v2 = vld [vmem:[%s5605_s20 + $0x38] sm:$0xff]   ;;  %v5223_v3 = vld [vmem:[%s5605_s20 + $0x84] sm:$0xff]   ;;  %v5224_v4 = vld [vmem:[%s5605_s20 + $0x30] sm:$0xff]  }
  0x10   : > { %278 = vmatpush1.bf16.msra.mxu0 %v5222_v2  ;;  %399 = vmatpush1.bf16.msra.mxu1 %v5223_v3  ;;  %v5225_v5 = vld [vmem:[%s5605_s20 + $0x7c] sm:$0xff]   ;;  %v5226_v6 = vld [vmem:[%s5605_s20 + $0x28] sm:$0xff]   ;;  %v5227_v7 = vld [vmem:[%s5605_s20 + $0x74] sm:$0xff]  }
  0x11   : > { %279 = vmatprep.subr.bf16.mxu0 %v5558_v0  ;;  %400 = vmatprep.subr.bf16.mxu1 %v5558_v0  ;;  %v5228_v8 = vld [vmem:[%s5605_s20 + $0x20] sm:$0xff]   ;;  %v5229_v9 = vld [vmem:[%s5605_s20 + $0x6c] sm:$0xff]   ;;  %v5230_v10 = vld [vmem:[%s5605_s20 + $0x18] sm:$0xff]  }
  0x12   : > { %v5231_v11 = vld [vmem:[%s5605_s20 + $0x64] sm:$0xff]   ;;  %v5232_v12 = vld [vmem:[%s5605_s20 + $0x10] sm:$0xff]   ;;  %v5233_v13 = vld [vmem:[%s5605_s20 + $0x5c] sm:$0xff]   ;;  %694 = vperm.xlu0 %5221, %v183_v48  }
  0x13   : > { %v5234_v14 = vld [vmem:[%s5605_s20 + $0x8] sm:$0xff]   ;;  %v5235_v15 = vld [vmem:[%s5605_s20 + $0x54] sm:$0xff]   ;;  %v5236_v17 = vld [vmem:[%s5605_s20] sm:$0xff]  }
  0x14   : > { %280 = vmatpush1.bf16.msra.mxu0 %v5224_v4  ;;  %401 = vmatpush1.bf16.msra.mxu1 %v5225_v5  ;;  %v5238_v16 = vld [vmem:[%s5605_s20 + $0x48] ss:$0 sps:$4 sm:$0x77]   ;;  %v5239_v18 = vld [vmem:[%s5605_s20 + $0x94] ss:$0 sps:$4 sm:$0x77]  }
  0x15   : > { %281 = vmatprep.subr.bf16.mxu0 %v5558_v0  ;;  %402 = vmatprep.subr.bf16.mxu1 %v5558_v0  ;;  %v5237_v19 = vld [vmem:[%s5605_s20 + $0x4c] sm:$0xff]   ;;  %v275_v20 = vsel %vm273_vm1, %v5238_v16, 0  ;;  %v396_v21 = vsel %vm273_vm1, %v5239_v18, 0  ;;  %v5240_v22 = vld [vmem:[%s5605_s20 + $0x40] sm:$0xff]   ;;  %v5248_v28 = vld [vmem:[%s5605_s20 + $0x114] sm:$0xff]  }
  0x16   : > { %v5241_v23 = vld [vmem:[%s5605_s20 + $0x8c] sm:$0xff]   ;;  %v5246_v26 = vld [vmem:[%s5605_s20 + $0x11c] sm:$0xff]   ;;  %v5252_v32 = vld [vmem:[%s5605_s20 + $0x104] sm:$0xff]  }
  0x17   : > { %v5245_v25 = vld [vmem:[%s5605_s20 + $0xd0] sm:$0xff]   ;;  %v5247_v27 = vld [vmem:[%s5605_s20 + $0xc8] sm:$0xff]   ;;  %v5249_v29 = vld [vmem:[%s5605_s20 + $0xc0] sm:$0xff]  }
  0x18   : > { %282 = vmatpush1.bf16.msra.mxu0 %v5226_v6  ;;  %403 = vmatpush1.bf16.msra.mxu1 %v5227_v7  ;;  %v5250_v30 = vld [vmem:[%s5605_s20 + $0x10c] sm:$0xff]   ;;  %v5251_v31 = vld [vmem:[%s5605_s20 + $0xb8] sm:$0xff]   ;;  %v5257_v37 = vld [vmem:[%s5605_s20 + $0xa0] sm:$0xff]  }
  0x19   : > { %283 = vmatprep.subr.bf16.mxu0 %v5558_v0  ;;  %404 = vmatprep.subr.bf16.mxu1 %v5558_v0  ;;  %v5253_v33 = vld [vmem:[%s5605_s20 + $0xb0] sm:$0xff]   ;;  %v5254_v34 = vld [vmem:[%s5605_s20 + $0xfc] sm:$0xff]   ;;  %v5255_v35 = vld [vmem:[%s5605_s20 + $0xa8] sm:$0xff]  }
  0x1a   : > { %v5256_v36 = vld [vmem:[%s5605_s20 + $0xf4] sm:$0xff]   ;;  %v5258_v38 = vld [vmem:[%s5605_s20 + $0xec] sm:$0xff]   ;;  %v5261_v39 = vld [vmem:[%s5605_s20 + $0xe0] ss:$0 sps:$4 sm:$0x77]  }
  0x1b   : > { %v5259_v40 = vld [vmem:[%s5605_s20 + $0x98] sm:$0xff]   ;;  %v5262_v41 = vld [vmem:[%s5605_s20 + $0x12c] ss:$0 sps:$4 sm:$0x77]   ;;  %v5260_v42 = vld [vmem:[%s5605_s20 + $0xe4] sm:$0xff]   ;;  %v517_v43 = vsel %vm273_vm1, %v5261_v39, 0 }
  0x1c   : > { %284 = vmatpush1.bf16.msra.mxu0 %v5228_v8  ;;  %405 = vmatpush1.bf16.msra.mxu1 %v5229_v9  ;;  %v638_v44 = vsel %vm273_vm1, %v5262_v41, 0  ;;  %v5263_v45 = vld [vmem:[%s5605_s20 + $0xd8] sm:$0xff]   ;;  %v5264_v47 = vld [vmem:[%s5605_s20 + $0x124] sm:$0xff]   ;;  %v5268_v52 = vld [vmem:[%s5605_s20 + $0x1ac] sm:$0xff]  }
  0x1d   : > { %285 = vmatprep.subr.bf16.mxu0 %v5558_v0  ;;  %406 = vmatprep.subr.bf16.mxu1 %v5558_v0  ;;  %v5265_v49 = vld [vmem:[%s5605_s20 + $0x168] sm:$0xff]   ;;  %v5266_v50 = vld [vmem:[%s5605_s20 + $0x1b4] sm:$0xff]   ;;  %v5267_v51 = vld [vmem:[%s5605_s20 + $0x160] sm:$0xff]  }
  0x1e   : > { %v5269_v53 = vld [vmem:[%s5605_s20 + $0x158] sm:$0xff]   ;;  %v5270_v54 = vld [vmem:[%s5605_s20 + $0x1a4] sm:$0xff]   ;;  %v5271_v55 = vld [vmem:[%s5605_s20 + $0x150] sm:$0xff]  }
  0x1f   : > { %v5272_v56 = vld [vmem:[%s5605_s20 + $0x19c] sm:$0xff]   ;;  %v5273_v57 = vld [vmem:[%s5605_s20 + $0x148] sm:$0xff]   ;;  %v5274_v58 = vld [vmem:[%s5605_s20 + $0x194] sm:$0xff]  }
  0x20   : > { %286 = vmatpush1.bf16.msra.mxu0 %v5230_v10  ;;  %407 = vmatpush1.bf16.msra.mxu1 %v5231_v11  ;;  %v5275_v59 = vld [vmem:[%s5605_s20 + $0x140] sm:$0xff]   ;;  %v5276_v60 = vld [vmem:[%s5605_s20 + $0x18c] sm:$0xff]   ;;  %v5277_v61 = vld [vmem:[%s5605_s20 + $0x138] sm:$0xff]  }
  0x21   : > { %287 = vmatprep.subr.bf16.mxu0 %v5558_v0  ;;  %408 = vmatprep.subr.bf16.mxu1 %v5558_v0  ;;  %v5278_v62 = vld [vmem:[%s5605_s20 + $0x184] sm:$0xff]   ;;  %v5281_v63 = vld [vmem:[%s5605_s20 + $0x178] ss:$0 sps:$4 sm:$0x77]   ;;  %v5279_v2 = vld [vmem:[%s5605_s20 + $0x130] sm:$0xff]  }
  0x22   : > { %v5282_v3 = vld [vmem:[%s5605_s20 + $0x1c4] ss:$0 sps:$4 sm:$0x77]   ;;  %v5280_v4 = vld [vmem:[%s5605_s20 + $0x17c] sm:$0xff]   ;;  %v782_v5 = vsel %vm273_vm1, %v5281_v63, 0  ;;  %v5283_v7 = vld [vmem:[%s5605_s20 + $0x170] sm:$0xff]  }
  0x23   : > { %v903_v6 = vsel %vm273_vm1, %v5282_v3, 0  ;;  %v5284_v8 = vld [vmem:[%s5605_s20 + $0x1bc] sm:$0xff]   ;;  %v5286_v10 = vld [vmem:[%s5605_s20 + $0x24c] sm:$0xff]   ;;  %v5292_v16 = vld [vmem:[%s5605_s20 + $0x234] sm:$0xff]  }
  0x24   : > { %288 = vmatpush1.bf16.msra.mxu0 %v5232_v12  ;;  %409 = vmatpush1.bf16.msra.mxu1 %v5233_v13  ;;  %v5285_v9 = vld [vmem:[%s5605_s20 + $0x200] sm:$0xff]   ;;  %v5287_v11 = vld [vmem:[%s5605_s20 + $0x1f8] sm:$0xff]   ;;  %v5289_v13 = vld [vmem:[%s5605_s20 + $0x1f0] sm:$0xff]  }
  0x25   : > { %289 = vmatprep.subr.bf16.mxu0 %v5558_v0  ;;  %410 = vmatprep.subr.bf16.mxu1 %v5558_v0  ;;  %v5288_v12 = vld [vmem:[%s5605_s20 + $0x244] sm:$0xff]   ;;  %v5295_v18 = vld [vmem:[%s5605_s20 + $0x1d8] sm:$0xff]   ;;  %v5315_v41 = vld [vmem:[%s5605_s20 + $0x270] sm:$0xff]  }
  0x26   : > { %v5313_v39 = vld [vmem:[%s5605_s20 + $0x278] sm:$0xff]   ;;  %v5321_v46 = vld [vmem:[%s5605_s20 + $0x2a8] ss:$0 sps:$4 sm:$0x77]   ;;  %v5320_v48 = vld [vmem:[%s5605_s20 + $0x2ac] sm:$0xff]  }
  0x27   : > { %v5334_v63 = vld [vmem:[%s5605_s20 + $0x35c] sm:$0xff]   ;;  %v5336_v3 = vld [vmem:[%s5605_s20 + $0x354] sm:$0xff]  }
  0x28   : > { %290 = vmatpush1.bf16.msra.mxu0 %v5234_v14  ;;  %411 = vmatpush1.bf16.msra.mxu1 %v5235_v15  ;;  %v5290_v14 = vld [vmem:[%s5605_s20 + $0x23c] sm:$0xff]   ;;  %v5291_v15 = vld [vmem:[%s5605_s20 + $0x1e8] sm:$0xff]  }
  0x29   : > { %291 = vmatprep.subr.bf16.mxu0 %v5558_v0  ;;  %412 = vmatprep.subr.bf16.mxu1 %v5558_v0 }
  0x2c   : > { %292 = vmatpush1.bf16.msra.mxu0 %v5236_v17  ;;  %413 = vmatpush1.bf16.msra.mxu1 %v5237_v19  ;;  %v5293_v17 = vld [vmem:[%s5605_s20 + $0x1e0] sm:$0xff]  }
  0x2d   : > { %305 = vmatprep.subr.bf16.mxu0 %v5558_v0  ;;  %426 = vmatprep.subr.bf16.mxu1 %v5558_v0  ;;  %v5296_v19 = vld [vmem:[%s5605_s20 + $0x224] sm:$0xff]  }
  0x30   : > { %306 = vmatpush2.bf16.msra.mxu0 %v275_v20  ;;  %427 = vmatpush2.bf16.msra.mxu1 %v396_v21  ;;  %v5297_v20 = vld [vmem:[%s5605_s20 + $0x1d0] sm:$0xff]   ;;  %v5298_v21 = vld [vmem:[%s5605_s20 + $0x21c] sm:$0xff]  }
  0x31   : > { %307 = vmatprep.subr.bf16.mxu0 %v5558_v0  ;;  %428 = vmatprep.subr.bf16.mxu1 %v5558_v0 }
  0x34   : > { %308 = vmatpush2.bf16.msra.mxu0 %v5240_v22  ;;  %429 = vmatpush2.bf16.msra.mxu1 %v5241_v23  ;;  %v5299_v22 = vld [vmem:[%s5605_s20 + $0x1c8] sm:$0xff]   ;;  %v5301_v23 = vld [vmem:[%s5605_s20 + $0x210] ss:$0 sps:$4 sm:$0x77]  }
  0x35   : > { %519 = vmatprep.subr.bf16.mxu0 %v5558_v0  ;;  %640 = vmatprep.subr.bf16.mxu1 %v5558_v0 }
  0x37   : > { %310 = vmatmul.mubr.bf16.vlgmr.msra.gmra.mxu0 %v5650_v24  ;;  %431 = vmatmul.mubr.bf16.vlgmr.msra.gmra.mxu1 %v5650_v24 }
  0x38   : > { %520 = vmatpush1.bf16.msra.mxu0 %v5245_v25  ;;  %641 = vmatpush1.bf16.msra.mxu1 %v5246_v26  ;;  %v5302_v25 = vld [vmem:[%s5605_s20 + $0x25c] ss:$0 sps:$4 sm:$0x77]   ;;  %v5300_v26 = vld [vmem:[%s5605_s20 + $0x214] sm:$0xff]  }
  0x39   : > { %521 = vmatprep.subr.bf16.mxu0 %v5558_v0  ;;  %642 = vmatprep.subr.bf16.mxu1 %v5558_v0 }
  0x3a   : > { %4323 = vmatprep.mubr.msk.bf16.mxu0 %vm269_vm0, %v5592_v1  ;;  %4353 = vmatprep.mubr.msk.bf16.mxu1 %vm269_vm0, %v5592_v1 }
  0x3c   : > { %522 = vmatpush1.bf16.msra.mxu0 %v5247_v27  ;;  %643 = vmatpush1.bf16.msra.mxu1 %v5248_v28  ;;  %v1024_v27 = vsel %vm273_vm1, %v5301_v23, 0  ;;  %v1145_v28 = vsel %vm273_vm1, %v5302_v25, 0  ;;  %v5347_v23 = vld [vmem:[%s5605_s20 + $0x3c0] sm:$0xff]   ;;  %v5348_v25 = vld [vmem:[%s5605_s20 + $0x40c] sm:$0xff]  }
  0x3d   : > { %523 = vmatprep.subr.bf16.mxu0 %v5558_v0  ;;  %644 = vmatprep.subr.bf16.mxu1 %v5558_v0 }
  0x40   : > { %524 = vmatpush1.bf16.msra.mxu0 %v5249_v29  ;;  %645 = vmatpush1.bf16.msra.mxu1 %v5250_v30  ;;  %v5303_v29 = vld [vmem:[%s5605_s20 + $0x208] sm:$0xff]   ;;  %v5304_v30 = vld [vmem:[%s5605_s20 + $0x254] sm:$0xff]  }
  0x41   : > { %525 = vmatprep.subr.bf16.mxu0 %v5558_v0  ;;  %646 = vmatprep.subr.bf16.mxu1 %v5558_v0 }
  0x44   : > { %526 = vmatpush1.bf16.msra.mxu0 %v5251_v31  ;;  %647 = vmatpush1.bf16.msra.mxu1 %v5252_v32  ;;  %v5305_v31 = vld [vmem:[%s5605_s20 + $0x298] sm:$0xff]   ;;  %v5306_v32 = vld [vmem:[%s5605_s20 + $0x2e4] sm:$0xff]  }
  0x45   : > { %527 = vmatprep.subr.bf16.mxu0 %v5558_v0  ;;  %648 = vmatprep.subr.bf16.mxu1 %v5558_v0 }
  0x48   : > { %528 = vmatpush1.bf16.msra.mxu0 %v5253_v33  ;;  %649 = vmatpush1.bf16.msra.mxu1 %v5254_v34  ;;  %v5307_v33 = vld [vmem:[%s5605_s20 + $0x290] sm:$0xff]   ;;  %v5308_v34 = vld [vmem:[%s5605_s20 + $0x2dc] sm:$0xff]  }
  0x49   : > { %529 = vmatprep.subr.bf16.mxu0 %v5558_v0  ;;  %650 = vmatprep.subr.bf16.mxu1 %v5558_v0 }
  0x4c   : > { %530 = vmatpush1.bf16.msra.mxu0 %v5255_v35  ;;  %651 = vmatpush1.bf16.msra.mxu1 %v5256_v36  ;;  %v5309_v35 = vld [vmem:[%s5605_s20 + $0x288] sm:$0xff]  }
  0x4d   : > { %531 = vmatprep.subr.bf16.mxu0 %v5558_v0  ;;  %652 = vmatprep.subr.bf16.mxu1 %v5558_v0  ;;  %v5816_v36 = vld [vmem:[%s6523_s1 + $0x4] ss:$8 sps:$4 sm:$0xff]  }
  0x50   : > { %532 = vmatpush1.bf16.msra.mxu0 %v5257_v37  ;;  %653 = vmatpush1.bf16.msra.mxu1 %v5258_v38  ;;  %v5310_v37 = vld [vmem:[%s5605_s20 + $0x2d4] sm:$0xff]   ;;  %v5312_v38 = vld [vmem:[%s5605_s20 + $0x2cc] sm:$0xff]  }
  0x51   : > { %533 = vmatprep.subr.bf16.mxu0 %v5558_v0  ;;  %654 = vmatprep.subr.bf16.mxu1 %v5558_v0 }
  0x54   : > { %534 = vmatpush1.bf16.msra.mxu0 %v5259_v40  ;;  %655 = vmatpush1.bf16.msra.mxu1 %v5260_v42  ;;  %v5314_v40 = vld [vmem:[%s5605_s20 + $0x2c4] sm:$0xff]   ;;  %v5316_v42 = vld [vmem:[%s5605_s20 + $0x2bc] sm:$0xff]  }
  0x55   : > { %547 = vmatprep.subr.bf16.mxu0 %v5558_v0  ;;  %668 = vmatprep.subr.bf16.mxu1 %v5558_v0 }
  0x58   : > { %548 = vmatpush2.bf16.msra.mxu0 %v517_v43  ;;  %669 = vmatpush2.bf16.msra.mxu1 %v638_v44  ;;  %v5317_v43 = vld [vmem:[%s5605_s20 + $0x268] sm:$0xff]   ;;  %v5318_v44 = vld [vmem:[%s5605_s20 + $0x2b4] sm:$0xff]  }
  0x59   : > { %549 = vmatprep.subr.bf16.mxu0 %v5558_v0  ;;  %670 = vmatprep.subr.bf16.mxu1 %v5558_v0 }
  0x5c   : > { %550 = vmatpush2.bf16.msra.mxu0 %v5263_v45  ;;  %671 = vmatpush2.bf16.msra.mxu1 %v5264_v47  ;;  %v5319_v45 = vld [vmem:[%s5605_s20 + $0x260] sm:$0xff]   ;;  %v5322_v47 = vld [vmem:[%s5605_s20 + $0x2f4] ss:$0 sps:$4 sm:$0x77]  }
  0x5d   : > { %784 = vmatprep.subr.bf16.mxu0 %v5558_v0  ;;  %905 = vmatprep.subr.bf16.mxu1 %v5558_v0 }
  0x5f   : > { %552 = vmatmul.mubr.bf16.vlgmr.msra.gmra.mxu0 %v5650_v24  ;;  %673 = vmatmul.mubr.bf16.vlgmr.msra.gmra.mxu1 %v5650_v24 }
  0x60   : > { %785 = vmatpush1.bf16.msra.mxu0 %v5265_v49  ;;  %906 = vmatpush1.bf16.msra.mxu1 %v5266_v50  ;;  %v1279_v49 = vsel %vm273_vm1, %v5321_v46, 0  ;;  %v1400_v50 = vsel %vm273_vm1, %v5322_v47, 0 }
  0x61   : > { %786 = vmatprep.subr.bf16.mxu0 %v5558_v0  ;;  %907 = vmatprep.subr.bf16.mxu1 %v5558_v0 }
  0x62   : > { %4383 = vmatprep.mubr.msk.bf16.mxu0 %vm269_vm0, %v5592_v1  ;;  %4413 = vmatprep.mubr.msk.bf16.mxu1 %vm269_vm0, %v5592_v1 }
  0x64   : > { %787 = vmatpush1.bf16.msra.mxu0 %v5267_v51  ;;  %908 = vmatpush1.bf16.msra.mxu1 %v5268_v52  ;;  %v5323_v51 = vld [vmem:[%s5605_s20 + $0x2a0] sm:$0xff]   ;;  %v5324_v52 = vld [vmem:[%s5605_s20 + $0x2ec] sm:$0xff]  }
  0x65   : > { %788 = vmatprep.subr.bf16.mxu0 %v5558_v0  ;;  %909 = vmatprep.subr.bf16.mxu1 %v5558_v0 }
  0x68   : > { %789 = vmatpush1.bf16.msra.mxu0 %v5269_v53  ;;  %910 = vmatpush1.bf16.msra.mxu1 %v5270_v54  ;;  %v5325_v53 = vld [vmem:[%s5605_s20 + $0x330] sm:$0xff]   ;;  %v5326_v54 = vld [vmem:[%s5605_s20 + $0x37c] sm:$0xff]  }
  0x69   : > { %790 = vmatprep.subr.bf16.mxu0 %v5558_v0  ;;  %911 = vmatprep.subr.bf16.mxu1 %v5558_v0 }
  0x6c   : > { %791 = vmatpush1.bf16.msra.mxu0 %v5271_v55  ;;  %912 = vmatpush1.bf16.msra.mxu1 %v5272_v56  ;;  %v5327_v55 = vld [vmem:[%s5605_s20 + $0x328] sm:$0xff]  }
  0x6d   : > { %792 = vmatprep.subr.bf16.mxu0 %v5558_v0  ;;  %913 = vmatprep.subr.bf16.mxu1 %v5558_v0  ;;  %v5863_v56 = vld [vmem:[%s6523_s1] ss:$8 sps:$4 sm:$0xff]  }
  0x70   : > { %793 = vmatpush1.bf16.msra.mxu0 %v5273_v57  ;;  %914 = vmatpush1.bf16.msra.mxu1 %v5274_v58  ;;  %v5328_v57 = vld [vmem:[%s5605_s20 + $0x374] sm:$0xff]   ;;  %v5329_v58 = vld [vmem:[%s5605_s20 + $0x320] sm:$0xff]  }
  0x71   : > { %794 = vmatprep.subr.bf16.mxu0 %v5558_v0  ;;  %915 = vmatprep.subr.bf16.mxu1 %v5558_v0 }
  0x74   : > { %795 = vmatpush1.bf16.msra.mxu0 %v5275_v59  ;;  %916 = vmatpush1.bf16.msra.mxu1 %v5276_v60  ;;  %v5330_v59 = vld [vmem:[%s5605_s20 + $0x36c] sm:$0xff]   ;;  %v5331_v60 = vld [vmem:[%s5605_s20 + $0x318] sm:$0xff]  }
  0x75   : > { %796 = vmatprep.subr.bf16.mxu0 %v5558_v0  ;;  %917 = vmatprep.subr.bf16.mxu1 %v5558_v0 }
  0x78   : > { %797 = vmatpush1.bf16.msra.mxu0 %v5277_v61  ;;  %918 = vmatpush1.bf16.msra.mxu1 %v5278_v62  ;;  %v5332_v61 = vld [vmem:[%s5605_s20 + $0x364] sm:$0xff]   ;;  %v5333_v62 = vld [vmem:[%s5605_s20 + $0x310] sm:$0xff]  }
  0x79   : > { %798 = vmatprep.subr.bf16.mxu0 %v5558_v0  ;;  %919 = vmatprep.subr.bf16.mxu1 %v5558_v0 }
  0x7c   : > { %799 = vmatpush1.bf16.msra.mxu0 %v5279_v2  ;;  %920 = vmatpush1.bf16.msra.mxu1 %v5280_v4  ;;  %v5335_v2 = vld [vmem:[%s5605_s20 + $0x308] sm:$0xff]   ;;  %v5337_v4 = vld [vmem:[%s5605_s20 + $0x300] sm:$0xff]  }
  0x7d   : > { %812 = vmatprep.subr.bf16.mxu0 %v5558_v0  ;;  %933 = vmatprep.subr.bf16.mxu1 %v5558_v0 }
  0x80   : > { %813 = vmatpush2.bf16.msra.mxu0 %v782_v5  ;;  %934 = vmatpush2.bf16.msra.mxu1 %v903_v6  ;;  %v5338_v5 = vld [vmem:[%s5605_s20 + $0x34c] sm:$0xff]   ;;  %v5339_v6 = vld [vmem:[%s5605_s20 + $0x2f8] sm:$0xff]  }
  0x81   : > { %814 = vmatprep.subr.bf16.mxu0 %v5558_v0  ;;  %935 = vmatprep.subr.bf16.mxu1 %v5558_v0 }
  0x84   : > { %815 = vmatpush2.bf16.msra.mxu0 %v5283_v7  ;;  %936 = vmatpush2.bf16.msra.mxu1 %v5284_v8  ;;  %v5341_v7 = vld [vmem:[%s5605_s20 + $0x340] ss:$0 sps:$4 sm:$0x77]   ;;  %v5342_v8 = vld [vmem:[%s5605_s20 + $0x38c] ss:$0 sps:$4 sm:$0x77]  }
  0x85   : > { %1026 = vmatprep.subr.bf16.mxu0 %v5558_v0  ;;  %1147 = vmatprep.subr.bf16.mxu1 %v5558_v0 }
  0x87   : > { %817 = vmatmul.mubr.bf16.vlgmr.msra.gmra.mxu0 %v5650_v24  ;;  %938 = vmatmul.mubr.bf16.vlgmr.msra.gmra.mxu1 %v5650_v24 }
  0x88   : > { %1027 = vmatpush1.bf16.msra.mxu0 %v5285_v9  ;;  %1148 = vmatpush1.bf16.msra.mxu1 %v5286_v10  ;;  %v5340_v9 = vld [vmem:[%s5605_s20 + $0x344] sm:$0xff]   ;;  %v1521_v10 = vsel %vm273_vm1, %v5341_v7, 0  ;;  %v5369_v7 = vld [vmem:[%s5605_s20 + $0x450] sm:$0xff]  }
  0x89   : > { %1028 = vmatprep.subr.bf16.mxu0 %v5558_v0  ;;  %1149 = vmatprep.subr.bf16.mxu1 %v5558_v0 }
  0x8a   : > { %4443 = vmatprep.mubr.msk.bf16.mxu0 %vm269_vm0, %v5592_v1  ;;  %4473 = vmatprep.mubr.msk.bf16.mxu1 %vm269_vm0, %v5592_v1  ;;  %v5294_v1 = vld [vmem:[%s5605_s20 + $0x22c] sm:$0xff]  }
  0x8c   : > { %1029 = vmatpush1.bf16.msra.mxu0 %v5287_v11  ;;  %1150 = vmatpush1.bf16.msra.mxu1 %v5288_v12  ;;  %v1642_v11 = vsel %vm273_vm1, %v5342_v8, 0  ;;  %v5370_v8 = vld [vmem:[%s5605_s20 + $0x49c] sm:$0xff]  }
  0x8d   : > { %1030 = vmatprep.subr.bf16.mxu0 %v5558_v0  ;;  %1151 = vmatprep.subr.bf16.mxu1 %v5558_v0 }
  0x90   : > { %1031 = vmatpush1.bf16.msra.mxu0 %v5289_v13  ;;  %1152 = vmatpush1.bf16.msra.mxu1 %v5290_v14  ;;  %v5343_v13 = vld [vmem:[%s5605_s20 + $0x338] sm:$0xff]   ;;  %v5344_v14 = vld [vmem:[%s5605_s20 + $0x384] sm:$0xff]  }
  0x91   : > { %1032 = vmatprep.subr.bf16.mxu0 %v5558_v0  ;;  %1153 = vmatprep.subr.bf16.mxu1 %v5558_v0 }
  0x94   : > { %1033 = vmatpush1.bf16.msra.mxu0 %v5291_v15  ;;  %1154 = vmatpush1.bf16.msra.mxu1 %v5292_v16 }
  0x95   : > { %1034 = vmatprep.subr.bf16.mxu0 %v5558_v0  ;;  %1155 = vmatprep.subr.bf16.mxu1 %v5558_v0 }
  0x98   : > { %1035 = vmatpush1.bf16.msra.mxu0 %v5293_v17  ;;  %1156 = vmatpush1.bf16.msra.mxu1 %v5294_v1 }
  0x99   : > { %1036 = vmatprep.subr.bf16.mxu0 %v5558_v0  ;;  %1157 = vmatprep.subr.bf16.mxu1 %v5558_v0 }
  0x9c   : > { %1037 = vmatpush1.bf16.msra.mxu0 %v5295_v18  ;;  %1158 = vmatpush1.bf16.msra.mxu1 %v5296_v19  ;;  %v5345_v18 = vld [vmem:[%s5605_s20 + $0x3c8] sm:$0xff]   ;;  %v5346_v19 = vld [vmem:[%s5605_s20 + $0x414] sm:$0xff]  }
  0x9d   : > { %1038 = vmatprep.subr.bf16.mxu0 %v5558_v0  ;;  %1159 = vmatprep.subr.bf16.mxu1 %v5558_v0 }
  0xa0   : > { %1039 = vmatpush1.bf16.msra.mxu0 %v5297_v20  ;;  %1160 = vmatpush1.bf16.msra.mxu1 %v5298_v21 }
  0xa1   : > { %1040 = vmatprep.subr.bf16.mxu0 %v5558_v0  ;;  %1161 = vmatprep.subr.bf16.mxu1 %v5558_v0 }
  0xa4   : > { %1041 = vmatpush1.bf16.msra.mxu0 %v5299_v22  ;;  %1162 = vmatpush1.bf16.msra.mxu1 %v5300_v26  ;;  %v5349_v26 = vld [vmem:[%s5605_s20 + $0x3b8] sm:$0xff]  }
  0xa5   : > { %1054 = vmatprep.subr.bf16.mxu0 %v5558_v0  ;;  %1175 = vmatprep.subr.bf16.mxu1 %v5558_v0 }
  0xa8   : > { %1055 = vmatpush2.bf16.msra.mxu0 %v1024_v27  ;;  %1176 = vmatpush2.bf16.msra.mxu1 %v1145_v28  ;;  %v5350_v27 = vld [vmem:[%s5605_s20 + $0x404] sm:$0xff]   ;;  %v5351_v28 = vld [vmem:[%s5605_s20 + $0x3b0] sm:$0xff]  }
  0xa9   : > { %1056 = vmatprep.subr.bf16.mxu0 %v5558_v0  ;;  %1177 = vmatprep.subr.bf16.mxu1 %v5558_v0 }
  0xac   : > { %1057 = vmatpush2.bf16.msra.mxu0 %v5303_v29  ;;  %1178 = vmatpush2.bf16.msra.mxu1 %v5304_v30  ;;  %v5352_v29 = vld [vmem:[%s5605_s20 + $0x3fc] sm:$0xff]   ;;  %v5353_v30 = vld [vmem:[%s5605_s20 + $0x3a8] sm:$0xff]  }
  0xad   : > { %1281 = vmatprep.subr.bf16.mxu0 %v5558_v0  ;;  %1402 = vmatprep.subr.bf16.mxu1 %v5558_v0 }
  0xaf   : > { %1059 = vmatmul.mubr.bf16.vlgmr.msra.gmra.mxu0 %v5650_v24  ;;  %1180 = vmatmul.mubr.bf16.vlgmr.msra.gmra.mxu1 %v5650_v24  ;;  %v5311_v24 = vld [vmem:[%s5605_s20 + $0x280] sm:$0xff]  }
  0xb0   : > { %1282 = vmatpush1.bf16.msra.mxu0 %v5305_v31  ;;  %1403 = vmatpush1.bf16.msra.mxu1 %v5306_v32  ;;  %v5354_v31 = vld [vmem:[%s5605_s20 + $0x3f4] sm:$0xff]   ;;  %v5355_v32 = vld [vmem:[%s5605_s20 + $0x3a0] sm:$0xff]  }
  0xb1   : > { %1283 = vmatprep.subr.bf16.mxu0 %v5558_v0  ;;  %1404 = vmatprep.subr.bf16.mxu1 %v5558_v0 }
  0xb2   : > { %4505 = vmatprep.mubr.msk.bf16.mxu0 %vm269_vm0, %v5816_v36  ;;  %4535 = vmatprep.mubr.msk.bf16.mxu1 %vm269_vm0, %v5816_v36 }
  0xb4   : > { %1284 = vmatpush1.bf16.msra.mxu0 %v5307_v33  ;;  %1405 = vmatpush1.bf16.msra.mxu1 %v5308_v34  ;;  %v5356_v33 = vld [vmem:[%s5605_s20 + $0x3ec] sm:$0xff]   ;;  %v5357_v34 = vld [vmem:[%s5605_s20 + $0x398] sm:$0xff]  }
  0xb5   : > { %1285 = vmatprep.subr.bf16.mxu0 %v5558_v0  ;;  %1406 = vmatprep.subr.bf16.mxu1 %v5558_v0 }
  0xb8   : > { %1286 = vmatpush1.bf16.msra.mxu0 %v5309_v35  ;;  %1407 = vmatpush1.bf16.msra.mxu1 %v5310_v37  ;;  %v5358_v35 = vld [vmem:[%s5605_s20 + $0x3e4] sm:$0xff]   ;;  %v5359_v37 = vld [vmem:[%s5605_s20 + $0x390] sm:$0xff]  }
  0xb9   : > { %1287 = vmatprep.subr.bf16.mxu0 %v5558_v0  ;;  %1408 = vmatprep.subr.bf16.mxu1 %v5558_v0 }
  0xbc   : > { %1288 = vmatpush1.bf16.msra.mxu0 %v5311_v24  ;;  %1409 = vmatpush1.bf16.msra.mxu1 %v5312_v38  ;;  %v5361_v24 = vld [vmem:[%s5605_s20 + $0x3d8] ss:$0 sps:$4 sm:$0x77]   ;;  %v5360_v38 = vld [vmem:[%s5605_s20 + $0x3dc] sm:$0xff]  }
  0xbd   : > { %1289 = vmatprep.subr.bf16.mxu0 %v5558_v0  ;;  %1410 = vmatprep.subr.bf16.mxu1 %v5558_v0 }
  0xc0   : > { %1290 = vmatpush1.bf16.msra.mxu0 %v5313_v39  ;;  %1411 = vmatpush1.bf16.msra.mxu1 %v5314_v40  ;;  %v5362_v39 = vld [vmem:[%s5605_s20 + $0x424] ss:$0 sps:$4 sm:$0x77]   ;;  %v1776_v40 = vsel %vm273_vm1, %v5361_v24, 0  ;;  %v5389_v24 = vld [vmem:[%s5605_s20 + $0x4e8] sm:$0xff]  }
  0xc1   : > { %1291 = vmatprep.subr.bf16.mxu0 %v5558_v0  ;;  %1412 = vmatprep.subr.bf16.mxu1 %v5558_v0 }
  0xc4   : > { %1292 = vmatpush1.bf16.msra.mxu0 %v5315_v41  ;;  %1413 = vmatpush1.bf16.msra.mxu1 %v5316_v42  ;;  %v1897_v41 = vsel %vm273_vm1, %v5362_v39, 0  ;;  %v5391_v39 = vld [vmem:[%s5605_s20 + $0x4e0] sm:$0xff]  }
  0xc5   : > { %1293 = vmatprep.subr.bf16.mxu0 %v5558_v0  ;;  %1414 = vmatprep.subr.bf16.mxu1 %v5558_v0 }
  0xc8   : > { %1294 = vmatpush1.bf16.msra.mxu0 %v5317_v43  ;;  %1415 = vmatpush1.bf16.msra.mxu1 %v5318_v44  ;;  %v5960_v44 = vpop.permute.xlu0 %689 }
  0xc9   : > { %1295 = vmatprep.subr.bf16.mxu0 %v5558_v0  ;;  %1416 = vmatprep.subr.bf16.mxu1 %v5558_v0 }
  0xcc   : > { %1296 = vmatpush1.bf16.msra.mxu0 %v5319_v45  ;;  %1417 = vmatpush1.bf16.msra.mxu1 %v5320_v48  ;;  %v5363_v45 = vld [vmem:[%s5605_s20 + $0x3d0] sm:$0xff]  }
  0xcd   : > { %1309 = vmatprep.subr.bf16.mxu0 %v5558_v0  ;;  %1430 = vmatprep.subr.bf16.mxu1 %v5558_v0 }
  0xd0   : > { %1310 = vmatpush2.bf16.msra.mxu0 %v1279_v49  ;;  %1431 = vmatpush2.bf16.msra.mxu1 %v1400_v50  ;;  %v5364_v49 = vld [vmem:[%s5605_s20 + $0x41c] sm:$0xff]  }
  0xd1   : > { %1311 = vmatprep.subr.bf16.mxu0 %v5558_v0  ;;  %1432 = vmatprep.subr.bf16.mxu1 %v5558_v0 }
  0xd4   : > { %1312 = vmatpush2.bf16.msra.mxu0 %v5323_v51  ;;  %1433 = vmatpush2.bf16.msra.mxu1 %v5324_v52 }
  0xd5   : > { %1523 = vmatprep.subr.bf16.mxu0 %v5558_v0  ;;  %1644 = vmatprep.subr.bf16.mxu1 %v5558_v0 }
  0xd7   : > { %1314 = vmatmul.mubr.bf16.vlgmr.msra.gmra.mxu0 %v5863_v56  ;;  %1435 = vmatmul.mubr.bf16.vlgmr.msra.gmra.mxu1 %v5863_v56 }
  0xd8   : > { %1524 = vmatpush1.bf16.msra.mxu0 %v5325_v53  ;;  %1645 = vmatpush1.bf16.msra.mxu1 %v5326_v54  ;;  %v5365_v54 = vld [vmem:[%s5605_s20 + $0x460] sm:$0xff]  }
  0xd9   : > { %1525 = vmatprep.subr.bf16.mxu0 %v5558_v0  ;;  %1646 = vmatprep.subr.bf16.mxu1 %v5558_v0 }
  0xda   : > { %4565 = vmatprep.mubr.msk.bf16.mxu0 %vm269_vm0, %v5816_v36  ;;  %4595 = vmatprep.mubr.msk.bf16.mxu1 %vm269_vm0, %v5816_v36 }
  0xdc   : > { %1526 = vmatpush1.bf16.msra.mxu0 %v5327_v55  ;;  %1647 = vmatpush1.bf16.msra.mxu1 %v5328_v57 }
  0xdd   : > { %1527 = vmatprep.subr.bf16.mxu0 %v5558_v0  ;;  %1648 = vmatprep.subr.bf16.mxu1 %v5558_v0 }
  0xe0   : > { %1528 = vmatpush1.bf16.msra.mxu0 %v5329_v58  ;;  %1649 = vmatpush1.bf16.msra.mxu1 %v5330_v59 }
  0xe1   : > { %1529 = vmatprep.subr.bf16.mxu0 %v5558_v0  ;;  %1650 = vmatprep.subr.bf16.mxu1 %v5558_v0 }
  0xe4   : > { %1530 = vmatpush1.bf16.msra.mxu0 %v5331_v60  ;;  %1651 = vmatpush1.bf16.msra.mxu1 %v5332_v61  ;;  %v5366_v60 = vld [vmem:[%s5605_s20 + $0x4ac] sm:$0xff]  }
  0xe5   : > { %1531 = vmatprep.subr.bf16.mxu0 %v5558_v0  ;;  %1652 = vmatprep.subr.bf16.mxu1 %v5558_v0 }
  0xe8   : > { %1532 = vmatpush1.bf16.msra.mxu0 %v5333_v62  ;;  %1653 = vmatpush1.bf16.msra.mxu1 %v5334_v63  ;;  %v5980_v62 = vpop.permute.xlu0 %694 }
  0xe9   : > { %1533 = vmatprep.subr.bf16.mxu0 %v5558_v0  ;;  %1654 = vmatprep.subr.bf16.mxu1 %v5558_v0 }
  0xec   : > { %1534 = vmatpush1.bf16.msra.mxu0 %v5335_v2  ;;  %1655 = vmatpush1.bf16.msra.mxu1 %v5336_v3  ;;  %v5367_v3 = vld [vmem:[%s5605_s20 + $0x458] sm:$0xff]  }
  0xed   : > { %1535 = vmatprep.subr.bf16.mxu0 %v5558_v0  ;;  %1656 = vmatprep.subr.bf16.mxu1 %v5558_v0 }
  0xf0   : > { %1536 = vmatpush1.bf16.msra.mxu0 %v5337_v4  ;;  %1657 = vmatpush1.bf16.msra.mxu1 %v5338_v5  ;;  %v5368_v5 = vld [vmem:[%s5605_s20 + $0x4a4] sm:$0xff]  }
  0xf1   : > { %1537 = vmatprep.subr.bf16.mxu0 %v5558_v0  ;;  %1658 = vmatprep.subr.bf16.mxu1 %v5558_v0 }
  0xf4   : > { %1538 = vmatpush1.bf16.msra.mxu0 %v5339_v6  ;;  %1659 = vmatpush1.bf16.msra.mxu1 %v5340_v9  ;;  %v5371_v9 = vld [vmem:[%s5605_s20 + $0x448] sm:$0xff]  }
  0xf5   : > { %1551 = vmatprep.subr.bf16.mxu0 %v5558_v0  ;;  %1672 = vmatprep.subr.bf16.mxu1 %v5558_v0 }
  0xf7   : > { %v5904_v12 = vpop.f32.mrf.mxu0  ;;  %v5908_v15 = vpop.f32.mrf.mxu1 }
  0xf8   : > { %1552 = vmatpush2.bf16.msra.mxu0 %v1521_v10  ;;  %1673 = vmatpush2.bf16.msra.mxu1 %v1642_v11  ;;  %v681_v46 = vmax.f32 %v5904_v12, %v5908_v15  ;;  %v5373_v10 = vld [vmem:[%s5605_s20 + $0x440] sm:$0xff]   ;;  %v5374_v11 = vld [vmem:[%s5605_s20 + $0x48c] sm:$0xff]   ;;  %v5375_v12 = vld [vmem:[%s5605_s20 + $0x438] sm:$0xff]  }
  0xf9   : > { %v313_v16 = vpop.f32.mrf.mxu0  ;;  %1553 = vmatprep.subr.bf16.mxu0 %v5558_v0  ;;  %v434_v17 = vpop.f32.mrf.mxu1  ;;  %1674 = vmatprep.subr.bf16.mxu1 %v5558_v0  ;;  %v5378_v15 = vld [vmem:[%s5605_s20 + $0x47c] sm:$0xff]  }
  0xfa   : > { %v5379_v16 = vld [vmem:[%s5605_s20 + $0x428] sm:$0xff]   ;;  %v5380_v17 = vld [vmem:[%s5605_s20 + $0x474] sm:$0xff]  }
  0xfb   : > { %v5912_v1 = vpop.f32.mrf.mxu0  ;;  %v5916_v20 = vpop.f32.mrf.mxu1 }
  0xfc   : > { %1554 = vmatpush2.bf16.msra.mxu0 %v5343_v13  ;;  %1675 = vmatpush2.bf16.msra.mxu1 %v5344_v14  ;;  %v682_v55 = vmax.f32 %v5912_v1, %v5916_v20  ;;  %v5376_v13 = vld [vmem:[%s5605_s20 + $0x484] sm:$0xff]   ;;  %v5377_v14 = vld [vmem:[%s5605_s20 + $0x430] sm:$0xff]  }
  0xfd   : > { %v316_v21 = vpop.f32.mrf.mxu0  ;;  %1778 = vmatprep.subr.bf16.mxu0 %v5558_v0  ;;  %v437_v22 = vpop.f32.mrf.mxu1  ;;  %1899 = vmatprep.subr.bf16.mxu1 %v5558_v0  ;;  %v5381_v1 = vld [vmem:[%s5605_s20 + $0x470] ss:$0 sps:$4 sm:$0x77]  }
  0xff   : > { %1556 = vmatmul.mubr.bf16.vlgmr.msra.gmra.mxu0 %v5863_v56  ;;  %1677 = vmatmul.mubr.bf16.vlgmr.msra.gmra.mxu1 %v5863_v56 }
 0x100   : > { %1779 = vmatpush1.bf16.msra.mxu0 %v5345_v18  ;;  %1900 = vmatpush1.bf16.msra.mxu1 %v5346_v19  ;;  %v5382_v18 = vld [vmem:[%s5605_s20 + $0x4bc] ss:$0 sps:$4 sm:$0x77]   ;;  %v2018_v19 = vsel %vm273_vm1, %v5381_v1, 0 }
 0x101   : > { %1780 = vmatprep.subr.bf16.mxu0 %v5558_v0  ;;  %1901 = vmatprep.subr.bf16.mxu1 %v5558_v0  ;;  %v2139_v20 = vsel %vm273_vm1, %v5382_v18, 0  ;;  %v5411_v1 = vld [vmem:[%s5605_s20 + $0x578] sm:$0xff]   ;;  %v5412_v18 = vld [vmem:[%s5605_s20 + $0x5c4] sm:$0xff]  }
 0x102   : > { %4627 = vmatprep.mubr.msk.bf16.mxu0 %vm269_vm0, %v5816_v36  ;;  %4657 = vmatprep.mubr.msk.bf16.mxu1 %vm269_vm0, %v5816_v36 }
 0x104   : > { %1781 = vmatpush1.bf16.msra.mxu0 %v5347_v23  ;;  %1902 = vmatpush1.bf16.msra.mxu1 %v5348_v25  ;;  %v5383_v23 = vld [vmem:[%s5605_s20 + $0x468] sm:$0xff]  }
 0x105   : > { %1782 = vmatprep.subr.bf16.mxu0 %v5558_v0  ;;  %1903 = vmatprep.subr.bf16.mxu1 %v5558_v0 }
 0x108   : > { %1783 = vmatpush1.bf16.msra.mxu0 %v5349_v26  ;;  %1904 = vmatpush1.bf16.msra.mxu1 %v5350_v27  ;;  %v5384_v26 = vld [vmem:[%s5605_s20 + $0x4b4] sm:$0xff]  }
 0x109   : > { %1784 = vmatprep.subr.bf16.mxu0 %v5558_v0  ;;  %1905 = vmatprep.subr.bf16.mxu1 %v5558_v0 }
 0x10c   : > { %1785 = vmatpush1.bf16.msra.mxu0 %v5351_v28  ;;  %1906 = vmatpush1.bf16.msra.mxu1 %v5352_v29 }
 0x10d   : > { %1786 = vmatprep.subr.bf16.mxu0 %v5558_v0  ;;  %1907 = vmatprep.subr.bf16.mxu1 %v5558_v0 }
 0x110   : > { %1787 = vmatpush1.bf16.msra.mxu0 %v5353_v30  ;;  %1908 = vmatpush1.bf16.msra.mxu1 %v5354_v31  ;;  %v5385_v30 = vld [vmem:[%s5605_s20 + $0x4f8] sm:$0xff]  }
 0x111   : > { %1788 = vmatprep.subr.bf16.mxu0 %v5558_v0  ;;  %1909 = vmatprep.subr.bf16.mxu1 %v5558_v0 }
 0x114   : > { %1789 = vmatpush1.bf16.msra.mxu0 %v5355_v32  ;;  %1910 = vmatpush1.bf16.msra.mxu1 %v5356_v33  ;;  %v5386_v32 = vld [vmem:[%s5605_s20 + $0x544] sm:$0xff]  }
 0x115   : > { %1790 = vmatprep.subr.bf16.mxu0 %v5558_v0  ;;  %1911 = vmatprep.subr.bf16.mxu1 %v5558_v0 }
 0x118   : > { %1791 = vmatpush1.bf16.msra.mxu0 %v5357_v34  ;;  %1912 = vmatpush1.bf16.msra.mxu1 %v5358_v35  ;;  %v5387_v34 = vld [vmem:[%s5605_s20 + $0x4f0] sm:$0xff]   ;;  %v5388_v35 = vld [vmem:[%s5605_s20 + $0x53c] sm:$0xff]  }
 0x119   : > { %1792 = vmatprep.subr.bf16.mxu0 %v5558_v0  ;;  %1913 = vmatprep.subr.bf16.mxu1 %v5558_v0 }
 0x11c   : > { %1793 = vmatpush1.bf16.msra.mxu0 %v5359_v37  ;;  %1914 = vmatpush1.bf16.msra.mxu1 %v5360_v38  ;;  %v6053_v37 = vld [vmem:[%s6523_s1 + $0x4] ss:$8 sps:$4 sm:$0xff]   ;;  %v5390_v38 = vld [vmem:[%s5605_s20 + $0x534] sm:$0xff]  }
 0x11d   : > { %1806 = vmatprep.subr.bf16.mxu0 %v5558_v0  ;;  %1927 = vmatprep.subr.bf16.mxu1 %v5558_v0 }
 0x11f   : > { %v553_v42 = vpop.f32.mrf.mxu0  ;;  %v674_v43 = vpop.f32.mrf.mxu1 }
 0x120   : > { %1807 = vmatpush2.bf16.msra.mxu0 %v1776_v40  ;;  %v683_v47 = vmax.f32 %v553_v42, %v674_v43  ;;  %1928 = vmatpush2.bf16.msra.mxu1 %v1897_v41  ;;  %v5392_v40 = vld [vmem:[%s5605_s20 + $0x52c] sm:$0xff]   ;;  %v5393_v41 = vld [vmem:[%s5605_s20 + $0x4d8] sm:$0xff]   ;;  %v5394_v42 = vld [vmem:[%s5605_s20 + $0x524] sm:$0xff]  }
 0x121   : > { %v555_v48 = vpop.f32.mrf.mxu0  ;;  %1808 = vmatprep.subr.bf16.mxu0 %v5558_v0  ;;  %v676_v50 = vpop.f32.mrf.mxu1  ;;  %1929 = vmatprep.subr.bf16.mxu1 %v5558_v0  ;;  %v5395_v43 = vld [vmem:[%s5605_s20 + $0x4d0] sm:$0xff]  }
 0x122   : > { %v685_v51 = vmax.f32 %v681_v46, %v683_v47  ;;  %v5397_v46 = vld [vmem:[%s5605_s20 + $0x4c8] sm:$0xff]   ;;  %v5398_v47 = vld [vmem:[%s5605_s20 + $0x514] sm:$0xff]   ;;  %v5399_v48 = vld [vmem:[%s5605_s20 + $0x4c0] sm:$0xff]  }
 0x123   : > { %v556_v52 = vpop.f32.mrf.mxu0  ;;  %v677_v53 = vpop.f32.mrf.mxu1  ;;  %v5401_v50 = vld [vmem:[%s5605_s20 + $0x508] ss:$0 sps:$4 sm:$0x77]  }
 0x124   : > { %1809 = vmatpush2.bf16.msra.mxu0 %v5363_v45  ;;  %v697_v57 = vadd.f32 %v5960_v44, %v685_v51  ;;  %v684_v58 = vmax.f32 %v556_v52, %v677_v53  ;;  %1930 = vmatpush2.bf16.msra.mxu1 %v5364_v49  ;;  %v5396_v45 = vld [vmem:[%s5605_s20 + $0x51c] sm:$0xff]   ;;  %v5400_v49 = vld [vmem:[%s5605_s20 + $0x50c] sm:$0xff]   ;;  %v5402_v51 = vld [vmem:[%s5605_s20 + $0x554] ss:$0 sps:$4 sm:$0x77]   ;;  %v2273_v52 = vsel %vm273_vm1, %v5401_v50, 0 }
 0x125   : > { %v558_v59 = vpop.f32.mrf.mxu0  ;;  %2020 = vmatprep.subr.bf16.mxu0 %v5558_v0  ;;  %v679_v61 = vpop.f32.mrf.mxu1  ;;  %2141 = vmatprep.subr.bf16.mxu1 %v5558_v0  ;;  %v2394_v53 = vsel %vm273_vm1, %v5402_v51, 0  ;;  %v5430_v50 = vld [vmem:[%s5605_s20 + $0x664] sm:$0xff]   ;;  %v5431_v51 = vld [vmem:[%s5605_s20 + $0x610] sm:$0xff]  }
 0x126   : > { %v699_v63 = vmax.f32 %v697_v57, 0.0  ;;  %v686_v2 = vmax.f32 %v682_v55, %v684_v58  ;;  %v5403_v57 = vld [vmem:[%s5605_s20 + $0x500] sm:$0xff]   ;;  %v5404_v61 = vld [vmem:[%s5605_s20 + $0x54c] sm:$0xff]  }
 0x127   : > { %1811 = vmatmul.mubr.bf16.vlgmr.msra.gmra.mxu0 %v5863_v56  ;;  %1932 = vmatmul.mubr.bf16.vlgmr.msra.gmra.mxu1 %v5863_v56 }
 0x128   : > { %2021 = vmatpush1.bf16.msra.mxu0 %v5365_v54  ;;  %702 = vst.msk [vmem:[%s5978_s7] sm:$0xff] %vm701_vm2, %v699_v63  ;;  %v698_v4 = vadd.f32 %v5980_v62, %v686_v2  ;;  %2142 = vmatpush1.bf16.msra.mxu1 %v5366_v60 }
 0x129   : > { %2022 = vmatprep.subr.bf16.mxu0 %v5558_v0  ;;  %2143 = vmatprep.subr.bf16.mxu1 %v5558_v0 }
 0x12a   : > { %4687 = vmatprep.mubr.msk.bf16.mxu0 %vm269_vm0, %v5816_v36  ;;  %v700_v6 = vmax.f32 %v698_v4, 0.0  ;;  %4717 = vmatprep.mubr.msk.bf16.mxu1 %vm269_vm0, %v5816_v36  ;;  %v5372_v36 = vld [vmem:[%s5605_s20 + $0x494] sm:$0xff]  }
 0x12c   : > { %2023 = vmatpush1.bf16.msra.mxu0 %v5367_v3  ;;  %703 = vst.msk [vmem:[%s5978_s7 + $0x8] sm:$0xff] %vm701_vm2, %v700_v6  ;;  %2144 = vmatpush1.bf16.msra.mxu1 %v5368_v5  ;;  %v5405_v5 = vld [vmem:[%s5605_s20 + $0x590] sm:$0xff]  }
 0x12d   : > { %2024 = vmatprep.subr.bf16.mxu0 %v5558_v0  ;;  %2145 = vmatprep.subr.bf16.mxu1 %v5558_v0 }
 0x130   : > { %2025 = vmatpush1.bf16.msra.mxu0 %v5369_v7  ;;  %2146 = vmatpush1.bf16.msra.mxu1 %v5370_v8 }
 0x131   : > { %2026 = vmatprep.subr.bf16.mxu0 %v5558_v0  ;;  %2147 = vmatprep.subr.bf16.mxu1 %v5558_v0 }
 0x134   : > { %2027 = vmatpush1.bf16.msra.mxu0 %v5371_v9  ;;  %2148 = vmatpush1.bf16.msra.mxu1 %v5372_v36  ;;  %v5406_v36 = vld [vmem:[%s5605_s20 + $0x5dc] sm:$0xff]  }
 0x135   : > { %2028 = vmatprep.subr.bf16.mxu0 %v5558_v0  ;;  %2149 = vmatprep.subr.bf16.mxu1 %v5558_v0 }
 0x138   : > { %2029 = vmatpush1.bf16.msra.mxu0 %v5373_v10  ;;  %2150 = vmatpush1.bf16.msra.mxu1 %v5374_v11 }
 0x139   : > { %2030 = vmatprep.subr.bf16.mxu0 %v5558_v0  ;;  %2151 = vmatprep.subr.bf16.mxu1 %v5558_v0 }
 0x13c   : > { %2031 = vmatpush1.bf16.msra.mxu0 %v5375_v12  ;;  %2152 = vmatpush1.bf16.msra.mxu1 %v5376_v13  ;;  %v5407_v13 = vld [vmem:[%s5605_s20 + $0x588] sm:$0xff]  }
 0x13d   : > { %2032 = vmatprep.subr.bf16.mxu0 %v5558_v0  ;;  %2153 = vmatprep.subr.bf16.mxu1 %v5558_v0 }
 0x140   : > { %2033 = vmatpush1.bf16.msra.mxu0 %v5377_v14  ;;  %2154 = vmatpush1.bf16.msra.mxu1 %v5378_v15  ;;  %v5408_v15 = vld [vmem:[%s5605_s20 + $0x5d4] sm:$0xff]  }
 0x141   : > { %2034 = vmatprep.subr.bf16.mxu0 %v5558_v0  ;;  %2155 = vmatprep.subr.bf16.mxu1 %v5558_v0 }
 0x144   : > { %2035 = vmatpush1.bf16.msra.mxu0 %v5379_v16  ;;  %2156 = vmatpush1.bf16.msra.mxu1 %v5380_v17  ;;  %v5410_v17 = vld [vmem:[%s5605_s20 + $0x5cc] sm:$0xff]  }
 0x145   : > { %2048 = vmatprep.subr.bf16.mxu0 %v5558_v0  ;;  %2169 = vmatprep.subr.bf16.mxu1 %v5558_v0 }
 0x147   : > { %v6028_v21 = vpop.f32.mrf.mxu0  ;;  %v6030_v22 = vpop.f32.mrf.mxu1 }
 0x148   : > { %2049 = vmatpush2.bf16.msra.mxu0 %v2018_v19  ;;  %2170 = vmatpush2.bf16.msra.mxu1 %v2139_v20  ;;  %v1188_v58 = vmax.f32 %v6028_v21, %v6030_v22  ;;  %v5413_v19 = vld [vmem:[%s5605_s20 + $0x570] sm:$0xff]   ;;  %v5414_v20 = vld [vmem:[%s5605_s20 + $0x5bc] sm:$0xff]   ;;  %v5415_v21 = vld [vmem:[%s5605_s20 + $0x568] sm:$0xff]  }
 0x149   : > { %v820_v25 = vpop.f32.mrf.mxu0  ;;  %2050 = vmatprep.subr.bf16.mxu0 %v5558_v0  ;;  %v941_v27 = vpop.f32.mrf.mxu1  ;;  %2171 = vmatprep.subr.bf16.mxu1 %v5558_v0  ;;  %v5416_v22 = vld [vmem:[%s5605_s20 + $0x5b4] sm:$0xff]  }
 0x14a   : > { %v5418_v25 = vld [vmem:[%s5605_s20 + $0x5ac] sm:$0xff]   ;;  %v5420_v27 = vld [vmem:[%s5605_s20 + $0x5a4] sm:$0xff]  }
 0x14b   : > { %v6036_v28 = vpop.f32.mrf.mxu0  ;;  %v6038_v29 = vpop.f32.mrf.mxu1 }
 0x14c   : > { %2051 = vmatpush2.bf16.msra.mxu0 %v5383_v23  ;;  %2172 = vmatpush2.bf16.msra.mxu1 %v5384_v26  ;;  %v1189_v6 = vmax.f32 %v6036_v28, %v6038_v29  ;;  %v5417_v23 = vld [vmem:[%s5605_s20 + $0x560] sm:$0xff]   ;;  %v5419_v26 = vld [vmem:[%s5605_s20 + $0x558] sm:$0xff]   ;;  %v5422_v29 = vld [vmem:[%s5605_s20 + $0x5ec] ss:$0 sps:$4 sm:$0x77]  }
 0x14d   : > { %v823_v31 = vpop.f32.mrf.mxu0  ;;  %2275 = vmatprep.subr.bf16.mxu0 %v5558_v0  ;;  %v944_v33 = vpop.f32.mrf.mxu1  ;;  %2396 = vmatprep.subr.bf16.mxu1 %v5558_v0  ;;  %v5421_v28 = vld [vmem:[%s5605_s20 + $0x5a0] ss:$0 sps:$4 sm:$0x77]  }
 0x14e   : > { %v2636_v31 = vsel %vm273_vm1, %v5422_v29, 0  ;;  %v5451_v29 = vld [vmem:[%s5605_s20 + $0x6a8] sm:$0xff]  }
 0x14f   : > { %2053 = vmatmul.mubr.bf16.vlgmr.msra.gmra.mxu0 %v5863_v56  ;;  %2174 = vmatmul.mubr.bf16.vlgmr.msra.gmra.mxu1 %v5863_v56 }
 0x150   : > { %2276 = vmatpush1.bf16.msra.mxu0 %v5385_v30  ;;  %2397 = vmatpush1.bf16.msra.mxu1 %v5386_v32  ;;  %v2515_v30 = vsel %vm273_vm1, %v5421_v28, 0  ;;  %v5450_v28 = vld [vmem:[%s5605_s20 + $0x6fc] sm:$0xff]  }
 0x151   : > { %2277 = vmatprep.subr.bf16.mxu0 %v5558_v0  ;;  %2398 = vmatprep.subr.bf16.mxu1 %v5558_v0 }
 0x152   : > { %4749 = vmatprep.mubr.msk.bf16.mxu0 %vm269_vm0, %v6053_v37  ;;  %4779 = vmatprep.mubr.msk.bf16.mxu1 %vm269_vm0, %v6053_v37 }
 0x154   : > { %2278 = vmatpush1.bf16.msra.mxu0 %v5387_v34  ;;  %2399 = vmatpush1.bf16.msra.mxu1 %v5388_v35  ;;  %v5423_v34 = vld [vmem:[%s5605_s20 + $0x598] sm:$0xff]  }
 0x155   : > { %2279 = vmatprep.subr.bf16.mxu0 %v5558_v0  ;;  %2400 = vmatprep.subr.bf16.mxu1 %v5558_v0 }
 0x158   : > { %2280 = vmatpush1.bf16.msra.mxu0 %v5389_v24  ;;  %2401 = vmatpush1.bf16.msra.mxu1 %v5390_v38  ;;  %v5424_v24 = vld [vmem:[%s5605_s20 + $0x5e4] sm:$0xff]  }
 0x159   : > { %2281 = vmatprep.subr.bf16.mxu0 %v5558_v0  ;;  %2402 = vmatprep.subr.bf16.mxu1 %v5558_v0 }
 0x15c   : > { %2282 = vmatpush1.bf16.msra.mxu0 %v5391_v39  ;;  %2403 = vmatpush1.bf16.msra.mxu1 %v5392_v40 }
 0x15d   : > { %2283 = vmatprep.subr.bf16.mxu0 %v5558_v0  ;;  %2404 = vmatprep.subr.bf16.mxu1 %v5558_v0 }
 0x160   : > { %2284 = vmatpush1.bf16.msra.mxu0 %v5393_v41  ;;  %2405 = vmatpush1.bf16.msra.mxu1 %v5394_v42  ;;  %v5425_v41 = vld [vmem:[%s5605_s20 + $0x628] sm:$0xff]  }
 0x161   : > { %2285 = vmatprep.subr.bf16.mxu0 %v5558_v0  ;;  %2406 = vmatprep.subr.bf16.mxu1 %v5558_v0 }
 0x164   : > { %2286 = vmatpush1.bf16.msra.mxu0 %v5395_v43  ;;  %2407 = vmatpush1.bf16.msra.mxu1 %v5396_v45  ;;  %v5426_v43 = vld [vmem:[%s5605_s20 + $0x674] sm:$0xff]  }
 0x165   : > { %2287 = vmatprep.subr.bf16.mxu0 %v5558_v0  ;;  %2408 = vmatprep.subr.bf16.mxu1 %v5558_v0 }
 0x168   : > { %2288 = vmatpush1.bf16.msra.mxu0 %v5397_v46  ;;  %2409 = vmatpush1.bf16.msra.mxu1 %v5398_v47  ;;  %v6166_v46 = vld [vmem:[%s6523_s1] ss:$8 sps:$4 sm:$0xff]  }
 0x169   : > { %2289 = vmatprep.subr.bf16.mxu0 %v5558_v0  ;;  %2410 = vmatprep.subr.bf16.mxu1 %v5558_v0  ;;  %v5427_v47 = vld [vmem:[%s5605_s20 + $0x620] sm:$0xff]  }
 0x16c   : > { %2290 = vmatpush1.bf16.msra.mxu0 %v5399_v48  ;;  %2411 = vmatpush1.bf16.msra.mxu1 %v5400_v49  ;;  %v5428_v48 = vld [vmem:[%s5605_s20 + $0x66c] sm:$0xff]   ;;  %v5429_v49 = vld [vmem:[%s5605_s20 + $0x618] sm:$0xff]  }
 0x16d   : > { %2303 = vmatprep.subr.bf16.mxu0 %v5558_v0  ;;  %2424 = vmatprep.subr.bf16.mxu1 %v5558_v0 }
 0x16f   : > { %v1060_v54 = vpop.f32.mrf.mxu0  ;;  %v1181_v55 = vpop.f32.mrf.mxu1 }
 0x170   : > { %2304 = vmatpush2.bf16.msra.mxu0 %v2273_v52  ;;  %v1190_v59 = vmax.f32 %v1060_v54, %v1181_v55  ;;  %2425 = vmatpush2.bf16.msra.mxu1 %v2394_v53  ;;  %v5432_v52 = vld [vmem:[%s5605_s20 + $0x65c] sm:$0xff]   ;;  %v5433_v53 = vld [vmem:[%s5605_s20 + $0x608] sm:$0xff]   ;;  %v5434_v54 = vld [vmem:[%s5605_s20 + $0x654] sm:$0xff]  }
 0x171   : > { %v1062_v60 = vpop.f32.mrf.mxu0  ;;  %2305 = vmatprep.subr.bf16.mxu0 %v5558_v0  ;;  %v1183_v63 = vpop.f32.mrf.mxu1  ;;  %2426 = vmatprep.subr.bf16.mxu1 %v5558_v0  ;;  %v5435_v55 = vld [vmem:[%s5605_s20 + $0x600] sm:$0xff]  }
 0x172   : > { %v1192_v2 = vmax.f32 %v1188_v58, %v1190_v59  ;;  %v5437_v58 = vld [vmem:[%s5605_s20 + $0x5f8] sm:$0xff]   ;;  %v5438_v59 = vld [vmem:[%s5605_s20 + $0x644] sm:$0xff]   ;;  %v5439_v60 = vld [vmem:[%s5605_s20 + $0x5f0] sm:$0xff]  }
 0x173   : > { %v1063_v3 = vpop.f32.mrf.mxu0  ;;  %v1184_v4 = vpop.f32.mrf.mxu1  ;;  %v5441_v63 = vld [vmem:[%s5605_s20 + $0x638] ss:$0 sps:$4 sm:$0x77]  }
 0x174   : > { %2306 = vmatpush2.bf16.msra.mxu0 %v5403_v57  ;;  %v1194_v7 = vadd.f32 %v1192_v2, %v5960_v44  ;;  %v1191_v8 = vmax.f32 %v1063_v3, %v1184_v4  ;;  %2427 = vmatpush2.bf16.msra.mxu1 %v5404_v61  ;;  %v5436_v57 = vld [vmem:[%s5605_s20 + $0x64c] sm:$0xff]   ;;  %v5440_v61 = vld [vmem:[%s5605_s20 + $0x63c] sm:$0xff]   ;;  %v5442_v2 = vld [vmem:[%s5605_s20 + $0x684] ss:$0 sps:$4 sm:$0x77]   ;;  %v2770_v3 = vsel %vm273_vm1, %v5441_v63, 0 }
 0x175   : > { %v1065_v9 = vpop.f32.mrf.mxu0  ;;  %2517 = vmatprep.subr.bf16.mxu0 %v5558_v0  ;;  %v1186_v10 = vpop.f32.mrf.mxu1  ;;  %2638 = vmatprep.subr.bf16.mxu1 %v5558_v0  ;;  %v2891_v4 = vsel %vm273_vm1, %v5442_v2, 0  ;;  %v5470_v63 = vld [vmem:[%s5605_s20 + $0x794] sm:$0xff]   ;;  %v5471_v2 = vld [vmem:[%s5605_s20 + $0x740] sm:$0xff]  }
 0x176   : > { %v1196_v11 = vmax.f32 %v1194_v7, 0.0  ;;  %v1193_v12 = vmax.f32 %v1189_v6, %v1191_v8  ;;  %v5443_v7 = vld [vmem:[%s5605_s20 + $0x630] sm:$0xff]   ;;  %v5444_v10 = vld [vmem:[%s5605_s20 + $0x67c] sm:$0xff]  }
 0x177   : > { %2308 = vmatmul.mubr.bf16.vlgmr.msra.gmra.mxu0 %v5863_v56  ;;  %2429 = vmatmul.mubr.bf16.vlgmr.msra.gmra.mxu1 %v5863_v56  ;;  %v5409_v56 = vld [vmem:[%s5605_s20 + $0x580] sm:$0xff]  }
 0x178   : > { %2518 = vmatpush1.bf16.msra.mxu0 %v5405_v5  ;;  %4474 = vst.msk [vmem:[%s5978_s7 + $0x10] sm:$0xff] %vm701_vm2, %v1196_v11  ;;  %v1195_v14 = vadd.f32 %v1193_v12, %v5980_v62  ;;  %2639 = vmatpush1.bf16.msra.mxu1 %v5406_v36 }
 0x179   : > { %2519 = vmatprep.subr.bf16.mxu0 %v5558_v0  ;;  %2640 = vmatprep.subr.bf16.mxu1 %v5558_v0 }
 0x17a   : > { %4809 = vmatprep.mubr.msk.bf16.mxu0 %vm269_vm0, %v6053_v37  ;;  %v1197_v16 = vmax.f32 %v1195_v14, 0.0  ;;  %4839 = vmatprep.mubr.msk.bf16.mxu1 %vm269_vm0, %v6053_v37 }
 0x17c   : > { %2520 = vmatpush1.bf16.msra.mxu0 %v5407_v13  ;;  %4475 = vst.msk [vmem:[%s5978_s7 + $0x18] sm:$0xff] %vm701_vm2, %v1197_v16  ;;  %2641 = vmatpush1.bf16.msra.mxu1 %v5408_v15  ;;  %v5445_v15 = vld [vmem:[%s5605_s20 + $0x6c0] sm:$0xff]  }
 0x17d   : > { %2521 = vmatprep.subr.bf16.mxu0 %v5558_v0  ;;  %2642 = vmatprep.subr.bf16.mxu1 %v5558_v0 }
 0x180   : > { %2522 = vmatpush1.bf16.msra.mxu0 %v5409_v56  ;;  %2643 = vmatpush1.bf16.msra.mxu1 %v5410_v17 }
 0x181   : > { %2523 = vmatprep.subr.bf16.mxu0 %v5558_v0  ;;  %2644 = vmatprep.subr.bf16.mxu1 %v5558_v0 }
 0x184   : > { %2524 = vmatpush1.bf16.msra.mxu0 %v5411_v1  ;;  %2645 = vmatpush1.bf16.msra.mxu1 %v5412_v18  ;;  %v5446_v18 = vld [vmem:[%s5605_s20 + $0x70c] sm:$0xff]  }
 0x185   : > { %2525 = vmatprep.subr.bf16.mxu0 %v5558_v0  ;;  %2646 = vmatprep.subr.bf16.mxu1 %v5558_v0 }
 0x188   : > { %2526 = vmatpush1.bf16.msra.mxu0 %v5413_v19  ;;  %2647 = vmatpush1.bf16.msra.mxu1 %v5414_v20 }
 0x189   : > { %2527 = vmatprep.subr.bf16.mxu0 %v5558_v0  ;;  %2648 = vmatprep.subr.bf16.mxu1 %v5558_v0 }
 0x18c   : > { %2528 = vmatpush1.bf16.msra.mxu0 %v5415_v21  ;;  %2649 = vmatpush1.bf16.msra.mxu1 %v5416_v22  ;;  %v5447_v22 = vld [vmem:[%s5605_s20 + $0x6b8] sm:$0xff]  }
 0x18d   : > { %2529 = vmatprep.subr.bf16.mxu0 %v5558_v0  ;;  %2650 = vmatprep.subr.bf16.mxu1 %v5558_v0 }
 0x190   : > { %2530 = vmatpush1.bf16.msra.mxu0 %v5417_v23  ;;  %2651 = vmatpush1.bf16.msra.mxu1 %v5418_v25  ;;  %v5448_v25 = vld [vmem:[%s5605_s20 + $0x704] sm:$0xff]  }
 0x191   : > { %2531 = vmatprep.subr.bf16.mxu0 %v5558_v0  ;;  %2652 = vmatprep.subr.bf16.mxu1 %v5558_v0 }
 0x194   : > { %2532 = vmatpush1.bf16.msra.mxu0 %v5419_v26  ;;  %2653 = vmatpush1.bf16.msra.mxu1 %v5420_v27  ;;  %v5449_v27 = vld [vmem:[%s5605_s20 + $0x6b0] sm:$0xff]  }
 0x195   : > { %2545 = vmatprep.subr.bf16.mxu0 %v5558_v0  ;;  %2666 = vmatprep.subr.bf16.mxu1 %v5558_v0 }
 0x197   : > { %v6147_v32 = vpop.f32.mrf.mxu0  ;;  %v6149_v33 = vpop.f32.mrf.mxu1 }
 0x198   : > { %2546 = vmatpush2.bf16.msra.mxu0 %v2515_v30  ;;  %2667 = vmatpush2.bf16.msra.mxu1 %v2636_v31  ;;  %v1685_v8 = vmax.f32 %v6147_v32, %v6149_v33  ;;  %v5452_v30 = vld [vmem:[%s5605_s20 + $0x6f4] sm:$0xff]   ;;  %v5453_v31 = vld [vmem:[%s5605_s20 + $0x6a0] sm:$0xff]   ;;  %v5454_v32 = vld [vmem:[%s5605_s20 + $0x6ec] sm:$0xff]  }
 0x199   : > { %v1317_v35 = vpop.f32.mrf.mxu0  ;;  %2547 = vmatprep.subr.bf16.mxu0 %v5558_v0  ;;  %v1438_v38 = vpop.f32.mrf.mxu1  ;;  %2668 = vmatprep.subr.bf16.mxu1 %v5558_v0  ;;  %v5455_v33 = vld [vmem:[%s5605_s20 + $0x698] sm:$0xff]  }
 0x19a   : > { %v5457_v35 = vld [vmem:[%s5605_s20 + $0x690] sm:$0xff]   ;;  %v5459_v38 = vld [vmem:[%s5605_s20 + $0x688] sm:$0xff]  }
 0x19b   : > { %v6155_v39 = vpop.f32.mrf.mxu0  ;;  %v6157_v40 = vpop.f32.mrf.mxu1 }
 0x19c   : > { %2548 = vmatpush2.bf16.msra.mxu0 %v5423_v34  ;;  %2669 = vmatpush2.bf16.msra.mxu1 %v5424_v24  ;;  %v1686_v16 = vmax.f32 %v6155_v39, %v6157_v40  ;;  %v5456_v34 = vld [vmem:[%s5605_s20 + $0x6e4] sm:$0xff]   ;;  %v5458_v24 = vld [vmem:[%s5605_s20 + $0x6dc] sm:$0xff]   ;;  %v5460_v39 = vld [vmem:[%s5605_s20 + $0x6d4] sm:$0xff]  }
 0x19d   : > { %v1320_v42 = vpop.f32.mrf.mxu0  ;;  %2772 = vmatprep.subr.bf16.mxu0 %v5558_v0  ;;  %v1441_v45 = vpop.f32.mrf.mxu1  ;;  %2893 = vmatprep.subr.bf16.mxu1 %v5558_v0  ;;  %v5461_v40 = vld [vmem:[%s5605_s20 + $0x6d0] ss:$0 sps:$4 sm:$0x77]  }
 0x19e   : > { %v3012_v42 = vsel %vm273_vm1, %v5461_v40, 0  ;;  %v5490_v40 = vld [vmem:[%s5605_s20 + $0x82c] sm:$0xff]  }
 0x19f   : > { %2550 = vmatmul.mubr.bf16.vlgmr.msra.gmra.mxu0 %v6166_v46  ;;  %2671 = vmatmul.mubr.bf16.vlgmr.msra.gmra.mxu1 %v6166_v46 }
 0x1a0   : > { %2773 = vmatpush1.bf16.msra.mxu0 %v5425_v41  ;;  %2894 = vmatpush1.bf16.msra.mxu1 %v5426_v43  ;;  %v5462_v41 = vld [vmem:[%s5605_s20 + $0x71c] ss:$0 sps:$4 sm:$0x77]  }
 0x1a1   : > { %2774 = vmatprep.subr.bf16.mxu0 %v5558_v0  ;;  %2895 = vmatprep.subr.bf16.mxu1 %v5558_v0  ;;  %v3133_v43 = vsel %vm273_vm1, %v5462_v41, 0  ;;  %v5491_v41 = vld [vmem:[%s5605_s20 + $0x7d8] sm:$0xff]  }
 0x1a2   : > { %4871 = vmatprep.mubr.msk.bf16.mxu0 %vm269_vm0, %v6053_v37  ;;  %4901 = vmatprep.mubr.msk.bf16.mxu1 %vm269_vm0, %v6053_v37 }
 0x1a4   : > { %2775 = vmatpush1.bf16.msra.mxu0 %v5427_v47  ;;  %2896 = vmatpush1.bf16.msra.mxu1 %v5428_v48  ;;  %v5463_v48 = vld [vmem:[%s5605_s20 + $0x6c8] sm:$0xff]  }
 0x1a5   : > { %2776 = vmatprep.subr.bf16.mxu0 %v5558_v0  ;;  %2897 = vmatprep.subr.bf16.mxu1 %v5558_v0 }
 0x1a8   : > { %2777 = vmatpush1.bf16.msra.mxu0 %v5429_v49  ;;  %2898 = vmatpush1.bf16.msra.mxu1 %v5430_v50  ;;  %v5464_v50 = vld [vmem:[%s5605_s20 + $0x714] sm:$0xff]  }
 0x1a9   : > { %2778 = vmatprep.subr.bf16.mxu0 %v5558_v0  ;;  %2899 = vmatprep.subr.bf16.mxu1 %v5558_v0 }
 0x1ac   : > { %2779 = vmatpush1.bf16.msra.mxu0 %v5431_v51  ;;  %2900 = vmatpush1.bf16.msra.mxu1 %v5432_v52 }
 0x1ad   : > { %2780 = vmatprep.subr.bf16.mxu0 %v5558_v0  ;;  %2901 = vmatprep.subr.bf16.mxu1 %v5558_v0 }
 0x1b0   : > { %2781 = vmatpush1.bf16.msra.mxu0 %v5433_v53  ;;  %2902 = vmatpush1.bf16.msra.mxu1 %v5434_v54  ;;  %v5465_v54 = vld [vmem:[%s5605_s20 + $0x758] sm:$0xff]  }
 0x1b1   : > { %2782 = vmatprep.subr.bf16.mxu0 %v5558_v0  ;;  %2903 = vmatprep.subr.bf16.mxu1 %v5558_v0 }
 0x1b4   : > { %2783 = vmatpush1.bf16.msra.mxu0 %v5435_v55  ;;  %2904 = vmatpush1.bf16.msra.mxu1 %v5436_v57  ;;  %v5466_v57 = vld [vmem:[%s5605_s20 + $0x7a4] sm:$0xff]  }
 0x1b5   : > { %2784 = vmatprep.subr.bf16.mxu0 %v5558_v0  ;;  %2905 = vmatprep.subr.bf16.mxu1 %v5558_v0 }
 0x1b8   : > { %2785 = vmatpush1.bf16.msra.mxu0 %v5437_v58  ;;  %2906 = vmatpush1.bf16.msra.mxu1 %v5438_v59  ;;  %v5467_v59 = vld [vmem:[%s5605_s20 + $0x750] sm:$0xff]  }
 0x1b9   : > { %2786 = vmatprep.subr.bf16.mxu0 %v5558_v0  ;;  %2907 = vmatprep.subr.bf16.mxu1 %v5558_v0 }
 0x1bc   : > { %2787 = vmatpush1.bf16.msra.mxu0 %v5439_v60  ;;  %2908 = vmatpush1.bf16.msra.mxu1 %v5440_v61  ;;  %v5468_v60 = vld [vmem:[%s5605_s20 + $0x79c] sm:$0xff]   ;;  %v5469_v61 = vld [vmem:[%s5605_s20 + $0x748] sm:$0xff]  }
 0x1bd   : > { %2800 = vmatprep.subr.bf16.mxu0 %v5558_v0  ;;  %2921 = vmatprep.subr.bf16.mxu1 %v5558_v0 }
 0x1bf   : > { %v1557_v5 = vpop.f32.mrf.mxu0  ;;  %v1678_v6 = vpop.f32.mrf.mxu1 }
 0x1c0   : > { %2801 = vmatpush2.bf16.msra.mxu0 %v2770_v3  ;;  %v1687_v9 = vmax.f32 %v1557_v5, %v1678_v6  ;;  %2922 = vmatpush2.bf16.msra.mxu1 %v2891_v4  ;;  %v5472_v3 = vld [vmem:[%s5605_s20 + $0x78c] sm:$0xff]   ;;  %v5473_v4 = vld [vmem:[%s5605_s20 + $0x738] sm:$0xff]   ;;  %v5474_v5 = vld [vmem:[%s5605_s20 + $0x784] sm:$0xff]  }
 0x1c1   : > { %v1559_v36 = vpop.f32.mrf.mxu0  ;;  %2802 = vmatprep.subr.bf16.mxu0 %v5558_v0  ;;  %v1680_v11 = vpop.f32.mrf.mxu1  ;;  %2923 = vmatprep.subr.bf16.mxu1 %v5558_v0  ;;  %v5475_v6 = vld [vmem:[%s5605_s20 + $0x730] sm:$0xff]  }
 0x1c2   : > { %v1689_v12 = vmax.f32 %v1685_v8, %v1687_v9  ;;  %v5477_v8 = vld [vmem:[%s5605_s20 + $0x728] sm:$0xff]   ;;  %v5478_v9 = vld [vmem:[%s5605_s20 + $0x774] sm:$0xff]   ;;  %v5479_v36 = vld [vmem:[%s5605_s20 + $0x720] sm:$0xff]  }
 0x1c3   : > { %v1560_v13 = vpop.f32.mrf.mxu0  ;;  %v1681_v14 = vpop.f32.mrf.mxu1  ;;  %v5481_v11 = vld [vmem:[%s5605_s20 + $0x768] ss:$0 sps:$4 sm:$0x77]  }
 0x1c4   : > { %2803 = vmatpush2.bf16.msra.mxu0 %v5443_v7  ;;  %v1691_v56 = vadd.f32 %v1689_v12, %v5960_v44  ;;  %v1688_v17 = vmax.f32 %v1560_v13, %v1681_v14  ;;  %2924 = vmatpush2.bf16.msra.mxu1 %v5444_v10  ;;  %v5476_v7 = vld [vmem:[%s5605_s20 + $0x77c] sm:$0xff]   ;;  %v5480_v10 = vld [vmem:[%s5605_s20 + $0x76c] sm:$0xff]   ;;  %v5482_v12 = vld [vmem:[%s5605_s20 + $0x7b4] ss:$0 sps:$4 sm:$0x77]   ;;  %v3267_v13 = vsel %vm273_vm1, %v5481_v11, 0 }
 0x1c5   : > { %v1562_v1 = vpop.f32.mrf.mxu0  ;;  %3014 = vmatprep.subr.bf16.mxu0 %v5558_v0  ;;  %v1683_v19 = vpop.f32.mrf.mxu1  ;;  %3135 = vmatprep.subr.bf16.mxu1 %v5558_v0  ;;  %v3388_v14 = vsel %vm273_vm1, %v5482_v12, 0  ;;  %v5510_v11 = vld [vmem:[%s5605_s20 + $0x8c4] sm:$0xff]   ;;  %v5511_v12 = vld [vmem:[%s5605_s20 + $0x870] sm:$0xff]  }
 0x1c6   : > { %v1693_v20 = vmax.f32 %v1691_v56, 0.0  ;;  %v1690_v21 = vmax.f32 %v1686_v16, %v1688_v17  ;;  %v5483_v56 = vld [vmem:[%s5605_s20 + $0x760] sm:$0xff]   ;;  %v5484_v19 = vld [vmem:[%s5605_s20 + $0x7ac] sm:$0xff]  }
 0x1c7   : > { %2805 = vmatmul.mubr.bf16.vlgmr.msra.gmra.mxu0 %v6166_v46  ;;  %2926 = vmatmul.mubr.bf16.vlgmr.msra.gmra.mxu1 %v6166_v46 }
 0x1c8   : > { %3015 = vmatpush1.bf16.msra.mxu0 %v5445_v15  ;;  %4596 = vst.msk [vmem:[%s5978_s7 + $0x20] sm:$0xff] %vm701_vm2, %v1693_v20  ;;  %v1692_v23 = vadd.f32 %v1690_v21, %v5980_v62  ;;  %3136 = vmatpush1.bf16.msra.mxu1 %v5446_v18 }
 0x1c9   : > { %3016 = vmatprep.subr.bf16.mxu0 %v5558_v0  ;;  %3137 = vmatprep.subr.bf16.mxu1 %v5558_v0 }
 0x1ca   : > { %4931 = vmatprep.mubr.msk.bf16.mxu0 %vm269_vm0, %v6053_v37  ;;  %v1694_v26 = vmax.f32 %v1692_v23, 0.0  ;;  %4961 = vmatprep.mubr.msk.bf16.mxu1 %vm269_vm0, %v6053_v37 }
 0x1cc   : > { %3017 = vmatpush1.bf16.msra.mxu0 %v5447_v22  ;;  %4597 = vst.msk [vmem:[%s5978_s7 + $0x28] sm:$0xff] %vm701_vm2, %v1694_v26  ;;  %3138 = vmatpush1.bf16.msra.mxu1 %v5448_v25  ;;  %v5485_v25 = vld [vmem:[%s5605_s20 + $0x7f0] sm:$0xff]  }
 0x1cd   : > { %3018 = vmatprep.subr.bf16.mxu0 %v5558_v0  ;;  %3139 = vmatprep.subr.bf16.mxu1 %v5558_v0 }
 0x1d0   : > { %3019 = vmatpush1.bf16.msra.mxu0 %v5449_v27  ;;  %3140 = vmatpush1.bf16.msra.mxu1 %v5450_v28 }
 0x1d1   : > { %3020 = vmatprep.subr.bf16.mxu0 %v5558_v0  ;;  %3141 = vmatprep.subr.bf16.mxu1 %v5558_v0 }
 0x1d4   : > { %3021 = vmatpush1.bf16.msra.mxu0 %v5451_v29  ;;  %3142 = vmatpush1.bf16.msra.mxu1 %v5452_v30  ;;  %v5486_v30 = vld [vmem:[%s5605_s20 + $0x83c] sm:$0xff]  }
 0x1d5   : > { %3022 = vmatprep.subr.bf16.mxu0 %v5558_v0  ;;  %3143 = vmatprep.subr.bf16.mxu1 %v5558_v0 }
 0x1d8   : > { %3023 = vmatpush1.bf16.msra.mxu0 %v5453_v31  ;;  %3144 = vmatpush1.bf16.msra.mxu1 %v5454_v32 }
 0x1d9   : > { %3024 = vmatprep.subr.bf16.mxu0 %v5558_v0  ;;  %3145 = vmatprep.subr.bf16.mxu1 %v5558_v0 }
 0x1dc   : > { %3025 = vmatpush1.bf16.msra.mxu0 %v5455_v33  ;;  %3146 = vmatpush1.bf16.msra.mxu1 %v5456_v34  ;;  %v5487_v34 = vld [vmem:[%s5605_s20 + $0x7e8] sm:$0xff]  }
 0x1dd   : > { %3026 = vmatprep.subr.bf16.mxu0 %v5558_v0  ;;  %3147 = vmatprep.subr.bf16.mxu1 %v5558_v0 }
 0x1e0   : > { %3027 = vmatpush1.bf16.msra.mxu0 %v5457_v35  ;;  %3148 = vmatpush1.bf16.msra.mxu1 %v5458_v24  ;;  %v5488_v24 = vld [vmem:[%s5605_s20 + $0x834] sm:$0xff]  }
 0x1e1   : > { %3028 = vmatprep.subr.bf16.mxu0 %v5558_v0  ;;  %3149 = vmatprep.subr.bf16.mxu1 %v5558_v0 }
 0x1e4   : > { %3029 = vmatpush1.bf16.msra.mxu0 %v5459_v38  ;;  %3150 = vmatpush1.bf16.msra.mxu1 %v5460_v39  ;;  %v5489_v39 = vld [vmem:[%s5605_s20 + $0x7e0] sm:$0xff]  }
 0x1e5   : > { %3042 = vmatprep.subr.bf16.mxu0 %v5558_v0  ;;  %3163 = vmatprep.subr.bf16.mxu1 %v5558_v0 }
 0x1e7   : > { %v6266_v45 = vpop.f32.mrf.mxu0  ;;  %v6268_v47 = vpop.f32.mrf.mxu1 }
 0x1e8   : > { %3043 = vmatpush2.bf16.msra.mxu0 %v3012_v42  ;;  %3164 = vmatpush2.bf16.msra.mxu1 %v3133_v43  ;;  %v2182_v17 = vmax.f32 %v6266_v45, %v6268_v47  ;;  %v5492_v42 = vld [vmem:[%s5605_s20 + $0x824] sm:$0xff]   ;;  %v5493_v43 = vld [vmem:[%s5605_s20 + $0x7d0] sm:$0xff]   ;;  %v5494_v45 = vld [vmem:[%s5605_s20 + $0x81c] sm:$0xff]  }
 0x1e9   : > { %v1814_v49 = vpop.f32.mrf.mxu0  ;;  %3044 = vmatprep.subr.bf16.mxu0 %v5558_v0  ;;  %v1935_v51 = vpop.f32.mrf.mxu1  ;;  %3165 = vmatprep.subr.bf16.mxu1 %v5558_v0  ;;  %v5495_v47 = vld [vmem:[%s5605_s20 + $0x7c8] sm:$0xff]  }
 0x1ea   : > { %v5497_v49 = vld [vmem:[%s5605_s20 + $0x7c0] sm:$0xff]   ;;  %v5499_v51 = vld [vmem:[%s5605_s20 + $0x7b8] sm:$0xff]  }
 0x1eb   : > { %v6274_v52 = vpop.f32.mrf.mxu0  ;;  %v6276_v53 = vpop.f32.mrf.mxu1 }
 0x1ec   : > { %3045 = vmatpush2.bf16.msra.mxu0 %v5463_v48  ;;  %3166 = vmatpush2.bf16.msra.mxu1 %v5464_v50  ;;  %v2183_v26 = vmax.f32 %v6274_v52, %v6276_v53  ;;  %v5496_v48 = vld [vmem:[%s5605_s20 + $0x814] sm:$0xff]   ;;  %v5498_v50 = vld [vmem:[%s5605_s20 + $0x80c] sm:$0xff]   ;;  %v5500_v52 = vld [vmem:[%s5605_s20 + $0x804] sm:$0xff]  }
 0x1ed   : > { %v1817_v55 = vpop.f32.mrf.mxu0  ;;  %3269 = vmatprep.subr.bf16.mxu0 %v5558_v0  ;;  %v1938_v58 = vpop.f32.mrf.mxu1  ;;  %3390 = vmatprep.subr.bf16.mxu1 %v5558_v0  ;;  %v5501_v53 = vld [vmem:[%s5605_s20 + $0x800] ss:$0 sps:$4 sm:$0x77]  }
 0x1ee   : > { %v3509_v55 = vsel %vm273_vm1, %v5501_v53, 0  ;;  %v5530_v53 = vld [vmem:[%s5605_s20 + $0x95c] sm:$0xff]  }
 0x1ef   : > { %3047 = vmatmul.mubr.bf16.vlgmr.msra.gmra.mxu0 %v6166_v46  ;;  %3168 = vmatmul.mubr.bf16.vlgmr.msra.gmra.mxu1 %v6166_v46 }
 0x1f0   : > { %3270 = vmatpush1.bf16.msra.mxu0 %v5465_v54  ;;  %3391 = vmatpush1.bf16.msra.mxu1 %v5466_v57  ;;  %v5502_v54 = vld [vmem:[%s5605_s20 + $0x84c] ss:$0 sps:$4 sm:$0x77]  }
 0x1f1   : > { %3271 = vmatprep.subr.bf16.mxu0 %v5558_v0  ;;  %3392 = vmatprep.subr.bf16.mxu1 %v5558_v0  ;;  %v3630_v57 = vsel %vm273_vm1, %v5502_v54, 0  ;;  %v5531_v54 = vld [vmem:[%s5605_s20 + $0x908] sm:$0xff]  }
 0x1f2   : > { %4993 = vmatprep.mubr.msk.bf16.mxu0 %vm269_vm0, %v6053_v37  ;;  %5023 = vmatprep.mubr.msk.bf16.mxu1 %vm269_vm0, %v6053_v37 }
 0x1f4   : > { %3272 = vmatpush1.bf16.msra.mxu0 %v5467_v59  ;;  %3393 = vmatpush1.bf16.msra.mxu1 %v5468_v60  ;;  %v5503_v60 = vld [vmem:[%s5605_s20 + $0x7f8] sm:$0xff]  }
 0x1f5   : > { %3273 = vmatprep.subr.bf16.mxu0 %v5558_v0  ;;  %3394 = vmatprep.subr.bf16.mxu1 %v5558_v0 }
 0x1f8   : > { %3274 = vmatpush1.bf16.msra.mxu0 %v5469_v61  ;;  %3395 = vmatpush1.bf16.msra.mxu1 %v5470_v63  ;;  %v5504_v63 = vld [vmem:[%s5605_s20 + $0x844] sm:$0xff]  }
 0x1f9   : > { %3275 = vmatprep.subr.bf16.mxu0 %v5558_v0  ;;  %3396 = vmatprep.subr.bf16.mxu1 %v5558_v0 }
 0x1fc   : > { %3276 = vmatpush1.bf16.msra.mxu0 %v5471_v2  ;;  %3397 = vmatpush1.bf16.msra.mxu1 %v5472_v3 }
 0x1fd   : > { %3277 = vmatprep.subr.bf16.mxu0 %v5558_v0  ;;  %3398 = vmatprep.subr.bf16.mxu1 %v5558_v0 }
 0x200   : > { %3278 = vmatpush1.bf16.msra.mxu0 %v5473_v4  ;;  %3399 = vmatpush1.bf16.msra.mxu1 %v5474_v5  ;;  %v5505_v5 = vld [vmem:[%s5605_s20 + $0x888] sm:$0xff]  }
 0x201   : > { %3279 = vmatprep.subr.bf16.mxu0 %v5558_v0  ;;  %3400 = vmatprep.subr.bf16.mxu1 %v5558_v0 }
 0x204   : > { %3280 = vmatpush1.bf16.msra.mxu0 %v5475_v6  ;;  %3401 = vmatpush1.bf16.msra.mxu1 %v5476_v7  ;;  %v5506_v7 = vld [vmem:[%s5605_s20 + $0x8d4] sm:$0xff]  }
 0x205   : > { %3281 = vmatprep.subr.bf16.mxu0 %v5558_v0  ;;  %3402 = vmatprep.subr.bf16.mxu1 %v5558_v0 }
 0x208   : > { %3282 = vmatpush1.bf16.msra.mxu0 %v5477_v8  ;;  %3403 = vmatpush1.bf16.msra.mxu1 %v5478_v9  ;;  %v5507_v9 = vld [vmem:[%s5605_s20 + $0x880] sm:$0xff]  }
 0x209   : > { %3283 = vmatprep.subr.bf16.mxu0 %v5558_v0  ;;  %3404 = vmatprep.subr.bf16.mxu1 %v5558_v0 }
 0x20c   : > { %3284 = vmatpush1.bf16.msra.mxu0 %v5479_v36  ;;  %3405 = vmatpush1.bf16.msra.mxu1 %v5480_v10  ;;  %v5508_v36 = vld [vmem:[%s5605_s20 + $0x8cc] sm:$0xff]   ;;  %v5509_v10 = vld [vmem:[%s5605_s20 + $0x878] sm:$0xff]  }
 0x20d   : > { %3297 = vmatprep.subr.bf16.mxu0 %v5558_v0  ;;  %3418 = vmatprep.subr.bf16.mxu1 %v5558_v0 }
 0x20f   : > { %v2054_v15 = vpop.f32.mrf.mxu0  ;;  %v2175_v16 = vpop.f32.mrf.mxu1 }
 0x210   : > { %3298 = vmatpush2.bf16.msra.mxu0 %v3267_v13  ;;  %v2184_v1 = vmax.f32 %v2054_v15, %v2175_v16  ;;  %3419 = vmatpush2.bf16.msra.mxu1 %v3388_v14  ;;  %v5512_v13 = vld [vmem:[%s5605_s20 + $0x8bc] sm:$0xff]   ;;  %v5514_v14 = vld [vmem:[%s5605_s20 + $0x8b4] sm:$0xff]   ;;  %v5516_v16 = vld [vmem:[%s5605_s20 + $0x8ac] sm:$0xff]  }
 0x211   : > { %v2056_v18 = vpop.f32.mrf.mxu0  ;;  %3299 = vmatprep.subr.bf16.mxu0 %v5558_v0  ;;  %v2177_v20 = vpop.f32.mrf.mxu1  ;;  %3420 = vmatprep.subr.bf16.mxu1 %v5558_v0  ;;  %v5515_v15 = vld [vmem:[%s5605_s20 + $0x860] sm:$0xff]  }
 0x212   : > { %v2186_v21 = vmax.f32 %v2182_v17, %v2184_v1  ;;  %v5518_v17 = vld [vmem:[%s5605_s20 + $0x8a4] sm:$0xff]   ;;  %v5519_v1 = vld [vmem:[%s5605_s20 + $0x850] sm:$0xff]   ;;  %v5520_v18 = vld [vmem:[%s5605_s20 + $0x89c] sm:$0xff]  }
 0x213   : > { %v2057_v22 = vpop.f32.mrf.mxu0  ;;  %v2178_v23 = vpop.f32.mrf.mxu1  ;;  %v5522_v20 = vld [vmem:[%s5605_s20 + $0x8e4] ss:$0 sps:$4 sm:$0x77]  }
 0x214   : > { %3300 = vmatpush2.bf16.msra.mxu0 %v5483_v56  ;;  %v2188_v27 = vadd.f32 %v2186_v21, %v5960_v44  ;;  %v2185_v28 = vmax.f32 %v2057_v22, %v2178_v23  ;;  %3421 = vmatpush2.bf16.msra.mxu1 %v5484_v19  ;;  %v5517_v56 = vld [vmem:[%s5605_s20 + $0x858] sm:$0xff]   ;;  %v3885_v22 = vsel %vm273_vm1, %v5522_v20, 0 }
 0x215   : > { %v2059_v29 = vpop.f32.mrf.mxu0  ;;  %3511 = vmatprep.subr.bf16.mxu0 %v5558_v0  ;;  %v2180_v31 = vpop.f32.mrf.mxu1  ;;  %3632 = vmatprep.subr.bf16.mxu1 %v5558_v0  ;;  %v5521_v19 = vld [vmem:[%s5605_s20 + $0x898] ss:$0 sps:$4 sm:$0x77]  }
 0x216   : > { %v2190_v32 = vmax.f32 %v2188_v27, 0.0  ;;  %v2187_v33 = vmax.f32 %v2183_v26, %v2185_v28  ;;  %v3764_v21 = vsel %vm273_vm1, %v5521_v19, 0  ;;  %v5523_v26 = vld [vmem:[%s5605_s20 + $0x890] sm:$0xff]  }
 0x217   : > { %3302 = vmatmul.mubr.bf16.vlgmr.msra.gmra.mxu0 %v6166_v46  ;;  %3423 = vmatmul.mubr.bf16.vlgmr.msra.gmra.mxu1 %v6166_v46 }
 0x218   : > { %3512 = vmatpush1.bf16.msra.mxu0 %v5485_v25  ;;  %4718 = vst.msk [vmem:[%s5978_s7 + $0x30] sm:$0xff] %vm701_vm2, %v2190_v32  ;;  %v2189_v35 = vadd.f32 %v2187_v33, %v5980_v62  ;;  %3633 = vmatpush1.bf16.msra.mxu1 %v5486_v30  ;;  %v5524_v30 = vld [vmem:[%s5605_s20 + $0x8dc] sm:$0xff]  }
 0x219   : > { %3513 = vmatprep.subr.bf16.mxu0 %v5558_v0  ;;  %3634 = vmatprep.subr.bf16.mxu1 %v5558_v0 }
 0x21a   : > { %5053 = vmatprep.mubr.msk.bf16.mxu0 %vm269_vm0, %v6053_v37  ;;  %v2191_v38 = vmax.f32 %v2189_v35, 0.0  ;;  %5083 = vmatprep.mubr.msk.bf16.mxu1 %vm269_vm0, %v6053_v37  ;;  %v5525_v35 = vld [vmem:[%s5605_s20 + $0x920] sm:$0xff]  }
 0x21c   : > { %3514 = vmatpush1.bf16.msra.mxu0 %v5487_v34  ;;  %4719 = vst.msk [vmem:[%s5978_s7 + $0x38] sm:$0xff] %vm701_vm2, %v2191_v38  ;;  %3635 = vmatpush1.bf16.msra.mxu1 %v5488_v24 }
 0x21d   : > { %3515 = vmatprep.subr.bf16.mxu0 %v5558_v0  ;;  %3636 = vmatprep.subr.bf16.mxu1 %v5558_v0 }
 0x220   : > { %3516 = vmatpush1.bf16.msra.mxu0 %v5489_v39  ;;  %3637 = vmatpush1.bf16.msra.mxu1 %v5490_v40 }
 0x221   : > { %3517 = vmatprep.subr.bf16.mxu0 %v5558_v0  ;;  %3638 = vmatprep.subr.bf16.mxu1 %v5558_v0 }
 0x224   : > { %3518 = vmatpush1.bf16.msra.mxu0 %v5491_v41  ;;  %3639 = vmatpush1.bf16.msra.mxu1 %v5492_v42  ;;  %v5526_v41 = vld [vmem:[%s5605_s20 + $0x96c] sm:$0xff]  }
 0x225   : > { %3519 = vmatprep.subr.bf16.mxu0 %v5558_v0  ;;  %3640 = vmatprep.subr.bf16.mxu1 %v5558_v0 }
 0x228   : > { %3520 = vmatpush1.bf16.msra.mxu0 %v5493_v43  ;;  %3641 = vmatpush1.bf16.msra.mxu1 %v5494_v45 }
 0x229   : > { %3521 = vmatprep.subr.bf16.mxu0 %v5558_v0  ;;  %3642 = vmatprep.subr.bf16.mxu1 %v5558_v0 }
 0x22c   : > { %3522 = vmatpush1.bf16.msra.mxu0 %v5495_v47  ;;  %3643 = vmatpush1.bf16.msra.mxu1 %v5496_v48  ;;  %v5527_v47 = vld [vmem:[%s5605_s20 + $0x918] sm:$0xff]  }
 0x22d   : > { %3523 = vmatprep.subr.bf16.mxu0 %v5558_v0  ;;  %3644 = vmatprep.subr.bf16.mxu1 %v5558_v0 }
 0x230   : > { %3524 = vmatpush1.bf16.msra.mxu0 %v5497_v49  ;;  %3645 = vmatpush1.bf16.msra.mxu1 %v5498_v50  ;;  %v5528_v49 = vld [vmem:[%s5605_s20 + $0x964] sm:$0xff]  }
 0x231   : > { %3525 = vmatprep.subr.bf16.mxu0 %v5558_v0  ;;  %3646 = vmatprep.subr.bf16.mxu1 %v5558_v0  ;;  %v5549_v50 = vld [vmem:[%s6523_s1 + $0x4] ss:$8 sps:$4 sm:$0xff]  }
 0x234   : > { %3526 = vmatpush1.bf16.msra.mxu0 %v5499_v51  ;;  %3647 = vmatpush1.bf16.msra.mxu1 %v5500_v52  ;;  %v5529_v52 = vld [vmem:[%s5605_s20 + $0x910] sm:$0xff]  }
 0x235   : > { %3539 = vmatprep.subr.bf16.mxu0 %v5558_v0  ;;  %3660 = vmatprep.subr.bf16.mxu1 %v5558_v0 }
 0x237   : > { %v6380_v58 = vpop.f32.mrf.mxu0  ;;  %v6382_v59 = vpop.f32.mrf.mxu1 }
 0x238   : > { %3540 = vmatpush2.bf16.msra.mxu0 %v3509_v55  ;;  %3661 = vmatpush2.bf16.msra.mxu1 %v3630_v57  ;;  %v2679_v27 = vmax.f32 %v6380_v58, %v6382_v59  ;;  %v5532_v55 = vld [vmem:[%s5605_s20 + $0x954] sm:$0xff]   ;;  %v5533_v57 = vld [vmem:[%s5605_s20 + $0x900] sm:$0xff]   ;;  %v5534_v58 = vld [vmem:[%s5605_s20 + $0x94c] sm:$0xff]  }
 0x239   : > { %v2311_v61 = vpop.f32.mrf.mxu0  ;;  %3541 = vmatprep.subr.bf16.mxu0 %v5558_v0  ;;  %v2432_v2 = vpop.f32.mrf.mxu1  ;;  %3662 = vmatprep.subr.bf16.mxu1 %v5558_v0  ;;  %v5535_v59 = vld [vmem:[%s5605_s20 + $0x8f8] sm:$0xff]  }
 0x23a   : > { %v5537_v61 = vld [vmem:[%s5605_s20 + $0x8f0] sm:$0xff]   ;;  %v5539_v2 = vld [vmem:[%s5605_s20 + $0x8e8] sm:$0xff]  }
 0x23b   : > { %v6388_v3 = vpop.f32.mrf.mxu0  ;;  %v6390_v4 = vpop.f32.mrf.mxu1 }
 0x23c   : > { %3542 = vmatpush2.bf16.msra.mxu0 %v5503_v60  ;;  %3663 = vmatpush2.bf16.msra.mxu1 %v5504_v63  ;;  %v2680_v24 = vmax.f32 %v6388_v3, %v6390_v4  ;;  %v5536_v60 = vld [vmem:[%s5605_s20 + $0x944] sm:$0xff]   ;;  %v5538_v63 = vld [vmem:[%s5605_s20 + $0x93c] sm:$0xff]   ;;  %v5540_v3 = vld [vmem:[%s5605_s20 + $0x934] sm:$0xff]  }
 0x23d   : > { %v2314_v6 = vpop.f32.mrf.mxu0  ;;  %3766 = vmatprep.subr.bf16.mxu0 %v5558_v0  ;;  %v2435_v8 = vpop.f32.mrf.mxu1  ;;  %3887 = vmatprep.subr.bf16.mxu1 %v5558_v0  ;;  %v5541_v4 = vld [vmem:[%s5605_s20 + $0x930] ss:$0 sps:$4 sm:$0x77]  }
 0x23e   : > { %v4006_v6 = vsel %vm273_vm1, %v5541_v4, 0 }
 0x23f   : > { %3544 = vmatmul.mubr.bf16.vlgmr.msra.gmra.mxu0 %v6166_v46  ;;  %3665 = vmatmul.mubr.bf16.vlgmr.msra.gmra.mxu1 %v6166_v46 }
 0x240   : > { %3767 = vmatpush1.bf16.msra.mxu0 %v5505_v5  ;;  %3888 = vmatpush1.bf16.msra.mxu1 %v5506_v7  ;;  %v5542_v5 = vld [vmem:[%s5605_s20 + $0x97c] ss:$0 sps:$4 sm:$0x77]  }
 0x241   : > { %3768 = vmatprep.subr.bf16.mxu0 %v5558_v0  ;;  %3889 = vmatprep.subr.bf16.mxu1 %v5558_v0  ;;  %v4127_v7 = vsel %vm273_vm1, %v5542_v5, 0 }
 0x242   : > { %5115 = vmatprep.mubr.msk.bf16.mxu0 %vm269_vm0, %v6053_v37  ;;  %5145 = vmatprep.mubr.msk.bf16.mxu1 %vm269_vm0, %v6053_v37  ;;  %v5513_v37 = vld [vmem:[%s5605_s20 + $0x868] sm:$0xff]  }
 0x244   : > { %3769 = vmatpush1.bf16.msra.mxu0 %v5507_v9  ;;  %3890 = vmatpush1.bf16.msra.mxu1 %v5508_v36  ;;  %v5543_v36 = vld [vmem:[%s5605_s20 + $0x928] sm:$0xff]  }
 0x245   : > { %3770 = vmatprep.subr.bf16.mxu0 %v5558_v0  ;;  %3891 = vmatprep.subr.bf16.mxu1 %v5558_v0 }
 0x248   : > { %3771 = vmatpush1.bf16.msra.mxu0 %v5509_v10  ;;  %3892 = vmatpush1.bf16.msra.mxu1 %v5510_v11  ;;  %v5544_v11 = vld [vmem:[%s5605_s20 + $0x974] sm:$0xff]  }
 0x249   : > { %3772 = vmatprep.subr.bf16.mxu0 %v5558_v0  ;;  %3893 = vmatprep.subr.bf16.mxu1 %v5558_v0 }
 0x24c   : > { %3773 = vmatpush1.bf16.msra.mxu0 %v5511_v12  ;;  %3894 = vmatpush1.bf16.msra.mxu1 %v5512_v13 }
 0x24d   : > { %3774 = vmatprep.subr.bf16.mxu0 %v5558_v0  ;;  %3895 = vmatprep.subr.bf16.mxu1 %v5558_v0 }
 0x250   : > { %3775 = vmatpush1.bf16.msra.mxu0 %v5513_v37  ;;  %3896 = vmatpush1.bf16.msra.mxu1 %v5514_v14 }
 0x251   : > { %3776 = vmatprep.subr.bf16.mxu0 %v5558_v0  ;;  %3897 = vmatprep.subr.bf16.mxu1 %v5558_v0 }
 0x254   : > { %3777 = vmatpush1.bf16.msra.mxu0 %v5515_v15  ;;  %3898 = vmatpush1.bf16.msra.mxu1 %v5516_v16 }
 0x255   : > { %3778 = vmatprep.subr.bf16.mxu0 %v5558_v0  ;;  %3899 = vmatprep.subr.bf16.mxu1 %v5558_v0 }
 0x258   : > { %3779 = vmatpush1.bf16.msra.mxu0 %v5517_v56  ;;  %3900 = vmatpush1.bf16.msra.mxu1 %v5518_v17 }
 0x259   : > { %3780 = vmatprep.subr.bf16.mxu0 %v5558_v0  ;;  %3901 = vmatprep.subr.bf16.mxu1 %v5558_v0 }
 0x25c   : > { %3781 = vmatpush1.bf16.msra.mxu0 %v5519_v1  ;;  %3902 = vmatpush1.bf16.msra.mxu1 %v5520_v18 }
 0x25d   : > { %3794 = vmatprep.subr.bf16.mxu0 %v5558_v0  ;;  %3915 = vmatprep.subr.bf16.mxu1 %v5558_v0 }
 0x25f   : > { %v2551_v23 = vpop.f32.mrf.mxu0  ;;  %v2672_v25 = vpop.f32.mrf.mxu1 }
 0x260   : > { %3795 = vmatpush2.bf16.msra.mxu0 %v3764_v21  ;;  %v2681_v28 = vmax.f32 %v2551_v23, %v2672_v25  ;;  %3916 = vmatpush2.bf16.msra.mxu1 %v3885_v22 }
 0x261   : > { %v2553_v29 = vpop.f32.mrf.mxu0  ;;  %3796 = vmatprep.subr.bf16.mxu0 %v5558_v0  ;;  %v2674_v31 = vpop.f32.mrf.mxu1  ;;  %3917 = vmatprep.subr.bf16.mxu1 %v5558_v0 }
 0x262   : > { %v2683_v32 = vmax.f32 %v2679_v27, %v2681_v28 }
 0x263   : > { %v2554_v33 = vpop.f32.mrf.mxu0  ;;  %v2675_v34 = vpop.f32.mrf.mxu1 }
 0x264   : > { %3797 = vmatpush2.bf16.msra.mxu0 %v5523_v26  ;;  %v2685_v38 = vadd.f32 %v2683_v32, %v5960_v44  ;;  %v2682_v39 = vmax.f32 %v2554_v33, %v2675_v34  ;;  %3918 = vmatpush2.bf16.msra.mxu1 %v5524_v30 }
 0x265   : > { %v2556_v40 = vpop.f32.mrf.mxu0  ;;  %4008 = vmatprep.subr.bf16.mxu0 %v5558_v0  ;;  %v2677_v42 = vpop.f32.mrf.mxu1  ;;  %4129 = vmatprep.subr.bf16.mxu1 %v5558_v0 }
 0x266   : > { %v2687_v43 = vmax.f32 %v2685_v38, 0.0  ;;  %v2684_v45 = vmax.f32 %v2680_v24, %v2682_v39 }
 0x267   : > { %3799 = vmatmul.mubr.bf16.vlgmr.msra.gmra.mxu0 %v6166_v46  ;;  %3920 = vmatmul.mubr.bf16.vlgmr.msra.gmra.mxu1 %v6166_v46 }
 0x268   : > { %4009 = vmatpush1.bf16.msra.mxu0 %v5525_v35  ;;  %4840 = vst.msk [vmem:[%s5978_s7 + $0x40] sm:$0xff] %vm701_vm2, %v2687_v43  ;;  %v2686_v48 = vadd.f32 %v2684_v45, %v5980_v62  ;;  %4130 = vmatpush1.bf16.msra.mxu1 %v5526_v41 }
 0x269   : > { %4010 = vmatprep.subr.bf16.mxu0 %v5558_v0  ;;  %4131 = vmatprep.subr.bf16.mxu1 %v5558_v0 }
 0x26a   : > { %5175 = vmatprep.mubr.msk.bf16.mxu0 %vm269_vm0, %v5549_v50  ;;  %v2688_v51 = vmax.f32 %v2686_v48, 0.0  ;;  %5205 = vmatprep.mubr.msk.bf16.mxu1 %vm269_vm0, %v5549_v50 }
 0x26c   : > { %4011 = vmatpush1.bf16.msra.mxu0 %v5527_v47  ;;  %4841 = vst.msk [vmem:[%s5978_s7 + $0x48] sm:$0xff] %vm701_vm2, %v2688_v51  ;;  %4132 = vmatpush1.bf16.msra.mxu1 %v5528_v49 }
 0x26d   : > { %4012 = vmatprep.subr.bf16.mxu0 %v5558_v0  ;;  %4133 = vmatprep.subr.bf16.mxu1 %v5558_v0 }
 0x270   : > { %4013 = vmatpush1.bf16.msra.mxu0 %v5529_v52  ;;  %4134 = vmatpush1.bf16.msra.mxu1 %v5530_v53 }
 0x271   : > { %4014 = vmatprep.subr.bf16.mxu0 %v5558_v0  ;;  %4135 = vmatprep.subr.bf16.mxu1 %v5558_v0 }
 0x274   : > { %4015 = vmatpush1.bf16.msra.mxu0 %v5531_v54  ;;  %4136 = vmatpush1.bf16.msra.mxu1 %v5532_v55 }
 0x275   : > { %4016 = vmatprep.subr.bf16.mxu0 %v5558_v0  ;;  %4137 = vmatprep.subr.bf16.mxu1 %v5558_v0 }
 0x278   : > { %4017 = vmatpush1.bf16.msra.mxu0 %v5533_v57  ;;  %4138 = vmatpush1.bf16.msra.mxu1 %v5534_v58 }
 0x279   : > { %4018 = vmatprep.subr.bf16.mxu0 %v5558_v0  ;;  %4139 = vmatprep.subr.bf16.mxu1 %v5558_v0 }
 0x27c   : > { %4019 = vmatpush1.bf16.msra.mxu0 %v5535_v59  ;;  %4140 = vmatpush1.bf16.msra.mxu1 %v5536_v60 }
 0x27d   : > { %4020 = vmatprep.subr.bf16.mxu0 %v5558_v0  ;;  %4141 = vmatprep.subr.bf16.mxu1 %v5558_v0 }
 0x280   : > { %4021 = vmatpush1.bf16.msra.mxu0 %v5537_v61  ;;  %4142 = vmatpush1.bf16.msra.mxu1 %v5538_v63 }
 0x281   : > { %4022 = vmatprep.subr.bf16.mxu0 %v5558_v0  ;;  %4143 = vmatprep.subr.bf16.mxu1 %v5558_v0 }
 0x284   : > { %4023 = vmatpush1.bf16.msra.mxu0 %v5539_v2  ;;  %4144 = vmatpush1.bf16.msra.mxu1 %v5540_v3 }
 0x285   : > { %4036 = vmatprep.subr.bf16.mxu0 %v5558_v0  ;;  %4157 = vmatprep.subr.bf16.mxu1 %v5558_v0 }
 0x287   : > { %v2806_v8 = vpop.f32.mrf.mxu0  ;;  %v2927_v9 = vpop.f32.mrf.mxu1 }
 0x288   : > { %4037 = vmatpush2.bf16.msra.mxu0 %v4006_v6  ;;  %4158 = vmatpush2.bf16.msra.mxu1 %v4127_v7  ;;  %v3176_v17 = vmax.f32 %v2806_v8, %v2927_v9 }
 0x289   : > { %v2808_v10 = vpop.f32.mrf.mxu0  ;;  %4038 = vmatprep.subr.bf16.mxu0 %v5558_v0  ;;  %v2929_v12 = vpop.f32.mrf.mxu1  ;;  %4159 = vmatprep.subr.bf16.mxu1 %v5558_v0 }
 0x28b   : > { %v2809_v13 = vpop.f32.mrf.mxu0  ;;  %v2930_v37 = vpop.f32.mrf.mxu1 }
 0x28c   : > { %4039 = vmatpush2.bf16.msra.mxu0 %v5543_v36  ;;  %4160 = vmatpush2.bf16.msra.mxu1 %v5544_v11  ;;  %v3177_v22 = vmax.f32 %v2809_v13, %v2930_v37 }
 0x28d   : > { %v2811_v14 = vpop.f32.mrf.mxu0  ;;  %v2932_v15 = vpop.f32.mrf.mxu1 }
 0x28f   : > { %4041 = vmatmul.mubr.bf16.vlgmr.msra.gmra.mxu0 %v6166_v46  ;;  %4162 = vmatmul.mubr.bf16.vlgmr.msra.gmra.mxu1 %v6166_v46 }
 0x2af   : > { %v3048_v16 = vpop.f32.mrf.mxu0  ;;  %v3169_v56 = vpop.f32.mrf.mxu1 }
 0x2b0   : > { %v3178_v1 = vmax.f32 %v3048_v16, %v3169_v56 }
 0x2b1   : > { %v3050_v18 = vpop.f32.mrf.mxu0  ;;  %v3171_v19 = vpop.f32.mrf.mxu1 }
 0x2b2   : > { %v3180_v20 = vmax.f32 %v3176_v17, %v3178_v1 }
 0x2b3   : > { %v3051_v0 = vpop.f32.mrf.mxu0  ;;  %v3172_v21 = vpop.f32.mrf.mxu1 }
 0x2b4   : > { %v3182_v23 = vadd.f32 %v3180_v20, %v5960_v44  ;;  %v3179_v25 = vmax.f32 %v3051_v0, %v3172_v21 }
 0x2b5   : > { %v3053_v26 = vpop.f32.mrf.mxu0  ;;  %v3174_v27 = vpop.f32.mrf.mxu1 }
 0x2b6   : > { %v3184_v28 = vmax.f32 %v3182_v23, 0.0  ;;  %v3181_v29 = vmax.f32 %v3177_v22, %v3179_v25 }
 0x2b8   : > { %4962 = vst.msk [vmem:[%s5978_s7 + $0x50] sm:$0xff] %vm701_vm2, %v3184_v28  ;;  %v3183_v46 = vadd.f32 %v3181_v29, %v5980_v62 }
 0x2ba   : > { %v3185_v30 = vmax.f32 %v3183_v46, 0.0 }
 0x2bc   : > { %4963 = vst.msk [vmem:[%s5978_s7 + $0x58] sm:$0xff] %vm701_vm2, %v3185_v30 }
 0x2d7   : > { %v3303_v31 = vpop.f32.mrf.mxu0  ;;  %v3424_v32 = vpop.f32.mrf.mxu1 }
 0x2d8   : > { %v3673_v42 = vmax.f32 %v3303_v31, %v3424_v32 }
 0x2d9   : > { %v3305_v33 = vpop.f32.mrf.mxu0  ;;  %v3426_v34 = vpop.f32.mrf.mxu1 }
 0x2db   : > { %v3306_v35 = vpop.f32.mrf.mxu0  ;;  %v3427_v24 = vpop.f32.mrf.mxu1 }
 0x2dc   : > { %v3674_v51 = vmax.f32 %v3306_v35, %v3427_v24 }
 0x2dd   : > { %v3308_v38 = vpop.f32.mrf.mxu0  ;;  %v3429_v39 = vpop.f32.mrf.mxu1 }
 0x2ff   : > { %v3545_v40 = vpop.f32.mrf.mxu0  ;;  %v3666_v41 = vpop.f32.mrf.mxu1 }
 0x300   : > { %v3675_v43 = vmax.f32 %v3545_v40, %v3666_v41 }
 0x301   : > { %v3547_v45 = vpop.f32.mrf.mxu0  ;;  %v3668_v47 = vpop.f32.mrf.mxu1 }
 0x302   : > { %v3677_v48 = vmax.f32 %v3673_v42, %v3675_v43 }
 0x303   : > { %v3548_v49 = vpop.f32.mrf.mxu0  ;;  %v3669_v50 = vpop.f32.mrf.mxu1 }
 0x304   : > { %v3679_v52 = vadd.f32 %v3677_v48, %v5960_v44  ;;  %v3676_v53 = vmax.f32 %v3548_v49, %v3669_v50 }
 0x305   : > { %v3550_v54 = vpop.f32.mrf.mxu0  ;;  %v3671_v55 = vpop.f32.mrf.mxu1 }
 0x306   : > { %v3681_v57 = vmax.f32 %v3679_v52, 0.0  ;;  %v3678_v58 = vmax.f32 %v3674_v51, %v3676_v53 }
 0x308   : > { %5084 = vst.msk [vmem:[%s5978_s7 + $0x60] sm:$0xff] %vm701_vm2, %v3681_v57  ;;  %v3680_v59 = vadd.f32 %v3678_v58, %v5980_v62 }
 0x30a   : > { %v3682_v60 = vmax.f32 %v3680_v59, 0.0 }
 0x30c   : > { %5085 = vst.msk [vmem:[%s5978_s7 + $0x68] sm:$0xff] %vm701_vm2, %v3682_v60 }
 0x327   : > { %v3800_v61 = vpop.f32.mrf.mxu0  ;;  %v3921_v63 = vpop.f32.mrf.mxu1 }
 0x328   : > { %v4170_v36 = vmax.f32 %v3800_v61, %v3921_v63 }
 0x329   : > { %v3802_v2 = vpop.f32.mrf.mxu0  ;;  %v3923_v3 = vpop.f32.mrf.mxu1 }
 0x32b   : > { %v3803_v4 = vpop.f32.mrf.mxu0  ;;  %v3924_v5 = vpop.f32.mrf.mxu1 }
 0x32c   : > { %v4171_v15 = vmax.f32 %v3803_v4, %v3924_v5 }
 0x32d   : > { %v3805_v6 = vpop.f32.mrf.mxu0  ;;  %v3926_v7 = vpop.f32.mrf.mxu1 }
 0x34f   : > { %v4042_v8 = vpop.f32.mrf.mxu0  ;;  %v4163_v9 = vpop.f32.mrf.mxu1 }
 0x350   : > { %v4172_v10 = vmax.f32 %v4042_v8, %v4163_v9 }
 0x351   : > { %v4044_v11 = vpop.f32.mrf.mxu0  ;;  %v4165_v12 = vpop.f32.mrf.mxu1 }
 0x352   : > { %v4174_v13 = vmax.f32 %v4170_v36, %v4172_v10 }
 0x353   : > { %v4045_v37 = vpop.f32.mrf.mxu0  ;;  %v4166_v14 = vpop.f32.mrf.mxu1 }
 0x354   : > { %v4176_v16 = vadd.f32 %v4174_v13, %v5960_v44  ;;  %v4173_v56 = vmax.f32 %v4045_v37, %v4166_v14 }
 0x355   : > { %v4047_v17 = vpop.f32.mrf.mxu0  ;;  %v4168_v1 = vpop.f32.mrf.mxu1 }
 0x356   : > { %v4178_v18 = vmax.f32 %v4176_v16, 0.0  ;;  %v4175_v19 = vmax.f32 %v4171_v15, %v4173_v56 }
 0x358   : > { %5206 = vst.msk [vmem:[%s5978_s7 + $0x70] sm:$0xff] %vm701_vm2, %v4178_v18  ;;  %v4177_v20 = vadd.f32 %v4175_v19, %v5980_v62 }
 0x35a   : > { %v4179_v0 = vmax.f32 %v4177_v20, 0.0 }
 0x35c   : > { %5207 = vst.msk [vmem:[%s5978_s7 + $0x78] sm:$0xff] %vm701_vm2, %v4179_v0 }
 0x35d PF: > { %s13_s12 = sadd.s32 1, %s5556_s12  }
 0x35e   : > { %p10_p4 = scmp.ge.s32.totalorder %s13_s12, 4  }
 0x360   :  { %12 = sbr.rel (!%p10_p4) target bundleno = 1 (0x1), region = 100 }

</bundles_post_ra>
